<compile_context>
chip_gen: v5e
topology: v5e:2x2
jax: 0.10.0
libtpu: 0.0.40
codegen_flags: <defaults>
</compile_context>

<pallas_src>
import functools

import numpy as np

import jax
import jax.numpy as jnp
from jax.experimental import pallas as pl
from jax.experimental.pallas import tpu as pltpu  # noqa: F401  (kept for TPU-specific tuning hooks)


# ---------------------------------------------------------------------------
# Single fused kernel: encoder (conv + relu + pool + fc) and decoder
# (2-layer LSTM + fc), everything resident in VMEM, one invocation (no grid).
# ---------------------------------------------------------------------------
def _baseline_kernel(
    xflat_ref,      # (B*Hp*Wp + pad, C)  zero-padded image, rows=(b, y_pad, x_pad), lanes=c
    pool_ref,       # (B, B*Hp*Wp)        constant masked-average-pool matrix
    wconv_ref,      # (9, C, Cf)          3x3 conv taps, one (C, Cf) slab per (dy, dx)
    bconv_ref,      # (1, Cf)
    ewfc_ref,       # (Cf, E)             encoder FC
    ebfc_ref,       # (1, E)
    we_ref,         # ((T-1)*B, E)        word embeddings, time-major flattened
    wih0_ref, whh0_ref, b0_ref,   # LSTM layer 0: (E,4H), (H,4H), (1,4H)
    wih1_ref, whh1_ref, b1_ref,   # LSTM layer 1: (H,4H), (H,4H), (1,4H)
    dwfc_ref,       # (H, V)              decoder FC
    dbfc_ref,       # (1, V)
    out_ref,        # (B, T, V)           logits, batch-first (final layout, no transpose)
    *, B, Hc, Wc, T, Hh,
):
    f32 = jnp.float32
    Hp, Wp = Hc + 2, Wc + 2
    npos = Hp * Wp                                   # flattened padded positions per image

    # ---------------- Encoder: conv3x3 -> ReLU -> masked GAP -> FC ----------------
    # conv as 9 shifted matmuls; a shift of (dy, dx) is a row offset dy*Wp + dx in
    # the flattened padded image. Rows whose receptive field crosses an image
    # boundary only contribute to positions that the pooling matrix masks out.
    acc = None
    for k in range(9):
        dy, dx = k // 3, k % 3
        off = dy * Wp + dx
        xs = xflat_ref[off:off + B * npos, :]                         # (B*npos, C)
        term = jnp.dot(xs, wconv_ref[k], preferred_element_type=f32)  # (B*npos, Cf)
        acc = term if acc is None else acc + term
    feat = jnp.maximum(acc + bconv_ref[...], 0.0)                     # relu(conv)

    # masked global-average-pool as one MXU matmul (mask + 1/(H*W) baked into pool_ref)
    pooled = jnp.dot(pool_ref[...], feat, preferred_element_type=f32)             # (B, Cf)
    features = (jnp.dot(pooled, ewfc_ref[...], preferred_element_type=f32)
                + ebfc_ref[...])                                                   # (B, E)

    # ---------------- Decoder: fused 2-layer LSTM + FC (time loop unrolled) -------
    wih0 = wih0_ref[...]; whh0 = whh0_ref[...]; b0 = b0_ref[...]
    wih1 = wih1_ref[...]; whh1 = whh1_ref[...]; b1 = b1_ref[...]
    dwfc = dwfc_ref[...]; dbfc = dbfc_ref[...]

    # hoist the layer-0 input projection off the serial recurrence:
    # one matmul over the whole sequence instead of T tiny ones.
    xp_feat = jnp.dot(features, wih0, preferred_element_type=f32) + b0       # (B, 4H)  t = 0
    xp_word = jnp.dot(we_ref[...], wih0, preferred_element_type=f32) + b0    # ((T-1)*B, 4H)

    def lstm_cell(xproj, h, c, whh):
        # gates laid out [i | f | g | o] across 4H lanes (full 128-lane vreg for H=32)
        gates = xproj + jnp.dot(h, whh, preferred_element_type=f32)          # (B, 4H)
        s = jax.nn.sigmoid(gates)     # one full-lane EUP pass (i, f, o lanes used)
        u = jnp.tanh(gates)           # one full-lane EUP pass (g lanes used)
        i = s[:, 0 * Hh:1 * Hh]
        f = s[:, 1 * Hh:2 * Hh]
        g = u[:, 2 * Hh:3 * Hh]
        o = s[:, 3 * Hh:4 * Hh]
        c = f * c + i * g
        h = o * jnp.tanh(c)
        return h, c

    z = jnp.zeros((B, Hh), f32)
    h0, c0, h1, c1 = z, z, z, z
    for t in range(T):                                 # T is static & small -> fully unrolled,
        xp0 = xp_feat if t == 0 else xp_word[(t - 1) * B:t * B, :]   # h/c stay in vregs
        h0, c0 = lstm_cell(xp0, h0, c0, whh0)
        xp1 = jnp.dot(h0, wih1, preferred_element_type=f32) + b1
        h1, c1 = lstm_cell(xp1, h1, c1, whh1)
        logit_t = jnp.dot(h1, dwfc, preferred_element_type=f32) + dbfc        # (B, V)
        out_ref[:, t, :] = logit_t.astype(out_ref.dtype)


# ---------------------------------------------------------------------------
# Parameter construction (deterministic, synthetic; torch-like parameterization
# with separate b_ih / b_hh biases per LSTM layer).
# ---------------------------------------------------------------------------
def init_params(key, *, in_chans, conv_chans, embed_dim, num_embeds, hidden_size):
    ks = jax.random.split(key, 16)
    s = 0.05
    H4 = 4 * hidden_size
    return {
        # encoder stand-in backbone: 3x3 conv taps + GAP, then encoder.fc
        "conv_w": s * jax.random.normal(ks[0], (9, in_chans, conv_chans), jnp.float32),
        "conv_b": s * jax.random.normal(ks[1], (conv_chans,), jnp.float32),
        "enc_fc_w": s * jax.random.normal(ks[2], (conv_chans, embed_dim), jnp.float32),
        "enc_fc_b": s * jax.random.normal(ks[3], (embed_dim,), jnp.float32),
        # decoder
        "embed": s * jax.random.normal(ks[4], (num_embeds, embed_dim), jnp.float32),
        "l0_wih": s * jax.random.normal(ks[5], (embed_dim, H4), jnp.float32),
        "l0_whh": s * jax.random.normal(ks[6], (hidden_size, H4), jnp.float32),
        "l0_b_ih": s * jax.random.normal(ks[7], (H4,), jnp.float32),
        "l0_b_hh": s * jax.random.normal(ks[8], (H4,), jnp.float32),
        "l1_wih": s * jax.random.normal(ks[9], (hidden_size, H4), jnp.float32),
        "l1_whh": s * jax.random.normal(ks[10], (hidden_size, H4), jnp.float32),
        "l1_b_ih": s * jax.random.normal(ks[11], (H4,), jnp.float32),
        "l1_b_hh": s * jax.random.normal(ks[12], (H4,), jnp.float32),
        "dec_fc_w": s * jax.random.normal(ks[13], (hidden_size, num_embeds), jnp.float32),
        "dec_fc_b": s * jax.random.normal(ks[14], (num_embeds,), jnp.float32),
    }


# ---------------------------------------------------------------------------
# Forward pass == Baseline.forward(images, captions), cell_type='LSTM', arch=1.
# ---------------------------------------------------------------------------
def baseline_forward(params, images, captions):
    B, C, Hc, Wc = images.shape
    E = params["enc_fc_w"].shape[1]
    Cf = params["conv_w"].shape[2]
    Hh = params["l0_whh"].shape[0]
    V = params["dec_fc_w"].shape[1]
    T = captions.shape[1]
    Hp, Wp = Hc + 2, Wc + 2

    # ---- JAX-side layout plumbing (few KB): pad + channels-last flatten ----
    xp = jnp.pad(images, ((0, 0), (0, 0), (1, 1), (1, 1)))               # (B, C, Hp, Wp)
    xflat = xp.transpose(0, 2, 3, 1).reshape(B * Hp * Wp, C)             # rows=(b,y,x), lanes=c
    max_off = 2 * Wp + 2                                                 # largest conv-tap shift
    tot = ((B * Hp * Wp + max_off + 7) // 8) * 8
    xflat = jnp.pad(xflat, ((0, tot - B * Hp * Wp), (0, 0)))             # slack for shifted loads

    # constant masked-average-pool matrix (compile-time, baked into the executable)
    r = np.arange(Hp * Wp)
    valid = ((r % Wp < Wc) & (r // Wp < Hc)).astype(np.float32) / (Hc * Wc)
    pool_np = np.zeros((B, B * Hp * Wp), np.float32)
    for b in range(B):
        pool_np[b, b * Hp * Wp:(b + 1) * Hp * Wp] = valid
    pool = jnp.asarray(pool_np)

    # ---- word-embedding gather, time-major flattened ((t, b) row order) ----
    caps_t = captions[:, :-1].T                                          # (T-1, B)
    we = jnp.take(params["embed"], caps_t, axis=0).reshape((T - 1) * B, E)

    # PyTorch LSTM carries two biases; they only ever appear summed.
    b0 = (params["l0_b_ih"] + params["l0_b_hh"]).reshape(1, 4 * Hh)
    b1 = (params["l1_b_ih"] + params["l1_b_hh"]).reshape(1, 4 * Hh)

    kernel = functools.partial(_baseline_kernel, B=B, Hc=Hc, Wc=Wc, T=T, Hh=Hh)
    full = lambda s: pl.BlockSpec(s, lambda: (0,) * len(s))

    inputs = [
        (xflat, full(tuple(xflat.shape))),
        (pool, full((B, B * Hp * Wp))),
        (params["conv_w"], full((9, C, Cf))),
        (params["conv_b"].reshape(1, Cf), full((1, Cf))),
        (params["enc_fc_w"], full((Cf, E))),
        (params["enc_fc_b"].reshape(1, E), full((1, E))),
        (we, full(((T - 1) * B, E))),
        (params["l0_wih"], full((E, 4 * Hh))),
        (params["l0_whh"], full((Hh, 4 * Hh))),
        (b0, full((1, 4 * Hh))),
        (params["l1_wih"], full((Hh, 4 * Hh))),
        (params["l1_whh"], full((Hh, 4 * Hh))),
        (b1, full((1, 4 * Hh))),
        (params["dec_fc_w"], full((Hh, V))),
        (params["dec_fc_b"].reshape(1, V), full((1, V))),
    ]
    arrays = [a for a, _ in inputs]
    specs = [s for _, s in inputs]

    return pl.pallas_call(
        kernel,
        out_shape=jax.ShapeDtypeStruct((B, T, V), jnp.float32),
        in_specs=specs,
        out_specs=pl.BlockSpec((B, T, V), lambda: (0, 0, 0)),
    )(*arrays)


if __name__ == "__main__":
    # Small shapes consistent with the module defaults.
    B, C, H, W = 2, 3, 16, 16
    embed_dim = 32
    hidden_size = 32
    num_embeds = 64
    conv_chans = 64
    cap_len = 8    # captions length L -> sequence length T = L

    key = jax.random.PRNGKey(0)
    k_img, k_cap, k_par = jax.random.split(key, 3)

    images = jax.random.normal(k_img, (B, C, H, W), jnp.float32)
    captions = jax.random.randint(k_cap, (B, cap_len), 0, num_embeds, jnp.int32)

    params = init_params(k_par, in_chans=C, conv_chans=conv_chans,
                         embed_dim=embed_dim, num_embeds=num_embeds,
                         hidden_size=hidden_size)

    fwd = jax.jit(baseline_forward)
    out = fwd(params, images, captions)
    jax.block_until_ready(out)

    assert out.shape == (B, cap_len, num_embeds), out.shape
    assert out.dtype == jnp.float32
    print("KERNEL_OK")
</pallas_src>

<mosaic_0001>
module attributes {stable_mosaic.version = 11 : i64} {
  func.func @_baseline_kernel(%arg0: memref<688x3xf32, #tpu.memory_space<vmem>>, %arg1: memref<2x648xf32, #tpu.memory_space<vmem>>, %arg2: memref<9x3x64xf32, #tpu.memory_space<vmem>>, %arg3: memref<1x64xf32, #tpu.memory_space<vmem>>, %arg4: memref<64x32xf32, #tpu.memory_space<vmem>>, %arg5: memref<1x32xf32, #tpu.memory_space<vmem>>, %arg6: memref<14x32xf32, #tpu.memory_space<vmem>>, %arg7: memref<32x128xf32, #tpu.memory_space<vmem>>, %arg8: memref<32x128xf32, #tpu.memory_space<vmem>>, %arg9: memref<1x128xf32, #tpu.memory_space<vmem>>, %arg10: memref<32x128xf32, #tpu.memory_space<vmem>>, %arg11: memref<32x128xf32, #tpu.memory_space<vmem>>, %arg12: memref<1x128xf32, #tpu.memory_space<vmem>>, %arg13: memref<32x64xf32, #tpu.memory_space<vmem>>, %arg14: memref<1x64xf32, #tpu.memory_space<vmem>>, %arg15: memref<2x8x64xf32, #tpu.memory_space<vmem>>) attributes {dimension_semantics = [], scalar_prefetch = 0 : i64, scratch_operands = 0 : i64, tpu.core_type = #tpu.core_type<tc>} {
    %c0 = arith.constant 0 : index
    %c0_0 = arith.constant 0 : index
    %0 = vector.load %arg0[%c0, %c0_0] : memref<688x3xf32, #tpu.memory_space<vmem>>, vector<648x3xf32>
    %c0_1 = arith.constant 0 : index
    %c0_2 = arith.constant 0 : index
    %c0_3 = arith.constant 0 : index
    %1 = vector.load %arg2[%c0_1, %c0_2, %c0_3] : memref<9x3x64xf32, #tpu.memory_space<vmem>>, vector<1x3x64xf32>
    %2 = vector.shape_cast %1 : vector<1x3x64xf32> to vector<3x64xf32>
    %cst = arith.constant dense<0.000000e+00> : vector<648x64xf32>
    %3 = tpu.matmul %0, %2, %cst {dimension_numbers = #tpu.dot_dimension_numbers<[1], [0], [0], [1], [0, 0, 1, 1], [], []>} : vector<648x3xf32>, vector<3x64xf32>, vector<648x64xf32> -> vector<648x64xf32>
    %c1 = arith.constant 1 : index
    %c0_4 = arith.constant 0 : index
    %4 = vector.load %arg0[%c1, %c0_4] : memref<688x3xf32, #tpu.memory_space<vmem>>, vector<648x3xf32>
    %c1_5 = arith.constant 1 : index
    %c0_6 = arith.constant 0 : index
    %c0_7 = arith.constant 0 : index
    %5 = vector.load %arg2[%c1_5, %c0_6, %c0_7] : memref<9x3x64xf32, #tpu.memory_space<vmem>>, vector<1x3x64xf32>
    %6 = vector.shape_cast %5 : vector<1x3x64xf32> to vector<3x64xf32>
    %cst_8 = arith.constant dense<0.000000e+00> : vector<648x64xf32>
    %7 = tpu.matmul %4, %6, %cst_8 {dimension_numbers = #tpu.dot_dimension_numbers<[1], [0], [0], [1], [0, 0, 1, 1], [], []>} : vector<648x3xf32>, vector<3x64xf32>, vector<648x64xf32> -> vector<648x64xf32>
    %8 = arith.addf %3, %7 : vector<648x64xf32>
    %c2 = arith.constant 2 : index
    %c0_9 = arith.constant 0 : index
    %9 = vector.load %arg0[%c2, %c0_9] : memref<688x3xf32, #tpu.memory_space<vmem>>, vector<648x3xf32>
    %c2_10 = arith.constant 2 : index
    %c0_11 = arith.constant 0 : index
    %c0_12 = arith.constant 0 : index
    %10 = vector.load %arg2[%c2_10, %c0_11, %c0_12] : memref<9x3x64xf32, #tpu.memory_space<vmem>>, vector<1x3x64xf32>
    %11 = vector.shape_cast %10 : vector<1x3x64xf32> to vector<3x64xf32>
    %cst_13 = arith.constant dense<0.000000e+00> : vector<648x64xf32>
    %12 = tpu.matmul %9, %11, %cst_13 {dimension_numbers = #tpu.dot_dimension_numbers<[1], [0], [0], [1], [0, 0, 1, 1], [], []>} : vector<648x3xf32>, vector<3x64xf32>, vector<648x64xf32> -> vector<648x64xf32>
    %13 = arith.addf %8, %12 : vector<648x64xf32>
    %c18 = arith.constant 18 : index
    %c0_14 = arith.constant 0 : index
    %14 = vector.load %arg0[%c18, %c0_14] : memref<688x3xf32, #tpu.memory_space<vmem>>, vector<648x3xf32>
    %c3 = arith.constant 3 : index
    %c0_15 = arith.constant 0 : index
    %c0_16 = arith.constant 0 : index
    %15 = vector.load %arg2[%c3, %c0_15, %c0_16] : memref<9x3x64xf32, #tpu.memory_space<vmem>>, vector<1x3x64xf32>
    %16 = vector.shape_cast %15 : vector<1x3x64xf32> to vector<3x64xf32>
    %cst_17 = arith.constant dense<0.000000e+00> : vector<648x64xf32>
    %17 = tpu.matmul %14, %16, %cst_17 {dimension_numbers = #tpu.dot_dimension_numbers<[1], [0], [0], [1], [0, 0, 1, 1], [], []>} : vector<648x3xf32>, vector<3x64xf32>, vector<648x64xf32> -> vector<648x64xf32>
    %18 = arith.addf %13, %17 : vector<648x64xf32>
    %c19 = arith.constant 19 : index
    %c0_18 = arith.constant 0 : index
    %19 = vector.load %arg0[%c19, %c0_18] : memref<688x3xf32, #tpu.memory_space<vmem>>, vector<648x3xf32>
    %c4 = arith.constant 4 : index
    %c0_19 = arith.constant 0 : index
    %c0_20 = arith.constant 0 : index
    %20 = vector.load %arg2[%c4, %c0_19, %c0_20] : memref<9x3x64xf32, #tpu.memory_space<vmem>>, vector<1x3x64xf32>
    %21 = vector.shape_cast %20 : vector<1x3x64xf32> to vector<3x64xf32>
    %cst_21 = arith.constant dense<0.000000e+00> : vector<648x64xf32>
    %22 = tpu.matmul %19, %21, %cst_21 {dimension_numbers = #tpu.dot_dimension_numbers<[1], [0], [0], [1], [0, 0, 1, 1], [], []>} : vector<648x3xf32>, vector<3x64xf32>, vector<648x64xf32> -> vector<648x64xf32>
    %23 = arith.addf %18, %22 : vector<648x64xf32>
    %c20 = arith.constant 20 : index
    %c0_22 = arith.constant 0 : index
    %24 = vector.load %arg0[%c20, %c0_22] : memref<688x3xf32, #tpu.memory_space<vmem>>, vector<648x3xf32>
    %c5 = arith.constant 5 : index
    %c0_23 = arith.constant 0 : index
    %c0_24 = arith.constant 0 : index
    %25 = vector.load %arg2[%c5, %c0_23, %c0_24] : memref<9x3x64xf32, #tpu.memory_space<vmem>>, vector<1x3x64xf32>
    %26 = vector.shape_cast %25 : vector<1x3x64xf32> to vector<3x64xf32>
    %cst_25 = arith.constant dense<0.000000e+00> : vector<648x64xf32>
    %27 = tpu.matmul %24, %26, %cst_25 {dimension_numbers = #tpu.dot_dimension_numbers<[1], [0], [0], [1], [0, 0, 1, 1], [], []>} : vector<648x3xf32>, vector<3x64xf32>, vector<648x64xf32> -> vector<648x64xf32>
    %28 = arith.addf %23, %27 : vector<648x64xf32>
    %c36 = arith.constant 36 : index
    %c0_26 = arith.constant 0 : index
    %29 = vector.load %arg0[%c36, %c0_26] : memref<688x3xf32, #tpu.memory_space<vmem>>, vector<648x3xf32>
    %c6 = arith.constant 6 : index
    %c0_27 = arith.constant 0 : index
    %c0_28 = arith.constant 0 : index
    %30 = vector.load %arg2[%c6, %c0_27, %c0_28] : memref<9x3x64xf32, #tpu.memory_space<vmem>>, vector<1x3x64xf32>
    %31 = vector.shape_cast %30 : vector<1x3x64xf32> to vector<3x64xf32>
    %cst_29 = arith.constant dense<0.000000e+00> : vector<648x64xf32>
    %32 = tpu.matmul %29, %31, %cst_29 {dimension_numbers = #tpu.dot_dimension_numbers<[1], [0], [0], [1], [0, 0, 1, 1], [], []>} : vector<648x3xf32>, vector<3x64xf32>, vector<648x64xf32> -> vector<648x64xf32>
    %33 = arith.addf %28, %32 : vector<648x64xf32>
    %c37 = arith.constant 37 : index
    %c0_30 = arith.constant 0 : index
    %34 = vector.load %arg0[%c37, %c0_30] : memref<688x3xf32, #tpu.memory_space<vmem>>, vector<648x3xf32>
    %c7 = arith.constant 7 : index
    %c0_31 = arith.constant 0 : index
    %c0_32 = arith.constant 0 : index
    %35 = vector.load %arg2[%c7, %c0_31, %c0_32] : memref<9x3x64xf32, #tpu.memory_space<vmem>>, vector<1x3x64xf32>
    %36 = vector.shape_cast %35 : vector<1x3x64xf32> to vector<3x64xf32>
    %cst_33 = arith.constant dense<0.000000e+00> : vector<648x64xf32>
    %37 = tpu.matmul %34, %36, %cst_33 {dimension_numbers = #tpu.dot_dimension_numbers<[1], [0], [0], [1], [0, 0, 1, 1], [], []>} : vector<648x3xf32>, vector<3x64xf32>, vector<648x64xf32> -> vector<648x64xf32>
    %38 = arith.addf %33, %37 : vector<648x64xf32>
    %c38 = arith.constant 38 : index
    %c0_34 = arith.constant 0 : index
    %39 = vector.load %arg0[%c38, %c0_34] : memref<688x3xf32, #tpu.memory_space<vmem>>, vector<648x3xf32>
    %c8 = arith.constant 8 : index
    %c0_35 = arith.constant 0 : index
    %c0_36 = arith.constant 0 : index
    %40 = vector.load %arg2[%c8, %c0_35, %c0_36] : memref<9x3x64xf32, #tpu.memory_space<vmem>>, vector<1x3x64xf32>
    %41 = vector.shape_cast %40 : vector<1x3x64xf32> to vector<3x64xf32>
    %cst_37 = arith.constant dense<0.000000e+00> : vector<648x64xf32>
    %42 = tpu.matmul %39, %41, %cst_37 {dimension_numbers = #tpu.dot_dimension_numbers<[1], [0], [0], [1], [0, 0, 1, 1], [], []>} : vector<648x3xf32>, vector<3x64xf32>, vector<648x64xf32> -> vector<648x64xf32>
    %43 = arith.addf %38, %42 : vector<648x64xf32>
    %c0_38 = arith.constant 0 : index
    %c0_39 = arith.constant 0 : index
    %44 = vector.load %arg3[%c0_38, %c0_39] : memref<1x64xf32, #tpu.memory_space<vmem>>, vector<1x64xf32>
    %45 = vector.broadcast %44 : vector<1x64xf32> to vector<648x64xf32>
    %46 = arith.addf %43, %45 : vector<648x64xf32>
    %cst_40 = arith.constant 0.000000e+00 : f32
    %47 = vector.broadcast %cst_40 : f32 to vector<648x64xf32>
    %48 = arith.maximumf %46, %47 : vector<648x64xf32>
    %c0_41 = arith.constant 0 : index
    %c0_42 = arith.constant 0 : index
    %49 = vector.load %arg1[%c0_41, %c0_42] : memref<2x648xf32, #tpu.memory_space<vmem>>, vector<2x648xf32>
    %cst_43 = arith.constant dense<0.000000e+00> : vector<2x64xf32>
    %50 = tpu.matmul %49, %48, %cst_43 {dimension_numbers = #tpu.dot_dimension_numbers<[1], [0], [0], [1], [0, 0, 1, 1], [], []>} : vector<2x648xf32>, vector<648x64xf32>, vector<2x64xf32> -> vector<2x64xf32>
    %c0_44 = arith.constant 0 : index
    %c0_45 = arith.constant 0 : index
    %51 = vector.load %arg4[%c0_44, %c0_45] : memref<64x32xf32, #tpu.memory_space<vmem>>, vector<64x32xf32>
    %cst_46 = arith.constant dense<0.000000e+00> : vector<2x32xf32>
    %52 = tpu.matmul %50, %51, %cst_46 {dimension_numbers = #tpu.dot_dimension_numbers<[1], [0], [0], [1], [0, 0, 1, 1], [], []>} : vector<2x64xf32>, vector<64x32xf32>, vector<2x32xf32> -> vector<2x32xf32>
    %c0_47 = arith.constant 0 : index
    %c0_48 = arith.constant 0 : index
    %53 = vector.load %arg5[%c0_47, %c0_48] : memref<1x32xf32, #tpu.memory_space<vmem>>, vector<1x32xf32>
    %54 = vector.broadcast %53 : vector<1x32xf32> to vector<2x32xf32>
    %55 = arith.addf %52, %54 : vector<2x32xf32>
    %c0_49 = arith.constant 0 : index
    %c0_50 = arith.constant 0 : index
    %56 = vector.load %arg7[%c0_49, %c0_50] : memref<32x128xf32, #tpu.memory_space<vmem>>, vector<32x128xf32>
    %c0_51 = arith.constant 0 : index
    %c0_52 = arith.constant 0 : index
    %57 = vector.load %arg8[%c0_51, %c0_52] : memref<32x128xf32, #tpu.memory_space<vmem>>, vector<32x128xf32>
    %c0_53 = arith.constant 0 : index
    %c0_54 = arith.constant 0 : index
    %58 = vector.load %arg9[%c0_53, %c0_54] : memref<1x128xf32, #tpu.memory_space<vmem>>, vector<1x128xf32>
    %c0_55 = arith.constant 0 : index
    %c0_56 = arith.constant 0 : index
    %59 = vector.load %arg10[%c0_55, %c0_56] : memref<32x128xf32, #tpu.memory_space<vmem>>, vector<32x128xf32>
    %c0_57 = arith.constant 0 : index
    %c0_58 = arith.constant 0 : index
    %60 = vector.load %arg11[%c0_57, %c0_58] : memref<32x128xf32, #tpu.memory_space<vmem>>, vector<32x128xf32>
    %c0_59 = arith.constant 0 : index
    %c0_60 = arith.constant 0 : index
    %61 = vector.load %arg12[%c0_59, %c0_60] : memref<1x128xf32, #tpu.memory_space<vmem>>, vector<1x128xf32>
    %c0_61 = arith.constant 0 : index
    %c0_62 = arith.constant 0 : index
    %62 = vector.load %arg13[%c0_61, %c0_62] : memref<32x64xf32, #tpu.memory_space<vmem>>, vector<32x64xf32>
    %c0_63 = arith.constant 0 : index
    %c0_64 = arith.constant 0 : index
    %63 = vector.load %arg14[%c0_63, %c0_64] : memref<1x64xf32, #tpu.memory_space<vmem>>, vector<1x64xf32>
    %cst_65 = arith.constant dense<0.000000e+00> : vector<2x128xf32>
    %64 = tpu.matmul %55, %56, %cst_65 {dimension_numbers = #tpu.dot_dimension_numbers<[1], [0], [0], [1], [0, 0, 1, 1], [], []>} : vector<2x32xf32>, vector<32x128xf32>, vector<2x128xf32> -> vector<2x128xf32>
    %65 = vector.broadcast %58 : vector<1x128xf32> to vector<2x128xf32>
    %66 = arith.addf %64, %65 : vector<2x128xf32>
    %c0_66 = arith.constant 0 : index
    %c0_67 = arith.constant 0 : index
    %67 = vector.load %arg6[%c0_66, %c0_67] : memref<14x32xf32, #tpu.memory_space<vmem>>, vector<14x32xf32>
    %cst_68 = arith.constant dense<0.000000e+00> : vector<14x128xf32>
    %68 = tpu.matmul %67, %56, %cst_68 {dimension_numbers = #tpu.dot_dimension_numbers<[1], [0], [0], [1], [0, 0, 1, 1], [], []>} : vector<14x32xf32>, vector<32x128xf32>, vector<14x128xf32> -> vector<14x128xf32>
    %69 = vector.broadcast %58 : vector<1x128xf32> to vector<14x128xf32>
    %70 = arith.addf %68, %69 : vector<14x128xf32>
    %cst_69 = arith.constant 0.000000e+00 : f32
    %71 = vector.broadcast %cst_69 : f32 to vector<2x32xf32>
    %cst_70 = arith.constant dense<0.000000e+00> : vector<2x128xf32>
    %72 = tpu.matmul %71, %57, %cst_70 {dimension_numbers = #tpu.dot_dimension_numbers<[1], [0], [0], [1], [0, 0, 1, 1], [], []>} : vector<2x32xf32>, vector<32x128xf32>, vector<2x128xf32> -> vector<2x128xf32>
    %73 = arith.addf %66, %72 : vector<2x128xf32>
    %74 = arith.negf %73 : vector<2x128xf32>
    %75 = math.exp %74 : vector<2x128xf32>
    %cst_71 = arith.constant 1.000000e+00 : f32
    %76 = vector.broadcast %cst_71 : f32 to vector<2x128xf32>
    %77 = arith.addf %76, %75 : vector<2x128xf32>
    %78 = arith.divf %76, %77 : vector<2x128xf32>
    %79 = math.tanh %73 : vector<2x128xf32>
    %80 = vector.extract_strided_slice %78 {offsets = [0, 0], sizes = [2, 32], strides = [1, 1]} : vector<2x128xf32> to vector<2x32xf32>
    %81 = vector.extract_strided_slice %78 {offsets = [0, 32], sizes = [2, 32], strides = [1, 1]} : vector<2x128xf32> to vector<2x32xf32>
    %82 = vector.extract_strided_slice %79 {offsets = [0, 64], sizes = [2, 32], strides = [1, 1]} : vector<2x128xf32> to vector<2x32xf32>
    %83 = vector.extract_strided_slice %78 {offsets = [0, 96], sizes = [2, 32], strides = [1, 1]} : vector<2x128xf32> to vector<2x32xf32>
    %84 = arith.mulf %81, %71 : vector<2x32xf32>
    %85 = arith.mulf %80, %82 : vector<2x32xf32>
    %86 = arith.addf %84, %85 : vector<2x32xf32>
    %87 = math.tanh %86 : vector<2x32xf32>
    %88 = arith.mulf %83, %87 : vector<2x32xf32>
    %cst_72 = arith.constant dense<0.000000e+00> : vector<2x128xf32>
    %89 = tpu.matmul %88, %59, %cst_72 {dimension_numbers = #tpu.dot_dimension_numbers<[1], [0], [0], [1], [0, 0, 1, 1], [], []>} : vector<2x32xf32>, vector<32x128xf32>, vector<2x128xf32> -> vector<2x128xf32>
    %90 = vector.broadcast %61 : vector<1x128xf32> to vector<2x128xf32>
    %91 = arith.addf %89, %90 : vector<2x128xf32>
    %cst_73 = arith.constant dense<0.000000e+00> : vector<2x128xf32>
    %92 = tpu.matmul %71, %60, %cst_73 {dimension_numbers = #tpu.dot_dimension_numbers<[1], [0], [0], [1], [0, 0, 1, 1], [], []>} : vector<2x32xf32>, vector<32x128xf32>, vector<2x128xf32> -> vector<2x128xf32>
    %93 = arith.addf %91, %92 : vector<2x128xf32>
    %94 = arith.negf %93 : vector<2x128xf32>
    %95 = math.exp %94 : vector<2x128xf32>
    %cst_74 = arith.constant 1.000000e+00 : f32
    %96 = vector.broadcast %cst_74 : f32 to vector<2x128xf32>
    %97 = arith.addf %96, %95 : vector<2x128xf32>
    %98 = arith.divf %96, %97 : vector<2x128xf32>
    %99 = math.tanh %93 : vector<2x128xf32>
    %100 = vector.extract_strided_slice %98 {offsets = [0, 0], sizes = [2, 32], strides = [1, 1]} : vector<2x128xf32> to vector<2x32xf32>
    %101 = vector.extract_strided_slice %98 {offsets = [0, 32], sizes = [2, 32], strides = [1, 1]} : vector<2x128xf32> to vector<2x32xf32>
    %102 = vector.extract_strided_slice %99 {offsets = [0, 64], sizes = [2, 32], strides = [1, 1]} : vector<2x128xf32> to vector<2x32xf32>
    %103 = vector.extract_strided_slice %98 {offsets = [0, 96], sizes = [2, 32], strides = [1, 1]} : vector<2x128xf32> to vector<2x32xf32>
    %104 = arith.mulf %101, %71 : vector<2x32xf32>
    %105 = arith.mulf %100, %102 : vector<2x32xf32>
    %106 = arith.addf %104, %105 : vector<2x32xf32>
    %107 = math.tanh %106 : vector<2x32xf32>
    %108 = arith.mulf %103, %107 : vector<2x32xf32>
    %cst_75 = arith.constant dense<0.000000e+00> : vector<2x64xf32>
    %109 = tpu.matmul %108, %62, %cst_75 {dimension_numbers = #tpu.dot_dimension_numbers<[1], [0], [0], [1], [0, 0, 1, 1], [], []>} : vector<2x32xf32>, vector<32x64xf32>, vector<2x64xf32> -> vector<2x64xf32>
    %110 = vector.broadcast %63 : vector<1x64xf32> to vector<2x64xf32>
    %111 = arith.addf %109, %110 : vector<2x64xf32>
    %c0_76 = arith.constant 0 : index
    %c0_77 = arith.constant 0 : index
    %c0_78 = arith.constant 0 : index
    %112 = vector.load %arg15[%c0_76, %c0_77, %c0_78] : memref<2x8x64xf32, #tpu.memory_space<vmem>>, vector<2x1x64xf32>
    %113 = vector.shape_cast %112 : vector<2x1x64xf32> to vector<2x64xf32>
    %114 = vector.shape_cast %111 : vector<2x64xf32> to vector<2x1x64xf32>
    tpu.vector_store %arg15[%c0_76, %c0_77, %c0_78], %114 {strides = array<i32>} : memref<2x8x64xf32, #tpu.memory_space<vmem>>, vector<2x1x64xf32>,
    %115 = vector.extract_strided_slice %70 {offsets = [0, 0], sizes = [2, 128], strides = [1, 1]} : vector<14x128xf32> to vector<2x128xf32>
    %cst_79 = arith.constant dense<0.000000e+00> : vector<2x128xf32>
    %116 = tpu.matmul %88, %57, %cst_79 {dimension_numbers = #tpu.dot_dimension_numbers<[1], [0], [0], [1], [0, 0, 1, 1], [], []>} : vector<2x32xf32>, vector<32x128xf32>, vector<2x128xf32> -> vector<2x128xf32>
    %117 = arith.addf %115, %116 : vector<2x128xf32>
    %118 = arith.negf %117 : vector<2x128xf32>
    %119 = math.exp %118 : vector<2x128xf32>
    %cst_80 = arith.constant 1.000000e+00 : f32
    %120 = vector.broadcast %cst_80 : f32 to vector<2x128xf32>
    %121 = arith.addf %120, %119 : vector<2x128xf32>
    %122 = arith.divf %120, %121 : vector<2x128xf32>
    %123 = math.tanh %117 : vector<2x128xf32>
    %124 = vector.extract_strided_slice %122 {offsets = [0, 0], sizes = [2, 32], strides = [1, 1]} : vector<2x128xf32> to vector<2x32xf32>
    %125 = vector.extract_strided_slice %122 {offsets = [0, 32], sizes = [2, 32], strides = [1, 1]} : vector<2x128xf32> to vector<2x32xf32>
    %126 = vector.extract_strided_slice %123 {offsets = [0, 64], sizes = [2, 32], strides = [1, 1]} : vector<2x128xf32> to vector<2x32xf32>
    %127 = vector.extract_strided_slice %122 {offsets = [0, 96], sizes = [2, 32], strides = [1, 1]} : vector<2x128xf32> to vector<2x32xf32>
    %128 = arith.mulf %125, %86 : vector<2x32xf32>
    %129 = arith.mulf %124, %126 : vector<2x32xf32>
    %130 = arith.addf %128, %129 : vector<2x32xf32>
    %131 = math.tanh %130 : vector<2x32xf32>
    %132 = arith.mulf %127, %131 : vector<2x32xf32>
    %cst_81 = arith.constant dense<0.000000e+00> : vector<2x128xf32>
    %133 = tpu.matmul %132, %59, %cst_81 {dimension_numbers = #tpu.dot_dimension_numbers<[1], [0], [0], [1], [0, 0, 1, 1], [], []>} : vector<2x32xf32>, vector<32x128xf32>, vector<2x128xf32> -> vector<2x128xf32>
    %134 = vector.broadcast %61 : vector<1x128xf32> to vector<2x128xf32>
    %135 = arith.addf %133, %134 : vector<2x128xf32>
    %cst_82 = arith.constant dense<0.000000e+00> : vector<2x128xf32>
    %136 = tpu.matmul %108, %60, %cst_82 {dimension_numbers = #tpu.dot_dimension_numbers<[1], [0], [0], [1], [0, 0, 1, 1], [], []>} : vector<2x32xf32>, vector<32x128xf32>, vector<2x128xf32> -> vector<2x128xf32>
    %137 = arith.addf %135, %136 : vector<2x128xf32>
    %138 = arith.negf %137 : vector<2x128xf32>
    %139 = math.exp %138 : vector<2x128xf32>
    %cst_83 = arith.constant 1.000000e+00 : f32
    %140 = vector.broadcast %cst_83 : f32 to vector<2x128xf32>
    %141 = arith.addf %140, %139 : vector<2x128xf32>
    %142 = arith.divf %140, %141 : vector<2x128xf32>
    %143 = math.tanh %137 : vector<2x128xf32>
    %144 = vector.extract_strided_slice %142 {offsets = [0, 0], sizes = [2, 32], strides = [1, 1]} : vector<2x128xf32> to vector<2x32xf32>
    %145 = vector.extract_strided_slice %142 {offsets = [0, 32], sizes = [2, 32], strides = [1, 1]} : vector<2x128xf32> to vector<2x32xf32>
    %146 = vector.extract_strided_slice %143 {offsets = [0, 64], sizes = [2, 32], strides = [1, 1]} : vector<2x128xf32> to vector<2x32xf32>
    %147 = vector.extract_strided_slice %142 {offsets = [0, 96], sizes = [2, 32], strides = [1, 1]} : vector<2x128xf32> to vector<2x32xf32>
    %148 = arith.mulf %145, %106 : vector<2x32xf32>
    %149 = arith.mulf %144, %146 : vector<2x32xf32>
    %150 = arith.addf %148, %149 : vector<2x32xf32>
    %151 = math.tanh %150 : vector<2x32xf32>
    %152 = arith.mulf %147, %151 : vector<2x32xf32>
    %cst_84 = arith.constant dense<0.000000e+00> : vector<2x64xf32>
    %153 = tpu.matmul %152, %62, %cst_84 {dimension_numbers = #tpu.dot_dimension_numbers<[1], [0], [0], [1], [0, 0, 1, 1], [], []>} : vector<2x32xf32>, vector<32x64xf32>, vector<2x64xf32> -> vector<2x64xf32>
    %154 = vector.broadcast %63 : vector<1x64xf32> to vector<2x64xf32>
    %155 = arith.addf %153, %154 : vector<2x64xf32>
    %c0_85 = arith.constant 0 : index
    %c1_86 = arith.constant 1 : index
    %c0_87 = arith.constant 0 : index
    %156 = vector.load %arg15[%c0_85, %c1_86, %c0_87] : memref<2x8x64xf32, #tpu.memory_space<vmem>>, vector<2x1x64xf32>
    %157 = vector.shape_cast %156 : vector<2x1x64xf32> to vector<2x64xf32>
    %158 = vector.shape_cast %155 : vector<2x64xf32> to vector<2x1x64xf32>
    tpu.vector_store %arg15[%c0_85, %c1_86, %c0_87], %158 {strides = array<i32>} : memref<2x8x64xf32, #tpu.memory_space<vmem>>, vector<2x1x64xf32>,
    %159 = vector.extract_strided_slice %70 {offsets = [2, 0], sizes = [2, 128], strides = [1, 1]} : vector<14x128xf32> to vector<2x128xf32>
    %cst_88 = arith.constant dense<0.000000e+00> : vector<2x128xf32>
    %160 = tpu.matmul %132, %57, %cst_88 {dimension_numbers = #tpu.dot_dimension_numbers<[1], [0], [0], [1], [0, 0, 1, 1], [], []>} : vector<2x32xf32>, vector<32x128xf32>, vector<2x128xf32> -> vector<2x128xf32>
    %161 = arith.addf %159, %160 : vector<2x128xf32>
    %162 = arith.negf %161 : vector<2x128xf32>
    %163 = math.exp %162 : vector<2x128xf32>
    %cst_89 = arith.constant 1.000000e+00 : f32
    %164 = vector.broadcast %cst_89 : f32 to vector<2x128xf32>
    %165 = arith.addf %164, %163 : vector<2x128xf32>
    %166 = arith.divf %164, %165 : vector<2x128xf32>
    %167 = math.tanh %161 : vector<2x128xf32>
    %168 = vector.extract_strided_slice %166 {offsets = [0, 0], sizes = [2, 32], strides = [1, 1]} : vector<2x128xf32> to vector<2x32xf32>
    %169 = vector.extract_strided_slice %166 {offsets = [0, 32], sizes = [2, 32], strides = [1, 1]} : vector<2x128xf32> to vector<2x32xf32>
    %170 = vector.extract_strided_slice %167 {offsets = [0, 64], sizes = [2, 32], strides = [1, 1]} : vector<2x128xf32> to vector<2x32xf32>
    %171 = vector.extract_strided_slice %166 {offsets = [0, 96], sizes = [2, 32], strides = [1, 1]} : vector<2x128xf32> to vector<2x32xf32>
    %172 = arith.mulf %169, %130 : vector<2x32xf32>
    %173 = arith.mulf %168, %170 : vector<2x32xf32>
    %174 = arith.addf %172, %173 : vector<2x32xf32>
    %175 = math.tanh %174 : vector<2x32xf32>
    %176 = arith.mulf %171, %175 : vector<2x32xf32>
    %cst_90 = arith.constant dense<0.000000e+00> : vector<2x128xf32>
    %177 = tpu.matmul %176, %59, %cst_90 {dimension_numbers = #tpu.dot_dimension_numbers<[1], [0], [0], [1], [0, 0, 1, 1], [], []>} : vector<2x32xf32>, vector<32x128xf32>, vector<2x128xf32> -> vector<2x128xf32>
    %178 = vector.broadcast %61 : vector<1x128xf32> to vector<2x128xf32>
    %179 = arith.addf %177, %178 : vector<2x128xf32>
    %cst_91 = arith.constant dense<0.000000e+00> : vector<2x128xf32>
    %180 = tpu.matmul %152, %60, %cst_91 {dimension_numbers = #tpu.dot_dimension_numbers<[1], [0], [0], [1], [0, 0, 1, 1], [], []>} : vector<2x32xf32>, vector<32x128xf32>, vector<2x128xf32> -> vector<2x128xf32>
    %181 = arith.addf %179, %180 : vector<2x128xf32>
    %182 = arith.negf %181 : vector<2x128xf32>
    %183 = math.exp %182 : vector<2x128xf32>
    %cst_92 = arith.constant 1.000000e+00 : f32
    %184 = vector.broadcast %cst_92 : f32 to vector<2x128xf32>
    %185 = arith.addf %184, %183 : vector<2x128xf32>
    %186 = arith.divf %184, %185 : vector<2x128xf32>
    %187 = math.tanh %181 : vector<2x128xf32>
    %188 = vector.extract_strided_slice %186 {offsets = [0, 0], sizes = [2, 32], strides = [1, 1]} : vector<2x128xf32> to vector<2x32xf32>
    %189 = vector.extract_strided_slice %186 {offsets = [0, 32], sizes = [2, 32], strides = [1, 1]} : vector<2x128xf32> to vector<2x32xf32>
    %190 = vector.extract_strided_slice %187 {offsets = [0, 64], sizes = [2, 32], strides = [1, 1]} : vector<2x128xf32> to vector<2x32xf32>
    %191 = vector.extract_strided_slice %186 {offsets = [0, 96], sizes = [2, 32], strides = [1, 1]} : vector<2x128xf32> to vector<2x32xf32>
    %192 = arith.mulf %189, %150 : vector<2x32xf32>
    %193 = arith.mulf %188, %190 : vector<2x32xf32>
    %194 = arith.addf %192, %193 : vector<2x32xf32>
    %195 = math.tanh %194 : vector<2x32xf32>
    %196 = arith.mulf %191, %195 : vector<2x32xf32>
    %cst_93 = arith.constant dense<0.000000e+00> : vector<2x64xf32>
    %197 = tpu.matmul %196, %62, %cst_93 {dimension_numbers = #tpu.dot_dimension_numbers<[1], [0], [0], [1], [0, 0, 1, 1], [], []>} : vector<2x32xf32>, vector<32x64xf32>, vector<2x64xf32> -> vector<2x64xf32>
    %198 = vector.broadcast %63 : vector<1x64xf32> to vector<2x64xf32>
    %199 = arith.addf %197, %198 : vector<2x64xf32>
    %c0_94 = arith.constant 0 : index
    %c2_95 = arith.constant 2 : index
    %c0_96 = arith.constant 0 : index
    %200 = vector.load %arg15[%c0_94, %c2_95, %c0_96] : memref<2x8x64xf32, #tpu.memory_space<vmem>>, vector<2x1x64xf32>
    %201 = vector.shape_cast %200 : vector<2x1x64xf32> to vector<2x64xf32>
    %202 = vector.shape_cast %199 : vector<2x64xf32> to vector<2x1x64xf32>
    tpu.vector_store %arg15[%c0_94, %c2_95, %c0_96], %202 {strides = array<i32>} : memref<2x8x64xf32, #tpu.memory_space<vmem>>, vector<2x1x64xf32>,
    %203 = vector.extract_strided_slice %70 {offsets = [4, 0], sizes = [2, 128], strides = [1, 1]} : vector<14x128xf32> to vector<2x128xf32>
    %cst_97 = arith.constant dense<0.000000e+00> : vector<2x128xf32>
    %204 = tpu.matmul %176, %57, %cst_97 {dimension_numbers = #tpu.dot_dimension_numbers<[1], [0], [0], [1], [0, 0, 1, 1], [], []>} : vector<2x32xf32>, vector<32x128xf32>, vector<2x128xf32> -> vector<2x128xf32>
    %205 = arith.addf %203, %204 : vector<2x128xf32>
    %206 = arith.negf %205 : vector<2x128xf32>
    %207 = math.exp %206 : vector<2x128xf32>
    %cst_98 = arith.constant 1.000000e+00 : f32
    %208 = vector.broadcast %cst_98 : f32 to vector<2x128xf32>
    %209 = arith.addf %208, %207 : vector<2x128xf32>
    %210 = arith.divf %208, %209 : vector<2x128xf32>
    %211 = math.tanh %205 : vector<2x128xf32>
    %212 = vector.extract_strided_slice %210 {offsets = [0, 0], sizes = [2, 32], strides = [1, 1]} : vector<2x128xf32> to vector<2x32xf32>
    %213 = vector.extract_strided_slice %210 {offsets = [0, 32], sizes = [2, 32], strides = [1, 1]} : vector<2x128xf32> to vector<2x32xf32>
    %214 = vector.extract_strided_slice %211 {offsets = [0, 64], sizes = [2, 32], strides = [1, 1]} : vector<2x128xf32> to vector<2x32xf32>
    %215 = vector.extract_strided_slice %210 {offsets = [0, 96], sizes = [2, 32], strides = [1, 1]} : vector<2x128xf32> to vector<2x32xf32>
    %216 = arith.mulf %213, %174 : vector<2x32xf32>
    %217 = arith.mulf %212, %214 : vector<2x32xf32>
    %218 = arith.addf %216, %217 : vector<2x32xf32>
    %219 = math.tanh %218 : vector<2x32xf32>
    %220 = arith.mulf %215, %219 : vector<2x32xf32>
    %cst_99 = arith.constant dense<0.000000e+00> : vector<2x128xf32>
    %221 = tpu.matmul %220, %59, %cst_99 {dimension_numbers = #tpu.dot_dimension_numbers<[1], [0], [0], [1], [0, 0, 1, 1], [], []>} : vector<2x32xf32>, vector<32x128xf32>, vector<2x128xf32> -> vector<2x128xf32>
    %222 = vector.broadcast %61 : vector<1x128xf32> to vector<2x128xf32>
    %223 = arith.addf %221, %222 : vector<2x128xf32>
    %cst_100 = arith.constant dense<0.000000e+00> : vector<2x128xf32>
    %224 = tpu.matmul %196, %60, %cst_100 {dimension_numbers = #tpu.dot_dimension_numbers<[1], [0], [0], [1], [0, 0, 1, 1], [], []>} : vector<2x32xf32>, vector<32x128xf32>, vector<2x128xf32> -> vector<2x128xf32>
    %225 = arith.addf %223, %224 : vector<2x128xf32>
    %226 = arith.negf %225 : vector<2x128xf32>
    %227 = math.exp %226 : vector<2x128xf32>
    %cst_101 = arith.constant 1.000000e+00 : f32
    %228 = vector.broadcast %cst_101 : f32 to vector<2x128xf32>
    %229 = arith.addf %228, %227 : vector<2x128xf32>
    %230 = arith.divf %228, %229 : vector<2x128xf32>
    %231 = math.tanh %225 : vector<2x128xf32>
    %232 = vector.extract_strided_slice %230 {offsets = [0, 0], sizes = [2, 32], strides = [1, 1]} : vector<2x128xf32> to vector<2x32xf32>
    %233 = vector.extract_strided_slice %230 {offsets = [0, 32], sizes = [2, 32], strides = [1, 1]} : vector<2x128xf32> to vector<2x32xf32>
    %234 = vector.extract_strided_slice %231 {offsets = [0, 64], sizes = [2, 32], strides = [1, 1]} : vector<2x128xf32> to vector<2x32xf32>
    %235 = vector.extract_strided_slice %230 {offsets = [0, 96], sizes = [2, 32], strides = [1, 1]} : vector<2x128xf32> to vector<2x32xf32>
    %236 = arith.mulf %233, %194 : vector<2x32xf32>
    %237 = arith.mulf %232, %234 : vector<2x32xf32>
    %238 = arith.addf %236, %237 : vector<2x32xf32>
    %239 = math.tanh %238 : vector<2x32xf32>
    %240 = arith.mulf %235, %239 : vector<2x32xf32>
    %cst_102 = arith.constant dense<0.000000e+00> : vector<2x64xf32>
    %241 = tpu.matmul %240, %62, %cst_102 {dimension_numbers = #tpu.dot_dimension_numbers<[1], [0], [0], [1], [0, 0, 1, 1], [], []>} : vector<2x32xf32>, vector<32x64xf32>, vector<2x64xf32> -> vector<2x64xf32>
    %242 = vector.broadcast %63 : vector<1x64xf32> to vector<2x64xf32>
    %243 = arith.addf %241, %242 : vector<2x64xf32>
    %c0_103 = arith.constant 0 : index
    %c3_104 = arith.constant 3 : index
    %c0_105 = arith.constant 0 : index
    %244 = vector.load %arg15[%c0_103, %c3_104, %c0_105] : memref<2x8x64xf32, #tpu.memory_space<vmem>>, vector<2x1x64xf32>
    %245 = vector.shape_cast %244 : vector<2x1x64xf32> to vector<2x64xf32>
    %246 = vector.shape_cast %243 : vector<2x64xf32> to vector<2x1x64xf32>
    tpu.vector_store %arg15[%c0_103, %c3_104, %c0_105], %246 {strides = array<i32>} : memref<2x8x64xf32, #tpu.memory_space<vmem>>, vector<2x1x64xf32>,
    %247 = vector.extract_strided_slice %70 {offsets = [6, 0], sizes = [2, 128], strides = [1, 1]} : vector<14x128xf32> to vector<2x128xf32>
    %cst_106 = arith.constant dense<0.000000e+00> : vector<2x128xf32>
    %248 = tpu.matmul %220, %57, %cst_106 {dimension_numbers = #tpu.dot_dimension_numbers<[1], [0], [0], [1], [0, 0, 1, 1], [], []>} : vector<2x32xf32>, vector<32x128xf32>, vector<2x128xf32> -> vector<2x128xf32>
    %249 = arith.addf %247, %248 : vector<2x128xf32>
    %250 = arith.negf %249 : vector<2x128xf32>
    %251 = math.exp %250 : vector<2x128xf32>
    %cst_107 = arith.constant 1.000000e+00 : f32
    %252 = vector.broadcast %cst_107 : f32 to vector<2x128xf32>
    %253 = arith.addf %252, %251 : vector<2x128xf32>
    %254 = arith.divf %252, %253 : vector<2x128xf32>
    %255 = math.tanh %249 : vector<2x128xf32>
    %256 = vector.extract_strided_slice %254 {offsets = [0, 0], sizes = [2, 32], strides = [1, 1]} : vector<2x128xf32> to vector<2x32xf32>
    %257 = vector.extract_strided_slice %254 {offsets = [0, 32], sizes = [2, 32], strides = [1, 1]} : vector<2x128xf32> to vector<2x32xf32>
    %258 = vector.extract_strided_slice %255 {offsets = [0, 64], sizes = [2, 32], strides = [1, 1]} : vector<2x128xf32> to vector<2x32xf32>
    %259 = vector.extract_strided_slice %254 {offsets = [0, 96], sizes = [2, 32], strides = [1, 1]} : vector<2x128xf32> to vector<2x32xf32>
    %260 = arith.mulf %257, %218 : vector<2x32xf32>
    %261 = arith.mulf %256, %258 : vector<2x32xf32>
    %262 = arith.addf %260, %261 : vector<2x32xf32>
    %263 = math.tanh %262 : vector<2x32xf32>
    %264 = arith.mulf %259, %263 : vector<2x32xf32>
    %cst_108 = arith.constant dense<0.000000e+00> : vector<2x128xf32>
    %265 = tpu.matmul %264, %59, %cst_108 {dimension_numbers = #tpu.dot_dimension_numbers<[1], [0], [0], [1], [0, 0, 1, 1], [], []>} : vector<2x32xf32>, vector<32x128xf32>, vector<2x128xf32> -> vector<2x128xf32>
    %266 = vector.broadcast %61 : vector<1x128xf32> to vector<2x128xf32>
    %267 = arith.addf %265, %266 : vector<2x128xf32>
    %cst_109 = arith.constant dense<0.000000e+00> : vector<2x128xf32>
    %268 = tpu.matmul %240, %60, %cst_109 {dimension_numbers = #tpu.dot_dimension_numbers<[1], [0], [0], [1], [0, 0, 1, 1], [], []>} : vector<2x32xf32>, vector<32x128xf32>, vector<2x128xf32> -> vector<2x128xf32>
    %269 = arith.addf %267, %268 : vector<2x128xf32>
    %270 = arith.negf %269 : vector<2x128xf32>
    %271 = math.exp %270 : vector<2x128xf32>
    %cst_110 = arith.constant 1.000000e+00 : f32
    %272 = vector.broadcast %cst_110 : f32 to vector<2x128xf32>
    %273 = arith.addf %272, %271 : vector<2x128xf32>
    %274 = arith.divf %272, %273 : vector<2x128xf32>
    %275 = math.tanh %269 : vector<2x128xf32>
    %276 = vector.extract_strided_slice %274 {offsets = [0, 0], sizes = [2, 32], strides = [1, 1]} : vector<2x128xf32> to vector<2x32xf32>
    %277 = vector.extract_strided_slice %274 {offsets = [0, 32], sizes = [2, 32], strides = [1, 1]} : vector<2x128xf32> to vector<2x32xf32>
    %278 = vector.extract_strided_slice %275 {offsets = [0, 64], sizes = [2, 32], strides = [1, 1]} : vector<2x128xf32> to vector<2x32xf32>
    %279 = vector.extract_strided_slice %274 {offsets = [0, 96], sizes = [2, 32], strides = [1, 1]} : vector<2x128xf32> to vector<2x32xf32>
    %280 = arith.mulf %277, %238 : vector<2x32xf32>
    %281 = arith.mulf %276, %278 : vector<2x32xf32>
    %282 = arith.addf %280, %281 : vector<2x32xf32>
    %283 = math.tanh %282 : vector<2x32xf32>
    %284 = arith.mulf %279, %283 : vector<2x32xf32>
    %cst_111 = arith.constant dense<0.000000e+00> : vector<2x64xf32>
    %285 = tpu.matmul %284, %62, %cst_111 {dimension_numbers = #tpu.dot_dimension_numbers<[1], [0], [0], [1], [0, 0, 1, 1], [], []>} : vector<2x32xf32>, vector<32x64xf32>, vector<2x64xf32> -> vector<2x64xf32>
    %286 = vector.broadcast %63 : vector<1x64xf32> to vector<2x64xf32>
    %287 = arith.addf %285, %286 : vector<2x64xf32>
    %c0_112 = arith.constant 0 : index
    %c4_113 = arith.constant 4 : index
    %c0_114 = arith.constant 0 : index
    %288 = vector.load %arg15[%c0_112, %c4_113, %c0_114] : memref<2x8x64xf32, #tpu.memory_space<vmem>>, vector<2x1x64xf32>
    %289 = vector.shape_cast %288 : vector<2x1x64xf32> to vector<2x64xf32>
    %290 = vector.shape_cast %287 : vector<2x64xf32> to vector<2x1x64xf32>
    tpu.vector_store %arg15[%c0_112, %c4_113, %c0_114], %290 {strides = array<i32>} : memref<2x8x64xf32, #tpu.memory_space<vmem>>, vector<2x1x64xf32>,
    %291 = vector.extract_strided_slice %70 {offsets = [8, 0], sizes = [2, 128], strides = [1, 1]} : vector<14x128xf32> to vector<2x128xf32>
    %cst_115 = arith.constant dense<0.000000e+00> : vector<2x128xf32>
    %292 = tpu.matmul %264, %57, %cst_115 {dimension_numbers = #tpu.dot_dimension_numbers<[1], [0], [0], [1], [0, 0, 1, 1], [], []>} : vector<2x32xf32>, vector<32x128xf32>, vector<2x128xf32> -> vector<2x128xf32>
    %293 = arith.addf %291, %292 : vector<2x128xf32>
    %294 = arith.negf %293 : vector<2x128xf32>
    %295 = math.exp %294 : vector<2x128xf32>
    %cst_116 = arith.constant 1.000000e+00 : f32
    %296 = vector.broadcast %cst_116 : f32 to vector<2x128xf32>
    %297 = arith.addf %296, %295 : vector<2x128xf32>
    %298 = arith.divf %296, %297 : vector<2x128xf32>
    %299 = math.tanh %293 : vector<2x128xf32>
    %300 = vector.extract_strided_slice %298 {offsets = [0, 0], sizes = [2, 32], strides = [1, 1]} : vector<2x128xf32> to vector<2x32xf32>
    %301 = vector.extract_strided_slice %298 {offsets = [0, 32], sizes = [2, 32], strides = [1, 1]} : vector<2x128xf32> to vector<2x32xf32>
    %302 = vector.extract_strided_slice %299 {offsets = [0, 64], sizes = [2, 32], strides = [1, 1]} : vector<2x128xf32> to vector<2x32xf32>
    %303 = vector.extract_strided_slice %298 {offsets = [0, 96], sizes = [2, 32], strides = [1, 1]} : vector<2x128xf32> to vector<2x32xf32>
    %304 = arith.mulf %301, %262 : vector<2x32xf32>
    %305 = arith.mulf %300, %302 : vector<2x32xf32>
    %306 = arith.addf %304, %305 : vector<2x32xf32>
    %307 = math.tanh %306 : vector<2x32xf32>
    %308 = arith.mulf %303, %307 : vector<2x32xf32>
    %cst_117 = arith.constant dense<0.000000e+00> : vector<2x128xf32>
    %309 = tpu.matmul %308, %59, %cst_117 {dimension_numbers = #tpu.dot_dimension_numbers<[1], [0], [0], [1], [0, 0, 1, 1], [], []>} : vector<2x32xf32>, vector<32x128xf32>, vector<2x128xf32> -> vector<2x128xf32>
    %310 = vector.broadcast %61 : vector<1x128xf32> to vector<2x128xf32>
    %311 = arith.addf %309, %310 : vector<2x128xf32>
    %cst_118 = arith.constant dense<0.000000e+00> : vector<2x128xf32>
    %312 = tpu.matmul %284, %60, %cst_118 {dimension_numbers = #tpu.dot_dimension_numbers<[1], [0], [0], [1], [0, 0, 1, 1], [], []>} : vector<2x32xf32>, vector<32x128xf32>, vector<2x128xf32> -> vector<2x128xf32>
    %313 = arith.addf %311, %312 : vector<2x128xf32>
    %314 = arith.negf %313 : vector<2x128xf32>
    %315 = math.exp %314 : vector<2x128xf32>
    %cst_119 = arith.constant 1.000000e+00 : f32
    %316 = vector.broadcast %cst_119 : f32 to vector<2x128xf32>
    %317 = arith.addf %316, %315 : vector<2x128xf32>
    %318 = arith.divf %316, %317 : vector<2x128xf32>
    %319 = math.tanh %313 : vector<2x128xf32>
    %320 = vector.extract_strided_slice %318 {offsets = [0, 0], sizes = [2, 32], strides = [1, 1]} : vector<2x128xf32> to vector<2x32xf32>
    %321 = vector.extract_strided_slice %318 {offsets = [0, 32], sizes = [2, 32], strides = [1, 1]} : vector<2x128xf32> to vector<2x32xf32>
    %322 = vector.extract_strided_slice %319 {offsets = [0, 64], sizes = [2, 32], strides = [1, 1]} : vector<2x128xf32> to vector<2x32xf32>
    %323 = vector.extract_strided_slice %318 {offsets = [0, 96], sizes = [2, 32], strides = [1, 1]} : vector<2x128xf32> to vector<2x32xf32>
    %324 = arith.mulf %321, %282 : vector<2x32xf32>
    %325 = arith.mulf %320, %322 : vector<2x32xf32>
    %326 = arith.addf %324, %325 : vector<2x32xf32>
    %327 = math.tanh %326 : vector<2x32xf32>
    %328 = arith.mulf %323, %327 : vector<2x32xf32>
    %cst_120 = arith.constant dense<0.000000e+00> : vector<2x64xf32>
    %329 = tpu.matmul %328, %62, %cst_120 {dimension_numbers = #tpu.dot_dimension_numbers<[1], [0], [0], [1], [0, 0, 1, 1], [], []>} : vector<2x32xf32>, vector<32x64xf32>, vector<2x64xf32> -> vector<2x64xf32>
    %330 = vector.broadcast %63 : vector<1x64xf32> to vector<2x64xf32>
    %331 = arith.addf %329, %330 : vector<2x64xf32>
    %c0_121 = arith.constant 0 : index
    %c5_122 = arith.constant 5 : index
    %c0_123 = arith.constant 0 : index
    %332 = vector.load %arg15[%c0_121, %c5_122, %c0_123] : memref<2x8x64xf32, #tpu.memory_space<vmem>>, vector<2x1x64xf32>
    %333 = vector.shape_cast %332 : vector<2x1x64xf32> to vector<2x64xf32>
    %334 = vector.shape_cast %331 : vector<2x64xf32> to vector<2x1x64xf32>
    tpu.vector_store %arg15[%c0_121, %c5_122, %c0_123], %334 {strides = array<i32>} : memref<2x8x64xf32, #tpu.memory_space<vmem>>, vector<2x1x64xf32>,
    %335 = vector.extract_strided_slice %70 {offsets = [10, 0], sizes = [2, 128], strides = [1, 1]} : vector<14x128xf32> to vector<2x128xf32>
    %cst_124 = arith.constant dense<0.000000e+00> : vector<2x128xf32>
    %336 = tpu.matmul %308, %57, %cst_124 {dimension_numbers = #tpu.dot_dimension_numbers<[1], [0], [0], [1], [0, 0, 1, 1], [], []>} : vector<2x32xf32>, vector<32x128xf32>, vector<2x128xf32> -> vector<2x128xf32>
    %337 = arith.addf %335, %336 : vector<2x128xf32>
    %338 = arith.negf %337 : vector<2x128xf32>
    %339 = math.exp %338 : vector<2x128xf32>
    %cst_125 = arith.constant 1.000000e+00 : f32
    %340 = vector.broadcast %cst_125 : f32 to vector<2x128xf32>
    %341 = arith.addf %340, %339 : vector<2x128xf32>
    %342 = arith.divf %340, %341 : vector<2x128xf32>
    %343 = math.tanh %337 : vector<2x128xf32>
    %344 = vector.extract_strided_slice %342 {offsets = [0, 0], sizes = [2, 32], strides = [1, 1]} : vector<2x128xf32> to vector<2x32xf32>
    %345 = vector.extract_strided_slice %342 {offsets = [0, 32], sizes = [2, 32], strides = [1, 1]} : vector<2x128xf32> to vector<2x32xf32>
    %346 = vector.extract_strided_slice %343 {offsets = [0, 64], sizes = [2, 32], strides = [1, 1]} : vector<2x128xf32> to vector<2x32xf32>
    %347 = vector.extract_strided_slice %342 {offsets = [0, 96], sizes = [2, 32], strides = [1, 1]} : vector<2x128xf32> to vector<2x32xf32>
    %348 = arith.mulf %345, %306 : vector<2x32xf32>
    %349 = arith.mulf %344, %346 : vector<2x32xf32>
    %350 = arith.addf %348, %349 : vector<2x32xf32>
    %351 = math.tanh %350 : vector<2x32xf32>
    %352 = arith.mulf %347, %351 : vector<2x32xf32>
    %cst_126 = arith.constant dense<0.000000e+00> : vector<2x128xf32>
    %353 = tpu.matmul %352, %59, %cst_126 {dimension_numbers = #tpu.dot_dimension_numbers<[1], [0], [0], [1], [0, 0, 1, 1], [], []>} : vector<2x32xf32>, vector<32x128xf32>, vector<2x128xf32> -> vector<2x128xf32>
    %354 = vector.broadcast %61 : vector<1x128xf32> to vector<2x128xf32>
    %355 = arith.addf %353, %354 : vector<2x128xf32>
    %cst_127 = arith.constant dense<0.000000e+00> : vector<2x128xf32>
    %356 = tpu.matmul %328, %60, %cst_127 {dimension_numbers = #tpu.dot_dimension_numbers<[1], [0], [0], [1], [0, 0, 1, 1], [], []>} : vector<2x32xf32>, vector<32x128xf32>, vector<2x128xf32> -> vector<2x128xf32>
    %357 = arith.addf %355, %356 : vector<2x128xf32>
    %358 = arith.negf %357 : vector<2x128xf32>
    %359 = math.exp %358 : vector<2x128xf32>
    %cst_128 = arith.constant 1.000000e+00 : f32
    %360 = vector.broadcast %cst_128 : f32 to vector<2x128xf32>
    %361 = arith.addf %360, %359 : vector<2x128xf32>
    %362 = arith.divf %360, %361 : vector<2x128xf32>
    %363 = math.tanh %357 : vector<2x128xf32>
    %364 = vector.extract_strided_slice %362 {offsets = [0, 0], sizes = [2, 32], strides = [1, 1]} : vector<2x128xf32> to vector<2x32xf32>
    %365 = vector.extract_strided_slice %362 {offsets = [0, 32], sizes = [2, 32], strides = [1, 1]} : vector<2x128xf32> to vector<2x32xf32>
    %366 = vector.extract_strided_slice %363 {offsets = [0, 64], sizes = [2, 32], strides = [1, 1]} : vector<2x128xf32> to vector<2x32xf32>
    %367 = vector.extract_strided_slice %362 {offsets = [0, 96], sizes = [2, 32], strides = [1, 1]} : vector<2x128xf32> to vector<2x32xf32>
    %368 = arith.mulf %365, %326 : vector<2x32xf32>
    %369 = arith.mulf %364, %366 : vector<2x32xf32>
    %370 = arith.addf %368, %369 : vector<2x32xf32>
    %371 = math.tanh %370 : vector<2x32xf32>
    %372 = arith.mulf %367, %371 : vector<2x32xf32>
    %cst_129 = arith.constant dense<0.000000e+00> : vector<2x64xf32>
    %373 = tpu.matmul %372, %62, %cst_129 {dimension_numbers = #tpu.dot_dimension_numbers<[1], [0], [0], [1], [0, 0, 1, 1], [], []>} : vector<2x32xf32>, vector<32x64xf32>, vector<2x64xf32> -> vector<2x64xf32>
    %374 = vector.broadcast %63 : vector<1x64xf32> to vector<2x64xf32>
    %375 = arith.addf %373, %374 : vector<2x64xf32>
    %c0_130 = arith.constant 0 : index
    %c6_131 = arith.constant 6 : index
    %c0_132 = arith.constant 0 : index
    %376 = vector.load %arg15[%c0_130, %c6_131, %c0_132] : memref<2x8x64xf32, #tpu.memory_space<vmem>>, vector<2x1x64xf32>
    %377 = vector.shape_cast %376 : vector<2x1x64xf32> to vector<2x64xf32>
    %378 = vector.shape_cast %375 : vector<2x64xf32> to vector<2x1x64xf32>
    tpu.vector_store %arg15[%c0_130, %c6_131, %c0_132], %378 {strides = array<i32>} : memref<2x8x64xf32, #tpu.memory_space<vmem>>, vector<2x1x64xf32>,
    %379 = vector.extract_strided_slice %70 {offsets = [12, 0], sizes = [2, 128], strides = [1, 1]} : vector<14x128xf32> to vector<2x128xf32>
    %cst_133 = arith.constant dense<0.000000e+00> : vector<2x128xf32>
    %380 = tpu.matmul %352, %57, %cst_133 {dimension_numbers = #tpu.dot_dimension_numbers<[1], [0], [0], [1], [0, 0, 1, 1], [], []>} : vector<2x32xf32>, vector<32x128xf32>, vector<2x128xf32> -> vector<2x128xf32>
    %381 = arith.addf %379, %380 : vector<2x128xf32>
    %382 = arith.negf %381 : vector<2x128xf32>
    %383 = math.exp %382 : vector<2x128xf32>
    %cst_134 = arith.constant 1.000000e+00 : f32
    %384 = vector.broadcast %cst_134 : f32 to vector<2x128xf32>
    %385 = arith.addf %384, %383 : vector<2x128xf32>
    %386 = arith.divf %384, %385 : vector<2x128xf32>
    %387 = math.tanh %381 : vector<2x128xf32>
    %388 = vector.extract_strided_slice %386 {offsets = [0, 0], sizes = [2, 32], strides = [1, 1]} : vector<2x128xf32> to vector<2x32xf32>
    %389 = vector.extract_strided_slice %386 {offsets = [0, 32], sizes = [2, 32], strides = [1, 1]} : vector<2x128xf32> to vector<2x32xf32>
    %390 = vector.extract_strided_slice %387 {offsets = [0, 64], sizes = [2, 32], strides = [1, 1]} : vector<2x128xf32> to vector<2x32xf32>
    %391 = vector.extract_strided_slice %386 {offsets = [0, 96], sizes = [2, 32], strides = [1, 1]} : vector<2x128xf32> to vector<2x32xf32>
    %392 = arith.mulf %389, %350 : vector<2x32xf32>
    %393 = arith.mulf %388, %390 : vector<2x32xf32>
    %394 = arith.addf %392, %393 : vector<2x32xf32>
    %395 = math.tanh %394 : vector<2x32xf32>
    %396 = arith.mulf %391, %395 : vector<2x32xf32>
    %cst_135 = arith.constant dense<0.000000e+00> : vector<2x128xf32>
    %397 = tpu.matmul %396, %59, %cst_135 {dimension_numbers = #tpu.dot_dimension_numbers<[1], [0], [0], [1], [0, 0, 1, 1], [], []>} : vector<2x32xf32>, vector<32x128xf32>, vector<2x128xf32> -> vector<2x128xf32>
    %398 = vector.broadcast %61 : vector<1x128xf32> to vector<2x128xf32>
    %399 = arith.addf %397, %398 : vector<2x128xf32>
    %cst_136 = arith.constant dense<0.000000e+00> : vector<2x128xf32>
    %400 = tpu.matmul %372, %60, %cst_136 {dimension_numbers = #tpu.dot_dimension_numbers<[1], [0], [0], [1], [0, 0, 1, 1], [], []>} : vector<2x32xf32>, vector<32x128xf32>, vector<2x128xf32> -> vector<2x128xf32>
    %401 = arith.addf %399, %400 : vector<2x128xf32>
    %402 = arith.negf %401 : vector<2x128xf32>
    %403 = math.exp %402 : vector<2x128xf32>
    %cst_137 = arith.constant 1.000000e+00 : f32
    %404 = vector.broadcast %cst_137 : f32 to vector<2x128xf32>
    %405 = arith.addf %404, %403 : vector<2x128xf32>
    %406 = arith.divf %404, %405 : vector<2x128xf32>
    %407 = math.tanh %401 : vector<2x128xf32>
    %408 = vector.extract_strided_slice %406 {offsets = [0, 0], sizes = [2, 32], strides = [1, 1]} : vector<2x128xf32> to vector<2x32xf32>
    %409 = vector.extract_strided_slice %406 {offsets = [0, 32], sizes = [2, 32], strides = [1, 1]} : vector<2x128xf32> to vector<2x32xf32>
    %410 = vector.extract_strided_slice %407 {offsets = [0, 64], sizes = [2, 32], strides = [1, 1]} : vector<2x128xf32> to vector<2x32xf32>
    %411 = vector.extract_strided_slice %406 {offsets = [0, 96], sizes = [2, 32], strides = [1, 1]} : vector<2x128xf32> to vector<2x32xf32>
    %412 = arith.mulf %409, %370 : vector<2x32xf32>
    %413 = arith.mulf %408, %410 : vector<2x32xf32>
    %414 = arith.addf %412, %413 : vector<2x32xf32>
    %415 = math.tanh %414 : vector<2x32xf32>
    %416 = arith.mulf %411, %415 : vector<2x32xf32>
    %cst_138 = arith.constant dense<0.000000e+00> : vector<2x64xf32>
    %417 = tpu.matmul %416, %62, %cst_138 {dimension_numbers = #tpu.dot_dimension_numbers<[1], [0], [0], [1], [0, 0, 1, 1], [], []>} : vector<2x32xf32>, vector<32x64xf32>, vector<2x64xf32> -> vector<2x64xf32>
    %418 = vector.broadcast %63 : vector<1x64xf32> to vector<2x64xf32>
    %419 = arith.addf %417, %418 : vector<2x64xf32>
    %c0_139 = arith.constant 0 : index
    %c7_140 = arith.constant 7 : index
    %c0_141 = arith.constant 0 : index
    %420 = vector.load %arg15[%c0_139, %c7_140, %c0_141] : memref<2x8x64xf32, #tpu.memory_space<vmem>>, vector<2x1x64xf32>
    %421 = vector.shape_cast %420 : vector<2x1x64xf32> to vector<2x64xf32>
    %422 = vector.shape_cast %419 : vector<2x64xf32> to vector<2x1x64xf32>
    tpu.vector_store %arg15[%c0_139, %c7_140, %c0_141], %422 {strides = array<i32>} : memref<2x8x64xf32, #tpu.memory_space<vmem>>, vector<2x1x64xf32>,
    return
  }
}

</mosaic_0001>

<bundles_post_ra>
// kernel: baseline_forward.1
= control target key start
LH: loop header
LB: loop body
LE: loop exit
PB: predicated region body
PF: predicated region fallthrough
CT: control target
= control target key end

     0   :  { %vm460_vm0 = vcmask 1042432   ;;  %vm216_vm1 = vcmask 23552   ;;  %s13229_s0 = inlined_call_operand.vmem [shape: f32[688,3], index: 0, kind: input, shape index: {}]   ;;  %s13230_s1 = inlined_call_operand.vmem [shape: f32[2,648], index: 1, kind: input, shape index: {}]   ;;  %s13231_s2 = inlined_call_operand.vmem [shape: f32[9,3,64], index: 2, kind: input, shape index: {}]   ;;  %s13232_s3 = inlined_call_operand.vmem [shape: f32[1,64], index: 3, kind: input, shape index: {}]   ;;  %s13233_s4 = inlined_call_operand.vmem [shape: f32[64,32], index: 4, kind: input, shape index: {}]   ;;  %s13234_s5 = inlined_call_operand.vmem [shape: f32[1,32], index: 5, kind: input, shape index: {}]   ;;  %s13235_s6 = inlined_call_operand.vmem [shape: f32[14,32], index: 6, kind: input, shape index: {}]   ;;  %s13236_s7 = inlined_call_operand.vmem [shape: f32[32,128], index: 7, kind: input, shape index: {}]   ;;  %s13237_s8 = inlined_call_operand.vmem [shape: f32[32,128], index: 8, kind: input, shape index: {}]   ;;  %s13238_s9 = inlined_call_operand.vmem [shape: f32[1,128], index: 9, kind: input, shape index: {}]   ;;  %s13239_s10 = inlined_call_operand.vmem [shape: f32[32,128], index: 10, kind: input, shape index: {}]   ;;  %s13240_s11 = inlined_call_operand.vmem [shape: f32[32,128], index: 11, kind: input, shape index: {}]   ;;  %s13241_s12 = inlined_call_operand.vmem [shape: f32[1,128], index: 12, kind: input, shape index: {}]   ;;  %s13242_s13 = inlined_call_operand.vmem [shape: f32[32,64], index: 13, kind: input, shape index: {}]   ;;  %s13243_s14 = inlined_call_operand.vmem [shape: f32[1,64], index: 14, kind: input, shape index: {}]   ;;  %s13244_s15 = inlined_call_operand.hbm [shape: f32[2,8,64], index: 15, kind: output, shape index: {}]  }
   0x1   :  { %v7778_v0 = vld [vmem:[%s13231_s2 + $0x4] sm:$0x7]  ;;  %v166_v2 = vld [vmem:[%s13229_s0 + $0x109] sm:$0xff]  ;;  %v180_v3 = vld [vmem:[%s13229_s0 + $0x179] sm:$0xff] }
   0x2   :  { %v133_v1 = vld [vmem:[%s13229_s0 + $0x1] sm:$0xff]  ;;  %7779 = vmatpush.msk.msra.mxu0 %vm460_vm0, %v7778_v0  ;;  %8575 = vmatpush.msk.msra.mxu1 %vm460_vm0, %v7778_v0  ;;  %v134_v5 = vld [vmem:[%s13229_s0 + $0x9] sm:$0xff]  ;;  %v167_v6 = vld [vmem:[%s13229_s0 + $0x111] sm:$0xff] }
   0x3   :  { %8576 = vmatpush.msk.msra.mxu2 %vm460_vm0, %v7778_v0  ;;  %7780 = vmatmul.msk.f32.vlgmr.msra.gmra.mxu0 %vm216_vm1, %v133_v1  ;;  %v197_v4 = vld [vmem:[%s13229_s0 + $0x201] sm:$0xff] }
   0x4   :  { %7813 = vmatmul.msk.f32.vlgmr.msra.gmra.mxu1 %vm216_vm1, %v166_v2  ;;  %7827 = vmatmul.msk.f32.vlgmr.msra.gmra.mxu2 %vm216_vm1, %v180_v3  ;;  %v181_v7 = vld [vmem:[%s13229_s0 + $0x181] sm:$0xff] }
   0x5   :  { %8577 = vmatpush.msk.msra.mxu3 %vm460_vm0, %v7778_v0 }
   0x6   :  { %7844 = vmatmul.msk.f32.vlgmr.msra.gmra.mxu3 %vm216_vm1, %v197_v4 }
   0x7   :  { %20 = vsyncpa [#allocation3], 0  ;;  %v198_v8 = vld [vmem:[%s13229_s0 + $0x209] sm:$0xff]  ;;  %v135_v9 = vld [vmem:[%s13229_s0 + $0x11] sm:$0xff]  ;;  %vm6104_vm2 = vcmask 64512   ;;  %vm6239_vm3 = vcmask 523264  }
   0x8   :  { %v168_v10 = vld [vmem:[%s13229_s0 + $0x119] sm:$0xff]  ;;  %v182_v11 = vld [vmem:[%s13229_s0 + $0x189] sm:$0xff]  ;;  %v199_v12 = vld [vmem:[%s13229_s0 + $0x211] sm:$0xff]  ;;  %vm6289_vm4 = vcmask 261120  }
   0x9   :  { %v136_v13 = vld [vmem:[%s13229_s0 + $0x19] sm:$0xff]  ;;  %v169_v14 = vld [vmem:[%s13229_s0 + $0x121] sm:$0xff]  ;;  %v183_v15 = vld [vmem:[%s13229_s0 + $0x191] sm:$0xff] }
   0xa   :  { %v200_v16 = vld [vmem:[%s13229_s0 + $0x219] sm:$0xff]  ;;  %v137_v17 = vld [vmem:[%s13229_s0 + $0x21] sm:$0xff]  ;;  %v170_v18 = vld [vmem:[%s13229_s0 + $0x129] sm:$0xff] }
   0xb   :  { %7781 = vmatmul.msk.f32.gmra.mxu0 %vm216_vm1, %v134_v5  ;;  %v184_v19 = vld [vmem:[%s13229_s0 + $0x199] sm:$0xff]  ;;  %v201_v20 = vld [vmem:[%s13229_s0 + $0x221] sm:$0xff]  ;;  %v138_v21 = vld [vmem:[%s13229_s0 + $0x29] sm:$0xff] }
   0xc   :  { %7814 = vmatmul.msk.f32.gmra.mxu1 %vm216_vm1, %v167_v6  ;;  %7828 = vmatmul.msk.f32.gmra.mxu2 %vm216_vm1, %v181_v7  ;;  %v171_v22 = vld [vmem:[%s13229_s0 + $0x131] sm:$0xff]  ;;  %v185_v23 = vld [vmem:[%s13229_s0 + $0x1a1] sm:$0xff]  ;;  %v202_v24 = vld [vmem:[%s13229_s0 + $0x229] sm:$0xff] }
   0xd   :  { %v139_v25 = vld [vmem:[%s13229_s0 + $0x31] sm:$0xff]  ;;  %v172_v26 = vld [vmem:[%s13229_s0 + $0x139] sm:$0xff]  ;;  %v186_v27 = vld [vmem:[%s13229_s0 + $0x1a9] sm:$0xff] }
   0xe   :  { %7845 = vmatmul.msk.f32.gmra.mxu3 %vm216_vm1, %v198_v8  ;;  %v203_v28 = vld [vmem:[%s13229_s0 + $0x231] sm:$0xff]  ;;  %v140_v29 = vld [vmem:[%s13229_s0 + $0x39] sm:$0xff]  ;;  %v173_v30 = vld [vmem:[%s13229_s0 + $0x141] sm:$0xff] }
   0xf   :  { %v187_v31 = vld [vmem:[%s13229_s0 + $0x1b1] sm:$0xff]  ;;  %v204_v32 = vld [vmem:[%s13229_s0 + $0x239] sm:$0xff]  ;;  %v141_v33 = vld [vmem:[%s13229_s0 + $0x41] sm:$0xff] }
  0x10   :  { %v174_v34 = vld [vmem:[%s13229_s0 + $0x149] sm:$0xff]  ;;  %v188_v35 = vld [vmem:[%s13229_s0 + $0x1b9] sm:$0xff]  ;;  %v205_v36 = vld [vmem:[%s13229_s0 + $0x241] sm:$0xff] }
  0x11   :  { %v142_v37 = vld [vmem:[%s13229_s0 + $0x49] sm:$0xff]  ;;  %v175_v38 = vld [vmem:[%s13229_s0 + $0x151] sm:$0xff]  ;;  %v189_v39 = vld [vmem:[%s13229_s0 + $0x1c1] sm:$0xff] }
  0x12   :  { %v206_v40 = vld [vmem:[%s13229_s0 + $0x249] sm:$0xff]  ;;  %v132_v41 = vld [vmem:[%s13231_s2] sm:$0x7]  ;;  %v143_v42 = vld [vmem:[%s13229_s0 + $0x51] sm:$0xff] }
  0x13   :  { %7782 = vmatmul.msk.f32.gmra.mxu0 %vm216_vm1, %v135_v9  ;;  %7861 = vmatpush.msk.msrb.mxu1 %vm460_vm0, %v132_v41  ;;  %v176_v43 = vld [vmem:[%s13229_s0 + $0x159] sm:$0xff]  ;;  %v190_v44 = vld [vmem:[%s13229_s0 + $0x1c9] sm:$0xff]  ;;  %v207_v45 = vld [vmem:[%s13229_s0 + $0x251] sm:$0xff] }
  0x14   :  { %7815 = vmatmul.msk.f32.gmra.mxu1 %vm216_vm1, %v168_v10  ;;  %7829 = vmatmul.msk.f32.gmra.mxu2 %vm216_vm1, %v182_v11  ;;  %v144_v46 = vld [vmem:[%s13229_s0 + $0x59] sm:$0xff]  ;;  %v177_v47 = vld [vmem:[%s13229_s0 + $0x161] sm:$0xff]  ;;  %v191_v48 = vld [vmem:[%s13229_s0 + $0x1d1] sm:$0xff] }
  0x15   :  { %v208_v49 = vld [vmem:[%s13229_s0 + $0x259] sm:$0xff]  ;;  %v145_v50 = vld [vmem:[%s13229_s0 + $0x61] sm:$0xff]  ;;  %v178_v51 = vld [vmem:[%s13229_s0 + $0x169] sm:$0xff] }
  0x16   :  { %7846 = vmatmul.msk.f32.gmra.mxu3 %vm216_vm1, %v199_v12  ;;  %v192_v52 = vld [vmem:[%s13229_s0 + $0x1d9] sm:$0xff]  ;;  %v209_v53 = vld [vmem:[%s13229_s0 + $0x261] sm:$0xff]  ;;  %v146_v54 = vld [vmem:[%s13229_s0 + $0x69] sm:$0xff] }
  0x17   :  { %v179_v55 = vld [vmem:[%s13229_s0 + $0x171] sm:$0xff]  ;;  %v193_v56 = vld [vmem:[%s13229_s0 + $0x1e1] sm:$0xff]  ;;  %v210_v58 = vld [vmem:[%s13229_s0 + $0x269] sm:$0xff] }
  0x18   :  { %v7943_v57 = vld [vmem:[%s13231_s2 + $0x8] sm:$0x7]  ;;  %v8026_v59 = vld [vmem:[%s13231_s2 + $0xc] sm:$0x7]  ;;  %v147_v60 = vld [vmem:[%s13229_s0 + $0x71] sm:$0xff] }
  0x19   :  { %7944 = vmatpush.msk.msrb.mxu2 %vm460_vm0, %v7943_v57  ;;  %8027 = vmatpush.msk.msrb.mxu3 %vm460_vm0, %v8026_v59  ;;  %v194_v61 = vld [vmem:[%s13229_s0 + $0x1e9] sm:$0xff]  ;;  %v51_v62 = vld [vmem:[%s13229_s0] sm:$0xff]  ;;  %v211_v63 = vld [vmem:[%s13229_s0 + $0x271] sm:$0xff] }
  0x1a   :  { %v148_v0 = vld [vmem:[%s13229_s0 + $0x79] sm:$0xff]  ;;  %v195_v1 = vld [vmem:[%s13229_s0 + $0x1f1] sm:$0xff]  ;;  %v52_v2 = vld [vmem:[%s13229_s0 + $0x8] sm:$0xff] }
  0x1b   :  { %7783 = vmatmul.msk.f32.gmra.mxu0 %vm216_vm1, %v136_v13  ;;  %v212_v3 = vld [vmem:[%s13229_s0 + $0x279] sm:$0xff]  ;;  %v149_v5 = vld [vmem:[%s13229_s0 + $0x81] sm:$0xff]  ;;  %v53_v8 = vld [vmem:[%s13229_s0 + $0x10] sm:$0xff] }
  0x1c   :  { %7816 = vmatmul.msk.f32.gmra.mxu1 %vm216_vm1, %v169_v14  ;;  %7830 = vmatmul.msk.f32.gmra.mxu2 %vm216_vm1, %v183_v15  ;;  %v196_v7 = vld [vmem:[%s13229_s0 + $0x1f9] sm:$0xff]  ;;  %v213_v9 = vld [vmem:[%s13229_s0 + $0x281] sm:$0xff]  ;;  %v150_v12 = vld [vmem:[%s13229_s0 + $0x89] sm:$0xff] }
  0x1d   :  { %v54_v15 = vld [vmem:[%s13229_s0 + $0x18] sm:$0xff]  ;;  %v60_v59 = vld [vmem:[%s13229_s0 + $0x48] sm:$0xff] }
  0x1e   :  { %7847 = vmatmul.msk.f32.gmra.mxu3 %vm216_vm1, %v200_v16  ;;  %v1230_v16 = vld [vmem:[%s13229_s0 + $0x2] sm:$0xff] }
  0x23   :  { %7784 = vmatmul.msk.f32.gmra.mxu0 %vm216_vm1, %v137_v17  ;;  %v1900_v17 = vld [vmem:[%s13229_s0 + $0x12] sm:$0xff] }
  0x24   :  { %7817 = vmatmul.msk.f32.gmra.mxu1 %vm216_vm1, %v170_v18  ;;  %7831 = vmatmul.msk.f32.gmra.mxu2 %vm216_vm1, %v184_v19 }
  0x26   :  { %7848 = vmatmul.msk.f32.gmra.mxu3 %vm216_vm1, %v201_v20  ;;  %v151_v20 = vld [vmem:[%s13229_s0 + $0x91] sm:$0xff] }
  0x2b   :  { %7785 = vmatmul.msk.f32.gmra.mxu0 %vm216_vm1, %v138_v21 }
  0x2c   :  { %7818 = vmatmul.msk.f32.gmra.mxu1 %vm216_vm1, %v171_v22  ;;  %7832 = vmatmul.msk.f32.gmra.mxu2 %vm216_vm1, %v185_v23  ;;  %v55_v23 = vld [vmem:[%s13229_s0 + $0x20] sm:$0xff] }
  0x2e   :  { %7849 = vmatmul.msk.f32.gmra.mxu3 %vm216_vm1, %v202_v24  ;;  %v1231_v24 = vld [vmem:[%s13229_s0 + $0xa] sm:$0xff] }
  0x33   :  { %7786 = vmatmul.msk.f32.gmra.mxu0 %vm216_vm1, %v139_v25  ;;  %v1901_v25 = vld [vmem:[%s13229_s0 + $0x1a] sm:$0xff] }
  0x34   :  { %7819 = vmatmul.msk.f32.gmra.mxu1 %vm216_vm1, %v172_v26  ;;  %7833 = vmatmul.msk.f32.gmra.mxu2 %vm216_vm1, %v186_v27 }
  0x36   :  { %7850 = vmatmul.msk.f32.gmra.mxu3 %vm216_vm1, %v203_v28  ;;  %v152_v28 = vld [vmem:[%s13229_s0 + $0x99] sm:$0xff] }
  0x3b   :  { %7787 = vmatmul.msk.f32.gmra.mxu0 %vm216_vm1, %v140_v29 }
  0x3c   :  { %7820 = vmatmul.msk.f32.gmra.mxu1 %vm216_vm1, %v173_v30  ;;  %7834 = vmatmul.msk.f32.gmra.mxu2 %vm216_vm1, %v187_v31  ;;  %v56_v31 = vld [vmem:[%s13229_s0 + $0x28] sm:$0xff] }
  0x3e   :  { %7851 = vmatmul.msk.f32.gmra.mxu3 %vm216_vm1, %v204_v32  ;;  %v1902_v32 = vld [vmem:[%s13229_s0 + $0x22] sm:$0xff] }
  0x43   :  { %7788 = vmatmul.msk.f32.gmra.mxu0 %vm216_vm1, %v141_v33 }
  0x44   :  { %7821 = vmatmul.msk.f32.gmra.mxu1 %vm216_vm1, %v174_v34  ;;  %7835 = vmatmul.msk.f32.gmra.mxu2 %vm216_vm1, %v188_v35  ;;  %v153_v35 = vld [vmem:[%s13229_s0 + $0xa1] sm:$0xff] }
  0x46   :  { %7852 = vmatmul.msk.f32.gmra.mxu3 %vm216_vm1, %v205_v36 }
  0x4b   :  { %7789 = vmatmul.msk.f32.gmra.mxu0 %vm216_vm1, %v142_v37 }
  0x4c   :  { %7822 = vmatmul.msk.f32.gmra.mxu1 %vm216_vm1, %v175_v38  ;;  %7836 = vmatmul.msk.f32.gmra.mxu2 %vm216_vm1, %v189_v39  ;;  %v57_v38 = vld [vmem:[%s13229_s0 + $0x30] sm:$0xff] }
  0x4d   :  { %v1903_v39 = vld [vmem:[%s13229_s0 + $0x2a] sm:$0xff] }
  0x4e   :  { %7853 = vmatmul.msk.f32.gmra.mxu3 %vm216_vm1, %v206_v40 }
  0x53   :  { %7790 = vmatmul.msk.f32.gmra.mxu0 %vm216_vm1, %v143_v42  ;;  %v154_v42 = vld [vmem:[%s13229_s0 + $0xa9] sm:$0xff] }
  0x54   :  { %7823 = vmatmul.msk.f32.gmra.mxu1 %vm216_vm1, %v176_v43  ;;  %7837 = vmatmul.msk.f32.gmra.mxu2 %vm216_vm1, %v190_v44 }
  0x56   :  { %7854 = vmatmul.msk.f32.gmra.mxu3 %vm216_vm1, %v207_v45  ;;  %v58_v45 = vld [vmem:[%s13229_s0 + $0x38] sm:$0xff] }
  0x5b   :  { %7791 = vmatmul.msk.f32.gmra.mxu0 %vm216_vm1, %v144_v46  ;;  %v1904_v46 = vld [vmem:[%s13229_s0 + $0x32] sm:$0xff] }
  0x5c   :  { %7824 = vmatmul.msk.f32.gmra.mxu1 %vm216_vm1, %v177_v47  ;;  %7838 = vmatmul.msk.f32.gmra.mxu2 %vm216_vm1, %v191_v48 }
  0x5e   :  { %7855 = vmatmul.msk.f32.gmra.mxu3 %vm216_vm1, %v208_v49  ;;  %v155_v49 = vld [vmem:[%s13229_s0 + $0xb1] sm:$0xff] }
  0x63   :  { %7792 = vmatmul.msk.f32.gmra.mxu0 %vm216_vm1, %v145_v50 }
  0x64   :  { %7825 = vmatmul.msk.f32.gmra.mxu1 %vm216_vm1, %v178_v51  ;;  %7839 = vmatmul.msk.f32.gmra.mxu2 %vm216_vm1, %v192_v52  ;;  %v59_v52 = vld [vmem:[%s13229_s0 + $0x40] sm:$0xff] }
  0x66   :  { %7856 = vmatmul.msk.f32.gmra.mxu3 %vm216_vm1, %v209_v53  ;;  %v1905_v53 = vld [vmem:[%s13229_s0 + $0x3a] sm:$0xff] }
  0x6b   :  { %7793 = vmatmul.msk.f32.gmra.mxu0 %vm216_vm1, %v146_v54 }
  0x6c   :  { %7826 = vmatmul.msk.f32.gmra.mxu1 %vm216_vm1, %v179_v55  ;;  %7840 = vmatmul.msk.f32.gmra.mxu2 %vm216_vm1, %v193_v56  ;;  %v156_v56 = vld [vmem:[%s13229_s0 + $0xb9] sm:$0xff] }
  0x6e   :  { %7857 = vmatmul.msk.f32.gmra.mxu3 %vm216_vm1, %v210_v58 }
  0x73   :  { %7794 = vmatmul.msk.f32.gmra.mxu0 %vm216_vm1, %v147_v60  ;;  %v1906_v60 = vld [vmem:[%s13229_s0 + $0x42] sm:$0xff] }
  0x74   :  { %7841 = vmatmul.msk.f32.gmra.mxu2 %vm216_vm1, %v194_v61  ;;  %7862 = vmatmul.msk.f32.vlgmr.msrb.gmra.mxu1 %vm216_vm1, %v51_v62 }
  0x76   :  { %7858 = vmatmul.msk.f32.gmra.mxu3 %vm216_vm1, %v211_v63  ;;  %v157_v63 = vld [vmem:[%s13229_s0 + $0xc1] sm:$0xff] }
  0x7b   :  { %7795 = vmatmul.msk.f32.gmra.mxu0 %vm216_vm1, %v148_v0 }
  0x7c   :  { %7842 = vmatmul.msk.f32.gmra.mxu2 %vm216_vm1, %v195_v1  ;;  %7863 = vmatmul.msk.f32.gmra.mxu1 %vm216_vm1, %v52_v2  ;;  %v61_v2 = vld [vmem:[%s13229_s0 + $0x50] sm:$0xff] }
  0x7e   :  { %7859 = vmatmul.msk.f32.gmra.mxu3 %vm216_vm1, %v212_v3  ;;  %v1907_v3 = vld [vmem:[%s13229_s0 + $0x4a] sm:$0xff] }
  0x80   :  { %v9124_v4 = vpop.f32.mrf.mxu0 }
  0x81   :  { %v9129_v6 = vpop.f32.mrf.mxu1 }
  0x83   :  { %7796 = vmatmul.msk.f32.gmra.mxu0 %vm216_vm1, %v149_v5 }
  0x84   :  { %7843 = vmatmul.msk.f32.gmra.mxu2 %vm216_vm1, %v196_v7  ;;  %7864 = vmatmul.msk.f32.gmra.mxu1 %vm216_vm1, %v53_v8  ;;  %v158_v8 = vld [vmem:[%s13229_s0 + $0xc9] sm:$0xff] }
  0x86   :  { %7860 = vmatmul.msk.f32.gmra.mxu3 %vm216_vm1, %v213_v9 }
  0x87   :  { %v9144_v10 = vpop.f32.mrf.mxu2 }
  0x88   :  { %v9146_v11 = vpop.f32.mrf.mxu0 }
  0x89   :  { %v9151_v13 = vpop.f32.mrf.mxu1  ;;  %v9153_v14 = vpop.f32.mrf.mxu3 }
  0x8a   :  { %13245 = vst [vmem:[#allocation5_spill] sm:$0xff] %v9153_v14 }
  0x8b   :  { %7797 = vmatmul.msk.f32.gmra.mxu0 %vm216_vm1, %v150_v12 }
  0x8c   :  { %7865 = vmatmul.msk.f32.gmra.mxu1 %vm216_vm1, %v54_v15  ;;  %7945 = vmatmul.msk.f32.vlgmr.msrb.gmra.mxu2 %vm216_vm1, %v1230_v16  ;;  %v62_v15 = vld [vmem:[%s13229_s0 + $0x58] sm:$0xff] }
  0x8d   :  { %v1908_v16 = vld [vmem:[%s13229_s0 + $0x52] sm:$0xff] }
  0x8e   :  { %8028 = vmatmul.msk.f32.vlgmr.msrb.gmra.mxu3 %vm216_vm1, %v1900_v17 }
  0x8f   :  { %v9168_v18 = vpop.f32.mrf.mxu2 }
  0x90   :  { %v9170_v19 = vpop.f32.mrf.mxu0 }
  0x91   :  { %v9175_v21 = vpop.f32.mrf.mxu1  ;;  %v9177_v22 = vpop.f32.mrf.mxu3 }
  0x92   :  { %13246 = vst [vmem:[#allocation6_spill] sm:$0xff] %v9177_v22 }
  0x93   :  { %7798 = vmatmul.msk.f32.gmra.mxu0 %vm216_vm1, %v151_v20 }
  0x94   :  { %7866 = vmatmul.msk.f32.gmra.mxu1 %vm216_vm1, %v55_v23  ;;  %7946 = vmatmul.msk.f32.gmra.mxu2 %vm216_vm1, %v1231_v24  ;;  %v159_v23 = vld [vmem:[%s13229_s0 + $0xd1] sm:$0xff] }
  0x96   :  { %8029 = vmatmul.msk.f32.gmra.mxu3 %vm216_vm1, %v1901_v25 }
  0x97   :  { %v9192_v26 = vpop.f32.mrf.mxu2 }
  0x98   :  { %v9194_v27 = vpop.f32.mrf.mxu0 }
  0x99   :  { %v9199_v29 = vpop.f32.mrf.mxu1  ;;  %v9201_v30 = vpop.f32.mrf.mxu3 }
  0x9a   :  { %13247 = vst [vmem:[#allocation7_spill] sm:$0xff] %v9201_v30 }
  0x9b   :  { %7799 = vmatmul.msk.f32.gmra.mxu0 %vm216_vm1, %v152_v28  ;;  %v63_v28 = vld [vmem:[%s13229_s0 + $0x60] sm:$0xff] }
  0x9c   :  { %7867 = vmatmul.msk.f32.gmra.mxu1 %vm216_vm1, %v56_v31  ;;  %7947 = vmatmul.msk.f32.gmra.mxu2 %vm216_vm1, %v1900_v17  ;;  %v1909_v31 = vld [vmem:[%s13229_s0 + $0x5a] sm:$0xff] }
  0x9e   :  { %8030 = vmatmul.msk.f32.gmra.mxu3 %vm216_vm1, %v1902_v32 }
  0x9f   :  { %v9213_v33 = vpop.f32.mrf.mxu2 }
  0xa0   :  { %v9215_v34 = vpop.f32.mrf.mxu0 }
  0xa1   :  { %v9220_v36 = vpop.f32.mrf.mxu1  ;;  %v9222_v37 = vpop.f32.mrf.mxu3 }
  0xa2   :  { %13248 = vst [vmem:[#allocation8_spill] sm:$0xff] %v9222_v37 }
  0xa3   :  { %7800 = vmatmul.msk.f32.gmra.mxu0 %vm216_vm1, %v153_v35 }
  0xa4   :  { %7868 = vmatmul.msk.f32.gmra.mxu1 %vm216_vm1, %v57_v38  ;;  %7948 = vmatmul.msk.f32.gmra.mxu2 %vm216_vm1, %v1901_v25  ;;  %v160_v38 = vld [vmem:[%s13229_s0 + $0xd9] sm:$0xff] }
  0xa6   :  { %8031 = vmatmul.msk.f32.gmra.mxu3 %vm216_vm1, %v1903_v39 }
  0xa7   :  { %v9234_v40 = vpop.f32.mrf.mxu2 }
  0xa8   :  { %v9236_v41 = vpop.f32.mrf.mxu0 }
  0xa9   :  { %v9241_v43 = vpop.f32.mrf.mxu1  ;;  %v9243_v44 = vpop.f32.mrf.mxu3 }
  0xaa   :  { %13249 = vst [vmem:[#allocation9_spill] sm:$0xff] %v9243_v44  ;;  %v70_v44 = vld [vmem:[%s13229_s0 + $0x98] sm:$0xff] }
  0xab   :  { %7801 = vmatmul.msk.f32.gmra.mxu0 %vm216_vm1, %v154_v42 }
  0xac   :  { %7869 = vmatmul.msk.f32.gmra.mxu1 %vm216_vm1, %v58_v45  ;;  %7949 = vmatmul.msk.f32.gmra.mxu2 %vm216_vm1, %v1902_v32  ;;  %v64_v45 = vld [vmem:[%s13229_s0 + $0x68] sm:$0xff] }
  0xae   :  { %8032 = vmatmul.msk.f32.gmra.mxu3 %vm216_vm1, %v1904_v46 }
  0xaf   :  { %v9255_v47 = vpop.f32.mrf.mxu2 }
  0xb0   :  { %v9257_v48 = vpop.f32.mrf.mxu0 }
  0xb1   :  { %v9262_v50 = vpop.f32.mrf.mxu1  ;;  %v9264_v51 = vpop.f32.mrf.mxu3 }
  0xb2   :  { %13250 = vst [vmem:[#allocation10_spill] sm:$0xff] %v9264_v51 }
  0xb3   :  { %7802 = vmatmul.msk.f32.gmra.mxu0 %vm216_vm1, %v155_v49 }
  0xb4   :  { %7870 = vmatmul.msk.f32.gmra.mxu1 %vm216_vm1, %v59_v52  ;;  %7950 = vmatmul.msk.f32.gmra.mxu2 %vm216_vm1, %v1903_v39 }
  0xb6   :  { %8033 = vmatmul.msk.f32.gmra.mxu3 %vm216_vm1, %v1905_v53 }
  0xb7   :  { %v9276_v54 = vpop.f32.mrf.mxu2 }
  0xb8   :  { %v9278_v55 = vpop.f32.mrf.mxu0 }
  0xb9   :  { %v9283_v57 = vpop.f32.mrf.mxu1  ;;  %v9285_v58 = vpop.f32.mrf.mxu3 }
  0xba   :  { %13251 = vst [vmem:[#allocation11_spill] sm:$0xff] %v9285_v58  ;;  %v2570_v58 = vld [vmem:[%s13229_s0 + $0x13] sm:$0xff] }
  0xbb   :  { %7803 = vmatmul.msk.f32.gmra.mxu0 %vm216_vm1, %v156_v56 }
  0xbc   :  { %7871 = vmatmul.msk.f32.gmra.mxu1 %vm216_vm1, %v60_v59  ;;  %7951 = vmatmul.msk.f32.gmra.mxu2 %vm216_vm1, %v1904_v46  ;;  %v1910_v46 = vld [vmem:[%s13229_s0 + $0x62] sm:$0xff] }
  0xbe   :  { %8034 = vmatmul.msk.f32.gmra.mxu3 %vm216_vm1, %v1906_v60 }
  0xbf   :  { %v9297_v61 = vpop.f32.mrf.mxu2 }
  0xc0   :  { %v9299_v62 = vpop.f32.mrf.mxu0 }
  0xc1   :  { %v9304_v0 = vpop.f32.mrf.mxu1  ;;  %v9306_v1 = vpop.f32.mrf.mxu3 }
  0xc2   :  { %13252 = vst [vmem:[#allocation12_spill] sm:$0xff] %v9306_v1  ;;  %v69_v1 = vld [vmem:[%s13229_s0 + $0x90] sm:$0xff] }
  0xc3   :  { %7804 = vmatmul.msk.f32.gmra.mxu0 %vm216_vm1, %v157_v63  ;;  %v1911_v63 = vld [vmem:[%s13229_s0 + $0x6a] sm:$0xff] }
  0xc4   :  { %7872 = vmatmul.msk.f32.gmra.mxu1 %vm216_vm1, %v61_v2  ;;  %7952 = vmatmul.msk.f32.gmra.mxu2 %vm216_vm1, %v1905_v53  ;;  %v161_v53 = vld [vmem:[%s13229_s0 + $0xe1] sm:$0xff] }
  0xc6   :  { %8035 = vmatmul.msk.f32.gmra.mxu3 %vm216_vm1, %v1907_v3 }
  0xc7   :  { %v9318_v5 = vpop.f32.mrf.mxu2 }
  0xc8   :  { %v9320_v7 = vpop.f32.mrf.mxu0 }
  0xc9   :  { %v9325_v9 = vpop.f32.mrf.mxu1  ;;  %v9327_v12 = vpop.f32.mrf.mxu3 }
  0xca   :  { %13253 = vst [vmem:[#allocation13_spill] sm:$0xff] %v9327_v12 }
  0xcb   :  { %7805 = vmatmul.msk.f32.gmra.mxu0 %vm216_vm1, %v158_v8  ;;  %v162_v8 = vld [vmem:[%s13229_s0 + $0xe9] sm:$0xff] }
  0xcc   :  { %7873 = vmatmul.msk.f32.gmra.mxu1 %vm216_vm1, %v62_v15  ;;  %7953 = vmatmul.msk.f32.gmra.mxu2 %vm216_vm1, %v1906_v60  ;;  %v65_v60 = vld [vmem:[%s13229_s0 + $0x70] sm:$0xff] }
  0xce   :  { %8036 = vmatmul.msk.f32.gmra.mxu3 %vm216_vm1, %v1908_v16 }
  0xcf   :  { %v9339_v17 = vpop.f32.mrf.mxu2 }
  0xd0   :  { %v9341_v20 = vpop.f32.mrf.mxu0 }
  0xd1   :  { %v9346_v24 = vpop.f32.mrf.mxu1  ;;  %v9348_v25 = vpop.f32.mrf.mxu3 }
  0xd2   :  { %13254 = vst [vmem:[#allocation14_spill] sm:$0xff] %v9348_v25  ;;  %v165_v25 = vld [vmem:[%s13229_s0 + $0x101] sm:$0xff] }
  0xd3   :  { %7806 = vmatmul.msk.f32.gmra.mxu0 %vm216_vm1, %v159_v23  ;;  %v66_v23 = vld [vmem:[%s13229_s0 + $0x78] sm:$0xff] }
  0xd4   :  { %7874 = vmatmul.msk.f32.gmra.mxu1 %vm216_vm1, %v63_v28  ;;  %7954 = vmatmul.msk.f32.gmra.mxu2 %vm216_vm1, %v1907_v3  ;;  %v8109_v28 = vld [vmem:[%s13231_s2 + $0x10] sm:$0x7] }
  0xd5   :  { %8110 = vmatpush.msk.msrb.mxu0 %vm460_vm0, %v8109_v28 }
  0xd6   :  { %8037 = vmatmul.msk.f32.gmra.mxu3 %vm216_vm1, %v1909_v31 }
  0xd7   :  { %v9360_v32 = vpop.f32.mrf.mxu2 }
  0xd8   :  { %v9362_v35 = vpop.f32.mrf.mxu0 }
  0xd9   :  { %v9367_v39 = vpop.f32.mrf.mxu1  ;;  %v9369_v42 = vpop.f32.mrf.mxu3 }
  0xda   :  { %13255 = vst [vmem:[#allocation15_spill] sm:$0xff] %v9369_v42  ;;  %v68_v42 = vld [vmem:[%s13229_s0 + $0x88] sm:$0xff] }
  0xdb   :  { %7807 = vmatmul.msk.f32.gmra.mxu0 %vm216_vm1, %v160_v38 }
  0xdc   :  { %7875 = vmatmul.msk.f32.gmra.mxu1 %vm216_vm1, %v64_v45  ;;  %7955 = vmatmul.msk.f32.gmra.mxu2 %vm216_vm1, %v1908_v16 }
  0xde   :  { %8038 = vmatmul.msk.f32.gmra.mxu3 %vm216_vm1, %v1910_v46 }
  0xdf   :  { %v9381_v49 = vpop.f32.mrf.mxu2 }
  0xe0   :  { %v9383_v52 = vpop.f32.mrf.mxu0 }
  0xe1   :  { %v9388_v56 = vpop.f32.mrf.mxu1  ;;  %v9390_v59 = vpop.f32.mrf.mxu3 }
  0xe2   :  { %13256 = vst [vmem:[#allocation16_spill] sm:$0xff] %v9390_v59 }
  0xe3   :  { %7808 = vmatmul.msk.f32.gmra.mxu0 %vm216_vm1, %v161_v53  ;;  %v163_v53 = vld [vmem:[%s13229_s0 + $0xf1] sm:$0xff] }
  0xe4   :  { %7876 = vmatmul.msk.f32.gmra.mxu1 %vm216_vm1, %v65_v60  ;;  %7956 = vmatmul.msk.f32.gmra.mxu2 %vm216_vm1, %v1909_v31  ;;  %v1912_v31 = vld [vmem:[%s13229_s0 + $0x72] sm:$0xff] }
  0xe6   :  { %8039 = vmatmul.msk.f32.gmra.mxu3 %vm216_vm1, %v1911_v63 }
  0xe7   :  { %v9402_v2 = vpop.f32.mrf.mxu2 }
  0xe8   :  { %v9404_v3 = vpop.f32.mrf.mxu0 }
  0xe9   :  { %v9409_v15 = vpop.f32.mrf.mxu1  ;;  %v9411_v16 = vpop.f32.mrf.mxu3 }
  0xea   :  { %13257 = vst [vmem:[#allocation17_spill] sm:$0xff] %v9411_v16  ;;  %v164_v16 = vld [vmem:[%s13229_s0 + $0xf9] sm:$0xff] }
  0xeb   :  { %7809 = vmatmul.msk.f32.gmra.mxu0 %vm216_vm1, %v162_v8 }
  0xec   :  { %7877 = vmatmul.msk.f32.gmra.mxu1 %vm216_vm1, %v66_v23  ;;  %7957 = vmatmul.msk.f32.gmra.mxu2 %vm216_vm1, %v1910_v46  ;;  %v67_v23 = vld [vmem:[%s13229_s0 + $0x80] sm:$0xff] }
  0xed   :  { %v1913_v46 = vld [vmem:[%s13229_s0 + $0x7a] sm:$0xff] }
  0xee   :  { %8040 = vmatmul.msk.f32.gmra.mxu3 %vm216_vm1, %v1912_v31 }
  0xef   :  { %v9427_v38 = vpop.f32.mrf.mxu2 }
  0xf0   :  { %v9429_v45 = vpop.f32.mrf.mxu0 }
  0xf1   :  { %v9434_v60 = vpop.f32.mrf.mxu3  ;;  %v987_v8 = vpop.f32.mrf.mxu1 }
  0xf2   :  { %13258 = vst [vmem:[#allocation18_spill] sm:$0xff] %v9434_v60 }
  0xf3   :  { %7810 = vmatmul.msk.f32.gmra.mxu0 %vm216_vm1, %v163_v53 }
  0xf4   :  { %7878 = vmatmul.msk.f32.gmra.mxu1 %vm216_vm1, %v67_v23  ;;  %7958 = vmatmul.msk.f32.gmra.mxu2 %vm216_vm1, %v1911_v63  ;;  %v1914_v63 = vld [vmem:[%s13229_s0 + $0x82] sm:$0xff] }
  0xf6   :  { %8041 = vmatmul.msk.f32.gmra.mxu3 %vm216_vm1, %v1913_v46 }
  0xf7   :  { %v9446_v28 = vpop.f32.mrf.mxu2 }
  0xf8   :  { %v9448_v60 = vpop.f32.mrf.mxu0 }
  0xf9   :  { %v9453_v59 = vpop.f32.mrf.mxu3  ;;  %v990_v53 = vpop.f32.mrf.mxu1 }
  0xfa   :  { %13259 = vst [vmem:[#allocation19_spill] sm:$0xff] %v9453_v59 }
  0xfb   :  { %7811 = vmatmul.msk.f32.gmra.mxu0 %vm216_vm1, %v164_v16 }
  0xfc   :  { %7879 = vmatmul.msk.f32.gmra.mxu1 %vm216_vm1, %v68_v42  ;;  %7959 = vmatmul.msk.f32.gmra.mxu2 %vm216_vm1, %v1912_v31  ;;  %v1915_v42 = vld [vmem:[%s13229_s0 + $0x8a] sm:$0xff] }
  0xfe   :  { %8042 = vmatmul.msk.f32.gmra.mxu3 %vm216_vm1, %v1914_v63 }
  0xff   :  { %v9465_v23 = vpop.f32.mrf.mxu2 }
 0x100   :  { %v9467_v59 = vpop.f32.mrf.mxu0 }
 0x101   :  { %v9472_v12 = vpop.f32.mrf.mxu3  ;;  %v993_v16 = vpop.f32.mrf.mxu1 }
 0x102   :  { %13260 = vst [vmem:[#allocation20_spill] sm:$0xff] %v9472_v12 }
 0x103   :  { %7812 = vmatmul.msk.f32.gmra.mxu0 %vm216_vm1, %v165_v25 }
 0x104   :  { %7880 = vmatmul.msk.f32.gmra.mxu1 %vm216_vm1, %v69_v1  ;;  %7960 = vmatmul.msk.f32.gmra.mxu2 %vm216_vm1, %v1913_v46  ;;  %v1916_v1 = vld [vmem:[%s13229_s0 + $0x92] sm:$0xff]  ;;  %v988_v46 = vadd.f32 %v987_v8, %v9124_v4  ;;  %v1917_v4 = vld [vmem:[%s13229_s0 + $0x9a] sm:$0xff] }
 0x106   :  { %8043 = vmatmul.msk.f32.gmra.mxu3 %vm216_vm1, %v1915_v42 }
 0x107   :  { %v9484_v31 = vpop.f32.mrf.mxu2 }
 0x108   :  { %13261 = vst [vmem:[#allocation21_spill] sm:$0xff] %v9484_v31  ;;  %v9486_v12 = vpop.f32.mrf.mxu0 }
 0x109   :  { %v9491_v51 = vpop.f32.mrf.mxu3  ;;  %v996_v25 = vpop.f32.mrf.mxu1 }
 0x10a   :  { %13262 = vst [vmem:[#allocation22_spill] sm:$0xff] %v9491_v51 }
 0x10b   :  { %8111 = vmatmul.msk.f32.vlgmr.msrb.gmra.mxu0 %vm216_vm1, %v2570_v58  ;;  %v2571_v58 = vld [vmem:[%s13229_s0 + $0x1b] sm:$0xff] }
 0x10c   :  { %7881 = vmatmul.msk.f32.gmra.mxu1 %vm216_vm1, %v70_v44  ;;  %7961 = vmatmul.msk.f32.gmra.mxu2 %vm216_vm1, %v1914_v63  ;;  %v71_v44 = vld [vmem:[%s13229_s0 + $0xa0] sm:$0xff] }
 0x10e   :  { %8044 = vmatmul.msk.f32.gmra.mxu3 %vm216_vm1, %v1916_v1 }
 0x10f   :  { %v1576_v51 = vpop.f32.mrf.mxu2 }
 0x110   :  { %v1819_v37 = vadd.f32 %v1576_v51, %v988_v46  ;;  %v9504_v30 = vpop.f32.mrf.mxu0  ;;  %v991_v51 = vadd.f32 %v990_v53, %v9146_v11  ;;  %v1918_v11 = vld [vmem:[%s13229_s0 + $0xa2] sm:$0xff]  ;;  %v994_v53 = vadd.f32 %v993_v16, %v9170_v19  ;;  %v1919_v19 = vld [vmem:[%s13229_s0 + $0xaa] sm:$0xff]  ;;  %v997_v16 = vadd.f32 %v996_v25, %v9194_v27  ;;  %v1920_v27 = vld [vmem:[%s13229_s0 + $0xb2] sm:$0xff] }
 0x111   :  { %v999_v22 = vpop.f32.mrf.mxu1  ;;  %v2246_v14 = vpop.f32.mrf.mxu3 }
 0x112   :  { %v9512_v31 = vadd.f32 %v2246_v14, %v1819_v37  ;;  %v2572_v14 = vld [vmem:[%s13229_s0 + $0x23] sm:$0xff]  ;;  %v1000_v25 = vadd.f32 %v999_v22, %v9215_v34  ;;  %v1921_v22 = vld [vmem:[%s13229_s0 + $0xba] sm:$0xff] }
 0x113   :  { %8112 = vmatmul.msk.f32.gmra.mxu0 %vm216_vm1, %v2571_v58 }
 0x114   :  { %13263 = vst [vmem:[#allocation23_spill] sm:$0xff] %v9512_v31  ;;  %7882 = vmatmul.msk.f32.gmra.mxu1 %vm216_vm1, %v71_v44  ;;  %7962 = vmatmul.msk.f32.gmra.mxu2 %vm216_vm1, %v1915_v42  ;;  %v72_v44 = vld [vmem:[%s13229_s0 + $0xa8] sm:$0xff] }
 0x116   :  { %8045 = vmatmul.msk.f32.gmra.mxu3 %vm216_vm1, %v1917_v4 }
 0x117   :  { %v1579_v8 = vpop.f32.mrf.mxu2 }
 0x118   :  { %v1820_v63 = vadd.f32 %v1579_v8, %v991_v51  ;;  %v9522_v46 = vpop.f32.mrf.mxu0 }
 0x119   :  { %v1002_v37 = vpop.f32.mrf.mxu1  ;;  %v2249_v58 = vpop.f32.mrf.mxu3 }
 0x11a   :  { %v9530_v31 = vadd.f32 %v2249_v58, %v1820_v63  ;;  %v2573_v63 = vld [vmem:[%s13229_s0 + $0x2b] sm:$0xff]  ;;  %v1003_v34 = vadd.f32 %v1002_v37, %v9236_v41  ;;  %v1922_v41 = vld [vmem:[%s13229_s0 + $0xc2] sm:$0xff] }
 0x11b   :  { %8113 = vmatmul.msk.f32.gmra.mxu0 %vm216_vm1, %v2572_v14 }
 0x11c   :  { %13264 = vst [vmem:[#allocation24_spill] sm:$0xff] %v9530_v31  ;;  %7883 = vmatmul.msk.f32.gmra.mxu1 %vm216_vm1, %v72_v44  ;;  %7963 = vmatmul.msk.f32.gmra.mxu2 %vm216_vm1, %v1916_v1  ;;  %v73_v44 = vld [vmem:[%s13229_s0 + $0xb0] sm:$0xff] }
 0x11e   :  { %8046 = vmatmul.msk.f32.gmra.mxu3 %vm216_vm1, %v1918_v11 }
 0x11f   :  { %v1582_v42 = vpop.f32.mrf.mxu2 }
 0x120   :  { %v1821_v51 = vadd.f32 %v1582_v42, %v994_v53  ;;  %v9540_v8 = vpop.f32.mrf.mxu0 }
 0x121   :  { %v1005_v14 = vpop.f32.mrf.mxu1  ;;  %v2252_v58 = vpop.f32.mrf.mxu3 }
 0x122   :  { %v9548_v31 = vadd.f32 %v2252_v58, %v1821_v51  ;;  %v2574_v51 = vld [vmem:[%s13229_s0 + $0x33] sm:$0xff]  ;;  %v1006_v37 = vadd.f32 %v1005_v14, %v9257_v48  ;;  %v1923_v48 = vld [vmem:[%s13229_s0 + $0xca] sm:$0xff] }
 0x123   :  { %8114 = vmatmul.msk.f32.gmra.mxu0 %vm216_vm1, %v2573_v63 }
 0x124   :  { %13265 = vst [vmem:[#allocation25_spill] sm:$0xff] %v9548_v31  ;;  %7884 = vmatmul.msk.f32.gmra.mxu1 %vm216_vm1, %v73_v44  ;;  %7964 = vmatmul.msk.f32.gmra.mxu2 %vm216_vm1, %v1917_v4  ;;  %v74_v44 = vld [vmem:[%s13229_s0 + $0xb8] sm:$0xff] }
 0x126   :  { %8047 = vmatmul.msk.f32.gmra.mxu3 %vm216_vm1, %v1919_v19 }
 0x127   :  { %v1585_v1 = vpop.f32.mrf.mxu2 }
 0x128   :  { %v1822_v53 = vadd.f32 %v1585_v1, %v997_v16  ;;  %v9558_v42 = vpop.f32.mrf.mxu0 }
 0x129   :  { %v1008_v63 = vpop.f32.mrf.mxu1  ;;  %v2255_v58 = vpop.f32.mrf.mxu3 }
 0x12a   :  { %v9566_v31 = vadd.f32 %v2255_v58, %v1822_v53  ;;  %v2575_v53 = vld [vmem:[%s13229_s0 + $0x3b] sm:$0xff]  ;;  %v1009_v14 = vadd.f32 %v1008_v63, %v9278_v55  ;;  %v1924_v55 = vld [vmem:[%s13229_s0 + $0xd2] sm:$0xff] }
 0x12b   :  { %8115 = vmatmul.msk.f32.gmra.mxu0 %vm216_vm1, %v2574_v51 }
 0x12c   :  { %13266 = vst [vmem:[#allocation26_spill] sm:$0xff] %v9566_v31  ;;  %7885 = vmatmul.msk.f32.gmra.mxu1 %vm216_vm1, %v74_v44  ;;  %7965 = vmatmul.msk.f32.gmra.mxu2 %vm216_vm1, %v1918_v11  ;;  %v75_v44 = vld [vmem:[%s13229_s0 + $0xc0] sm:$0xff] }
 0x12e   :  { %8048 = vmatmul.msk.f32.gmra.mxu3 %vm216_vm1, %v1920_v27 }
 0x12f   :  { %v1588_v4 = vpop.f32.mrf.mxu2 }
 0x130   :  { %v1823_v16 = vadd.f32 %v1588_v4, %v1000_v25  ;;  %v9576_v1 = vpop.f32.mrf.mxu0 }
 0x131   :  { %v1011_v51 = vpop.f32.mrf.mxu1  ;;  %v2258_v58 = vpop.f32.mrf.mxu3 }
 0x132   :  { %v9584_v31 = vadd.f32 %v2258_v58, %v1823_v16  ;;  %v2576_v16 = vld [vmem:[%s13229_s0 + $0x43] sm:$0xff]  ;;  %v1012_v63 = vadd.f32 %v1011_v51, %v9299_v62  ;;  %v1925_v62 = vld [vmem:[%s13229_s0 + $0xda] sm:$0xff] }
 0x133   :  { %8116 = vmatmul.msk.f32.gmra.mxu0 %vm216_vm1, %v2575_v53 }
 0x134   :  { %13267 = vst [vmem:[#allocation27_spill] sm:$0xff] %v9584_v31  ;;  %7886 = vmatmul.msk.f32.gmra.mxu1 %vm216_vm1, %v75_v44  ;;  %7966 = vmatmul.msk.f32.gmra.mxu2 %vm216_vm1, %v1919_v19  ;;  %v76_v44 = vld [vmem:[%s13229_s0 + $0xc8] sm:$0xff] }
 0x136   :  { %8049 = vmatmul.msk.f32.gmra.mxu3 %vm216_vm1, %v1921_v22 }
 0x137   :  { %v1591_v11 = vpop.f32.mrf.mxu2 }
 0x138   :  { %v1824_v25 = vadd.f32 %v1591_v11, %v1003_v34  ;;  %v9594_v4 = vpop.f32.mrf.mxu0 }
 0x139   :  { %v1014_v53 = vpop.f32.mrf.mxu1  ;;  %v2261_v58 = vpop.f32.mrf.mxu3 }
 0x13a   :  { %v9602_v31 = vadd.f32 %v2261_v58, %v1824_v25  ;;  %v2577_v25 = vld [vmem:[%s13229_s0 + $0x4b] sm:$0xff]  ;;  %v1015_v51 = vadd.f32 %v1014_v53, %v9320_v7  ;;  %v1926_v7 = vld [vmem:[%s13229_s0 + $0xe2] sm:$0xff] }
 0x13b   :  { %8117 = vmatmul.msk.f32.gmra.mxu0 %vm216_vm1, %v2576_v16 }
 0x13c   :  { %13268 = vst [vmem:[#allocation28_spill] sm:$0xff] %v9602_v31  ;;  %7887 = vmatmul.msk.f32.gmra.mxu1 %vm216_vm1, %v76_v44  ;;  %7967 = vmatmul.msk.f32.gmra.mxu2 %vm216_vm1, %v1920_v27  ;;  %v77_v44 = vld [vmem:[%s13229_s0 + $0xd0] sm:$0xff] }
 0x13e   :  { %8050 = vmatmul.msk.f32.gmra.mxu3 %vm216_vm1, %v1922_v41 }
 0x13f   :  { %v1594_v19 = vpop.f32.mrf.mxu2 }
 0x140   :  { %v1825_v34 = vadd.f32 %v1594_v19, %v1006_v37  ;;  %v9612_v11 = vpop.f32.mrf.mxu0 }
 0x141   :  { %v1017_v16 = vpop.f32.mrf.mxu1  ;;  %v2264_v58 = vpop.f32.mrf.mxu3 }
 0x142   :  { %v9620_v31 = vadd.f32 %v2264_v58, %v1825_v34  ;;  %v2578_v34 = vld [vmem:[%s13229_s0 + $0x53] sm:$0xff]  ;;  %v1018_v53 = vadd.f32 %v1017_v16, %v9341_v20  ;;  %v1927_v20 = vld [vmem:[%s13229_s0 + $0xea] sm:$0xff] }
 0x143   :  { %8118 = vmatmul.msk.f32.gmra.mxu0 %vm216_vm1, %v2577_v25 }
 0x144   :  { %13269 = vst [vmem:[#allocation29_spill] sm:$0xff] %v9620_v31  ;;  %7888 = vmatmul.msk.f32.gmra.mxu1 %vm216_vm1, %v77_v44  ;;  %7968 = vmatmul.msk.f32.gmra.mxu2 %vm216_vm1, %v1921_v22  ;;  %v78_v44 = vld [vmem:[%s13229_s0 + $0xd8] sm:$0xff] }
 0x146   :  { %8051 = vmatmul.msk.f32.gmra.mxu3 %vm216_vm1, %v1923_v48 }
 0x147   :  { %v1597_v27 = vpop.f32.mrf.mxu2 }
 0x148   :  { %v1826_v37 = vadd.f32 %v1597_v27, %v1009_v14  ;;  %v9630_v19 = vpop.f32.mrf.mxu0 }
 0x149   :  { %v1020_v25 = vpop.f32.mrf.mxu1  ;;  %v2267_v58 = vpop.f32.mrf.mxu3 }
 0x14a   :  { %v9638_v31 = vadd.f32 %v2267_v58, %v1826_v37  ;;  %v2579_v37 = vld [vmem:[%s13229_s0 + $0x5b] sm:$0xff]  ;;  %v1021_v16 = vadd.f32 %v1020_v25, %v9362_v35  ;;  %v1928_v35 = vld [vmem:[%s13229_s0 + $0xf2] sm:$0xff] }
 0x14b   :  { %8119 = vmatmul.msk.f32.gmra.mxu0 %vm216_vm1, %v2578_v34 }
 0x14c   :  { %13270 = vst [vmem:[#allocation30_spill] sm:$0xff] %v9638_v31  ;;  %7889 = vmatmul.msk.f32.gmra.mxu1 %vm216_vm1, %v78_v44  ;;  %7969 = vmatmul.msk.f32.gmra.mxu2 %vm216_vm1, %v1922_v41  ;;  %v79_v44 = vld [vmem:[%s13229_s0 + $0xe0] sm:$0xff] }
 0x14e   :  { %8052 = vmatmul.msk.f32.gmra.mxu3 %vm216_vm1, %v1924_v55 }
 0x14f   :  { %v1600_v22 = vpop.f32.mrf.mxu2 }
 0x150   :  { %v1827_v14 = vadd.f32 %v1600_v22, %v1012_v63  ;;  %v9648_v27 = vpop.f32.mrf.mxu0 }
 0x151   :  { %v1023_v34 = vpop.f32.mrf.mxu1  ;;  %v2270_v58 = vpop.f32.mrf.mxu3 }
 0x152   :  { %v9656_v31 = vadd.f32 %v2270_v58, %v1827_v14  ;;  %v2580_v14 = vld [vmem:[%s13229_s0 + $0x63] sm:$0xff]  ;;  %v1024_v25 = vadd.f32 %v1023_v34, %v9383_v52  ;;  %v1929_v52 = vld [vmem:[%s13229_s0 + $0xfa] sm:$0xff] }
 0x153   :  { %8120 = vmatmul.msk.f32.gmra.mxu0 %vm216_vm1, %v2579_v37 }
 0x154   :  { %13271 = vst [vmem:[#allocation31_spill] sm:$0xff] %v9656_v31  ;;  %7890 = vmatmul.msk.f32.gmra.mxu1 %vm216_vm1, %v79_v44  ;;  %7970 = vmatmul.msk.f32.gmra.mxu2 %vm216_vm1, %v1923_v48  ;;  %v80_v44 = vld [vmem:[%s13229_s0 + $0xe8] sm:$0xff] }
 0x156   :  { %8053 = vmatmul.msk.f32.gmra.mxu3 %vm216_vm1, %v1925_v62 }
 0x157   :  { %v1603_v41 = vpop.f32.mrf.mxu2 }
 0x158   :  { %v1828_v63 = vadd.f32 %v1603_v41, %v1015_v51  ;;  %v9666_v22 = vpop.f32.mrf.mxu0 }
 0x159   :  { %v1026_v37 = vpop.f32.mrf.mxu1  ;;  %v2273_v58 = vpop.f32.mrf.mxu3 }
 0x15a   :  { %v9674_v31 = vadd.f32 %v2273_v58, %v1828_v63  ;;  %v2581_v63 = vld [vmem:[%s13229_s0 + $0x6b] sm:$0xff]  ;;  %v1027_v34 = vadd.f32 %v1026_v37, %v9404_v3  ;;  %v1930_v3 = vld [vmem:[%s13229_s0 + $0x102] sm:$0xff] }
 0x15b   :  { %8121 = vmatmul.msk.f32.gmra.mxu0 %vm216_vm1, %v2580_v14 }
 0x15c   :  { %13272 = vst [vmem:[#allocation32_spill] sm:$0xff] %v9674_v31  ;;  %7891 = vmatmul.msk.f32.gmra.mxu1 %vm216_vm1, %v80_v44  ;;  %7971 = vmatmul.msk.f32.gmra.mxu2 %vm216_vm1, %v1924_v55  ;;  %v81_v44 = vld [vmem:[%s13229_s0 + $0xf0] sm:$0xff] }
 0x15e   :  { %8054 = vmatmul.msk.f32.gmra.mxu3 %vm216_vm1, %v1926_v7 }
 0x15f   :  { %v1606_v48 = vpop.f32.mrf.mxu2 }
 0x160   :  { %v1829_v51 = vadd.f32 %v1606_v48, %v1018_v53  ;;  %v9684_v41 = vpop.f32.mrf.mxu0 }
 0x161   :  { %v1029_v14 = vpop.f32.mrf.mxu1  ;;  %v2276_v58 = vpop.f32.mrf.mxu3 }
 0x162   :  { %v9692_v31 = vadd.f32 %v2276_v58, %v1829_v51  ;;  %v2582_v51 = vld [vmem:[%s13229_s0 + $0x73] sm:$0xff]  ;;  %v1030_v37 = vadd.f32 %v1029_v14, %v9429_v45  ;;  %v1931_v45 = vld [vmem:[%s13229_s0 + $0x10a] sm:$0xff] }
 0x163   :  { %8122 = vmatmul.msk.f32.gmra.mxu0 %vm216_vm1, %v2581_v63 }
 0x164   :  { %13273 = vst [vmem:[#allocation33_spill] sm:$0xff] %v9692_v31  ;;  %7892 = vmatmul.msk.f32.gmra.mxu1 %vm216_vm1, %v81_v44  ;;  %7972 = vmatmul.msk.f32.gmra.mxu2 %vm216_vm1, %v1925_v62  ;;  %v82_v44 = vld [vmem:[%s13229_s0 + $0xf8] sm:$0xff] }
 0x166   :  { %8055 = vmatmul.msk.f32.gmra.mxu3 %vm216_vm1, %v1927_v20 }
 0x167   :  { %v1609_v55 = vpop.f32.mrf.mxu2 }
 0x168   :  { %v1830_v53 = vadd.f32 %v1609_v55, %v1021_v16  ;;  %v9702_v48 = vpop.f32.mrf.mxu0 }
 0x169   :  { %v1032_v63 = vpop.f32.mrf.mxu1  ;;  %v2279_v58 = vpop.f32.mrf.mxu3 }
 0x16a   :  { %v9710_v31 = vadd.f32 %v2279_v58, %v1830_v53  ;;  %v2583_v53 = vld [vmem:[%s13229_s0 + $0x7b] sm:$0xff]  ;;  %v1033_v14 = vadd.f32 %v1032_v63, %v9448_v60  ;;  %v1932_v60 = vld [vmem:[%s13229_s0 + $0x112] sm:$0xff] }
 0x16b   :  { %8123 = vmatmul.msk.f32.gmra.mxu0 %vm216_vm1, %v2582_v51 }
 0x16c   :  { %13274 = vst [vmem:[#allocation34_spill] sm:$0xff] %v9710_v31  ;;  %7893 = vmatmul.msk.f32.gmra.mxu1 %vm216_vm1, %v82_v44  ;;  %7973 = vmatmul.msk.f32.gmra.mxu2 %vm216_vm1, %v1926_v7  ;;  %v83_v44 = vld [vmem:[%s13229_s0 + $0x100] sm:$0xff] }
 0x16e   :  { %8056 = vmatmul.msk.f32.gmra.mxu3 %vm216_vm1, %v1928_v35 }
 0x16f   :  { %v1612_v62 = vpop.f32.mrf.mxu2 }
 0x170   :  { %v1831_v16 = vadd.f32 %v1612_v62, %v1024_v25  ;;  %v9720_v55 = vpop.f32.mrf.mxu0 }
 0x171   :  { %v1035_v51 = vpop.f32.mrf.mxu1  ;;  %v2282_v58 = vpop.f32.mrf.mxu3 }
 0x172   :  { %v9728_v31 = vadd.f32 %v2282_v58, %v1831_v16  ;;  %v2584_v16 = vld [vmem:[%s13229_s0 + $0x83] sm:$0xff]  ;;  %v1036_v63 = vadd.f32 %v1035_v51, %v9467_v59  ;;  %v1933_v59 = vld [vmem:[%s13229_s0 + $0x11a] sm:$0xff] }
 0x173   :  { %8124 = vmatmul.msk.f32.gmra.mxu0 %vm216_vm1, %v2583_v53 }
 0x174   :  { %13275 = vst [vmem:[#allocation35_spill] sm:$0xff] %v9728_v31  ;;  %7894 = vmatmul.msk.f32.gmra.mxu1 %vm216_vm1, %v83_v44  ;;  %7974 = vmatmul.msk.f32.gmra.mxu2 %vm216_vm1, %v1927_v20  ;;  %v84_v44 = vld [vmem:[%s13229_s0 + $0x108] sm:$0xff] }
 0x176   :  { %8057 = vmatmul.msk.f32.gmra.mxu3 %vm216_vm1, %v1929_v52 }
 0x177   :  { %v1615_v7 = vpop.f32.mrf.mxu2 }
 0x178   :  { %v1832_v25 = vadd.f32 %v1615_v7, %v1027_v34  ;;  %v9738_v62 = vpop.f32.mrf.mxu0 }
 0x179   :  { %v1038_v53 = vpop.f32.mrf.mxu1  ;;  %v2285_v58 = vpop.f32.mrf.mxu3 }
 0x17a   :  { %v9746_v31 = vadd.f32 %v2285_v58, %v1832_v25  ;;  %v2585_v25 = vld [vmem:[%s13229_s0 + $0x8b] sm:$0xff]  ;;  %v1039_v51 = vadd.f32 %v1038_v53, %v9486_v12  ;;  %v1934_v12 = vld [vmem:[%s13229_s0 + $0x122] sm:$0xff] }
 0x17b   :  { %8125 = vmatmul.msk.f32.gmra.mxu0 %vm216_vm1, %v2584_v16 }
 0x17c   :  { %13276 = vst [vmem:[#allocation36_spill] sm:$0xff] %v9746_v31  ;;  %7895 = vmatmul.msk.f32.gmra.mxu1 %vm216_vm1, %v84_v44  ;;  %7975 = vmatmul.msk.f32.gmra.mxu2 %vm216_vm1, %v1928_v35  ;;  %v85_v44 = vld [vmem:[%s13229_s0 + $0x110] sm:$0xff] }
 0x17e   :  { %8058 = vmatmul.msk.f32.gmra.mxu3 %vm216_vm1, %v1930_v3 }
 0x17f   :  { %v1618_v20 = vpop.f32.mrf.mxu2 }
 0x180   :  { %v1833_v34 = vadd.f32 %v1618_v20, %v1030_v37  ;;  %v9756_v7 = vpop.f32.mrf.mxu0 }
 0x181   :  { %v1041_v16 = vpop.f32.mrf.mxu1  ;;  %v2288_v58 = vpop.f32.mrf.mxu3 }
 0x182   :  { %v9764_v31 = vadd.f32 %v2288_v58, %v1833_v34  ;;  %v2586_v34 = vld [vmem:[%s13229_s0 + $0x93] sm:$0xff]  ;;  %v1042_v53 = vadd.f32 %v1041_v16, %v9504_v30  ;;  %v1935_v30 = vld [vmem:[%s13229_s0 + $0x12a] sm:$0xff] }
 0x183   :  { %8126 = vmatmul.msk.f32.gmra.mxu0 %vm216_vm1, %v2585_v25 }
 0x184   :  { %13277 = vst [vmem:[#allocation37_spill] sm:$0xff] %v9764_v31  ;;  %7896 = vmatmul.msk.f32.gmra.mxu1 %vm216_vm1, %v85_v44  ;;  %7976 = vmatmul.msk.f32.gmra.mxu2 %vm216_vm1, %v1929_v52  ;;  %v86_v44 = vld [vmem:[%s13229_s0 + $0x118] sm:$0xff] }
 0x186   :  { %8059 = vmatmul.msk.f32.gmra.mxu3 %vm216_vm1, %v1931_v45 }
 0x187   :  { %v1621_v35 = vpop.f32.mrf.mxu2 }
 0x188   :  { %v1834_v37 = vadd.f32 %v1621_v35, %v1033_v14  ;;  %v9774_v20 = vpop.f32.mrf.mxu0 }
 0x189   :  { %v1044_v25 = vpop.f32.mrf.mxu1  ;;  %v2291_v58 = vpop.f32.mrf.mxu3 }
 0x18a   :  { %v9782_v31 = vadd.f32 %v2291_v58, %v1834_v37  ;;  %v2587_v37 = vld [vmem:[%s13229_s0 + $0x9b] sm:$0xff]  ;;  %v1045_v16 = vadd.f32 %v1044_v25, %v9522_v46  ;;  %v1936_v46 = vld [vmem:[%s13229_s0 + $0x132] sm:$0xff] }
 0x18b   :  { %8127 = vmatmul.msk.f32.gmra.mxu0 %vm216_vm1, %v2586_v34 }
 0x18c   :  { %13278 = vst [vmem:[#allocation38_spill] sm:$0xff] %v9782_v31  ;;  %7897 = vmatmul.msk.f32.gmra.mxu1 %vm216_vm1, %v86_v44  ;;  %7977 = vmatmul.msk.f32.gmra.mxu2 %vm216_vm1, %v1930_v3  ;;  %v87_v44 = vld [vmem:[%s13229_s0 + $0x120] sm:$0xff] }
 0x18e   :  { %8060 = vmatmul.msk.f32.gmra.mxu3 %vm216_vm1, %v1932_v60 }
 0x18f   :  { %v1624_v52 = vpop.f32.mrf.mxu2 }
 0x190   :  { %v1835_v14 = vadd.f32 %v1624_v52, %v1036_v63  ;;  %v9792_v35 = vpop.f32.mrf.mxu0 }
 0x191   :  { %v1047_v34 = vpop.f32.mrf.mxu1  ;;  %v2294_v58 = vpop.f32.mrf.mxu3 }
 0x192   :  { %v9800_v31 = vadd.f32 %v2294_v58, %v1835_v14  ;;  %v2588_v14 = vld [vmem:[%s13229_s0 + $0xa3] sm:$0xff]  ;;  %v1048_v25 = vadd.f32 %v1047_v34, %v9540_v8  ;;  %v1937_v8 = vld [vmem:[%s13229_s0 + $0x13a] sm:$0xff] }
 0x193   :  { %8128 = vmatmul.msk.f32.gmra.mxu0 %vm216_vm1, %v2587_v37 }
 0x194   :  { %13279 = vst [vmem:[#allocation39_spill] sm:$0xff] %v9800_v31  ;;  %7898 = vmatmul.msk.f32.gmra.mxu1 %vm216_vm1, %v87_v44  ;;  %7978 = vmatmul.msk.f32.gmra.mxu2 %vm216_vm1, %v1931_v45  ;;  %v88_v44 = vld [vmem:[%s13229_s0 + $0x128] sm:$0xff] }
 0x196   :  { %8061 = vmatmul.msk.f32.gmra.mxu3 %vm216_vm1, %v1933_v59 }
 0x197   :  { %v1627_v3 = vpop.f32.mrf.mxu2 }
 0x198   :  { %v1836_v63 = vadd.f32 %v1627_v3, %v1039_v51  ;;  %v9810_v52 = vpop.f32.mrf.mxu0 }
 0x199   :  { %v1050_v37 = vpop.f32.mrf.mxu1  ;;  %v2297_v58 = vpop.f32.mrf.mxu3 }
 0x19a   :  { %v9818_v31 = vadd.f32 %v2297_v58, %v1836_v63  ;;  %v2589_v63 = vld [vmem:[%s13229_s0 + $0xab] sm:$0xff]  ;;  %v1051_v34 = vadd.f32 %v1050_v37, %v9558_v42  ;;  %v1938_v42 = vld [vmem:[%s13229_s0 + $0x142] sm:$0xff] }
 0x19b   :  { %8129 = vmatmul.msk.f32.gmra.mxu0 %vm216_vm1, %v2588_v14 }
 0x19c   :  { %13280 = vst [vmem:[#allocation40_spill] sm:$0xff] %v9818_v31  ;;  %7899 = vmatmul.msk.f32.gmra.mxu1 %vm216_vm1, %v88_v44  ;;  %7979 = vmatmul.msk.f32.gmra.mxu2 %vm216_vm1, %v1932_v60  ;;  %v89_v44 = vld [vmem:[%s13229_s0 + $0x130] sm:$0xff] }
 0x19e   :  { %8062 = vmatmul.msk.f32.gmra.mxu3 %vm216_vm1, %v1934_v12 }
 0x19f   :  { %v1630_v45 = vpop.f32.mrf.mxu2 }
 0x1a0   :  { %v1837_v51 = vadd.f32 %v1630_v45, %v1042_v53  ;;  %v9828_v3 = vpop.f32.mrf.mxu0 }
 0x1a1   :  { %v1053_v14 = vpop.f32.mrf.mxu1  ;;  %v2300_v58 = vpop.f32.mrf.mxu3 }
 0x1a2   :  { %v9836_v31 = vadd.f32 %v2300_v58, %v1837_v51  ;;  %v2590_v51 = vld [vmem:[%s13229_s0 + $0xb3] sm:$0xff]  ;;  %v1054_v37 = vadd.f32 %v1053_v14, %v9576_v1  ;;  %v1939_v1 = vld [vmem:[%s13229_s0 + $0x14a] sm:$0xff] }
 0x1a3   :  { %8130 = vmatmul.msk.f32.gmra.mxu0 %vm216_vm1, %v2589_v63 }
 0x1a4   :  { %13281 = vst [vmem:[#allocation41_spill] sm:$0xff] %v9836_v31  ;;  %7900 = vmatmul.msk.f32.gmra.mxu1 %vm216_vm1, %v89_v44  ;;  %7980 = vmatmul.msk.f32.gmra.mxu2 %vm216_vm1, %v1933_v59  ;;  %v90_v44 = vld [vmem:[%s13229_s0 + $0x138] sm:$0xff] }
 0x1a6   :  { %8063 = vmatmul.msk.f32.gmra.mxu3 %vm216_vm1, %v1935_v30 }
 0x1a7   :  { %v1633_v60 = vpop.f32.mrf.mxu2 }
 0x1a8   :  { %v1838_v53 = vadd.f32 %v1633_v60, %v1045_v16  ;;  %v9846_v45 = vpop.f32.mrf.mxu0 }
 0x1a9   :  { %v1056_v63 = vpop.f32.mrf.mxu1  ;;  %v2303_v58 = vpop.f32.mrf.mxu3 }
 0x1aa   :  { %v9854_v31 = vadd.f32 %v2303_v58, %v1838_v53  ;;  %v2591_v53 = vld [vmem:[%s13229_s0 + $0xbb] sm:$0xff]  ;;  %v1057_v14 = vadd.f32 %v1056_v63, %v9594_v4  ;;  %v1940_v4 = vld [vmem:[%s13229_s0 + $0x152] sm:$0xff] }
 0x1ab   :  { %8131 = vmatmul.msk.f32.gmra.mxu0 %vm216_vm1, %v2590_v51 }
 0x1ac   :  { %13282 = vst [vmem:[#allocation42_spill] sm:$0xff] %v9854_v31  ;;  %7901 = vmatmul.msk.f32.gmra.mxu1 %vm216_vm1, %v90_v44  ;;  %7981 = vmatmul.msk.f32.gmra.mxu2 %vm216_vm1, %v1934_v12  ;;  %v91_v44 = vld [vmem:[%s13229_s0 + $0x140] sm:$0xff] }
 0x1ae   :  { %8064 = vmatmul.msk.f32.gmra.mxu3 %vm216_vm1, %v1936_v46 }
 0x1af   :  { %v1636_v59 = vpop.f32.mrf.mxu2 }
 0x1b0   :  { %v1839_v16 = vadd.f32 %v1636_v59, %v1048_v25  ;;  %v9864_v60 = vpop.f32.mrf.mxu0 }
 0x1b1   :  { %v1059_v51 = vpop.f32.mrf.mxu1  ;;  %v2306_v58 = vpop.f32.mrf.mxu3 }
 0x1b2   :  { %v9872_v31 = vadd.f32 %v2306_v58, %v1839_v16  ;;  %v2592_v16 = vld [vmem:[%s13229_s0 + $0xc3] sm:$0xff]  ;;  %v1060_v63 = vadd.f32 %v1059_v51, %v9612_v11  ;;  %v1941_v11 = vld [vmem:[%s13229_s0 + $0x15a] sm:$0xff] }
 0x1b3   :  { %8132 = vmatmul.msk.f32.gmra.mxu0 %vm216_vm1, %v2591_v53 }
 0x1b4   :  { %13283 = vst [vmem:[#allocation43_spill] sm:$0xff] %v9872_v31  ;;  %7902 = vmatmul.msk.f32.gmra.mxu1 %vm216_vm1, %v91_v44  ;;  %7982 = vmatmul.msk.f32.gmra.mxu2 %vm216_vm1, %v1935_v30  ;;  %v92_v44 = vld [vmem:[%s13229_s0 + $0x148] sm:$0xff] }
 0x1b6   :  { %8065 = vmatmul.msk.f32.gmra.mxu3 %vm216_vm1, %v1937_v8 }
 0x1b7   :  { %v1639_v12 = vpop.f32.mrf.mxu2 }
 0x1b8   :  { %v1840_v25 = vadd.f32 %v1639_v12, %v1051_v34  ;;  %v9882_v59 = vpop.f32.mrf.mxu0 }
 0x1b9   :  { %v1062_v53 = vpop.f32.mrf.mxu1  ;;  %v2309_v58 = vpop.f32.mrf.mxu3 }
 0x1ba   :  { %v9890_v31 = vadd.f32 %v2309_v58, %v1840_v25  ;;  %v2593_v25 = vld [vmem:[%s13229_s0 + $0xcb] sm:$0xff]  ;;  %v1063_v51 = vadd.f32 %v1062_v53, %v9630_v19  ;;  %v1942_v19 = vld [vmem:[%s13229_s0 + $0x162] sm:$0xff] }
 0x1bb   :  { %8133 = vmatmul.msk.f32.gmra.mxu0 %vm216_vm1, %v2592_v16 }
 0x1bc   :  { %13284 = vst [vmem:[#allocation44_spill] sm:$0xff] %v9890_v31  ;;  %7903 = vmatmul.msk.f32.gmra.mxu1 %vm216_vm1, %v92_v44  ;;  %7983 = vmatmul.msk.f32.gmra.mxu2 %vm216_vm1, %v1936_v46  ;;  %v93_v44 = vld [vmem:[%s13229_s0 + $0x150] sm:$0xff] }
 0x1be   :  { %8066 = vmatmul.msk.f32.gmra.mxu3 %vm216_vm1, %v1938_v42 }
 0x1bf   :  { %v1642_v30 = vpop.f32.mrf.mxu2 }
 0x1c0   :  { %v1841_v34 = vadd.f32 %v1642_v30, %v1054_v37  ;;  %v9900_v12 = vpop.f32.mrf.mxu0 }
 0x1c1   :  { %v1065_v16 = vpop.f32.mrf.mxu1  ;;  %v2312_v58 = vpop.f32.mrf.mxu3 }
 0x1c2   :  { %v9908_v31 = vadd.f32 %v2312_v58, %v1841_v34  ;;  %v2594_v34 = vld [vmem:[%s13229_s0 + $0xd3] sm:$0xff]  ;;  %v1066_v53 = vadd.f32 %v1065_v16, %v9648_v27  ;;  %v1943_v27 = vld [vmem:[%s13229_s0 + $0x16a] sm:$0xff] }
 0x1c3   :  { %8134 = vmatmul.msk.f32.gmra.mxu0 %vm216_vm1, %v2593_v25 }
 0x1c4   :  { %13285 = vst [vmem:[#allocation45_spill] sm:$0xff] %v9908_v31  ;;  %7904 = vmatmul.msk.f32.gmra.mxu1 %vm216_vm1, %v93_v44  ;;  %7984 = vmatmul.msk.f32.gmra.mxu2 %vm216_vm1, %v1937_v8  ;;  %v94_v44 = vld [vmem:[%s13229_s0 + $0x158] sm:$0xff] }
 0x1c6   :  { %8067 = vmatmul.msk.f32.gmra.mxu3 %vm216_vm1, %v1939_v1 }
 0x1c7   :  { %v1645_v46 = vpop.f32.mrf.mxu2 }
 0x1c8   :  { %v1842_v37 = vadd.f32 %v1645_v46, %v1057_v14  ;;  %v9918_v30 = vpop.f32.mrf.mxu0 }
 0x1c9   :  { %v1068_v25 = vpop.f32.mrf.mxu1  ;;  %v2315_v58 = vpop.f32.mrf.mxu3 }
 0x1ca   :  { %v9926_v31 = vadd.f32 %v2315_v58, %v1842_v37  ;;  %v2595_v37 = vld [vmem:[%s13229_s0 + $0xdb] sm:$0xff]  ;;  %v1069_v16 = vadd.f32 %v1068_v25, %v9666_v22  ;;  %v1944_v22 = vld [vmem:[%s13229_s0 + $0x172] sm:$0xff] }
 0x1cb   :  { %8135 = vmatmul.msk.f32.gmra.mxu0 %vm216_vm1, %v2594_v34 }
 0x1cc   :  { %13286 = vst [vmem:[#allocation46_spill] sm:$0xff] %v9926_v31  ;;  %7905 = vmatmul.msk.f32.gmra.mxu1 %vm216_vm1, %v94_v44  ;;  %7985 = vmatmul.msk.f32.gmra.mxu2 %vm216_vm1, %v1938_v42  ;;  %v95_v44 = vld [vmem:[%s13229_s0 + $0x160] sm:$0xff] }
 0x1ce   :  { %8068 = vmatmul.msk.f32.gmra.mxu3 %vm216_vm1, %v1940_v4 }
 0x1cf   :  { %v1648_v8 = vpop.f32.mrf.mxu2 }
 0x1d0   :  { %v1843_v14 = vadd.f32 %v1648_v8, %v1060_v63  ;;  %v9936_v46 = vpop.f32.mrf.mxu0 }
 0x1d1   :  { %v1071_v34 = vpop.f32.mrf.mxu1  ;;  %v2318_v58 = vpop.f32.mrf.mxu3 }
 0x1d2   :  { %v9944_v31 = vadd.f32 %v2318_v58, %v1843_v14  ;;  %v2596_v14 = vld [vmem:[%s13229_s0 + $0xe3] sm:$0xff]  ;;  %v1072_v25 = vadd.f32 %v1071_v34, %v9684_v41  ;;  %v1945_v41 = vld [vmem:[%s13229_s0 + $0x17a] sm:$0xff] }
 0x1d3   :  { %8136 = vmatmul.msk.f32.gmra.mxu0 %vm216_vm1, %v2595_v37 }
 0x1d4   :  { %13287 = vst [vmem:[#allocation47_spill] sm:$0xff] %v9944_v31  ;;  %7906 = vmatmul.msk.f32.gmra.mxu1 %vm216_vm1, %v95_v44  ;;  %7986 = vmatmul.msk.f32.gmra.mxu2 %vm216_vm1, %v1939_v1  ;;  %v96_v44 = vld [vmem:[%s13229_s0 + $0x168] sm:$0xff] }
 0x1d6   :  { %8069 = vmatmul.msk.f32.gmra.mxu3 %vm216_vm1, %v1941_v11 }
 0x1d7   :  { %v1651_v42 = vpop.f32.mrf.mxu2 }
 0x1d8   :  { %v1844_v63 = vadd.f32 %v1651_v42, %v1063_v51  ;;  %v9954_v8 = vpop.f32.mrf.mxu0 }
 0x1d9   :  { %v1074_v37 = vpop.f32.mrf.mxu1  ;;  %v2321_v58 = vpop.f32.mrf.mxu3 }
 0x1da   :  { %v9962_v31 = vadd.f32 %v2321_v58, %v1844_v63  ;;  %v2597_v63 = vld [vmem:[%s13229_s0 + $0xeb] sm:$0xff]  ;;  %v1075_v34 = vadd.f32 %v1074_v37, %v9702_v48  ;;  %v1946_v48 = vld [vmem:[%s13229_s0 + $0x182] sm:$0xff] }
 0x1db   :  { %8137 = vmatmul.msk.f32.gmra.mxu0 %vm216_vm1, %v2596_v14 }
 0x1dc   :  { %13288 = vst [vmem:[#allocation48_spill] sm:$0xff] %v9962_v31  ;;  %7907 = vmatmul.msk.f32.gmra.mxu1 %vm216_vm1, %v96_v44  ;;  %7987 = vmatmul.msk.f32.gmra.mxu2 %vm216_vm1, %v1940_v4  ;;  %v97_v44 = vld [vmem:[%s13229_s0 + $0x170] sm:$0xff] }
 0x1de   :  { %8070 = vmatmul.msk.f32.gmra.mxu3 %vm216_vm1, %v1942_v19 }
 0x1df   :  { %v1654_v1 = vpop.f32.mrf.mxu2 }
 0x1e0   :  { %v1845_v51 = vadd.f32 %v1654_v1, %v1066_v53  ;;  %v9972_v42 = vpop.f32.mrf.mxu0 }
 0x1e1   :  { %v1077_v14 = vpop.f32.mrf.mxu1  ;;  %v2324_v58 = vpop.f32.mrf.mxu3 }
 0x1e2   :  { %v9980_v31 = vadd.f32 %v2324_v58, %v1845_v51  ;;  %v2598_v51 = vld [vmem:[%s13229_s0 + $0xf3] sm:$0xff]  ;;  %v1078_v37 = vadd.f32 %v1077_v14, %v9720_v55  ;;  %v1947_v55 = vld [vmem:[%s13229_s0 + $0x18a] sm:$0xff] }
 0x1e3   :  { %8138 = vmatmul.msk.f32.gmra.mxu0 %vm216_vm1, %v2597_v63 }
 0x1e4   :  { %13289 = vst [vmem:[#allocation49_spill] sm:$0xff] %v9980_v31  ;;  %7908 = vmatmul.msk.f32.gmra.mxu1 %vm216_vm1, %v97_v44  ;;  %7988 = vmatmul.msk.f32.gmra.mxu2 %vm216_vm1, %v1941_v11  ;;  %v98_v44 = vld [vmem:[%s13229_s0 + $0x178] sm:$0xff] }
 0x1e6   :  { %8071 = vmatmul.msk.f32.gmra.mxu3 %vm216_vm1, %v1943_v27 }
 0x1e7   :  { %v1657_v4 = vpop.f32.mrf.mxu2 }
 0x1e8   :  { %v1846_v53 = vadd.f32 %v1657_v4, %v1069_v16  ;;  %v9990_v1 = vpop.f32.mrf.mxu0 }
 0x1e9   :  { %v1080_v63 = vpop.f32.mrf.mxu1  ;;  %v2327_v58 = vpop.f32.mrf.mxu3 }
 0x1ea   :  { %v9998_v31 = vadd.f32 %v2327_v58, %v1846_v53  ;;  %v2599_v53 = vld [vmem:[%s13229_s0 + $0xfb] sm:$0xff]  ;;  %v1081_v14 = vadd.f32 %v1080_v63, %v9738_v62  ;;  %v1948_v62 = vld [vmem:[%s13229_s0 + $0x192] sm:$0xff] }
 0x1eb   :  { %8139 = vmatmul.msk.f32.gmra.mxu0 %vm216_vm1, %v2598_v51 }
 0x1ec   :  { %13290 = vst [vmem:[#allocation50_spill] sm:$0xff] %v9998_v31  ;;  %7909 = vmatmul.msk.f32.gmra.mxu1 %vm216_vm1, %v98_v44  ;;  %7989 = vmatmul.msk.f32.gmra.mxu2 %vm216_vm1, %v1942_v19  ;;  %v99_v44 = vld [vmem:[%s13229_s0 + $0x180] sm:$0xff] }
 0x1ee   :  { %8072 = vmatmul.msk.f32.gmra.mxu3 %vm216_vm1, %v1944_v22 }
 0x1ef   :  { %v1660_v11 = vpop.f32.mrf.mxu2 }
 0x1f0   :  { %v1847_v16 = vadd.f32 %v1660_v11, %v1072_v25  ;;  %v10008_v4 = vpop.f32.mrf.mxu0 }
 0x1f1   :  { %v1083_v51 = vpop.f32.mrf.mxu1  ;;  %v2330_v58 = vpop.f32.mrf.mxu3 }
 0x1f2   :  { %v10016_v31 = vadd.f32 %v2330_v58, %v1847_v16  ;;  %v2600_v16 = vld [vmem:[%s13229_s0 + $0x103] sm:$0xff]  ;;  %v1084_v63 = vadd.f32 %v1083_v51, %v9756_v7  ;;  %v1949_v7 = vld [vmem:[%s13229_s0 + $0x19a] sm:$0xff] }
 0x1f3   :  { %8140 = vmatmul.msk.f32.gmra.mxu0 %vm216_vm1, %v2599_v53 }
 0x1f4   :  { %13291 = vst [vmem:[#allocation51_spill] sm:$0xff] %v10016_v31  ;;  %7910 = vmatmul.msk.f32.gmra.mxu1 %vm216_vm1, %v99_v44  ;;  %7990 = vmatmul.msk.f32.gmra.mxu2 %vm216_vm1, %v1943_v27  ;;  %v100_v44 = vld [vmem:[%s13229_s0 + $0x188] sm:$0xff] }
 0x1f6   :  { %8073 = vmatmul.msk.f32.gmra.mxu3 %vm216_vm1, %v1945_v41 }
 0x1f7   :  { %v1663_v19 = vpop.f32.mrf.mxu2 }
 0x1f8   :  { %v1848_v25 = vadd.f32 %v1663_v19, %v1075_v34  ;;  %v10026_v11 = vpop.f32.mrf.mxu0 }
 0x1f9   :  { %v1086_v53 = vpop.f32.mrf.mxu1  ;;  %v2333_v58 = vpop.f32.mrf.mxu3 }
 0x1fa   :  { %v10034_v31 = vadd.f32 %v2333_v58, %v1848_v25  ;;  %v2601_v25 = vld [vmem:[%s13229_s0 + $0x10b] sm:$0xff]  ;;  %v1087_v51 = vadd.f32 %v1086_v53, %v9129_v6  ;;  %v1950_v6 = vld [vmem:[%s13229_s0 + $0x1a2] sm:$0xff] }
 0x1fb   :  { %8141 = vmatmul.msk.f32.gmra.mxu0 %vm216_vm1, %v2600_v16 }
 0x1fc   :  { %13292 = vst [vmem:[#allocation52_spill] sm:$0xff] %v10034_v31  ;;  %7911 = vmatmul.msk.f32.gmra.mxu1 %vm216_vm1, %v100_v44  ;;  %7991 = vmatmul.msk.f32.gmra.mxu2 %vm216_vm1, %v1944_v22  ;;  %v101_v44 = vld [vmem:[%s13229_s0 + $0x190] sm:$0xff] }
 0x1fe   :  { %8074 = vmatmul.msk.f32.gmra.mxu3 %vm216_vm1, %v1946_v48 }
 0x1ff   :  { %v1666_v27 = vpop.f32.mrf.mxu2 }
 0x200   :  { %v1849_v34 = vadd.f32 %v1666_v27, %v1078_v37  ;;  %v10044_v19 = vpop.f32.mrf.mxu0 }
 0x201   :  { %v1089_v16 = vpop.f32.mrf.mxu1  ;;  %v2336_v58 = vpop.f32.mrf.mxu3 }
 0x202   :  { %v10052_v31 = vadd.f32 %v2336_v58, %v1849_v34  ;;  %v2602_v34 = vld [vmem:[%s13229_s0 + $0x113] sm:$0xff]  ;;  %v1090_v53 = vadd.f32 %v1089_v16, %v9151_v13  ;;  %v1951_v13 = vld [vmem:[%s13229_s0 + $0x1aa] sm:$0xff] }
 0x203   :  { %8142 = vmatmul.msk.f32.gmra.mxu0 %vm216_vm1, %v2601_v25 }
 0x204   :  { %13293 = vst [vmem:[#allocation53_spill] sm:$0xff] %v10052_v31  ;;  %7912 = vmatmul.msk.f32.gmra.mxu1 %vm216_vm1, %v101_v44  ;;  %7992 = vmatmul.msk.f32.gmra.mxu2 %vm216_vm1, %v1945_v41  ;;  %v102_v44 = vld [vmem:[%s13229_s0 + $0x198] sm:$0xff] }
 0x206   :  { %8075 = vmatmul.msk.f32.gmra.mxu3 %vm216_vm1, %v1947_v55 }
 0x207   :  { %v1669_v22 = vpop.f32.mrf.mxu2 }
 0x208   :  { %v1850_v37 = vadd.f32 %v1669_v22, %v1081_v14  ;;  %v10062_v27 = vpop.f32.mrf.mxu0 }
 0x209   :  { %v1092_v25 = vpop.f32.mrf.mxu1  ;;  %v2339_v58 = vpop.f32.mrf.mxu3 }
 0x20a   :  { %v10070_v31 = vadd.f32 %v2339_v58, %v1850_v37  ;;  %v2603_v37 = vld [vmem:[%s13229_s0 + $0x11b] sm:$0xff]  ;;  %v1093_v16 = vadd.f32 %v1092_v25, %v9175_v21  ;;  %v1952_v21 = vld [vmem:[%s13229_s0 + $0x1b2] sm:$0xff] }
 0x20b   :  { %8143 = vmatmul.msk.f32.gmra.mxu0 %vm216_vm1, %v2602_v34 }
 0x20c   :  { %13294 = vst [vmem:[#allocation54_spill] sm:$0xff] %v10070_v31  ;;  %7913 = vmatmul.msk.f32.gmra.mxu1 %vm216_vm1, %v102_v44  ;;  %7993 = vmatmul.msk.f32.gmra.mxu2 %vm216_vm1, %v1946_v48  ;;  %v103_v44 = vld [vmem:[%s13229_s0 + $0x1a0] sm:$0xff] }
 0x20e   :  { %8076 = vmatmul.msk.f32.gmra.mxu3 %vm216_vm1, %v1948_v62 }
 0x20f   :  { %v1672_v41 = vpop.f32.mrf.mxu2 }
 0x210   :  { %v1851_v14 = vadd.f32 %v1672_v41, %v1084_v63  ;;  %v10080_v22 = vpop.f32.mrf.mxu0 }
 0x211   :  { %v1095_v34 = vpop.f32.mrf.mxu1  ;;  %v2342_v58 = vpop.f32.mrf.mxu3 }
 0x212   :  { %v10088_v31 = vadd.f32 %v2342_v58, %v1851_v14  ;;  %v2604_v14 = vld [vmem:[%s13229_s0 + $0x123] sm:$0xff]  ;;  %v1096_v25 = vadd.f32 %v1095_v34, %v9199_v29  ;;  %v1953_v29 = vld [vmem:[%s13229_s0 + $0x1ba] sm:$0xff] }
 0x213   :  { %8144 = vmatmul.msk.f32.gmra.mxu0 %vm216_vm1, %v2603_v37 }
 0x214   :  { %13295 = vst [vmem:[#allocation55_spill] sm:$0xff] %v10088_v31  ;;  %7914 = vmatmul.msk.f32.gmra.mxu1 %vm216_vm1, %v103_v44  ;;  %7994 = vmatmul.msk.f32.gmra.mxu2 %vm216_vm1, %v1947_v55  ;;  %v104_v44 = vld [vmem:[%s13229_s0 + $0x1a8] sm:$0xff] }
 0x216   :  { %8077 = vmatmul.msk.f32.gmra.mxu3 %vm216_vm1, %v1949_v7 }
 0x217   :  { %v1675_v48 = vpop.f32.mrf.mxu2 }
 0x218   :  { %v1852_v63 = vadd.f32 %v1675_v48, %v1087_v51  ;;  %v10098_v41 = vpop.f32.mrf.mxu0 }
 0x219   :  { %v1098_v37 = vpop.f32.mrf.mxu1  ;;  %v2345_v58 = vpop.f32.mrf.mxu3 }
 0x21a   :  { %v10106_v31 = vadd.f32 %v2345_v58, %v1852_v63  ;;  %v2605_v63 = vld [vmem:[%s13229_s0 + $0x12b] sm:$0xff]  ;;  %v1099_v34 = vadd.f32 %v1098_v37, %v9220_v36  ;;  %v1954_v36 = vld [vmem:[%s13229_s0 + $0x1c2] sm:$0xff] }
 0x21b   :  { %8145 = vmatmul.msk.f32.gmra.mxu0 %vm216_vm1, %v2604_v14 }
 0x21c   :  { %13296 = vst [vmem:[#allocation56_spill] sm:$0xff] %v10106_v31  ;;  %7915 = vmatmul.msk.f32.gmra.mxu1 %vm216_vm1, %v104_v44  ;;  %7995 = vmatmul.msk.f32.gmra.mxu2 %vm216_vm1, %v1948_v62  ;;  %v105_v44 = vld [vmem:[%s13229_s0 + $0x1b0] sm:$0xff] }
 0x21e   :  { %8078 = vmatmul.msk.f32.gmra.mxu3 %vm216_vm1, %v1950_v6 }
 0x21f   :  { %v1678_v55 = vpop.f32.mrf.mxu2 }
 0x220   :  { %v1853_v51 = vadd.f32 %v1678_v55, %v1090_v53  ;;  %v10116_v48 = vpop.f32.mrf.mxu0 }
 0x221   :  { %v1101_v14 = vpop.f32.mrf.mxu1  ;;  %v2348_v58 = vpop.f32.mrf.mxu3 }
 0x222   :  { %v10124_v31 = vadd.f32 %v2348_v58, %v1853_v51  ;;  %v2606_v51 = vld [vmem:[%s13229_s0 + $0x133] sm:$0xff]  ;;  %v1102_v37 = vadd.f32 %v1101_v14, %v9241_v43  ;;  %v1955_v43 = vld [vmem:[%s13229_s0 + $0x1ca] sm:$0xff] }
 0x223   :  { %8146 = vmatmul.msk.f32.gmra.mxu0 %vm216_vm1, %v2605_v63 }
 0x224   :  { %13297 = vst [vmem:[#allocation57_spill] sm:$0xff] %v10124_v31  ;;  %7916 = vmatmul.msk.f32.gmra.mxu1 %vm216_vm1, %v105_v44  ;;  %7996 = vmatmul.msk.f32.gmra.mxu2 %vm216_vm1, %v1949_v7  ;;  %v106_v44 = vld [vmem:[%s13229_s0 + $0x1b8] sm:$0xff] }
 0x226   :  { %8079 = vmatmul.msk.f32.gmra.mxu3 %vm216_vm1, %v1951_v13 }
 0x227   :  { %v1681_v62 = vpop.f32.mrf.mxu2 }
 0x228   :  { %v1854_v53 = vadd.f32 %v1681_v62, %v1093_v16  ;;  %v10134_v55 = vpop.f32.mrf.mxu0 }
 0x229   :  { %v1104_v63 = vpop.f32.mrf.mxu1  ;;  %v2351_v58 = vpop.f32.mrf.mxu3 }
 0x22a   :  { %v10142_v31 = vadd.f32 %v2351_v58, %v1854_v53  ;;  %v2607_v53 = vld [vmem:[%s13229_s0 + $0x13b] sm:$0xff]  ;;  %v1105_v14 = vadd.f32 %v1104_v63, %v9262_v50  ;;  %v1956_v50 = vld [vmem:[%s13229_s0 + $0x1d2] sm:$0xff] }
 0x22b   :  { %8147 = vmatmul.msk.f32.gmra.mxu0 %vm216_vm1, %v2606_v51 }
 0x22c   :  { %13298 = vst [vmem:[#allocation58_spill] sm:$0xff] %v10142_v31  ;;  %7917 = vmatmul.msk.f32.gmra.mxu1 %vm216_vm1, %v106_v44  ;;  %7997 = vmatmul.msk.f32.gmra.mxu2 %vm216_vm1, %v1950_v6  ;;  %v107_v44 = vld [vmem:[%s13229_s0 + $0x1c0] sm:$0xff] }
 0x22e   :  { %8080 = vmatmul.msk.f32.gmra.mxu3 %vm216_vm1, %v1952_v21 }
 0x22f   :  { %v1684_v7 = vpop.f32.mrf.mxu2 }
 0x230   :  { %v1855_v16 = vadd.f32 %v1684_v7, %v1096_v25  ;;  %v10152_v62 = vpop.f32.mrf.mxu0 }
 0x231   :  { %v1107_v51 = vpop.f32.mrf.mxu1  ;;  %v2354_v58 = vpop.f32.mrf.mxu3 }
 0x232   :  { %v10160_v31 = vadd.f32 %v2354_v58, %v1855_v16  ;;  %v2608_v16 = vld [vmem:[%s13229_s0 + $0x143] sm:$0xff]  ;;  %v1108_v63 = vadd.f32 %v1107_v51, %v9283_v57  ;;  %v8275_v57 = vld [vmem:[%s13231_s2 + $0x18] sm:$0x7]  ;;  %v8358_v51 = vld [vmem:[%s13231_s2 + $0x1c] sm:$0x7] }
 0x233   :  { %8148 = vmatmul.msk.f32.gmra.mxu0 %vm216_vm1, %v2607_v53  ;;  %8276 = vmatpush.msk.msra.mxu2 %vm460_vm0, %v8275_v57 }
 0x234   :  { %13299 = vst [vmem:[#allocation59_spill] sm:$0xff] %v10160_v31  ;;  %7918 = vmatmul.msk.f32.gmra.mxu1 %vm216_vm1, %v107_v44  ;;  %7998 = vmatmul.msk.f32.gmra.mxu2 %vm216_vm1, %v1951_v13  ;;  %v108_v44 = vld [vmem:[%s13229_s0 + $0x1c8] sm:$0xff] }
 0x235   :  { %8359 = vmatpush.msk.msra.mxu3 %vm460_vm0, %v8358_v51  ;;  %v112_v51 = vld [vmem:[%s13229_s0 + $0x1e8] sm:$0xff] }
 0x236   :  { %8081 = vmatmul.msk.f32.gmra.mxu3 %vm216_vm1, %v1953_v29 }
 0x237   :  { %v1687_v6 = vpop.f32.mrf.mxu2 }
 0x238   :  { %v1856_v25 = vadd.f32 %v1687_v6, %v1099_v34  ;;  %v10170_v7 = vpop.f32.mrf.mxu0 }
 0x239   :  { %v1110_v53 = vpop.f32.mrf.mxu1  ;;  %v2357_v58 = vpop.f32.mrf.mxu3 }
 0x23a   :  { %v10178_v31 = vadd.f32 %v2357_v58, %v1856_v25  ;;  %v2609_v25 = vld [vmem:[%s13229_s0 + $0x14b] sm:$0xff] }
 0x23b   :  { %8149 = vmatmul.msk.f32.gmra.mxu0 %vm216_vm1, %v2608_v16 }
 0x23c   :  { %13300 = vst [vmem:[#allocation60_spill] sm:$0xff] %v10178_v31  ;;  %7919 = vmatmul.msk.f32.gmra.mxu1 %vm216_vm1, %v108_v44  ;;  %7999 = vmatmul.msk.f32.gmra.mxu2 %vm216_vm1, %v1952_v21  ;;  %v109_v44 = vld [vmem:[%s13229_s0 + $0x1d0] sm:$0xff] }
 0x23e   :  { %8082 = vmatmul.msk.f32.gmra.mxu3 %vm216_vm1, %v1954_v36 }
 0x23f   :  { %v1690_v13 = vpop.f32.mrf.mxu2 }
 0x240   :  { %v1857_v34 = vadd.f32 %v1690_v13, %v1102_v37  ;;  %v10188_v6 = vpop.f32.mrf.mxu0 }
 0x241   :  { %v1113_v16 = vpop.f32.mrf.mxu1  ;;  %v2360_v58 = vpop.f32.mrf.mxu3 }
 0x242   :  { %v10196_v31 = vadd.f32 %v2360_v58, %v1857_v34  ;;  %v2610_v34 = vld [vmem:[%s13229_s0 + $0x153] sm:$0xff] }
 0x243   :  { %8150 = vmatmul.msk.f32.gmra.mxu0 %vm216_vm1, %v2609_v25 }
 0x244   :  { %13301 = vst [vmem:[#allocation61_spill] sm:$0xff] %v10196_v31  ;;  %7920 = vmatmul.msk.f32.gmra.mxu1 %vm216_vm1, %v109_v44  ;;  %8000 = vmatmul.msk.f32.gmra.mxu2 %vm216_vm1, %v1953_v29  ;;  %v110_v44 = vld [vmem:[%s13229_s0 + $0x1d8] sm:$0xff] }
 0x246   :  { %8083 = vmatmul.msk.f32.gmra.mxu3 %vm216_vm1, %v1955_v43 }
 0x247   :  { %v1693_v21 = vpop.f32.mrf.mxu2 }
 0x248   :  { %v1858_v37 = vadd.f32 %v1693_v21, %v1105_v14  ;;  %v10206_v13 = vpop.f32.mrf.mxu0 }
 0x249   :  { %v1116_v25 = vpop.f32.mrf.mxu1  ;;  %v2363_v58 = vpop.f32.mrf.mxu3 }
 0x24a   :  { %v10214_v31 = vadd.f32 %v2363_v58, %v1858_v37  ;;  %v2611_v37 = vld [vmem:[%s13229_s0 + $0x15b] sm:$0xff] }
 0x24b   :  { %8151 = vmatmul.msk.f32.gmra.mxu0 %vm216_vm1, %v2610_v34 }
 0x24c   :  { %13302 = vst [vmem:[#allocation62_spill] sm:$0xff] %v10214_v31  ;;  %7921 = vmatmul.msk.f32.gmra.mxu1 %vm216_vm1, %v110_v44  ;;  %8001 = vmatmul.msk.f32.gmra.mxu2 %vm216_vm1, %v1954_v36  ;;  %v111_v44 = vld [vmem:[%s13229_s0 + $0x1e0] sm:$0xff] }
 0x24d   :  { %v1957_v36 = vld [vmem:[%s13229_s0 + $0x1da] sm:$0xff] }
 0x24e   :  { %8084 = vmatmul.msk.f32.gmra.mxu3 %vm216_vm1, %v1956_v50 }
 0x24f   :  { %v1696_v29 = vpop.f32.mrf.mxu2 }
 0x250   :  { %v1859_v14 = vadd.f32 %v1696_v29, %v1108_v63  ;;  %v10224_v21 = vpop.f32.mrf.mxu0  ;;  %v8192_v63 = vld [vmem:[%s13231_s2 + $0x14] sm:$0x7]  ;;  %v1111_v29 = vadd.f32 %v1110_v53, %v9304_v0  ;;  %v8441_v0 = vld [vmem:[%s13231_s2 + $0x20] sm:$0x7] }
 0x251   :  { %v1119_v34 = vpop.f32.mrf.mxu1  ;;  %v2366_v58 = vpop.f32.mrf.mxu3  ;;  %8193 = vmatpush.msk.msra.mxu1 %vm460_vm0, %v8192_v63  ;;  %v1958_v53 = vld [vmem:[%s13229_s0 + $0x1e2] sm:$0xff]  ;;  %8442 = vmatpush.msk.msra.mxu0 %vm460_vm0, %v8441_v0  ;;  %v1114_v63 = vadd.f32 %v1113_v16, %v9325_v9  ;;  %v1959_v9 = vld [vmem:[%s13229_s0 + $0x1ea] sm:$0xff]  ;;  %v1117_v16 = vadd.f32 %v1116_v25, %v9346_v24  ;;  %v1960_v24 = vld [vmem:[%s13229_s0 + $0x1f2] sm:$0xff] }
 0x252   :  { %v10232_v31 = vadd.f32 %v2366_v58, %v1859_v14  ;;  %v1120_v25 = vadd.f32 %v1119_v34, %v9367_v39  ;;  %v1961_v39 = vld [vmem:[%s13229_s0 + $0x1fa] sm:$0xff] }
 0x253   :  { %8152 = vmatmul.msk.f32.gmra.mxu0 %vm216_vm1, %v2611_v37 }
 0x254   :  { %13303 = vst [vmem:[#allocation63_spill] sm:$0xff] %v10232_v31  ;;  %7922 = vmatmul.msk.f32.gmra.mxu1 %vm216_vm1, %v111_v44  ;;  %8002 = vmatmul.msk.f32.gmra.mxu2 %vm216_vm1, %v1955_v43  ;;  %v2612_v43 = vld [vmem:[%s13229_s0 + $0x163] sm:$0xff] }
 0x256   :  { %8085 = vmatmul.msk.f32.gmra.mxu3 %vm216_vm1, %v1957_v36 }
 0x257   :  { %v1699_v14 = vpop.f32.mrf.mxu2 }
 0x258   :  { %v1860_v37 = vadd.f32 %v1699_v14, %v1111_v29  ;;  %v10254_v58 = vpop.f32.mrf.mxu0 }
 0x259   :  { %v1122_v44 = vpop.f32.mrf.mxu1  ;;  %v2369_v57 = vpop.f32.mrf.mxu3 }
 0x25a   :  { %v10262_v31 = vadd.f32 %v2369_v57, %v1860_v37  ;;  %v1123_v34 = vadd.f32 %v1122_v44, %v9388_v56  ;;  %v1962_v56 = vld [vmem:[%s13229_s0 + $0x202] sm:$0xff] }
 0x25b   :  { %8153 = vmatmul.msk.f32.gmra.mxu0 %vm216_vm1, %v2612_v43  ;;  %v2613_v43 = vld [vmem:[%s13229_s0 + $0x16b] sm:$0xff] }
 0x25c   :  { %13304 = vst [vmem:[#allocation64_spill] sm:$0xff] %v10262_v31  ;;  %7923 = vmatmul.msk.f32.gmra.mxu1 %vm216_vm1, %v112_v51  ;;  %8003 = vmatmul.msk.f32.gmra.mxu2 %vm216_vm1, %v1956_v50  ;;  %v113_v50 = vld [vmem:[%s13229_s0 + $0x1f0] sm:$0xff] }
 0x25e   :  { %8086 = vmatmul.msk.f32.gmra.mxu3 %vm216_vm1, %v1958_v53 }
 0x25f   :  { %v1702_v29 = vpop.f32.mrf.mxu2 }
 0x260   :  { %v1861_v14 = vadd.f32 %v1702_v29, %v1114_v63  ;;  %v10276_v37 = vpop.f32.mrf.mxu0 }
 0x261   :  { %v1125_v57 = vpop.f32.mrf.mxu1  ;;  %v2372_v31 = vpop.f32.mrf.mxu3 }
 0x262   :  { %v10284_v51 = vadd.f32 %v2372_v31, %v1861_v14  ;;  %v2614_v31 = vld [vmem:[%s13229_s0 + $0x173] sm:$0xff]  ;;  %v1126_v44 = vadd.f32 %v1125_v57, %v9409_v15  ;;  %v1963_v15 = vld [vmem:[%s13229_s0 + $0x20a] sm:$0xff] }
 0x263   :  { %8154 = vmatmul.msk.f32.gmra.mxu0 %vm216_vm1, %v2613_v43 }
 0x264   :  { %13305 = vst [vmem:[#allocation65_spill] sm:$0xff] %v10284_v51  ;;  %7924 = vmatmul.msk.f32.gmra.mxu1 %vm216_vm1, %v113_v50  ;;  %8004 = vmatmul.msk.f32.gmra.mxu2 %vm216_vm1, %v1957_v36  ;;  %v114_v50 = vld [vmem:[%s13229_s0 + $0x1f8] sm:$0xff] }
 0x266   :  { %8087 = vmatmul.msk.f32.gmra.mxu3 %vm216_vm1, %v1959_v9 }
 0x267   :  { %v1705_v0 = vpop.f32.mrf.mxu2 }
 0x268   :  { %v1862_v63 = vadd.f32 %v1705_v0, %v1117_v16  ;;  %v10294_v29 = vpop.f32.mrf.mxu0 }
 0x269   :  { %v1128_v14 = vpop.f32.mrf.mxu1  ;;  %v2375_v43 = vpop.f32.mrf.mxu3 }
 0x26a   :  { %v10302_v51 = vadd.f32 %v2375_v43, %v1862_v63  ;;  %v2615_v63 = vld [vmem:[%s13229_s0 + $0x17b] sm:$0xff]  ;;  %v1129_v57 = vadd.f32 %v1128_v14, %v9144_v10  ;;  %v1964_v10 = vld [vmem:[%s13229_s0 + $0x212] sm:$0xff] }
 0x26b   :  { %8155 = vmatmul.msk.f32.gmra.mxu0 %vm216_vm1, %v2614_v31 }
 0x26c   :  { %13306 = vst [vmem:[#allocation66_spill] sm:$0xff] %v10302_v51  ;;  %7925 = vmatmul.msk.f32.gmra.mxu1 %vm216_vm1, %v114_v50  ;;  %8005 = vmatmul.msk.f32.gmra.mxu2 %vm216_vm1, %v1958_v53  ;;  %v115_v50 = vld [vmem:[%s13229_s0 + $0x200] sm:$0xff] }
 0x26e   :  { %8088 = vmatmul.msk.f32.gmra.mxu3 %vm216_vm1, %v1960_v24 }
 0x26f   :  { %v1708_v36 = vpop.f32.mrf.mxu2 }
 0x270   :  { %v1863_v16 = vadd.f32 %v1708_v36, %v1120_v25  ;;  %v10312_v0 = vpop.f32.mrf.mxu0 }
 0x271   :  { %v1131_v31 = vpop.f32.mrf.mxu1  ;;  %v2378_v43 = vpop.f32.mrf.mxu3 }
 0x272   :  { %v10320_v51 = vadd.f32 %v2378_v43, %v1863_v16  ;;  %v2616_v16 = vld [vmem:[%s13229_s0 + $0x183] sm:$0xff]  ;;  %v1132_v14 = vadd.f32 %v1131_v31, %v9168_v18  ;;  %v1965_v18 = vld [vmem:[%s13229_s0 + $0x21a] sm:$0xff] }
 0x273   :  { %8156 = vmatmul.msk.f32.gmra.mxu0 %vm216_vm1, %v2615_v63 }
 0x274   :  { %13307 = vst [vmem:[#allocation67_spill] sm:$0xff] %v10320_v51  ;;  %7926 = vmatmul.msk.f32.gmra.mxu1 %vm216_vm1, %v115_v50  ;;  %8006 = vmatmul.msk.f32.gmra.mxu2 %vm216_vm1, %v1959_v9  ;;  %v116_v50 = vld [vmem:[%s13229_s0 + $0x208] sm:$0xff] }
 0x276   :  { %8089 = vmatmul.msk.f32.gmra.mxu3 %vm216_vm1, %v1961_v39 }
 0x277   :  { %v1711_v53 = vpop.f32.mrf.mxu2 }
 0x278   :  { %v1864_v25 = vadd.f32 %v1711_v53, %v1123_v34  ;;  %v10330_v36 = vpop.f32.mrf.mxu0 }
 0x279   :  { %v1134_v63 = vpop.f32.mrf.mxu1  ;;  %v2381_v43 = vpop.f32.mrf.mxu3 }
 0x27a   :  { %v10338_v51 = vadd.f32 %v2381_v43, %v1864_v25  ;;  %v2617_v25 = vld [vmem:[%s13229_s0 + $0x18b] sm:$0xff]  ;;  %v1135_v31 = vadd.f32 %v1134_v63, %v9192_v26  ;;  %v1966_v26 = vld [vmem:[%s13229_s0 + $0x222] sm:$0xff] }
 0x27b   :  { %8157 = vmatmul.msk.f32.gmra.mxu0 %vm216_vm1, %v2616_v16 }
 0x27c   :  { %13308 = vst [vmem:[#allocation68_spill] sm:$0xff] %v10338_v51  ;;  %7927 = vmatmul.msk.f32.gmra.mxu1 %vm216_vm1, %v116_v50  ;;  %8007 = vmatmul.msk.f32.gmra.mxu2 %vm216_vm1, %v1960_v24  ;;  %v117_v50 = vld [vmem:[%s13229_s0 + $0x210] sm:$0xff] }
 0x27e   :  { %8090 = vmatmul.msk.f32.gmra.mxu3 %vm216_vm1, %v1962_v56 }
 0x27f   :  { %v1714_v9 = vpop.f32.mrf.mxu2 }
 0x280   :  { %v1865_v34 = vadd.f32 %v1714_v9, %v1126_v44  ;;  %v10348_v53 = vpop.f32.mrf.mxu0 }
 0x281   :  { %13309 = vst [vmem:[#allocation69_spill] sm:$0xff] %v10348_v53  ;;  %v1137_v16 = vpop.f32.mrf.mxu1  ;;  %v2384_v43 = vpop.f32.mrf.mxu3 }
 0x282   :  { %v10356_v51 = vadd.f32 %v2384_v43, %v1865_v34  ;;  %v2618_v34 = vld [vmem:[%s13229_s0 + $0x193] sm:$0xff]  ;;  %v1138_v63 = vadd.f32 %v1137_v16, %v9213_v33  ;;  %v1967_v33 = vld [vmem:[%s13229_s0 + $0x22a] sm:$0xff] }
 0x283   :  { %8158 = vmatmul.msk.f32.gmra.mxu0 %vm216_vm1, %v2617_v25 }
 0x284   :  { %13310 = vst [vmem:[#allocation70_spill] sm:$0xff] %v10356_v51  ;;  %7928 = vmatmul.msk.f32.gmra.mxu1 %vm216_vm1, %v117_v50  ;;  %8008 = vmatmul.msk.f32.gmra.mxu2 %vm216_vm1, %v1961_v39  ;;  %v118_v50 = vld [vmem:[%s13229_s0 + $0x218] sm:$0xff] }
 0x286   :  { %8091 = vmatmul.msk.f32.gmra.mxu3 %vm216_vm1, %v1963_v15 }
 0x287   :  { %v1717_v24 = vpop.f32.mrf.mxu2 }
 0x288   :  { %v1866_v44 = vadd.f32 %v1717_v24, %v1129_v57  ;;  %v10366_v9 = vpop.f32.mrf.mxu0 }
 0x289   :  { %v1140_v25 = vpop.f32.mrf.mxu1  ;;  %v2387_v43 = vpop.f32.mrf.mxu3 }
 0x28a   :  { %v10374_v51 = vadd.f32 %v2387_v43, %v1866_v44  ;;  %v2619_v44 = vld [vmem:[%s13229_s0 + $0x19b] sm:$0xff]  ;;  %v1141_v16 = vadd.f32 %v1140_v25, %v9234_v40  ;;  %v1968_v40 = vld [vmem:[%s13229_s0 + $0x232] sm:$0xff] }
 0x28b   :  { %8159 = vmatmul.msk.f32.gmra.mxu0 %vm216_vm1, %v2618_v34 }
 0x28c   :  { %13311 = vst [vmem:[#allocation71_spill] sm:$0xff] %v10374_v51  ;;  %7929 = vmatmul.msk.f32.gmra.mxu1 %vm216_vm1, %v118_v50  ;;  %8009 = vmatmul.msk.f32.gmra.mxu2 %vm216_vm1, %v1962_v56  ;;  %v119_v50 = vld [vmem:[%s13229_s0 + $0x220] sm:$0xff] }
 0x28e   :  { %8092 = vmatmul.msk.f32.gmra.mxu3 %vm216_vm1, %v1964_v10 }
 0x28f   :  { %v1720_v39 = vpop.f32.mrf.mxu2 }
 0x290   :  { %v1867_v57 = vadd.f32 %v1720_v39, %v1132_v14  ;;  %v10384_v24 = vpop.f32.mrf.mxu0 }
 0x291   :  { %v1143_v34 = vpop.f32.mrf.mxu1  ;;  %v2390_v43 = vpop.f32.mrf.mxu3 }
 0x292   :  { %v10392_v51 = vadd.f32 %v2390_v43, %v1867_v57  ;;  %v2620_v57 = vld [vmem:[%s13229_s0 + $0x1a3] sm:$0xff]  ;;  %v1144_v25 = vadd.f32 %v1143_v34, %v9255_v47  ;;  %v1969_v47 = vld [vmem:[%s13229_s0 + $0x23a] sm:$0xff] }
 0x293   :  { %8160 = vmatmul.msk.f32.gmra.mxu0 %vm216_vm1, %v2619_v44 }
 0x294   :  { %13312 = vst [vmem:[#allocation72_spill] sm:$0xff] %v10392_v51  ;;  %7930 = vmatmul.msk.f32.gmra.mxu1 %vm216_vm1, %v119_v50  ;;  %8010 = vmatmul.msk.f32.gmra.mxu2 %vm216_vm1, %v1963_v15  ;;  %v120_v50 = vld [vmem:[%s13229_s0 + $0x228] sm:$0xff] }
 0x296   :  { %8093 = vmatmul.msk.f32.gmra.mxu3 %vm216_vm1, %v1965_v18 }
 0x297   :  { %v1723_v56 = vpop.f32.mrf.mxu2 }
 0x298   :  { %v1868_v14 = vadd.f32 %v1723_v56, %v1135_v31  ;;  %v10402_v39 = vpop.f32.mrf.mxu0 }
 0x299   :  { %v1146_v44 = vpop.f32.mrf.mxu1  ;;  %v2393_v43 = vpop.f32.mrf.mxu3 }
 0x29a   :  { %v10410_v51 = vadd.f32 %v2393_v43, %v1868_v14  ;;  %v2621_v14 = vld [vmem:[%s13229_s0 + $0x1ab] sm:$0xff]  ;;  %v1147_v34 = vadd.f32 %v1146_v44, %v9276_v54  ;;  %v1970_v54 = vld [vmem:[%s13229_s0 + $0x242] sm:$0xff] }
 0x29b   :  { %8161 = vmatmul.msk.f32.gmra.mxu0 %vm216_vm1, %v2620_v57 }
 0x29c   :  { %13313 = vst [vmem:[#allocation73_spill] sm:$0xff] %v10410_v51  ;;  %7931 = vmatmul.msk.f32.gmra.mxu1 %vm216_vm1, %v120_v50  ;;  %8011 = vmatmul.msk.f32.gmra.mxu2 %vm216_vm1, %v1964_v10  ;;  %v121_v50 = vld [vmem:[%s13229_s0 + $0x230] sm:$0xff] }
 0x29e   :  { %8094 = vmatmul.msk.f32.gmra.mxu3 %vm216_vm1, %v1966_v26 }
 0x29f   :  { %v1726_v15 = vpop.f32.mrf.mxu2 }
 0x2a0   :  { %v1869_v31 = vadd.f32 %v1726_v15, %v1138_v63  ;;  %v10420_v56 = vpop.f32.mrf.mxu0 }
 0x2a1   :  { %v1149_v57 = vpop.f32.mrf.mxu1  ;;  %v2396_v43 = vpop.f32.mrf.mxu3 }
 0x2a2   :  { %v10428_v51 = vadd.f32 %v2396_v43, %v1869_v31  ;;  %v2622_v31 = vld [vmem:[%s13229_s0 + $0x1b3] sm:$0xff]  ;;  %v1150_v44 = vadd.f32 %v1149_v57, %v9297_v61  ;;  %v1971_v61 = vld [vmem:[%s13229_s0 + $0x24a] sm:$0xff] }
 0x2a3   :  { %8162 = vmatmul.msk.f32.gmra.mxu0 %vm216_vm1, %v2621_v14 }
 0x2a4   :  { %13314 = vst [vmem:[#allocation74_spill] sm:$0xff] %v10428_v51  ;;  %7932 = vmatmul.msk.f32.gmra.mxu1 %vm216_vm1, %v121_v50  ;;  %8012 = vmatmul.msk.f32.gmra.mxu2 %vm216_vm1, %v1965_v18  ;;  %v122_v50 = vld [vmem:[%s13229_s0 + $0x238] sm:$0xff] }
 0x2a6   :  { %8095 = vmatmul.msk.f32.gmra.mxu3 %vm216_vm1, %v1967_v33 }
 0x2a7   :  { %v1729_v10 = vpop.f32.mrf.mxu2 }
 0x2a8   :  { %v1870_v63 = vadd.f32 %v1729_v10, %v1141_v16  ;;  %v10438_v15 = vpop.f32.mrf.mxu0 }
 0x2a9   :  { %v1152_v14 = vpop.f32.mrf.mxu1  ;;  %v2399_v43 = vpop.f32.mrf.mxu3 }
 0x2aa   :  { %v10446_v51 = vadd.f32 %v2399_v43, %v1870_v63  ;;  %v2623_v63 = vld [vmem:[%s13229_s0 + $0x1bb] sm:$0xff]  ;;  %v1153_v57 = vadd.f32 %v1152_v14, %v9318_v5  ;;  %v1972_v5 = vld [vmem:[%s13229_s0 + $0x252] sm:$0xff] }
 0x2ab   :  { %8163 = vmatmul.msk.f32.gmra.mxu0 %vm216_vm1, %v2622_v31 }
 0x2ac   :  { %13315 = vst [vmem:[#allocation75_spill] sm:$0xff] %v10446_v51  ;;  %7933 = vmatmul.msk.f32.gmra.mxu1 %vm216_vm1, %v122_v50  ;;  %8013 = vmatmul.msk.f32.gmra.mxu2 %vm216_vm1, %v1966_v26  ;;  %v123_v50 = vld [vmem:[%s13229_s0 + $0x240] sm:$0xff] }
 0x2ae   :  { %8096 = vmatmul.msk.f32.gmra.mxu3 %vm216_vm1, %v1968_v40 }
 0x2af   :  { %v1732_v18 = vpop.f32.mrf.mxu2 }
 0x2b0   :  { %v1871_v16 = vadd.f32 %v1732_v18, %v1144_v25  ;;  %v10456_v10 = vpop.f32.mrf.mxu0 }
 0x2b1   :  { %v1155_v31 = vpop.f32.mrf.mxu1  ;;  %v2402_v43 = vpop.f32.mrf.mxu3 }
 0x2b2   :  { %v10464_v51 = vadd.f32 %v2402_v43, %v1871_v16  ;;  %v2624_v16 = vld [vmem:[%s13229_s0 + $0x1c3] sm:$0xff]  ;;  %v1156_v14 = vadd.f32 %v1155_v31, %v9339_v17  ;;  %v1973_v17 = vld [vmem:[%s13229_s0 + $0x25a] sm:$0xff] }
 0x2b3   :  { %8164 = vmatmul.msk.f32.gmra.mxu0 %vm216_vm1, %v2623_v63 }
 0x2b4   :  { %13316 = vst [vmem:[#allocation76_spill] sm:$0xff] %v10464_v51  ;;  %7934 = vmatmul.msk.f32.gmra.mxu1 %vm216_vm1, %v123_v50  ;;  %8014 = vmatmul.msk.f32.gmra.mxu2 %vm216_vm1, %v1967_v33  ;;  %v124_v50 = vld [vmem:[%s13229_s0 + $0x248] sm:$0xff] }
 0x2b6   :  { %8097 = vmatmul.msk.f32.gmra.mxu3 %vm216_vm1, %v1969_v47 }
 0x2b7   :  { %v1735_v26 = vpop.f32.mrf.mxu2 }
 0x2b8   :  { %v1872_v25 = vadd.f32 %v1735_v26, %v1147_v34  ;;  %v10474_v18 = vpop.f32.mrf.mxu0 }
 0x2b9   :  { %v1158_v63 = vpop.f32.mrf.mxu1  ;;  %v2405_v43 = vpop.f32.mrf.mxu3 }
 0x2ba   :  { %v10482_v51 = vadd.f32 %v2405_v43, %v1872_v25  ;;  %v2625_v25 = vld [vmem:[%s13229_s0 + $0x1cb] sm:$0xff]  ;;  %v1159_v31 = vadd.f32 %v1158_v63, %v9360_v32  ;;  %v1974_v32 = vld [vmem:[%s13229_s0 + $0x262] sm:$0xff] }
 0x2bb   :  { %8165 = vmatmul.msk.f32.gmra.mxu0 %vm216_vm1, %v2624_v16 }
 0x2bc   :  { %13317 = vst [vmem:[#allocation77_spill] sm:$0xff] %v10482_v51  ;;  %7935 = vmatmul.msk.f32.gmra.mxu1 %vm216_vm1, %v124_v50  ;;  %8015 = vmatmul.msk.f32.gmra.mxu2 %vm216_vm1, %v1968_v40  ;;  %v125_v50 = vld [vmem:[%s13229_s0 + $0x250] sm:$0xff] }
 0x2be   :  { %8098 = vmatmul.msk.f32.gmra.mxu3 %vm216_vm1, %v1970_v54 }
 0x2bf   :  { %v1738_v33 = vpop.f32.mrf.mxu2 }
 0x2c0   :  { %v1873_v34 = vadd.f32 %v1738_v33, %v1150_v44  ;;  %v10492_v26 = vpop.f32.mrf.mxu0 }
 0x2c1   :  { %v1161_v16 = vpop.f32.mrf.mxu1  ;;  %v2408_v43 = vpop.f32.mrf.mxu3 }
 0x2c2   :  { %v10500_v51 = vadd.f32 %v2408_v43, %v1873_v34  ;;  %v2626_v34 = vld [vmem:[%s13229_s0 + $0x1d3] sm:$0xff]  ;;  %v1162_v63 = vadd.f32 %v1161_v16, %v9381_v49  ;;  %v1975_v49 = vld [vmem:[%s13229_s0 + $0x26a] sm:$0xff] }
 0x2c3   :  { %8166 = vmatmul.msk.f32.gmra.mxu0 %vm216_vm1, %v2625_v25 }
 0x2c4   :  { %13318 = vst [vmem:[#allocation78_spill] sm:$0xff] %v10500_v51  ;;  %7936 = vmatmul.msk.f32.gmra.mxu1 %vm216_vm1, %v125_v50  ;;  %8016 = vmatmul.msk.f32.gmra.mxu2 %vm216_vm1, %v1969_v47  ;;  %v126_v50 = vld [vmem:[%s13229_s0 + $0x258] sm:$0xff] }
 0x2c6   :  { %8099 = vmatmul.msk.f32.gmra.mxu3 %vm216_vm1, %v1971_v61 }
 0x2c7   :  { %v1741_v40 = vpop.f32.mrf.mxu2 }
 0x2c8   :  { %v1874_v44 = vadd.f32 %v1741_v40, %v1153_v57  ;;  %v10510_v33 = vpop.f32.mrf.mxu0 }
 0x2c9   :  { %v1164_v25 = vpop.f32.mrf.mxu1  ;;  %v2411_v43 = vpop.f32.mrf.mxu3 }
 0x2ca   :  { %v10518_v51 = vadd.f32 %v2411_v43, %v1874_v44  ;;  %v2627_v44 = vld [vmem:[%s13229_s0 + $0x1db] sm:$0xff]  ;;  %v1165_v16 = vadd.f32 %v1164_v25, %v9402_v2  ;;  %v1976_v2 = vld [vmem:[%s13229_s0 + $0x272] sm:$0xff] }
 0x2cb   :  { %8167 = vmatmul.msk.f32.gmra.mxu0 %vm216_vm1, %v2626_v34 }
 0x2cc   :  { %13319 = vst [vmem:[#allocation79_spill] sm:$0xff] %v10518_v51  ;;  %7937 = vmatmul.msk.f32.gmra.mxu1 %vm216_vm1, %v126_v50  ;;  %8017 = vmatmul.msk.f32.gmra.mxu2 %vm216_vm1, %v1970_v54  ;;  %v127_v50 = vld [vmem:[%s13229_s0 + $0x260] sm:$0xff] }
 0x2ce   :  { %8100 = vmatmul.msk.f32.gmra.mxu3 %vm216_vm1, %v1972_v5 }
 0x2cf   :  { %v1744_v47 = vpop.f32.mrf.mxu2 }
 0x2d0   :  { %v1875_v57 = vadd.f32 %v1744_v47, %v1156_v14  ;;  %v10528_v40 = vpop.f32.mrf.mxu0 }
 0x2d1   :  { %v1167_v34 = vpop.f32.mrf.mxu1  ;;  %v2414_v43 = vpop.f32.mrf.mxu3 }
 0x2d2   :  { %v10536_v51 = vadd.f32 %v2414_v43, %v1875_v57  ;;  %v2628_v57 = vld [vmem:[%s13229_s0 + $0x1e3] sm:$0xff]  ;;  %v1168_v25 = vadd.f32 %v1167_v34, %v9427_v38  ;;  %v1977_v38 = vld [vmem:[%s13229_s0 + $0x27a] sm:$0xff] }
 0x2d3   :  { %8168 = vmatmul.msk.f32.gmra.mxu0 %vm216_vm1, %v2627_v44 }
 0x2d4   :  { %13320 = vst [vmem:[#allocation80_spill] sm:$0xff] %v10536_v51  ;;  %7938 = vmatmul.msk.f32.gmra.mxu1 %vm216_vm1, %v127_v50  ;;  %8018 = vmatmul.msk.f32.gmra.mxu2 %vm216_vm1, %v1971_v61  ;;  %v128_v50 = vld [vmem:[%s13229_s0 + $0x268] sm:$0xff] }
 0x2d6   :  { %8101 = vmatmul.msk.f32.gmra.mxu3 %vm216_vm1, %v1973_v17 }
 0x2d7   :  { %v1747_v54 = vpop.f32.mrf.mxu2 }
 0x2d8   :  { %v1876_v14 = vadd.f32 %v1747_v54, %v1159_v31  ;;  %v10546_v47 = vpop.f32.mrf.mxu0 }
 0x2d9   :  { %v1170_v44 = vpop.f32.mrf.mxu1  ;;  %v2417_v43 = vpop.f32.mrf.mxu3 }
 0x2da   :  { %v10554_v51 = vadd.f32 %v2417_v43, %v1876_v14  ;;  %v2629_v14 = vld [vmem:[%s13229_s0 + $0x1eb] sm:$0xff]  ;;  %v1171_v34 = vadd.f32 %v1170_v44, %v9446_v28  ;;  %v1978_v28 = vld [vmem:[%s13229_s0 + $0x282] sm:$0xff] }
 0x2db   :  { %8169 = vmatmul.msk.f32.gmra.mxu0 %vm216_vm1, %v2628_v57 }
 0x2dc   :  { %13321 = vst [vmem:[#allocation81_spill] sm:$0xff] %v10554_v51  ;;  %7939 = vmatmul.msk.f32.gmra.mxu1 %vm216_vm1, %v128_v50  ;;  %8019 = vmatmul.msk.f32.gmra.mxu2 %vm216_vm1, %v1972_v5  ;;  %v129_v50 = vld [vmem:[%s13229_s0 + $0x270] sm:$0xff] }
 0x2de   :  { %8102 = vmatmul.msk.f32.gmra.mxu3 %vm216_vm1, %v1974_v32 }
 0x2df   :  { %v1750_v61 = vpop.f32.mrf.mxu2 }
 0x2e0   :  { %v1877_v31 = vadd.f32 %v1750_v61, %v1162_v63  ;;  %v10564_v54 = vpop.f32.mrf.mxu0 }
 0x2e1   :  { %v1173_v57 = vpop.f32.mrf.mxu1  ;;  %v2420_v43 = vpop.f32.mrf.mxu3 }
 0x2e2   :  { %v10572_v51 = vadd.f32 %v2420_v43, %v1877_v31  ;;  %v2630_v31 = vld [vmem:[%s13229_s0 + $0x1f3] sm:$0xff]  ;;  %v1174_v44 = vadd.f32 %v1173_v57, %v9465_v23  ;;  %v1979_v23 = vld [vmem:[%s13229_s0 + $0x28a] sm:$0xff] }
 0x2e3   :  { %8170 = vmatmul.msk.f32.gmra.mxu0 %vm216_vm1, %v2629_v14  ;;  %v13331_v57 = vld [vmem:[#allocation21_spill] sm:$0xff] }
 0x2e4   :  { %13322 = vst [vmem:[#allocation82_spill] sm:$0xff] %v10572_v51  ;;  %7940 = vmatmul.msk.f32.gmra.mxu1 %vm216_vm1, %v129_v50  ;;  %8020 = vmatmul.msk.f32.gmra.mxu2 %vm216_vm1, %v1973_v17  ;;  %v130_v50 = vld [vmem:[%s13229_s0 + $0x278] sm:$0xff] }
 0x2e6   :  { %8103 = vmatmul.msk.f32.gmra.mxu3 %vm216_vm1, %v1975_v49 }
 0x2e7   :  { %v1753_v5 = vpop.f32.mrf.mxu2 }
 0x2e8   :  { %v1878_v63 = vadd.f32 %v1753_v5, %v1165_v16  ;;  %v10582_v61 = vpop.f32.mrf.mxu0 }
 0x2e9   :  { %13323 = vst [vmem:[#allocation83_spill] sm:$0xff] %v10582_v61  ;;  %v1176_v14 = vpop.f32.mrf.mxu1  ;;  %v2423_v43 = vpop.f32.mrf.mxu3 }
 0x2ea   :  { %v10590_v51 = vadd.f32 %v2423_v43, %v1878_v63  ;;  %v2631_v63 = vld [vmem:[%s13229_s0 + $0x1fb] sm:$0xff] }
 0x2eb   :  { %8171 = vmatmul.msk.f32.gmra.mxu0 %vm216_vm1, %v2630_v31 }
 0x2ec   :  { %13324 = vst [vmem:[#allocation84_spill] sm:$0xff] %v10590_v51  ;;  %7941 = vmatmul.msk.f32.gmra.mxu1 %vm216_vm1, %v130_v50  ;;  %8021 = vmatmul.msk.f32.gmra.mxu2 %vm216_vm1, %v1974_v32  ;;  %v131_v50 = vld [vmem:[%s13229_s0 + $0x280] sm:$0xff] }
 0x2ee   :  { %8104 = vmatmul.msk.f32.gmra.mxu3 %vm216_vm1, %v1976_v2 }
 0x2ef   :  { %v1756_v17 = vpop.f32.mrf.mxu2 }
 0x2f0   :  { %v1879_v16 = vadd.f32 %v1756_v17, %v1168_v25  ;;  %v10600_v5 = vpop.f32.mrf.mxu0 }
 0x2f1   :  { %13325 = vst [vmem:[#allocation85_spill] sm:$0xff] %v10600_v5  ;;  %v1179_v31 = vpop.f32.mrf.mxu1  ;;  %v2426_v43 = vpop.f32.mrf.mxu3 }
 0x2f2   :  { %v10608_v51 = vadd.f32 %v2426_v43, %v1879_v16  ;;  %v2632_v16 = vld [vmem:[%s13229_s0 + $0x203] sm:$0xff] }
 0x2f3   :  { %8172 = vmatmul.msk.f32.gmra.mxu0 %vm216_vm1, %v2631_v63 }
 0x2f4   :  { %13326 = vst [vmem:[#allocation86_spill] sm:$0xff] %v10608_v51  ;;  %7942 = vmatmul.msk.f32.gmra.mxu1 %vm216_vm1, %v131_v50  ;;  %8022 = vmatmul.msk.f32.gmra.mxu2 %vm216_vm1, %v1975_v49  ;;  %v3240_v50 = vld [vmem:[%s13229_s0 + $0x14] sm:$0xff] }
 0x2f6   :  { %8105 = vmatmul.msk.f32.gmra.mxu3 %vm216_vm1, %v1977_v38 }
 0x2f7   :  { %v1759_v32 = vpop.f32.mrf.mxu2 }
 0x2f8   :  { %v1880_v25 = vadd.f32 %v1759_v32, %v1171_v34  ;;  %v10618_v17 = vpop.f32.mrf.mxu0 }
 0x2f9   :  { %13327 = vst [vmem:[#allocation87_spill] sm:$0xff] %v10618_v17  ;;  %v1182_v63 = vpop.f32.mrf.mxu1  ;;  %v2429_v43 = vpop.f32.mrf.mxu3 }
 0x2fa   :  { %v10626_v51 = vadd.f32 %v2429_v43, %v1880_v25  ;;  %v2633_v25 = vld [vmem:[%s13229_s0 + $0x20b] sm:$0xff] }
 0x2fb   :  { %8173 = vmatmul.msk.f32.gmra.mxu0 %vm216_vm1, %v2632_v16 }
 0x2fc   :  { %13328 = vst [vmem:[#allocation88_spill] sm:$0xff] %v10626_v51  ;;  %8023 = vmatmul.msk.f32.gmra.mxu2 %vm216_vm1, %v1976_v2  ;;  %8194 = vmatmul.msk.f32.vlgmr.msra.gmra.mxu1 %vm216_vm1, %v3240_v50  ;;  %v3241_v2 = vld [vmem:[%s13229_s0 + $0x1c] sm:$0xff]  ;;  %v1177_v50 = vadd.f32 %v1176_v14, %v13331_v57  ;;  %v1980_v14 = vld [vmem:[%s13229_s0 + $0x292] sm:$0xff] }
 0x2fe   :  { %8106 = vmatmul.msk.f32.gmra.mxu3 %vm216_vm1, %v1978_v28 }
 0x2ff   :  { %v1762_v49 = vpop.f32.mrf.mxu2 }
 0x300   :  { %v1881_v34 = vadd.f32 %v1762_v49, %v1174_v44  ;;  %v10636_v32 = vpop.f32.mrf.mxu0 }
 0x301   :  { %13329 = vst [vmem:[#allocation89_spill] sm:$0xff] %v10636_v32  ;;  %v1185_v16 = vpop.f32.mrf.mxu1  ;;  %v2432_v43 = vpop.f32.mrf.mxu3 }
 0x302   :  { %v10644_v51 = vadd.f32 %v2432_v43, %v1881_v34  ;;  %v2634_v34 = vld [vmem:[%s13229_s0 + $0x213] sm:$0xff] }
 0x303   :  { %8174 = vmatmul.msk.f32.gmra.mxu0 %vm216_vm1, %v2633_v25 }
 0x304   :  { %13330 = vst [vmem:[#allocation90_spill] sm:$0xff] %v10644_v51  ;;  %8024 = vmatmul.msk.f32.gmra.mxu2 %vm216_vm1, %v1977_v38  ;;  %8195 = vmatmul.msk.f32.gmra.mxu1 %vm216_vm1, %v3241_v2  ;;  %v3242_v38 = vld [vmem:[%s13229_s0 + $0x24] sm:$0xff]  ;;  %v13334_v2 = vld [vmem:[#allocation5_spill] sm:$0xff] }
 0x306   :  { %8107 = vmatmul.msk.f32.gmra.mxu3 %vm216_vm1, %v1979_v23  ;;  %v1180_v23 = vadd.f32 %v1179_v31, %v13334_v2  ;;  %v4580_v31 = vld [vmem:[%s13229_s0 + $0x25] sm:$0xff] }
 0x307   :  { %v1765_v44 = vpop.f32.mrf.mxu2 }
 0x308   :  { %v1882_v49 = vadd.f32 %v1765_v44, %v1177_v50  ;;  %v10654_v32 = vpop.f32.mrf.mxu0 }
 0x309   :  { %13332 = vst [vmem:[#allocation21_spill] sm:$0xff] %v10654_v32  ;;  %v1188_v25 = vpop.f32.mrf.mxu1  ;;  %v2435_v43 = vpop.f32.mrf.mxu3 }
 0x30a   :  { %v10662_v51 = vadd.f32 %v2435_v43, %v1882_v49  ;;  %v2635_v49 = vld [vmem:[%s13229_s0 + $0x21b] sm:$0xff] }
 0x30b   :  { %8175 = vmatmul.msk.f32.gmra.mxu0 %vm216_vm1, %v2634_v34 }
 0x30c   :  { %13333 = vst [vmem:[#allocation91_spill] sm:$0xff] %v10662_v51  ;;  %8025 = vmatmul.msk.f32.gmra.mxu2 %vm216_vm1, %v1978_v28  ;;  %8196 = vmatmul.msk.f32.gmra.mxu1 %vm216_vm1, %v3242_v38  ;;  %v3243_v28 = vld [vmem:[%s13229_s0 + $0x2c] sm:$0xff] }
 0x30e   :  { %8108 = vmatmul.msk.f32.gmra.mxu3 %vm216_vm1, %v1980_v14  ;;  %v13337_v14 = vld [vmem:[#allocation6_spill] sm:$0xff] }
 0x30f   :  { %v1768_v57 = vpop.f32.mrf.mxu2  ;;  %v1183_v2 = vadd.f32 %v1182_v63, %v13337_v14  ;;  %v4581_v63 = vld [vmem:[%s13229_s0 + $0x2d] sm:$0xff] }
 0x310   :  { %v1883_v50 = vadd.f32 %v1768_v57, %v1180_v23  ;;  %v10672_v44 = vpop.f32.mrf.mxu0 }
 0x311   :  { %13335 = vst [vmem:[#allocation5_spill] sm:$0xff] %v10672_v44  ;;  %v1191_v34 = vpop.f32.mrf.mxu1  ;;  %v2438_v43 = vpop.f32.mrf.mxu3 }
 0x312   :  { %v10680_v51 = vadd.f32 %v2438_v43, %v1883_v50  ;;  %v2636_v50 = vld [vmem:[%s13229_s0 + $0x223] sm:$0xff] }
 0x313   :  { %8176 = vmatmul.msk.f32.gmra.mxu0 %vm216_vm1, %v2635_v49 }
 0x314   :  { %13336 = vst [vmem:[#allocation92_spill] sm:$0xff] %v10680_v51  ;;  %8197 = vmatmul.msk.f32.gmra.mxu1 %vm216_vm1, %v3243_v28  ;;  %8277 = vmatmul.msk.f32.vlgmr.msra.gmra.mxu2 %vm216_vm1, %v3242_v38  ;;  %v3244_v51 = vld [vmem:[%s13229_s0 + $0x34] sm:$0xff]  ;;  %v13340_v38 = vld [vmem:[#allocation7_spill] sm:$0xff] }
 0x316   :  { %8360 = vmatmul.msk.f32.vlgmr.msra.gmra.mxu3 %vm216_vm1, %v4580_v31  ;;  %v1186_v31 = vadd.f32 %v1185_v16, %v13340_v38  ;;  %v4582_v16 = vld [vmem:[%s13229_s0 + $0x35] sm:$0xff] }
 0x317   :  { %v1771_v23 = vpop.f32.mrf.mxu2 }
 0x318   :  { %v1884_v57 = vadd.f32 %v1771_v23, %v1183_v2  ;;  %v10690_v44 = vpop.f32.mrf.mxu0 }
 0x319   :  { %13338 = vst [vmem:[#allocation6_spill] sm:$0xff] %v10690_v44  ;;  %v1194_v49 = vpop.f32.mrf.mxu1  ;;  %v2441_v43 = vpop.f32.mrf.mxu3 }
 0x31a   :  { %v10698_v32 = vadd.f32 %v2441_v43, %v1884_v57  ;;  %v2637_v57 = vld [vmem:[%s13229_s0 + $0x22b] sm:$0xff] }
 0x31b   :  { %8177 = vmatmul.msk.f32.gmra.mxu0 %vm216_vm1, %v2636_v50 }
 0x31c   :  { %13339 = vst [vmem:[#allocation93_spill] sm:$0xff] %v10698_v32  ;;  %8198 = vmatmul.msk.f32.gmra.mxu1 %vm216_vm1, %v3244_v51  ;;  %8278 = vmatmul.msk.f32.gmra.mxu2 %vm216_vm1, %v3243_v28  ;;  %v3245_v32 = vld [vmem:[%s13229_s0 + $0x3c] sm:$0xff]  ;;  %v13343_v28 = vld [vmem:[#allocation8_spill] sm:$0xff] }
 0x31e   :  { %8361 = vmatmul.msk.f32.gmra.mxu3 %vm216_vm1, %v4581_v63  ;;  %v1189_v63 = vadd.f32 %v1188_v25, %v13343_v28  ;;  %v13346_v25 = vld [vmem:[#allocation9_spill] sm:$0xff] }
 0x31f   :  { %v1774_v14 = vpop.f32.mrf.mxu2 }
 0x320   :  { %v1885_v2 = vadd.f32 %v1774_v14, %v1186_v31  ;;  %v10708_v23 = vpop.f32.mrf.mxu0 }
 0x321   :  { %13341 = vst [vmem:[#allocation7_spill] sm:$0xff] %v10708_v23  ;;  %v1197_v50 = vpop.f32.mrf.mxu1  ;;  %v2444_v43 = vpop.f32.mrf.mxu3 }
 0x322   :  { %v10716_v44 = vadd.f32 %v2444_v43, %v1885_v2  ;;  %v2638_v2 = vld [vmem:[%s13229_s0 + $0x233] sm:$0xff] }
 0x323   :  { %8178 = vmatmul.msk.f32.gmra.mxu0 %vm216_vm1, %v2637_v57 }
 0x324   :  { %13342 = vst [vmem:[#allocation94_spill] sm:$0xff] %v10716_v44  ;;  %8199 = vmatmul.msk.f32.gmra.mxu1 %vm216_vm1, %v3245_v32  ;;  %8279 = vmatmul.msk.f32.gmra.mxu2 %vm216_vm1, %v3244_v51  ;;  %v3246_v44 = vld [vmem:[%s13229_s0 + $0x44] sm:$0xff] }
 0x325   :  { %v4583_v51 = vld [vmem:[%s13229_s0 + $0x3d] sm:$0xff] }
 0x326   :  { %8362 = vmatmul.msk.f32.gmra.mxu3 %vm216_vm1, %v4582_v16  ;;  %v1192_v16 = vadd.f32 %v1191_v34, %v13346_v25  ;;  %v13349_v34 = vld [vmem:[#allocation10_spill] sm:$0xff] }
 0x327   :  { %v1777_v38 = vpop.f32.mrf.mxu2 }
 0x328   :  { %v1886_v31 = vadd.f32 %v1777_v38, %v1189_v63  ;;  %v10726_v14 = vpop.f32.mrf.mxu0 }
 0x329   :  { %13344 = vst [vmem:[#allocation8_spill] sm:$0xff] %v10726_v14  ;;  %v1200_v57 = vpop.f32.mrf.mxu1  ;;  %v2447_v43 = vpop.f32.mrf.mxu3 }
 0x32a   :  { %v10734_v23 = vadd.f32 %v2447_v43, %v1886_v31  ;;  %v2639_v31 = vld [vmem:[%s13229_s0 + $0x23b] sm:$0xff] }
 0x32b   :  { %8179 = vmatmul.msk.f32.gmra.mxu0 %vm216_vm1, %v2638_v2 }
 0x32c   :  { %13345 = vst [vmem:[#allocation95_spill] sm:$0xff] %v10734_v23  ;;  %8200 = vmatmul.msk.f32.gmra.mxu1 %vm216_vm1, %v3246_v44  ;;  %8280 = vmatmul.msk.f32.gmra.mxu2 %vm216_vm1, %v3245_v32  ;;  %v3247_v23 = vld [vmem:[%s13229_s0 + $0x4c] sm:$0xff] }
 0x32d   :  { %v4584_v32 = vld [vmem:[%s13229_s0 + $0x45] sm:$0xff] }
 0x32e   :  { %8363 = vmatmul.msk.f32.gmra.mxu3 %vm216_vm1, %v4583_v51  ;;  %v1195_v51 = vadd.f32 %v1194_v49, %v13349_v34  ;;  %v13352_v49 = vld [vmem:[#allocation11_spill] sm:$0xff] }
 0x32f   :  { %v1780_v28 = vpop.f32.mrf.mxu2 }
 0x330   :  { %v1887_v63 = vadd.f32 %v1780_v28, %v1192_v16  ;;  %v10744_v38 = vpop.f32.mrf.mxu0 }
 0x331   :  { %13347 = vst [vmem:[#allocation9_spill] sm:$0xff] %v10744_v38  ;;  %v1203_v2 = vpop.f32.mrf.mxu1  ;;  %v2450_v43 = vpop.f32.mrf.mxu3 }
 0x332   :  { %v10752_v14 = vadd.f32 %v2450_v43, %v1887_v63  ;;  %v2640_v63 = vld [vmem:[%s13229_s0 + $0x243] sm:$0xff] }
 0x333   :  { %8180 = vmatmul.msk.f32.gmra.mxu0 %vm216_vm1, %v2639_v31 }
 0x334   :  { %13348 = vst [vmem:[#allocation96_spill] sm:$0xff] %v10752_v14  ;;  %8201 = vmatmul.msk.f32.gmra.mxu1 %vm216_vm1, %v3247_v23  ;;  %8281 = vmatmul.msk.f32.gmra.mxu2 %vm216_vm1, %v3246_v44  ;;  %v3248_v14 = vld [vmem:[%s13229_s0 + $0x54] sm:$0xff] }
 0x335   :  { %v4585_v44 = vld [vmem:[%s13229_s0 + $0x4d] sm:$0xff] }
 0x336   :  { %8364 = vmatmul.msk.f32.gmra.mxu3 %vm216_vm1, %v4584_v32  ;;  %v1198_v32 = vadd.f32 %v1197_v50, %v13352_v49  ;;  %v13355_v50 = vld [vmem:[#allocation12_spill] sm:$0xff] }
 0x337   :  { %v1783_v25 = vpop.f32.mrf.mxu2 }
 0x338   :  { %v1888_v16 = vadd.f32 %v1783_v25, %v1195_v51  ;;  %v10762_v28 = vpop.f32.mrf.mxu0 }
 0x339   :  { %13350 = vst [vmem:[#allocation10_spill] sm:$0xff] %v10762_v28  ;;  %v1206_v31 = vpop.f32.mrf.mxu1  ;;  %v2453_v43 = vpop.f32.mrf.mxu3 }
 0x33a   :  { %v10770_v38 = vadd.f32 %v2453_v43, %v1888_v16  ;;  %v2641_v16 = vld [vmem:[%s13229_s0 + $0x24b] sm:$0xff] }
 0x33b   :  { %8181 = vmatmul.msk.f32.gmra.mxu0 %vm216_vm1, %v2640_v63 }
 0x33c   :  { %13351 = vst [vmem:[#allocation97_spill] sm:$0xff] %v10770_v38  ;;  %8202 = vmatmul.msk.f32.gmra.mxu1 %vm216_vm1, %v3248_v14  ;;  %8282 = vmatmul.msk.f32.gmra.mxu2 %vm216_vm1, %v3247_v23  ;;  %v3249_v38 = vld [vmem:[%s13229_s0 + $0x5c] sm:$0xff] }
 0x33d   :  { %v4586_v23 = vld [vmem:[%s13229_s0 + $0x55] sm:$0xff] }
 0x33e   :  { %8365 = vmatmul.msk.f32.gmra.mxu3 %vm216_vm1, %v4585_v44  ;;  %v1201_v44 = vadd.f32 %v1200_v57, %v13355_v50  ;;  %v13358_v57 = vld [vmem:[#allocation13_spill] sm:$0xff] }
 0x33f   :  { %v1786_v34 = vpop.f32.mrf.mxu2 }
 0x340   :  { %v1889_v51 = vadd.f32 %v1786_v34, %v1198_v32  ;;  %v10780_v25 = vpop.f32.mrf.mxu0 }
 0x341   :  { %13353 = vst [vmem:[#allocation11_spill] sm:$0xff] %v10780_v25  ;;  %v1209_v63 = vpop.f32.mrf.mxu1  ;;  %v2456_v43 = vpop.f32.mrf.mxu3 }
 0x342   :  { %v10788_v28 = vadd.f32 %v2456_v43, %v1889_v51  ;;  %v2642_v51 = vld [vmem:[%s13229_s0 + $0x253] sm:$0xff] }
 0x343   :  { %8182 = vmatmul.msk.f32.gmra.mxu0 %vm216_vm1, %v2641_v16 }
 0x344   :  { %13354 = vst [vmem:[#allocation98_spill] sm:$0xff] %v10788_v28  ;;  %8203 = vmatmul.msk.f32.gmra.mxu1 %vm216_vm1, %v3249_v38  ;;  %8283 = vmatmul.msk.f32.gmra.mxu2 %vm216_vm1, %v3248_v14  ;;  %v3250_v28 = vld [vmem:[%s13229_s0 + $0x64] sm:$0xff] }
 0x345   :  { %v4587_v14 = vld [vmem:[%s13229_s0 + $0x5d] sm:$0xff] }
 0x346   :  { %8366 = vmatmul.msk.f32.gmra.mxu3 %vm216_vm1, %v4586_v23  ;;  %v1204_v23 = vadd.f32 %v1203_v2, %v13358_v57  ;;  %v13361_v2 = vld [vmem:[#allocation14_spill] sm:$0xff] }
 0x347   :  { %v1789_v49 = vpop.f32.mrf.mxu2 }
 0x348   :  { %v1890_v32 = vadd.f32 %v1789_v49, %v1201_v44  ;;  %v10798_v34 = vpop.f32.mrf.mxu0 }
 0x349   :  { %13356 = vst [vmem:[#allocation12_spill] sm:$0xff] %v10798_v34  ;;  %v1212_v16 = vpop.f32.mrf.mxu1  ;;  %v2459_v43 = vpop.f32.mrf.mxu3 }
 0x34a   :  { %v10806_v25 = vadd.f32 %v2459_v43, %v1890_v32  ;;  %v2643_v32 = vld [vmem:[%s13229_s0 + $0x25b] sm:$0xff] }
 0x34b   :  { %8183 = vmatmul.msk.f32.gmra.mxu0 %vm216_vm1, %v2642_v51 }
 0x34c   :  { %13357 = vst [vmem:[#allocation99_spill] sm:$0xff] %v10806_v25  ;;  %8204 = vmatmul.msk.f32.gmra.mxu1 %vm216_vm1, %v3250_v28  ;;  %8284 = vmatmul.msk.f32.gmra.mxu2 %vm216_vm1, %v3249_v38  ;;  %v3251_v25 = vld [vmem:[%s13229_s0 + $0x6c] sm:$0xff] }
 0x34d   :  { %v4588_v38 = vld [vmem:[%s13229_s0 + $0x65] sm:$0xff] }
 0x34e   :  { %8367 = vmatmul.msk.f32.gmra.mxu3 %vm216_vm1, %v4587_v14  ;;  %v1207_v14 = vadd.f32 %v1206_v31, %v13361_v2  ;;  %v13364_v31 = vld [vmem:[#allocation15_spill] sm:$0xff] }
 0x34f   :  { %v1792_v50 = vpop.f32.mrf.mxu2 }
 0x350   :  { %v1891_v44 = vadd.f32 %v1792_v50, %v1204_v23  ;;  %v10816_v49 = vpop.f32.mrf.mxu0 }
 0x351   :  { %13359 = vst [vmem:[#allocation13_spill] sm:$0xff] %v10816_v49  ;;  %v1215_v51 = vpop.f32.mrf.mxu1  ;;  %v2462_v43 = vpop.f32.mrf.mxu3  ;;  %v3252_v49 = vld [vmem:[%s13229_s0 + $0x74] sm:$0xff] }
 0x352   :  { %v10824_v34 = vadd.f32 %v2462_v43, %v1891_v44  ;;  %v2644_v44 = vld [vmem:[%s13229_s0 + $0x263] sm:$0xff] }
 0x353   :  { %8184 = vmatmul.msk.f32.gmra.mxu0 %vm216_vm1, %v2643_v32 }
 0x354   :  { %13360 = vst [vmem:[#allocation100_spill] sm:$0xff] %v10824_v34  ;;  %8205 = vmatmul.msk.f32.gmra.mxu1 %vm216_vm1, %v3251_v25  ;;  %8285 = vmatmul.msk.f32.gmra.mxu2 %vm216_vm1, %v3250_v28  ;;  %v4589_v28 = vld [vmem:[%s13229_s0 + $0x6d] sm:$0xff] }
 0x356   :  { %8368 = vmatmul.msk.f32.gmra.mxu3 %vm216_vm1, %v4588_v38  ;;  %v1210_v38 = vadd.f32 %v1209_v63, %v13364_v31  ;;  %v13367_v63 = vld [vmem:[#allocation16_spill] sm:$0xff] }
 0x357   :  { %v1795_v57 = vpop.f32.mrf.mxu2 }
 0x358   :  { %v1892_v23 = vadd.f32 %v1795_v57, %v1207_v14  ;;  %v10834_v50 = vpop.f32.mrf.mxu0 }
 0x359   :  { %13362 = vst [vmem:[#allocation14_spill] sm:$0xff] %v10834_v50  ;;  %v1218_v32 = vpop.f32.mrf.mxu1  ;;  %v2465_v43 = vpop.f32.mrf.mxu3 }
 0x35a   :  { %v10842_v34 = vadd.f32 %v2465_v43, %v1892_v23  ;;  %v2645_v23 = vld [vmem:[%s13229_s0 + $0x26b] sm:$0xff] }
 0x35b   :  { %8185 = vmatmul.msk.f32.gmra.mxu0 %vm216_vm1, %v2644_v44 }
 0x35c   :  { %13363 = vst [vmem:[#allocation101_spill] sm:$0xff] %v10842_v34  ;;  %8206 = vmatmul.msk.f32.gmra.mxu1 %vm216_vm1, %v3252_v49  ;;  %8286 = vmatmul.msk.f32.gmra.mxu2 %vm216_vm1, %v3251_v25  ;;  %v3253_v34 = vld [vmem:[%s13229_s0 + $0x7c] sm:$0xff] }
 0x35d   :  { %v4590_v25 = vld [vmem:[%s13229_s0 + $0x75] sm:$0xff] }
 0x35e   :  { %8369 = vmatmul.msk.f32.gmra.mxu3 %vm216_vm1, %v4589_v28  ;;  %v1213_v28 = vadd.f32 %v1212_v16, %v13367_v63  ;;  %v4591_v16 = vld [vmem:[%s13229_s0 + $0x7d] sm:$0xff] }
 0x35f   :  { %v1798_v2 = vpop.f32.mrf.mxu2 }
 0x360   :  { %v1893_v14 = vadd.f32 %v1798_v2, %v1210_v38  ;;  %v10852_v57 = vpop.f32.mrf.mxu0 }
 0x361   :  { %13365 = vst [vmem:[#allocation15_spill] sm:$0xff] %v10852_v57  ;;  %v1221_v44 = vpop.f32.mrf.mxu1  ;;  %v2468_v43 = vpop.f32.mrf.mxu3 }
 0x362   :  { %v10860_v50 = vadd.f32 %v2468_v43, %v1893_v14  ;;  %v2646_v14 = vld [vmem:[%s13229_s0 + $0x273] sm:$0xff] }
 0x363   :  { %8186 = vmatmul.msk.f32.gmra.mxu0 %vm216_vm1, %v2645_v23 }
 0x364   :  { %13366 = vst [vmem:[#allocation102_spill] sm:$0xff] %v10860_v50  ;;  %8207 = vmatmul.msk.f32.gmra.mxu1 %vm216_vm1, %v3253_v34  ;;  %8287 = vmatmul.msk.f32.gmra.mxu2 %vm216_vm1, %v3252_v49  ;;  %v3254_v50 = vld [vmem:[%s13229_s0 + $0x84] sm:$0xff]  ;;  %v13370_v49 = vld [vmem:[#allocation17_spill] sm:$0xff] }
 0x366   :  { %8370 = vmatmul.msk.f32.gmra.mxu3 %vm216_vm1, %v4590_v25  ;;  %v1216_v25 = vadd.f32 %v1215_v51, %v13370_v49  ;;  %v13373_v51 = vld [vmem:[#allocation18_spill] sm:$0xff] }
 0x367   :  { %v1801_v31 = vpop.f32.mrf.mxu2 }
 0x368   :  { %v1894_v38 = vadd.f32 %v1801_v31, %v1213_v28  ;;  %v10870_v2 = vpop.f32.mrf.mxu0 }
 0x369   :  { %13368 = vst [vmem:[#allocation16_spill] sm:$0xff] %v10870_v2  ;;  %v1224_v23 = vpop.f32.mrf.mxu1  ;;  %v2471_v43 = vpop.f32.mrf.mxu3 }
 0x36a   :  { %v10878_v57 = vadd.f32 %v2471_v43, %v1894_v38  ;;  %v2647_v38 = vld [vmem:[%s13229_s0 + $0x27b] sm:$0xff] }
 0x36b   :  { %8187 = vmatmul.msk.f32.gmra.mxu0 %vm216_vm1, %v2646_v14 }
 0x36c   :  { %13369 = vst [vmem:[#allocation103_spill] sm:$0xff] %v10878_v57  ;;  %8208 = vmatmul.msk.f32.gmra.mxu1 %vm216_vm1, %v3254_v50  ;;  %8288 = vmatmul.msk.f32.gmra.mxu2 %vm216_vm1, %v3253_v34  ;;  %v3255_v57 = vld [vmem:[%s13229_s0 + $0x8c] sm:$0xff] }
 0x36d   :  { %v4592_v34 = vld [vmem:[%s13229_s0 + $0x85] sm:$0xff] }
 0x36e   :  { %8371 = vmatmul.msk.f32.gmra.mxu3 %vm216_vm1, %v4591_v16  ;;  %v1219_v16 = vadd.f32 %v1218_v32, %v13373_v51  ;;  %v13376_v32 = vld [vmem:[#allocation19_spill] sm:$0xff] }
 0x36f   :  { %v1804_v63 = vpop.f32.mrf.mxu2 }
 0x370   :  { %v1895_v28 = vadd.f32 %v1804_v63, %v1216_v25  ;;  %v10888_v31 = vpop.f32.mrf.mxu0 }
 0x371   :  { %13371 = vst [vmem:[#allocation17_spill] sm:$0xff] %v10888_v31  ;;  %v1227_v14 = vpop.f32.mrf.mxu1  ;;  %v2474_v43 = vpop.f32.mrf.mxu3 }
 0x372   :  { %v10896_v2 = vadd.f32 %v2474_v43, %v1895_v28  ;;  %v2648_v28 = vld [vmem:[%s13229_s0 + $0x283] sm:$0xff] }
 0x373   :  { %8188 = vmatmul.msk.f32.gmra.mxu0 %vm216_vm1, %v2647_v38 }
 0x374   :  { %13372 = vst [vmem:[#allocation104_spill] sm:$0xff] %v10896_v2  ;;  %8209 = vmatmul.msk.f32.gmra.mxu1 %vm216_vm1, %v3255_v57  ;;  %8289 = vmatmul.msk.f32.gmra.mxu2 %vm216_vm1, %v3254_v50  ;;  %v3256_v2 = vld [vmem:[%s13229_s0 + $0x94] sm:$0xff] }
 0x375   :  { %v4593_v50 = vld [vmem:[%s13229_s0 + $0x8d] sm:$0xff] }
 0x376   :  { %8372 = vmatmul.msk.f32.gmra.mxu3 %vm216_vm1, %v4592_v34  ;;  %v1222_v34 = vadd.f32 %v1221_v44, %v13376_v32  ;;  %v13379_v44 = vld [vmem:[#allocation20_spill] sm:$0xff] }
 0x377   :  { %v1807_v49 = vpop.f32.mrf.mxu2 }
 0x378   :  { %v1896_v25 = vadd.f32 %v1807_v49, %v1219_v16  ;;  %v10906_v63 = vpop.f32.mrf.mxu0 }
 0x379   :  { %13374 = vst [vmem:[#allocation18_spill] sm:$0xff] %v10906_v63  ;;  %v2477_v38 = vpop.f32.mrf.mxu3  ;;  %v3586_v43 = vpop.f32.mrf.mxu1 }
 0x37a   :  { %v10914_v31 = vadd.f32 %v2477_v38, %v1896_v25  ;;  %v2649_v25 = vld [vmem:[%s13229_s0 + $0x28b] sm:$0xff] }
 0x37b   :  { %8189 = vmatmul.msk.f32.gmra.mxu0 %vm216_vm1, %v2648_v28 }
 0x37c   :  { %13375 = vst [vmem:[#allocation105_spill] sm:$0xff] %v10914_v31  ;;  %8210 = vmatmul.msk.f32.gmra.mxu1 %vm216_vm1, %v3256_v2  ;;  %8290 = vmatmul.msk.f32.gmra.mxu2 %vm216_vm1, %v3255_v57  ;;  %v3257_v31 = vld [vmem:[%s13229_s0 + $0x9c] sm:$0xff] }
 0x37d   :  { %v4594_v57 = vld [vmem:[%s13229_s0 + $0x95] sm:$0xff] }
 0x37e   :  { %8373 = vmatmul.msk.f32.gmra.mxu3 %vm216_vm1, %v4593_v50  ;;  %v1225_v50 = vadd.f32 %v1224_v23, %v13379_v44  ;;  %v13382_v23 = vld [vmem:[#allocation22_spill] sm:$0xff] }
 0x37f   :  { %v1810_v51 = vpop.f32.mrf.mxu2 }
 0x380   :  { %v1897_v16 = vadd.f32 %v1810_v51, %v1222_v34  ;;  %v10924_v49 = vpop.f32.mrf.mxu0 }
 0x381   :  { %13377 = vst [vmem:[#allocation19_spill] sm:$0xff] %v10924_v49  ;;  %v2480_v28 = vpop.f32.mrf.mxu3  ;;  %v3589_v38 = vpop.f32.mrf.mxu1 }
 0x382   :  { %v10932_v63 = vadd.f32 %v2480_v28, %v1897_v16  ;;  %v2650_v16 = vld [vmem:[%s13229_s0 + $0x293] sm:$0xff] }
 0x383   :  { %8190 = vmatmul.msk.f32.gmra.mxu0 %vm216_vm1, %v2649_v25 }
 0x384   :  { %13378 = vst [vmem:[#allocation106_spill] sm:$0xff] %v10932_v63  ;;  %8211 = vmatmul.msk.f32.gmra.mxu1 %vm216_vm1, %v3257_v31  ;;  %8291 = vmatmul.msk.f32.gmra.mxu2 %vm216_vm1, %v3256_v2  ;;  %v3258_v63 = vld [vmem:[%s13229_s0 + $0xa4] sm:$0xff] }
 0x385   :  { %v4595_v2 = vld [vmem:[%s13229_s0 + $0x9d] sm:$0xff] }
 0x386   :  { %8374 = vmatmul.msk.f32.gmra.mxu3 %vm216_vm1, %v4594_v57  ;;  %v1228_v57 = vadd.f32 %v1227_v14, %v13382_v23  ;;  %v13385_v14 = vld [vmem:[#allocation23_spill] sm:$0xff] }
 0x387   :  { %v1813_v32 = vpop.f32.mrf.mxu2 }
 0x388   :  { %v1898_v34 = vadd.f32 %v1813_v32, %v1225_v50  ;;  %v10942_v51 = vpop.f32.mrf.mxu0 }
 0x389   :  { %13380 = vst [vmem:[#allocation20_spill] sm:$0xff] %v10942_v51  ;;  %v2483_v25 = vpop.f32.mrf.mxu3  ;;  %v3592_v28 = vpop.f32.mrf.mxu1 }
 0x38a   :  { %v10950_v49 = vadd.f32 %v2483_v25, %v1898_v34  ;;  %v5250_v34 = vld [vmem:[%s13229_s0 + $0x26] sm:$0xff] }
 0x38b   :  { %8191 = vmatmul.msk.f32.gmra.mxu0 %vm216_vm1, %v2650_v16 }
 0x38c   :  { %13381 = vst [vmem:[#allocation107_spill] sm:$0xff] %v10950_v49  ;;  %8212 = vmatmul.msk.f32.gmra.mxu1 %vm216_vm1, %v3258_v63  ;;  %8292 = vmatmul.msk.f32.gmra.mxu2 %vm216_vm1, %v3257_v31  ;;  %v3259_v49 = vld [vmem:[%s13229_s0 + $0xac] sm:$0xff] }
 0x38d   :  { %v4596_v31 = vld [vmem:[%s13229_s0 + $0xa5] sm:$0xff] }
 0x38e   :  { %8375 = vmatmul.msk.f32.gmra.mxu3 %vm216_vm1, %v4595_v2  ;;  %v3159_v2 = vadd.f32 %v9774_v20, %v13385_v14  ;;  %v3260_v20 = vld [vmem:[%s13229_s0 + $0xb4] sm:$0xff] }
 0x38f   :  { %v1816_v44 = vpop.f32.mrf.mxu2 }
 0x390   :  { %v1899_v50 = vadd.f32 %v1816_v44, %v1228_v57  ;;  %v10960_v32 = vpop.f32.mrf.mxu0  ;;  %v3829_v23 = vadd.f32 %v3586_v43, %v3159_v2  ;;  %v13387_v43 = vld [vmem:[#allocation24_spill] sm:$0xff] }
 0x391   :  { %13383 = vst [vmem:[#allocation22_spill] sm:$0xff] %v10960_v32  ;;  %v2486_v16 = vpop.f32.mrf.mxu3  ;;  %v3595_v25 = vpop.f32.mrf.mxu1 }
 0x392   :  { %v10968_v51 = vadd.f32 %v2486_v16, %v1899_v50 }
 0x393   :  { %8443 = vmatmul.msk.f32.vlgmr.msra.gmra.mxu0 %vm216_vm1, %v5250_v34  ;;  %v5251_v34 = vld [vmem:[%s13229_s0 + $0x2e] sm:$0xff] }
 0x394   :  { %13384 = vst [vmem:[#allocation108_spill] sm:$0xff] %v10968_v51  ;;  %8213 = vmatmul.msk.f32.gmra.mxu1 %vm216_vm1, %v3259_v49  ;;  %8293 = vmatmul.msk.f32.gmra.mxu2 %vm216_vm1, %v3258_v63  ;;  %v4597_v63 = vld [vmem:[%s13229_s0 + $0xad] sm:$0xff] }
 0x396   :  { %8376 = vmatmul.msk.f32.gmra.mxu3 %vm216_vm1, %v4596_v31  ;;  %v3160_v31 = vadd.f32 %v9792_v35, %v13387_v43  ;;  %v3261_v35 = vld [vmem:[%s13229_s0 + $0xbc] sm:$0xff] }
 0x397   :  { %v4256_v57 = vpop.f32.mrf.mxu2 }
 0x398   :  { %v4499_v44 = vadd.f32 %v4256_v57, %v3829_v23  ;;  %v10979_v50 = vpop.f32.mrf.mxu0  ;;  %v3830_v2 = vadd.f32 %v3589_v38, %v3160_v31  ;;  %v13389_v38 = vld [vmem:[#allocation25_spill] sm:$0xff] }
 0x399   :  { %13386 = vst [vmem:[#allocation23_spill] sm:$0xff] %v10979_v50  ;;  %v3598_v16 = vpop.f32.mrf.mxu1  ;;  %v4926_v51 = vpop.f32.mrf.mxu3 }
 0x39a   :  { %v10987_v14 = vadd.f32 %v4926_v51, %v4499_v44  ;;  %v5252_v44 = vld [vmem:[%s13229_s0 + $0x36] sm:$0xff] }
 0x39b   :  { %8444 = vmatmul.msk.f32.gmra.mxu0 %vm216_vm1, %v5251_v34 }
 0x39c   :  { %8214 = vmatmul.msk.f32.gmra.mxu1 %vm216_vm1, %v3260_v20  ;;  %8294 = vmatmul.msk.f32.gmra.mxu2 %vm216_vm1, %v3259_v49  ;;  %v4598_v49 = vld [vmem:[%s13229_s0 + $0xb5] sm:$0xff] }
 0x39e   :  { %8377 = vmatmul.msk.f32.gmra.mxu3 %vm216_vm1, %v4597_v63  ;;  %v3161_v63 = vadd.f32 %v9810_v52, %v13389_v38  ;;  %v3262_v52 = vld [vmem:[%s13229_s0 + $0xc4] sm:$0xff] }
 0x39f   :  { %v4259_v23 = vpop.f32.mrf.mxu2 }
 0x3a0   :  { %v4500_v57 = vadd.f32 %v4259_v23, %v3830_v2  ;;  %v10998_v51 = vpop.f32.mrf.mxu0  ;;  %v3831_v31 = vadd.f32 %v3592_v28, %v3161_v63  ;;  %v4599_v28 = vld [vmem:[%s13229_s0 + $0xbd] sm:$0xff] }
 0x3a1   :  { %13388 = vst [vmem:[#allocation24_spill] sm:$0xff] %v10998_v51  ;;  %v3601_v34 = vpop.f32.mrf.mxu1  ;;  %v4929_v50 = vpop.f32.mrf.mxu3 }
 0x3a2   :  { %v11006_v43 = vadd.f32 %v4929_v50, %v4500_v57  ;;  %v5253_v57 = vld [vmem:[%s13229_s0 + $0x3e] sm:$0xff] }
 0x3a3   :  { %8445 = vmatmul.msk.f32.gmra.mxu0 %vm216_vm1, %v5252_v44 }
 0x3a4   :  { %8215 = vmatmul.msk.f32.gmra.mxu1 %vm216_vm1, %v3261_v35  ;;  %8295 = vmatmul.msk.f32.gmra.mxu2 %vm216_vm1, %v3260_v20  ;;  %v13391_v20 = vld [vmem:[#allocation26_spill] sm:$0xff] }
 0x3a6   :  { %8378 = vmatmul.msk.f32.gmra.mxu3 %vm216_vm1, %v4598_v49  ;;  %v3162_v49 = vadd.f32 %v9828_v3, %v13391_v20  ;;  %v3263_v3 = vld [vmem:[%s13229_s0 + $0xcc] sm:$0xff] }
 0x3a7   :  { %v4262_v2 = vpop.f32.mrf.mxu2 }
 0x3a8   :  { %v4501_v23 = vadd.f32 %v4262_v2, %v3831_v31  ;;  %v11017_v50 = vpop.f32.mrf.mxu0  ;;  %v3832_v63 = vadd.f32 %v3595_v25, %v3162_v49  ;;  %v4600_v25 = vld [vmem:[%s13229_s0 + $0xc5] sm:$0xff] }
 0x3a9   :  { %13390 = vst [vmem:[#allocation25_spill] sm:$0xff] %v11017_v50  ;;  %v3604_v44 = vpop.f32.mrf.mxu1  ;;  %v4932_v51 = vpop.f32.mrf.mxu3 }
 0x3aa   :  { %v11025_v38 = vadd.f32 %v4932_v51, %v4501_v23  ;;  %v5254_v23 = vld [vmem:[%s13229_s0 + $0x46] sm:$0xff] }
 0x3ab   :  { %8446 = vmatmul.msk.f32.gmra.mxu0 %vm216_vm1, %v5253_v57 }
 0x3ac   :  { %8216 = vmatmul.msk.f32.gmra.mxu1 %vm216_vm1, %v3262_v52  ;;  %8296 = vmatmul.msk.f32.gmra.mxu2 %vm216_vm1, %v3261_v35  ;;  %v13393_v35 = vld [vmem:[#allocation27_spill] sm:$0xff] }
 0x3ae   :  { %8379 = vmatmul.msk.f32.gmra.mxu3 %vm216_vm1, %v4599_v28  ;;  %v3163_v28 = vadd.f32 %v9846_v45, %v13393_v35  ;;  %v3264_v45 = vld [vmem:[%s13229_s0 + $0xd4] sm:$0xff] }
 0x3af   :  { %v4265_v31 = vpop.f32.mrf.mxu2 }
 0x3b0   :  { %v4502_v2 = vadd.f32 %v4265_v31, %v3832_v63  ;;  %v11036_v51 = vpop.f32.mrf.mxu0  ;;  %v3833_v49 = vadd.f32 %v3598_v16, %v3163_v28  ;;  %v4601_v16 = vld [vmem:[%s13229_s0 + $0xcd] sm:$0xff] }
 0x3b1   :  { %13392 = vst [vmem:[#allocation26_spill] sm:$0xff] %v11036_v51  ;;  %v3607_v57 = vpop.f32.mrf.mxu1  ;;  %v4935_v50 = vpop.f32.mrf.mxu3 }
 0x3b2   :  { %v11044_v20 = vadd.f32 %v4935_v50, %v4502_v2  ;;  %v5255_v2 = vld [vmem:[%s13229_s0 + $0x4e] sm:$0xff] }
 0x3b3   :  { %8447 = vmatmul.msk.f32.gmra.mxu0 %vm216_vm1, %v5254_v23 }
 0x3b4   :  { %8217 = vmatmul.msk.f32.gmra.mxu1 %vm216_vm1, %v3263_v3  ;;  %8297 = vmatmul.msk.f32.gmra.mxu2 %vm216_vm1, %v3262_v52  ;;  %v13395_v52 = vld [vmem:[#allocation28_spill] sm:$0xff] }
 0x3b6   :  { %8380 = vmatmul.msk.f32.gmra.mxu3 %vm216_vm1, %v4600_v25  ;;  %v3164_v25 = vadd.f32 %v9864_v60, %v13395_v52  ;;  %v3265_v60 = vld [vmem:[%s13229_s0 + $0xdc] sm:$0xff] }
 0x3b7   :  { %v4268_v63 = vpop.f32.mrf.mxu2 }
 0x3b8   :  { %v4503_v31 = vadd.f32 %v4268_v63, %v3833_v49  ;;  %v11055_v50 = vpop.f32.mrf.mxu0  ;;  %v3834_v28 = vadd.f32 %v3601_v34, %v3164_v25  ;;  %v4602_v34 = vld [vmem:[%s13229_s0 + $0xd5] sm:$0xff] }
 0x3b9   :  { %13394 = vst [vmem:[#allocation27_spill] sm:$0xff] %v11055_v50  ;;  %v3610_v23 = vpop.f32.mrf.mxu1  ;;  %v4938_v51 = vpop.f32.mrf.mxu3 }
 0x3ba   :  { %v11063_v35 = vadd.f32 %v4938_v51, %v4503_v31  ;;  %v5256_v31 = vld [vmem:[%s13229_s0 + $0x56] sm:$0xff] }
 0x3bb   :  { %8448 = vmatmul.msk.f32.gmra.mxu0 %vm216_vm1, %v5255_v2 }
 0x3bc   :  { %8218 = vmatmul.msk.f32.gmra.mxu1 %vm216_vm1, %v3264_v45  ;;  %8298 = vmatmul.msk.f32.gmra.mxu2 %vm216_vm1, %v3263_v3  ;;  %v13397_v3 = vld [vmem:[#allocation29_spill] sm:$0xff] }
 0x3be   :  { %8381 = vmatmul.msk.f32.gmra.mxu3 %vm216_vm1, %v4601_v16  ;;  %v3165_v16 = vadd.f32 %v9882_v59, %v13397_v3  ;;  %v3266_v59 = vld [vmem:[%s13229_s0 + $0xe4] sm:$0xff] }
 0x3bf   :  { %v4271_v49 = vpop.f32.mrf.mxu2 }
 0x3c0   :  { %v4504_v63 = vadd.f32 %v4271_v49, %v3834_v28  ;;  %v11074_v51 = vpop.f32.mrf.mxu0  ;;  %v3835_v25 = vadd.f32 %v3604_v44, %v3165_v16  ;;  %v4603_v44 = vld [vmem:[%s13229_s0 + $0xdd] sm:$0xff] }
 0x3c1   :  { %13396 = vst [vmem:[#allocation28_spill] sm:$0xff] %v11074_v51  ;;  %v3613_v2 = vpop.f32.mrf.mxu1  ;;  %v4941_v32 = vpop.f32.mrf.mxu3 }
 0x3c2   :  { %v11082_v52 = vadd.f32 %v4941_v32, %v4504_v63  ;;  %v5257_v63 = vld [vmem:[%s13229_s0 + $0x5e] sm:$0xff] }
 0x3c3   :  { %8449 = vmatmul.msk.f32.gmra.mxu0 %vm216_vm1, %v5256_v31 }
 0x3c4   :  { %8219 = vmatmul.msk.f32.gmra.mxu1 %vm216_vm1, %v3265_v60  ;;  %8299 = vmatmul.msk.f32.gmra.mxu2 %vm216_vm1, %v3264_v45  ;;  %v13399_v45 = vld [vmem:[#allocation30_spill] sm:$0xff] }
 0x3c6   :  { %8382 = vmatmul.msk.f32.gmra.mxu3 %vm216_vm1, %v4602_v34  ;;  %v3166_v34 = vadd.f32 %v9900_v12, %v13399_v45  ;;  %v3267_v12 = vld [vmem:[%s13229_s0 + $0xec] sm:$0xff] }
 0x3c7   :  { %v4274_v28 = vpop.f32.mrf.mxu2 }
 0x3c8   :  { %v4505_v49 = vadd.f32 %v4274_v28, %v3835_v25  ;;  %v11093_v32 = vpop.f32.mrf.mxu0  ;;  %v3836_v16 = vadd.f32 %v3607_v57, %v3166_v34  ;;  %v4604_v57 = vld [vmem:[%s13229_s0 + $0xe5] sm:$0xff] }
 0x3c9   :  { %13398 = vst [vmem:[#allocation29_spill] sm:$0xff] %v11093_v32  ;;  %v3616_v31 = vpop.f32.mrf.mxu1  ;;  %v4944_v50 = vpop.f32.mrf.mxu3 }
 0x3ca   :  { %v11101_v3 = vadd.f32 %v4944_v50, %v4505_v49  ;;  %v5258_v49 = vld [vmem:[%s13229_s0 + $0x66] sm:$0xff] }
 0x3cb   :  { %8450 = vmatmul.msk.f32.gmra.mxu0 %vm216_vm1, %v5257_v63 }
 0x3cc   :  { %8220 = vmatmul.msk.f32.gmra.mxu1 %vm216_vm1, %v3266_v59  ;;  %8300 = vmatmul.msk.f32.gmra.mxu2 %vm216_vm1, %v3265_v60  ;;  %v13401_v60 = vld [vmem:[#allocation31_spill] sm:$0xff] }
 0x3ce   :  { %8383 = vmatmul.msk.f32.gmra.mxu3 %vm216_vm1, %v4603_v44  ;;  %v3167_v44 = vadd.f32 %v9918_v30, %v13401_v60  ;;  %v3268_v30 = vld [vmem:[%s13229_s0 + $0xf4] sm:$0xff] }
 0x3cf   :  { %v4277_v25 = vpop.f32.mrf.mxu2 }
 0x3d0   :  { %v4506_v28 = vadd.f32 %v4277_v25, %v3836_v16  ;;  %v11112_v50 = vpop.f32.mrf.mxu0  ;;  %v3837_v34 = vadd.f32 %v3610_v23, %v3167_v44  ;;  %v4605_v23 = vld [vmem:[%s13229_s0 + $0xed] sm:$0xff] }
 0x3d1   :  { %13400 = vst [vmem:[#allocation30_spill] sm:$0xff] %v11112_v50  ;;  %v3619_v63 = vpop.f32.mrf.mxu1  ;;  %v4947_v32 = vpop.f32.mrf.mxu3 }
 0x3d2   :  { %v11120_v45 = vadd.f32 %v4947_v32, %v4506_v28  ;;  %v5259_v28 = vld [vmem:[%s13229_s0 + $0x6e] sm:$0xff] }
 0x3d3   :  { %8451 = vmatmul.msk.f32.gmra.mxu0 %vm216_vm1, %v5258_v49 }
 0x3d4   :  { %8221 = vmatmul.msk.f32.gmra.mxu1 %vm216_vm1, %v3267_v12  ;;  %8301 = vmatmul.msk.f32.gmra.mxu2 %vm216_vm1, %v3266_v59  ;;  %v13403_v59 = vld [vmem:[#allocation32_spill] sm:$0xff] }
 0x3d6   :  { %8384 = vmatmul.msk.f32.gmra.mxu3 %vm216_vm1, %v4604_v57  ;;  %v3168_v57 = vadd.f32 %v9936_v46, %v13403_v59  ;;  %v3269_v46 = vld [vmem:[%s13229_s0 + $0xfc] sm:$0xff] }
 0x3d7   :  { %v4280_v16 = vpop.f32.mrf.mxu2 }
 0x3d8   :  { %v4507_v25 = vadd.f32 %v4280_v16, %v3837_v34  ;;  %v11131_v32 = vpop.f32.mrf.mxu0  ;;  %v3838_v44 = vadd.f32 %v3613_v2, %v3168_v57  ;;  %v4606_v2 = vld [vmem:[%s13229_s0 + $0xf5] sm:$0xff] }
 0x3d9   :  { %13402 = vst [vmem:[#allocation31_spill] sm:$0xff] %v11131_v32  ;;  %v3622_v49 = vpop.f32.mrf.mxu1  ;;  %v4950_v50 = vpop.f32.mrf.mxu3 }
 0x3da   :  { %v11139_v60 = vadd.f32 %v4950_v50, %v4507_v25  ;;  %v5260_v25 = vld [vmem:[%s13229_s0 + $0x76] sm:$0xff] }
 0x3db   :  { %8452 = vmatmul.msk.f32.gmra.mxu0 %vm216_vm1, %v5259_v28 }
 0x3dc   :  { %8222 = vmatmul.msk.f32.gmra.mxu1 %vm216_vm1, %v3268_v30  ;;  %8302 = vmatmul.msk.f32.gmra.mxu2 %vm216_vm1, %v3267_v12  ;;  %v13405_v12 = vld [vmem:[#allocation33_spill] sm:$0xff] }
 0x3de   :  { %8385 = vmatmul.msk.f32.gmra.mxu3 %vm216_vm1, %v4605_v23  ;;  %v3169_v23 = vadd.f32 %v9954_v8, %v13405_v12  ;;  %v3270_v8 = vld [vmem:[%s13229_s0 + $0x104] sm:$0xff] }
 0x3df   :  { %v4283_v34 = vpop.f32.mrf.mxu2 }
 0x3e0   :  { %v4508_v16 = vadd.f32 %v4283_v34, %v3838_v44  ;;  %v11150_v50 = vpop.f32.mrf.mxu0  ;;  %v3839_v57 = vadd.f32 %v3616_v31, %v3169_v23  ;;  %v4607_v31 = vld [vmem:[%s13229_s0 + $0xfd] sm:$0xff] }
 0x3e1   :  { %13404 = vst [vmem:[#allocation32_spill] sm:$0xff] %v11150_v50  ;;  %v3625_v28 = vpop.f32.mrf.mxu1  ;;  %v4953_v32 = vpop.f32.mrf.mxu3 }
 0x3e2   :  { %v11158_v59 = vadd.f32 %v4953_v32, %v4508_v16  ;;  %v5261_v16 = vld [vmem:[%s13229_s0 + $0x7e] sm:$0xff] }
 0x3e3   :  { %8453 = vmatmul.msk.f32.gmra.mxu0 %vm216_vm1, %v5260_v25 }
 0x3e4   :  { %8223 = vmatmul.msk.f32.gmra.mxu1 %vm216_vm1, %v3269_v46  ;;  %8303 = vmatmul.msk.f32.gmra.mxu2 %vm216_vm1, %v3268_v30  ;;  %v13407_v30 = vld [vmem:[#allocation34_spill] sm:$0xff] }
 0x3e6   :  { %8386 = vmatmul.msk.f32.gmra.mxu3 %vm216_vm1, %v4606_v2  ;;  %v3170_v2 = vadd.f32 %v9972_v42, %v13407_v30  ;;  %v3271_v42 = vld [vmem:[%s13229_s0 + $0x10c] sm:$0xff] }
 0x3e7   :  { %v4286_v44 = vpop.f32.mrf.mxu2 }
 0x3e8   :  { %v4509_v34 = vadd.f32 %v4286_v44, %v3839_v57  ;;  %v11169_v32 = vpop.f32.mrf.mxu0  ;;  %v3840_v23 = vadd.f32 %v3619_v63, %v3170_v2  ;;  %v4608_v63 = vld [vmem:[%s13229_s0 + $0x105] sm:$0xff] }
 0x3e9   :  { %13406 = vst [vmem:[#allocation33_spill] sm:$0xff] %v11169_v32  ;;  %v3628_v25 = vpop.f32.mrf.mxu1  ;;  %v4956_v50 = vpop.f32.mrf.mxu3 }
 0x3ea   :  { %v11177_v12 = vadd.f32 %v4956_v50, %v4509_v34  ;;  %v5262_v34 = vld [vmem:[%s13229_s0 + $0x86] sm:$0xff] }
 0x3eb   :  { %8454 = vmatmul.msk.f32.gmra.mxu0 %vm216_vm1, %v5261_v16 }
 0x3ec   :  { %8224 = vmatmul.msk.f32.gmra.mxu1 %vm216_vm1, %v3270_v8  ;;  %8304 = vmatmul.msk.f32.gmra.mxu2 %vm216_vm1, %v3269_v46  ;;  %v13409_v46 = vld [vmem:[#allocation35_spill] sm:$0xff] }
 0x3ee   :  { %8387 = vmatmul.msk.f32.gmra.mxu3 %vm216_vm1, %v4607_v31  ;;  %v3171_v31 = vadd.f32 %v9990_v1, %v13409_v46  ;;  %v3272_v1 = vld [vmem:[%s13229_s0 + $0x114] sm:$0xff] }
 0x3ef   :  { %v4289_v57 = vpop.f32.mrf.mxu2 }
 0x3f0   :  { %v4510_v44 = vadd.f32 %v4289_v57, %v3840_v23  ;;  %v11188_v50 = vpop.f32.mrf.mxu0  ;;  %v3841_v2 = vadd.f32 %v3622_v49, %v3171_v31  ;;  %v4609_v49 = vld [vmem:[%s13229_s0 + $0x10d] sm:$0xff] }
 0x3f1   :  { %13408 = vst [vmem:[#allocation34_spill] sm:$0xff] %v11188_v50  ;;  %v11193_v16 = vpop.f32.mrf.mxu1  ;;  %v4959_v32 = vpop.f32.mrf.mxu3 }
 0x3f2   :  { %v11198_v30 = vadd.f32 %v4959_v32, %v4510_v44  ;;  %v5263_v44 = vld [vmem:[%s13229_s0 + $0x8e] sm:$0xff] }
 0x3f3   :  { %8455 = vmatmul.msk.f32.gmra.mxu0 %vm216_vm1, %v5262_v34 }
 0x3f4   :  { %8225 = vmatmul.msk.f32.gmra.mxu1 %vm216_vm1, %v3271_v42  ;;  %8305 = vmatmul.msk.f32.gmra.mxu2 %vm216_vm1, %v3270_v8  ;;  %v13411_v8 = vld [vmem:[#allocation36_spill] sm:$0xff] }
 0x3f6   :  { %8388 = vmatmul.msk.f32.gmra.mxu3 %vm216_vm1, %v4608_v63  ;;  %v3172_v63 = vadd.f32 %v10008_v4, %v13411_v8  ;;  %v3273_v4 = vld [vmem:[%s13229_s0 + $0x11c] sm:$0xff] }
 0x3f7   :  { %v4292_v23 = vpop.f32.mrf.mxu2 }
 0x3f8   :  { %v4511_v57 = vadd.f32 %v4292_v23, %v3841_v2  ;;  %v11209_v32 = vpop.f32.mrf.mxu0  ;;  %v3842_v31 = vadd.f32 %v3625_v28, %v3172_v63  ;;  %v4610_v28 = vld [vmem:[%s13229_s0 + $0x115] sm:$0xff] }
 0x3f9   :  { %13410 = vst [vmem:[#allocation35_spill] sm:$0xff] %v11209_v32  ;;  %v3634_v34 = vpop.f32.mrf.mxu1  ;;  %v4962_v50 = vpop.f32.mrf.mxu3 }
 0x3fa   :  { %v11217_v46 = vadd.f32 %v4962_v50, %v4511_v57  ;;  %v5264_v57 = vld [vmem:[%s13229_s0 + $0x96] sm:$0xff] }
 0x3fb   :  { %8456 = vmatmul.msk.f32.gmra.mxu0 %vm216_vm1, %v5263_v44 }
 0x3fc   :  { %8226 = vmatmul.msk.f32.gmra.mxu1 %vm216_vm1, %v3272_v1  ;;  %8306 = vmatmul.msk.f32.gmra.mxu2 %vm216_vm1, %v3271_v42  ;;  %v13413_v42 = vld [vmem:[#allocation37_spill] sm:$0xff] }
 0x3fe   :  { %8389 = vmatmul.msk.f32.gmra.mxu3 %vm216_vm1, %v4609_v49  ;;  %v3173_v49 = vadd.f32 %v10026_v11, %v13413_v42  ;;  %v3274_v11 = vld [vmem:[%s13229_s0 + $0x124] sm:$0xff] }
 0x3ff   :  { %v4295_v2 = vpop.f32.mrf.mxu2 }
 0x400   :  { %v4512_v23 = vadd.f32 %v4295_v2, %v3842_v31  ;;  %v11228_v50 = vpop.f32.mrf.mxu0  ;;  %v3843_v63 = vadd.f32 %v3628_v25, %v3173_v49  ;;  %v4611_v25 = vld [vmem:[%s13229_s0 + $0x11d] sm:$0xff] }
 0x401   :  { %13412 = vst [vmem:[#allocation36_spill] sm:$0xff] %v11228_v50  ;;  %v3637_v44 = vpop.f32.mrf.mxu1  ;;  %v4965_v32 = vpop.f32.mrf.mxu3 }
 0x402   :  { %v11236_v8 = vadd.f32 %v4965_v32, %v4512_v23  ;;  %v5265_v23 = vld [vmem:[%s13229_s0 + $0x9e] sm:$0xff] }
 0x403   :  { %8457 = vmatmul.msk.f32.gmra.mxu0 %vm216_vm1, %v5264_v57 }
 0x404   :  { %8227 = vmatmul.msk.f32.gmra.mxu1 %vm216_vm1, %v3273_v4  ;;  %8307 = vmatmul.msk.f32.gmra.mxu2 %vm216_vm1, %v3272_v1 }
 0x406   :  { %8390 = vmatmul.msk.f32.gmra.mxu3 %vm216_vm1, %v4610_v28 }
 0x407   :  { %v4298_v31 = vpop.f32.mrf.mxu2 }
 0x408   :  { %v4513_v2 = vadd.f32 %v4298_v31, %v3843_v63  ;;  %v11247_v32 = vpop.f32.mrf.mxu0  ;;  %v3275_v31 = vld [vmem:[%s13229_s0 + $0x12c] sm:$0xff] }
 0x409   :  { %13414 = vst [vmem:[#allocation37_spill] sm:$0xff] %v11247_v32  ;;  %v3640_v57 = vpop.f32.mrf.mxu1  ;;  %v4968_v50 = vpop.f32.mrf.mxu3 }
 0x40a   :  { %v11255_v42 = vadd.f32 %v4968_v50, %v4513_v2  ;;  %v5266_v50 = vld [vmem:[%s13229_s0 + $0xa6] sm:$0xff] }
 0x40b   :  { %8458 = vmatmul.msk.f32.gmra.mxu0 %vm216_vm1, %v5265_v23  ;;  %v13415_v2 = vld [vmem:[#allocation39_spill] sm:$0xff] }
 0x40c   :  { %8228 = vmatmul.msk.f32.gmra.mxu1 %vm216_vm1, %v3274_v11  ;;  %8308 = vmatmul.msk.f32.gmra.mxu2 %vm216_vm1, %v3273_v4  ;;  %v4612_v4 = vld [vmem:[%s13229_s0 + $0x125] sm:$0xff]  ;;  %v3175_v23 = vadd.f32 %v10062_v27, %v13415_v2  ;;  %v3276_v27 = vld [vmem:[%s13229_s0 + $0x134] sm:$0xff] }
 0x40e   :  { %8391 = vmatmul.msk.f32.gmra.mxu3 %vm216_vm1, %v4611_v25  ;;  %v3845_v25 = vadd.f32 %v3634_v34, %v3175_v23  ;;  %v4613_v34 = vld [vmem:[%s13229_s0 + $0x12d] sm:$0xff] }
 0x40f   :  { %v11264_v1 = vpop.f32.mrf.mxu2 }
 0x410   :  { %v11266_v28 = vpop.f32.mrf.mxu0 }
 0x411   :  { %v3643_v49 = vpop.f32.mrf.mxu1  ;;  %v11271_v63 = vpop.f32.mrf.mxu3 }
 0x413   :  { %8459 = vmatmul.msk.f32.gmra.mxu0 %vm216_vm1, %v5266_v50  ;;  %v5267_v50 = vld [vmem:[%s13229_s0 + $0xae] sm:$0xff] }
 0x414   :  { %8229 = vmatmul.msk.f32.gmra.mxu1 %vm216_vm1, %v3275_v31  ;;  %8309 = vmatmul.msk.f32.gmra.mxu2 %vm216_vm1, %v3274_v11 }
 0x416   :  { %8392 = vmatmul.msk.f32.gmra.mxu3 %vm216_vm1, %v4612_v4 }
 0x417   :  { %v4304_v32 = vpop.f32.mrf.mxu2 }
 0x418   :  { %v4515_v51 = vadd.f32 %v4304_v32, %v3845_v25  ;;  %v11285_v17 = vpop.f32.mrf.mxu0  ;;  %v13417_v32 = vld [vmem:[#allocation40_spill] sm:$0xff] }
 0x419   :  { %v3646_v53 = vpop.f32.mrf.mxu1  ;;  %v4974_v5 = vpop.f32.mrf.mxu3  ;;  %v3176_v11 = vadd.f32 %v10080_v22, %v13417_v32  ;;  %v3277_v22 = vld [vmem:[%s13229_s0 + $0x13c] sm:$0xff] }
 0x41a   :  { %v11293_v2 = vadd.f32 %v4974_v5, %v4515_v51  ;;  %v5268_v51 = vld [vmem:[%s13229_s0 + $0xb6] sm:$0xff] }
 0x41b   :  { %8460 = vmatmul.msk.f32.gmra.mxu0 %vm216_vm1, %v5267_v50  ;;  %v3846_v4 = vadd.f32 %v3637_v44, %v3176_v11  ;;  %v4614_v44 = vld [vmem:[%s13229_s0 + $0x135] sm:$0xff] }
 0x41c   :  { %13416 = vst [vmem:[#allocation39_spill] sm:$0xff] %v11293_v2  ;;  %8230 = vmatmul.msk.f32.gmra.mxu1 %vm216_vm1, %v3276_v27  ;;  %8310 = vmatmul.msk.f32.gmra.mxu2 %vm216_vm1, %v3275_v31  ;;  %v13419_v31 = vld [vmem:[#allocation41_spill] sm:$0xff] }
 0x41e   :  { %8393 = vmatmul.msk.f32.gmra.mxu3 %vm216_vm1, %v4613_v34  ;;  %v3177_v34 = vadd.f32 %v10098_v41, %v13419_v31  ;;  %v3278_v41 = vld [vmem:[%s13229_s0 + $0x144] sm:$0xff] }
 0x41f   :  { %v4307_v23 = vpop.f32.mrf.mxu2 }
 0x420   :  { %v4516_v25 = vadd.f32 %v4307_v23, %v3846_v4  ;;  %v11304_v5 = vpop.f32.mrf.mxu0  ;;  %v3847_v11 = vadd.f32 %v3640_v57, %v3177_v34  ;;  %v4615_v57 = vld [vmem:[%s13229_s0 + $0x13d] sm:$0xff] }
 0x421   :  { %v3649_v50 = vpop.f32.mrf.mxu1  ;;  %v4977_v2 = vpop.f32.mrf.mxu3 }
 0x422   :  { %v11312_v32 = vadd.f32 %v4977_v2, %v4516_v25  ;;  %v5269_v25 = vld [vmem:[%s13229_s0 + $0xbe] sm:$0xff] }
 0x423   :  { %8461 = vmatmul.msk.f32.gmra.mxu0 %vm216_vm1, %v5268_v51 }
 0x424   :  { %13418 = vst [vmem:[#allocation40_spill] sm:$0xff] %v11312_v32  ;;  %8231 = vmatmul.msk.f32.gmra.mxu1 %vm216_vm1, %v3277_v22  ;;  %8311 = vmatmul.msk.f32.gmra.mxu2 %vm216_vm1, %v3276_v27  ;;  %v13421_v27 = vld [vmem:[#allocation42_spill] sm:$0xff] }
 0x426   :  { %8394 = vmatmul.msk.f32.gmra.mxu3 %vm216_vm1, %v4614_v44  ;;  %v3178_v44 = vadd.f32 %v10116_v48, %v13421_v27  ;;  %v3279_v48 = vld [vmem:[%s13229_s0 + $0x14c] sm:$0xff] }
 0x427   :  { %v4310_v4 = vpop.f32.mrf.mxu2 }
 0x428   :  { %v4517_v23 = vadd.f32 %v4310_v4, %v3847_v11  ;;  %v11323_v2 = vpop.f32.mrf.mxu0  ;;  %v3848_v34 = vadd.f32 %v3643_v49, %v3178_v44  ;;  %v4616_v49 = vld [vmem:[%s13229_s0 + $0x145] sm:$0xff] }
 0x429   :  { %v3652_v51 = vpop.f32.mrf.mxu1  ;;  %v4980_v32 = vpop.f32.mrf.mxu3 }
 0x42a   :  { %v11331_v31 = vadd.f32 %v4980_v32, %v4517_v23  ;;  %v5270_v23 = vld [vmem:[%s13229_s0 + $0xc6] sm:$0xff] }
 0x42b   :  { %8462 = vmatmul.msk.f32.gmra.mxu0 %vm216_vm1, %v5269_v25 }
 0x42c   :  { %13420 = vst [vmem:[#allocation41_spill] sm:$0xff] %v11331_v31  ;;  %8232 = vmatmul.msk.f32.gmra.mxu1 %vm216_vm1, %v3278_v41  ;;  %8312 = vmatmul.msk.f32.gmra.mxu2 %vm216_vm1, %v3277_v22  ;;  %v13423_v22 = vld [vmem:[#allocation43_spill] sm:$0xff] }
 0x42e   :  { %8395 = vmatmul.msk.f32.gmra.mxu3 %vm216_vm1, %v4615_v57  ;;  %v3179_v57 = vadd.f32 %v10134_v55, %v13423_v22  ;;  %v3280_v55 = vld [vmem:[%s13229_s0 + $0x154] sm:$0xff] }
 0x42f   :  { %v4313_v11 = vpop.f32.mrf.mxu2 }
 0x430   :  { %v4518_v4 = vadd.f32 %v4313_v11, %v3848_v34  ;;  %v11342_v32 = vpop.f32.mrf.mxu0  ;;  %v3849_v44 = vadd.f32 %v3646_v53, %v3179_v57  ;;  %v4617_v53 = vld [vmem:[%s13229_s0 + $0x14d] sm:$0xff] }
 0x431   :  { %v3655_v25 = vpop.f32.mrf.mxu1  ;;  %v4983_v31 = vpop.f32.mrf.mxu3 }
 0x432   :  { %v11350_v27 = vadd.f32 %v4983_v31, %v4518_v4  ;;  %v5271_v4 = vld [vmem:[%s13229_s0 + $0xce] sm:$0xff] }
 0x433   :  { %8463 = vmatmul.msk.f32.gmra.mxu0 %vm216_vm1, %v5270_v23 }
 0x434   :  { %13422 = vst [vmem:[#allocation42_spill] sm:$0xff] %v11350_v27  ;;  %8233 = vmatmul.msk.f32.gmra.mxu1 %vm216_vm1, %v3279_v48  ;;  %8313 = vmatmul.msk.f32.gmra.mxu2 %vm216_vm1, %v3278_v41  ;;  %v13425_v41 = vld [vmem:[#allocation44_spill] sm:$0xff] }
 0x436   :  { %8396 = vmatmul.msk.f32.gmra.mxu3 %vm216_vm1, %v4616_v49  ;;  %v3180_v49 = vadd.f32 %v10152_v62, %v13425_v41  ;;  %v3281_v62 = vld [vmem:[%s13229_s0 + $0x15c] sm:$0xff] }
 0x437   :  { %v4316_v34 = vpop.f32.mrf.mxu2 }
 0x438   :  { %v4519_v11 = vadd.f32 %v4316_v34, %v3849_v44  ;;  %v11361_v31 = vpop.f32.mrf.mxu0  ;;  %v3850_v57 = vadd.f32 %v3649_v50, %v3180_v49  ;;  %v4618_v50 = vld [vmem:[%s13229_s0 + $0x155] sm:$0xff] }
 0x439   :  { %v3658_v23 = vpop.f32.mrf.mxu1  ;;  %v4986_v27 = vpop.f32.mrf.mxu3 }
 0x43a   :  { %v11369_v22 = vadd.f32 %v4986_v27, %v4519_v11  ;;  %v5272_v11 = vld [vmem:[%s13229_s0 + $0xd6] sm:$0xff] }
 0x43b   :  { %8464 = vmatmul.msk.f32.gmra.mxu0 %vm216_vm1, %v5271_v4 }
 0x43c   :  { %13424 = vst [vmem:[#allocation43_spill] sm:$0xff] %v11369_v22  ;;  %8234 = vmatmul.msk.f32.gmra.mxu1 %vm216_vm1, %v3280_v55  ;;  %8314 = vmatmul.msk.f32.gmra.mxu2 %vm216_vm1, %v3279_v48  ;;  %v13427_v48 = vld [vmem:[#allocation45_spill] sm:$0xff] }
 0x43e   :  { %8397 = vmatmul.msk.f32.gmra.mxu3 %vm216_vm1, %v4617_v53  ;;  %v3181_v53 = vadd.f32 %v10170_v7, %v13427_v48  ;;  %v3282_v7 = vld [vmem:[%s13229_s0 + $0x164] sm:$0xff] }
 0x43f   :  { %v4319_v44 = vpop.f32.mrf.mxu2 }
 0x440   :  { %v4520_v34 = vadd.f32 %v4319_v44, %v3850_v57  ;;  %v11380_v27 = vpop.f32.mrf.mxu0  ;;  %v3851_v49 = vadd.f32 %v3652_v51, %v3181_v53  ;;  %v4619_v51 = vld [vmem:[%s13229_s0 + $0x15d] sm:$0xff] }
 0x441   :  { %v3661_v4 = vpop.f32.mrf.mxu1  ;;  %v4989_v22 = vpop.f32.mrf.mxu3 }
 0x442   :  { %v11388_v41 = vadd.f32 %v4989_v22, %v4520_v34  ;;  %v5273_v34 = vld [vmem:[%s13229_s0 + $0xde] sm:$0xff] }
 0x443   :  { %8465 = vmatmul.msk.f32.gmra.mxu0 %vm216_vm1, %v5272_v11 }
 0x444   :  { %13426 = vst [vmem:[#allocation44_spill] sm:$0xff] %v11388_v41  ;;  %8235 = vmatmul.msk.f32.gmra.mxu1 %vm216_vm1, %v3281_v62  ;;  %8315 = vmatmul.msk.f32.gmra.mxu2 %vm216_vm1, %v3280_v55  ;;  %v13429_v55 = vld [vmem:[#allocation46_spill] sm:$0xff] }
 0x446   :  { %8398 = vmatmul.msk.f32.gmra.mxu3 %vm216_vm1, %v4618_v50  ;;  %v3182_v50 = vadd.f32 %v10188_v6, %v13429_v55  ;;  %v3283_v6 = vld [vmem:[%s13229_s0 + $0x16c] sm:$0xff] }
 0x447   :  { %v4322_v57 = vpop.f32.mrf.mxu2 }
 0x448   :  { %v4521_v44 = vadd.f32 %v4322_v57, %v3851_v49  ;;  %v11399_v22 = vpop.f32.mrf.mxu0  ;;  %v3852_v53 = vadd.f32 %v3655_v25, %v3182_v50  ;;  %v4620_v25 = vld [vmem:[%s13229_s0 + $0x165] sm:$0xff] }
 0x449   :  { %v3664_v11 = vpop.f32.mrf.mxu1  ;;  %v4992_v41 = vpop.f32.mrf.mxu3 }
 0x44a   :  { %v11407_v48 = vadd.f32 %v4992_v41, %v4521_v44  ;;  %v5274_v44 = vld [vmem:[%s13229_s0 + $0xe6] sm:$0xff] }
 0x44b   :  { %8466 = vmatmul.msk.f32.gmra.mxu0 %vm216_vm1, %v5273_v34 }
 0x44c   :  { %13428 = vst [vmem:[#allocation45_spill] sm:$0xff] %v11407_v48  ;;  %8236 = vmatmul.msk.f32.gmra.mxu1 %vm216_vm1, %v3282_v7  ;;  %8316 = vmatmul.msk.f32.gmra.mxu2 %vm216_vm1, %v3281_v62 }
 0x44e   :  { %8399 = vmatmul.msk.f32.gmra.mxu3 %vm216_vm1, %v4619_v51  ;;  %v13431_v51 = vld [vmem:[#allocation47_spill] sm:$0xff] }
 0x44f   :  { %v4325_v49 = vpop.f32.mrf.mxu2  ;;  %v3183_v55 = vadd.f32 %v10206_v13, %v13431_v51  ;;  %v3284_v13 = vld [vmem:[%s13229_s0 + $0x174] sm:$0xff] }
 0x450   :  { %v4522_v57 = vadd.f32 %v4325_v49, %v3852_v53  ;;  %v5620_v41 = vpop.f32.mrf.mxu0  ;;  %v5275_v49 = vld [vmem:[%s13229_s0 + $0xee] sm:$0xff] }
 0x451   :  { %v3667_v34 = vpop.f32.mrf.mxu1  ;;  %v4995_v48 = vpop.f32.mrf.mxu3  ;;  %v11422_v61 = vadd.f32 %v5620_v41, %v11139_v60  ;;  %v3853_v60 = vadd.f32 %v3658_v23, %v3183_v55  ;;  %v4621_v23 = vld [vmem:[%s13229_s0 + $0x16d] sm:$0xff] }
 0x452   :  { %v11427_v62 = vadd.f32 %v4995_v48, %v4522_v57 }
 0x453   :  { %8467 = vmatmul.msk.f32.gmra.mxu0 %vm216_vm1, %v5274_v44 }
 0x454   :  { %13430 = vst [vmem:[#allocation46_spill] sm:$0xff] %v11427_v62  ;;  %8237 = vmatmul.msk.f32.gmra.mxu1 %vm216_vm1, %v3283_v6  ;;  %8317 = vmatmul.msk.f32.gmra.mxu2 %vm216_vm1, %v3282_v7  ;;  %v13432_v7 = vld [vmem:[#allocation48_spill] sm:$0xff] }
 0x456   :  { %8400 = vmatmul.msk.f32.gmra.mxu3 %vm216_vm1, %v4620_v25  ;;  %v3184_v25 = vadd.f32 %v10224_v21, %v13432_v7  ;;  %v3285_v21 = vld [vmem:[%s13229_s0 + $0x17c] sm:$0xff] }
 0x457   :  { %v4328_v50 = vpop.f32.mrf.mxu2 }
 0x458   :  { %v4523_v53 = vadd.f32 %v4328_v50, %v3853_v60  ;;  %v11438_v48 = vpop.f32.mrf.mxu0  ;;  %v3854_v51 = vadd.f32 %v3661_v4, %v3184_v25  ;;  %v4622_v4 = vld [vmem:[%s13229_s0 + $0x175] sm:$0xff] }
 0x459   :  { %v3670_v57 = vpop.f32.mrf.mxu1  ;;  %v4998_v41 = vpop.f32.mrf.mxu3 }
 0x45a   :  { %v11446_v44 = vadd.f32 %v4998_v41, %v4523_v53  ;;  %v5276_v53 = vld [vmem:[%s13229_s0 + $0xf6] sm:$0xff] }
 0x45b   :  { %8468 = vmatmul.msk.f32.gmra.mxu0 %vm216_vm1, %v5275_v49 }
 0x45c   :  { %8238 = vmatmul.msk.f32.gmra.mxu1 %vm216_vm1, %v3284_v13  ;;  %8318 = vmatmul.msk.f32.gmra.mxu2 %vm216_vm1, %v3283_v6  ;;  %v13434_v6 = vld [vmem:[#allocation49_spill] sm:$0xff] }
 0x45e   :  { %8401 = vmatmul.msk.f32.gmra.mxu3 %vm216_vm1, %v4621_v23  ;;  %v3185_v23 = vadd.f32 %v10254_v58, %v13434_v6  ;;  %v3286_v58 = vld [vmem:[%s13229_s0 + $0x184] sm:$0xff] }
 0x45f   :  { %v4331_v55 = vpop.f32.mrf.mxu2 }
 0x460   :  { %v4524_v60 = vadd.f32 %v4331_v55, %v3854_v51  ;;  %v11457_v50 = vpop.f32.mrf.mxu0  ;;  %v3855_v25 = vadd.f32 %v3664_v11, %v3185_v23  ;;  %v4623_v11 = vld [vmem:[%s13229_s0 + $0x17d] sm:$0xff] }
 0x461   :  { %v3673_v49 = vpop.f32.mrf.mxu1  ;;  %v5001_v41 = vpop.f32.mrf.mxu3 }
 0x462   :  { %v11465_v7 = vadd.f32 %v5001_v41, %v4524_v60 }
 0x463   :  { %8469 = vmatmul.msk.f32.gmra.mxu0 %vm216_vm1, %v5276_v53  ;;  %v5277_v53 = vld [vmem:[%s13229_s0 + $0xfe] sm:$0xff] }
 0x464   :  { %13433 = vst [vmem:[#allocation47_spill] sm:$0xff] %v11465_v7  ;;  %8239 = vmatmul.msk.f32.gmra.mxu1 %vm216_vm1, %v3285_v21  ;;  %8319 = vmatmul.msk.f32.gmra.mxu2 %vm216_vm1, %v3284_v13  ;;  %v13436_v13 = vld [vmem:[#allocation50_spill] sm:$0xff] }
 0x466   :  { %8402 = vmatmul.msk.f32.gmra.mxu3 %vm216_vm1, %v4622_v4  ;;  %v3186_v4 = vadd.f32 %v10276_v37, %v13436_v13  ;;  %v3287_v37 = vld [vmem:[%s13229_s0 + $0x18c] sm:$0xff] }
 0x467   :  { %v4334_v51 = vpop.f32.mrf.mxu2 }
 0x468   :  { %v4525_v55 = vadd.f32 %v4334_v51, %v3855_v25  ;;  %v11476_v60 = vpop.f32.mrf.mxu0  ;;  %v3856_v23 = vadd.f32 %v3667_v34, %v3186_v4  ;;  %v4624_v34 = vld [vmem:[%s13229_s0 + $0x185] sm:$0xff] }
 0x469   :  { %v3676_v41 = vpop.f32.mrf.mxu1  ;;  %v5004_v62 = vpop.f32.mrf.mxu3 }
 0x46a   :  { %v11484_v6 = vadd.f32 %v5004_v62, %v4525_v55  ;;  %v5278_v55 = vld [vmem:[%s13229_s0 + $0x106] sm:$0xff] }
 0x46b   :  { %8470 = vmatmul.msk.f32.gmra.mxu0 %vm216_vm1, %v5277_v53 }
 0x46c   :  { %13435 = vst [vmem:[#allocation48_spill] sm:$0xff] %v11484_v6  ;;  %8240 = vmatmul.msk.f32.gmra.mxu1 %vm216_vm1, %v3286_v58  ;;  %8320 = vmatmul.msk.f32.gmra.mxu2 %vm216_vm1, %v3285_v21  ;;  %v13438_v21 = vld [vmem:[#allocation51_spill] sm:$0xff] }
 0x46e   :  { %8403 = vmatmul.msk.f32.gmra.mxu3 %vm216_vm1, %v4623_v11  ;;  %v3187_v11 = vadd.f32 %v10294_v29, %v13438_v21  ;;  %v3288_v29 = vld [vmem:[%s13229_s0 + $0x194] sm:$0xff] }
 0x46f   :  { %v4337_v25 = vpop.f32.mrf.mxu2 }
 0x470   :  { %v4526_v51 = vadd.f32 %v4337_v25, %v3856_v23  ;;  %v5632_v62 = vpop.f32.mrf.mxu0  ;;  %v3857_v4 = vadd.f32 %v3670_v57, %v3187_v11  ;;  %v4625_v57 = vld [vmem:[%s13229_s0 + $0x18d] sm:$0xff] }
 0x471   :  { %v11498_v53 = vpop.f32.mrf.mxu1  ;;  %v5007_v7 = vpop.f32.mrf.mxu3 }
 0x472   :  { %v11503_v13 = vadd.f32 %v5007_v7, %v4526_v51  ;;  %v5279_v51 = vld [vmem:[%s13229_s0 + $0x10e] sm:$0xff] }
 0x473   :  { %8471 = vmatmul.msk.f32.gmra.mxu0 %vm216_vm1, %v5278_v55 }
 0x474   :  { %13437 = vst [vmem:[#allocation49_spill] sm:$0xff] %v11503_v13  ;;  %8241 = vmatmul.msk.f32.gmra.mxu1 %vm216_vm1, %v3287_v37  ;;  %8321 = vmatmul.msk.f32.gmra.mxu2 %vm216_vm1, %v3286_v58  ;;  %v13440_v58 = vld [vmem:[#allocation52_spill] sm:$0xff] }
 0x475   :  { %v5280_v13 = vld [vmem:[%s13229_s0 + $0x116] sm:$0xff] }
 0x476   :  { %8404 = vmatmul.msk.f32.gmra.mxu3 %vm216_vm1, %v4624_v34  ;;  %v3188_v34 = vadd.f32 %v10312_v0, %v13440_v58 }
 0x477   :  { %v4340_v23 = vpop.f32.mrf.mxu2 }
 0x478   :  { %v4527_v25 = vadd.f32 %v4340_v23, %v3857_v4  ;;  %v5635_v7 = vpop.f32.mrf.mxu0  ;;  %v3858_v11 = vadd.f32 %v3673_v49, %v3188_v34  ;;  %v13441_v4 = vld [vmem:[#allocation38_spill] sm:$0xff]  ;;  %v13442_v34 = vld [vmem:[#allocation53_spill] sm:$0xff] }
 0x479   :  { %v11517_v55 = vpop.f32.mrf.mxu1  ;;  %v5010_v6 = vpop.f32.mrf.mxu3  ;;  %v3289_v49 = vld [vmem:[%s13229_s0 + $0x19c] sm:$0xff] }
 0x47a   :  { %v11522_v21 = vadd.f32 %v5010_v6, %v4527_v25  ;;  %v3174_v6 = vadd.f32 %v10044_v19, %v13441_v4 }
 0x47b   :  { %8472 = vmatmul.msk.f32.gmra.mxu0 %vm216_vm1, %v5279_v51 }
 0x47c   :  { %13439 = vst [vmem:[#allocation50_spill] sm:$0xff] %v11522_v21  ;;  %8242 = vmatmul.msk.f32.gmra.mxu1 %vm216_vm1, %v3288_v29  ;;  %8322 = vmatmul.msk.f32.gmra.mxu2 %vm216_vm1, %v3287_v37  ;;  %v3844_v21 = vadd.f32 %v11193_v16, %v3174_v6  ;;  %v3189_v16 = vadd.f32 %v10330_v36, %v13442_v34  ;;  %v11564_v36 = vld [vmem:[%s13232_s3] ss:$0 sm:$0xff] }
 0x47e   :  { %8405 = vmatmul.msk.f32.gmra.mxu3 %vm216_vm1, %v4625_v57  ;;  %v4514_v19 = vadd.f32 %v11264_v1, %v3844_v21  ;;  %v4626_v57 = vld [vmem:[%s13229_s0 + $0x195] sm:$0xff] }
 0x47f   :  { %v4343_v23 = vpop.f32.mrf.mxu2 }
 0x480   :  { %v4528_v25 = vadd.f32 %v4343_v23, %v3858_v11  ;;  %v5638_v51 = vpop.f32.mrf.mxu0  ;;  %v3859_v11 = vadd.f32 %v3676_v41, %v3189_v16  ;;  %v5184_v4 = vadd.f32 %v11271_v63, %v4514_v19  ;;  %v5281_v23 = vld [vmem:[%s13229_s0 + $0x11e] sm:$0xff]  ;;  %v5852_v41 = vadd.f32 %v5635_v7, %v11236_v8 }
 0x481   :  { %v11539_v0 = vpop.f32.mrf.mxu1  ;;  %v5013_v58 = vpop.f32.mrf.mxu3  ;;  %v5853_v1 = vadd.f32 %v5638_v51, %v11255_v42  ;;  %v3290_v42 = vld [vmem:[%s13229_s0 + $0x1a4] sm:$0xff]  ;;  %v5850_v7 = vadd.f32 %v11476_v60, %v11198_v30  ;;  %v5848_v60 = vadd.f32 %v11438_v48, %v11158_v59 }
 0x482   :  { %v11544_v37 = vadd.f32 %v5013_v58, %v4528_v25  ;;  %v5851_v58 = vadd.f32 %v5632_v62, %v11217_v46  ;;  %v4627_v8 = vld [vmem:[%s13229_s0 + $0x19d] sm:$0xff]  ;;  %v5937_v34 = vadd.f32 %v11564_v36, %v5852_v41  ;;  %v5849_v62 = vadd.f32 %v11457_v50, %v11177_v12  ;;  %v5282_v30 = vld [vmem:[%s13229_s0 + $0x126] sm:$0xff] }
 0x483   :  { %8473 = vmatmul.msk.f32.gmra.mxu0 %vm216_vm1, %v5280_v13  ;;  %v5938_v19 = vadd.f32 %v11564_v36, %v5853_v1  ;;  %v3291_v50 = vld [vmem:[%s13229_s0 + $0x1ac] sm:$0xff] }
 0x484   :  { %8243 = vmatmul.msk.f32.gmra.mxu1 %vm216_vm1, %v3289_v49  ;;  %8323 = vmatmul.msk.f32.gmra.mxu2 %vm216_vm1, %v3288_v29  ;;  %v5936_v16 = vadd.f32 %v11564_v36, %v5851_v58  ;;  %v4628_v59 = vld [vmem:[%s13229_s0 + $0x1a5] sm:$0xff] }
 0x486   :  { %8406 = vmatmul.msk.f32.gmra.mxu3 %vm216_vm1, %v4626_v57  ;;  %v6017_v48 = vmax.f32 %v5936_v16, 0.0  ;;  %v5843_v16 = vadd.f32 %v11342_v32, %v11063_v35  ;;  %v5842_v35 = vadd.f32 %v11323_v2, %v11044_v20  ;;  %v5284_v20 = vld [vmem:[%s13229_s0 + $0x136] sm:$0xff]  ;;  %v5840_v2 = vadd.f32 %v11285_v17, %v11006_v43 }
 0x487   :  { %v4346_v21 = vpop.f32.mrf.mxu2  ;;  %v4630_v17 = vld [vmem:[%s13229_s0 + $0x1b5] sm:$0xff] }
 0x488   :  { %v4529_v13 = vadd.f32 %v4346_v21, %v3859_v11  ;;  %v5641_v6 = vpop.f32.mrf.mxu0 }
 0x489   :  { %v11567_v29 = vpop.f32.mrf.mxu1  ;;  %v5016_v25 = vpop.f32.mrf.mxu3  ;;  %v5854_v63 = vadd.f32 %v5641_v6, %v5184_v4  ;;  %v6019_v4 = vmax.f32 %v5938_v19, 0.0  ;;  %v5934_v6 = vadd.f32 %v11564_v36, %v5849_v62 }
 0x48a   :  { %v11572_v51 = vadd.f32 %v5016_v25, %v4529_v13  ;;  %v6018_v13 = vmax.f32 %v5937_v34, 0.0  ;;  %v5846_v25 = vadd.f32 %v11399_v22, %v11120_v45  ;;  %v5283_v45 = vld [vmem:[%s13229_s0 + $0x12e] sm:$0xff]  ;;  %v5844_v22 = vadd.f32 %v11361_v31, %v11082_v52 }
 0x48b   :  { %v5939_v57 = vadd.f32 %v11564_v36, %v5854_v63  ;;  %8474 = vmatmul.msk.f32.gmra.mxu0 %vm216_vm1, %v5281_v23  ;;  %v13443_v23 = vld [vmem:[#allocation55_spill] sm:$0xff]  ;;  %v5933_v63 = vadd.f32 %v11564_v36, %v5848_v60 }
 0x48c   :  { %8244 = vmatmul.msk.f32.gmra.mxu1 %vm216_vm1, %v3290_v42  ;;  %8324 = vmatmul.msk.f32.gmra.mxu2 %vm216_vm1, %v3289_v49  ;;  %v5935_v49 = vadd.f32 %v11564_v36, %v5850_v7  ;;  %v3191_v41 = vadd.f32 %v10366_v9, %v13443_v23  ;;  %v5932_v9 = vadd.f32 %v11564_v36, %v11422_v61  ;;  %v3292_v61 = vld [vmem:[%s13229_s0 + $0x1b4] sm:$0xff] }
 0x48d   :  { %v6020_v46 = vmax.f32 %v5939_v57, 0.0  ;;  %v5845_v57 = vadd.f32 %v11380_v27, %v11101_v3  ;;  %v6014_v27 = vmax.f32 %v5933_v63, 0.0  ;;  %v4629_v52 = vld [vmem:[%s13229_s0 + $0x1ad] sm:$0xff]  ;;  %v5929_v32 = vadd.f32 %v11564_v36, %v5844_v22 }
 0x48e   :  { %8407 = vmatmul.msk.f32.gmra.mxu3 %vm216_vm1, %v4627_v8  ;;  %v6016_v58 = vmax.f32 %v5935_v49, 0.0  ;;  %v3861_v19 = vadd.f32 %v11517_v55, %v3191_v41  ;;  %v5931_v55 = vadd.f32 %v11564_v36, %v5846_v25  ;;  %v6013_v31 = vmax.f32 %v5932_v9, 0.0 }
 0x48f   :  { %v11590_v11 = vpop.f32.mrf.mxu2  ;;  %6107 = vmatpush.msrb.mxu1 %v6020_v46  ;;  %v6010_v25 = vmax.f32 %v5929_v32, 0.0 }
 0x490   :  { %v11592_v1 = vpop.f32.mrf.mxu0  ;;  %v6012_v49 = vmax.f32 %v5931_v55, 0.0 }
 0x491   :  { %v11600_v21 = vpop.f32.mrf.mxu1  ;;  %v11602_v12 = vpop.f32.mrf.mxu3  ;;  %6108 = vmatpush.msrb.mxu1 %v6019_v4  ;;  %v5930_v4 = vadd.f32 %v11564_v36, %v5845_v57  ;;  %v13445_v57 = vld [vmem:[#allocation57_spill] sm:$0xff] }
 0x492   :  { %v3193_v9 = vadd.f32 %v10402_v39, %v13445_v57  ;;  %v5285_v39 = vld [vmem:[%s13229_s0 + $0x13e] sm:$0xff] }
 0x493   :  { %8475 = vmatmul.msk.f32.gmra.mxu0 %vm216_vm1, %v5282_v30  ;;  %6109 = vmatpush.msrb.mxu1 %v6018_v13  ;;  %v13444_v30 = vld [vmem:[#allocation56_spill] sm:$0xff] }
 0x494   :  { %8245 = vmatmul.msk.f32.gmra.mxu1 %vm216_vm1, %v3291_v50  ;;  %8325 = vmatmul.msk.f32.gmra.mxu2 %vm216_vm1, %v3290_v42  ;;  %v6015_v42 = vmax.f32 %v5934_v6, 0.0  ;;  %v3192_v60 = vadd.f32 %v10384_v24, %v13444_v30  ;;  %v5841_v6 = vadd.f32 %v11304_v5, %v11025_v38  ;;  %v5928_v24 = vadd.f32 %v11564_v36, %v5843_v16  ;;  %v3293_v5 = vld [vmem:[%s13229_s0 + $0x1bc] sm:$0xff] }
 0x495   :  { %6110 = vmatpush.msrb.mxu1 %v6017_v48  ;;  %v6011_v48 = vmax.f32 %v5930_v4, 0.0  ;;  %v4631_v4 = vld [vmem:[%s13229_s0 + $0x1bd] sm:$0xff] }
 0x496   :  { %8408 = vmatmul.msk.f32.gmra.mxu3 %vm216_vm1, %v4628_v59  ;;  %v3862_v13 = vadd.f32 %v11539_v0, %v3192_v60  ;;  %v5927_v0 = vadd.f32 %v11564_v36, %v5842_v35  ;;  %v6009_v43 = vmax.f32 %v5928_v24, 0.0 }
 0x497   :  { %v4352_v8 = vpop.f32.mrf.mxu2  ;;  %6111 = vmatpush.msrb.mxu1 %v6016_v58  ;;  %v5839_v58 = vadd.f32 %v11266_v28, %v10987_v14  ;;  %v3863_v28 = vadd.f32 %v11567_v29, %v3193_v9  ;;  %v3294_v29 = vld [vmem:[%s13229_s0 + $0x1c4] sm:$0xff] }
 0x498   :  { %v4531_v7 = vadd.f32 %v4352_v8, %v3861_v19  ;;  %v11625_v34 = vpop.f32.mrf.mxu0  ;;  %v5926_v19 = vadd.f32 %v11564_v36, %v5841_v6  ;;  %v5925_v8 = vadd.f32 %v11564_v36, %v5840_v2  ;;  %v6008_v14 = vmax.f32 %v5927_v0, 0.0 }
 0x499   :  { %v11633_v46 = vpop.f32.mrf.mxu1  ;;  %v5022_v3 = vpop.f32.mrf.mxu3  ;;  %6112 = vmatpush.msrb.mxu1 %v6015_v42  ;;  %v5924_v42 = vadd.f32 %v11564_v36, %v5839_v58 }
 0x49a   :  { %v11638_v62 = vadd.f32 %v5022_v3, %v4531_v7 }
 0x49b   :  { %8476 = vmatmul.msk.f32.gmra.mxu0 %vm216_vm1, %v5283_v45  ;;  %6113 = vmatpush.msrb.mxu1 %v6014_v27  ;;  %v6007_v45 = vmax.f32 %v5926_v19, 0.0  ;;  %v6006_v27 = vmax.f32 %v5925_v8, 0.0 }
 0x49c   :  { %8246 = vmatmul.msk.f32.gmra.mxu1 %vm216_vm1, %v3292_v61  ;;  %8326 = vmatmul.msk.f32.gmra.mxu2 %vm216_vm1, %v3291_v50 }
 0x49d   :  { %6114 = vmatpush.msrb.mxu1 %v6013_v31  ;;  %v13446_v31 = vld [vmem:[#allocation58_spill] sm:$0xff] }
 0x49e   :  { %8409 = vmatmul.msk.f32.gmra.mxu3 %vm216_vm1, %v4629_v52  ;;  %v6005_v52 = vmax.f32 %v5924_v42, 0.0  ;;  %v3194_v30 = vadd.f32 %v10420_v56, %v13446_v31  ;;  %v3295_v56 = vld [vmem:[%s13229_s0 + $0x1cc] sm:$0xff] }
 0x49f   :  { %v4355_v59 = vpop.f32.mrf.mxu2  ;;  %6115 = vmatpush.msrb.mxu1 %v6012_v49 }
 0x4a0   :  { %v4532_v50 = vadd.f32 %v4355_v59, %v3862_v13  ;;  %v11659_v23 = vpop.f32.mrf.mxu0  ;;  %v3864_v60 = vadd.f32 %v11600_v21, %v3194_v30  ;;  %v5286_v13 = vld [vmem:[%s13229_s0 + $0x146] sm:$0xff] }
 0x4a1   :  { %v11667_v41 = vpop.f32.mrf.mxu1  ;;  %v5025_v38 = vpop.f32.mrf.mxu3  ;;  %6116 = vmatpush.msrb.mxu1 %v6011_v48  ;;  %v4632_v21 = vld [vmem:[%s13229_s0 + $0x1c5] sm:$0xff] }
 0x4a2   :  { %v11672_v63 = vadd.f32 %v5025_v38, %v4532_v50  ;;  %v13447_v48 = vld [vmem:[#allocation59_spill] sm:$0xff] }
 0x4a3   :  { %8477 = vmatmul.msk.f32.gmra.mxu0 %vm216_vm1, %v5284_v20  ;;  %6117 = vmatpush.msrb.mxu1 %v6010_v25  ;;  %v3195_v50 = vadd.f32 %v10438_v15, %v13447_v48  ;;  %v3296_v15 = vld [vmem:[%s13229_s0 + $0x1d4] sm:$0xff]  ;;  %v5290_v48 = vld [vmem:[%s13229_s0 + $0x166] sm:$0xff] }
 0x4a4   :  { %8247 = vmatmul.msk.f32.gmra.mxu1 %vm216_vm1, %v3293_v5  ;;  %8327 = vmatmul.msk.f32.gmra.mxu2 %vm216_vm1, %v3292_v61 }
 0x4a5   :  { %6118 = vmatpush.msrb.mxu1 %v6009_v43  ;;  %v3865_v20 = vadd.f32 %v11633_v46, %v3195_v50  ;;  %v4633_v46 = vld [vmem:[%s13229_s0 + $0x1cd] sm:$0xff] }
 0x4a6   :  { %8410 = vmatmul.msk.f32.gmra.mxu3 %vm216_vm1, %v4630_v17  ;;  %v13448_v17 = vld [vmem:[#allocation60_spill] sm:$0xff] }
 0x4a7   :  { %v4358_v7 = vpop.f32.mrf.mxu2  ;;  %6119 = vmatpush.msrb.mxu1 %v6008_v14  ;;  %v3196_v43 = vadd.f32 %v10456_v10, %v13448_v17  ;;  %v3297_v10 = vld [vmem:[%s13229_s0 + $0x1dc] sm:$0xff] }
 0x4a8   :  { %v4533_v22 = vadd.f32 %v4358_v7, %v3863_v28  ;;  %v11689_v55 = vpop.f32.mrf.mxu0  ;;  %v5288_v28 = vld [vmem:[%s13229_s0 + $0x156] sm:$0xff] }
 0x4a9   :  { %v3700_v3 = vpop.f32.mrf.mxu1  ;;  %v5028_v61 = vpop.f32.mrf.mxu3  ;;  %6120 = vmatpush.msrb.mxu1 %v6007_v45  ;;  %v3866_v57 = vadd.f32 %v11667_v41, %v3196_v43  ;;  %v4634_v41 = vld [vmem:[%s13229_s0 + $0x1d5] sm:$0xff] }
 0x4aa   :  { %v11697_v16 = vadd.f32 %v5028_v61, %v4533_v22  ;;  %v13449_v22 = vld [vmem:[#allocation61_spill] sm:$0xff]  ;;  %v5291_v43 = vld [vmem:[%s13229_s0 + $0x16e] sm:$0xff] }
 0x4ab   :  { %8478 = vmatmul.msk.f32.gmra.mxu0 %vm216_vm1, %v5285_v39  ;;  %6121 = vmatpush.msrb.mxu1 %v6006_v27  ;;  %v3197_v39 = vadd.f32 %v10474_v18, %v13449_v22  ;;  %v3298_v18 = vld [vmem:[%s13229_s0 + $0x1e4] sm:$0xff] }
 0x4ac   :  { %8248 = vmatmul.msk.f32.gmra.mxu1 %vm216_vm1, %v3294_v29  ;;  %8328 = vmatmul.msk.f32.gmra.mxu2 %vm216_vm1, %v3293_v5  ;;  %v5287_v5 = vld [vmem:[%s13229_s0 + $0x14e] sm:$0xff] }
 0x4ad   :  { %6122 = vmatpush.msrb.mxu1 %v6005_v52  ;;  %v3867_v61 = vadd.f32 %v3700_v3, %v3197_v39  ;;  %v5289_v52 = vld [vmem:[%s13229_s0 + $0x15e] sm:$0xff] }
 0x4ae   :  { %8411 = vmatmul.msk.f32.gmra.mxu3 %vm216_vm1, %v4631_v4  ;;  %v4635_v3 = vld [vmem:[%s13229_s0 + $0x1dd] sm:$0xff] }
 0x4af   :  { %v4361_v35 = vpop.f32.mrf.mxu2 }
 0x4b0   :  { %v4534_v32 = vadd.f32 %v4361_v35, %v3864_v60  ;;  %v11709_v49 = vpop.f32.mrf.mxu0  ;;  %v13450_v35 = vld [vmem:[#allocation62_spill] sm:$0xff] }
 0x4b1   :  { %v3703_v6 = vpop.f32.mrf.mxu1  ;;  %v5031_v24 = vpop.f32.mrf.mxu3 }
 0x4b2   :  { %v11717_v59 = vadd.f32 %v5031_v24, %v4534_v32  ;;  %v3198_v32 = vadd.f32 %v10492_v26, %v13450_v35  ;;  %v3299_v26 = vld [vmem:[%s13229_s0 + $0x1ec] sm:$0xff] }
 0x4b3   :  { %8479 = vmatmul.msk.f32.gmra.mxu0 %vm216_vm1, %v5286_v13 }
 0x4b4   :  { %8249 = vmatmul.msk.f32.gmra.mxu1 %vm216_vm1, %v3295_v56  ;;  %8329 = vmatmul.msk.f32.gmra.mxu2 %vm216_vm1, %v3294_v29  ;;  %v3868_v13 = vadd.f32 %v3703_v6, %v3198_v32  ;;  %v4636_v6 = vld [vmem:[%s13229_s0 + $0x1e5] sm:$0xff] }
 0x4b6   :  { %8412 = vmatmul.msk.f32.gmra.mxu3 %vm216_vm1, %v4632_v21 }
 0x4b7   :  { %v4364_v2 = vpop.f32.mrf.mxu2 }
 0x4b8   :  { %v4535_v0 = vadd.f32 %v4364_v2, %v3865_v20  ;;  %v11729_v38 = vpop.f32.mrf.mxu0 }
 0x4b9   :  { %v3706_v25 = vpop.f32.mrf.mxu1  ;;  %v5034_v58 = vpop.f32.mrf.mxu3 }
 0x4ba   :  { %v11737_v19 = vadd.f32 %v5034_v58, %v4535_v0 }
 0x4bb   :  { %8480 = vmatmul.msk.f32.gmra.mxu0 %vm216_vm1, %v5287_v5  ;;  %v13451_v5 = vld [vmem:[#allocation63_spill] sm:$0xff] }
 0x4bc   :  { %8250 = vmatmul.msk.f32.gmra.mxu1 %vm216_vm1, %v3296_v15  ;;  %8330 = vmatmul.msk.f32.gmra.mxu2 %vm216_vm1, %v3295_v56  ;;  %v3199_v58 = vadd.f32 %v10510_v33, %v13451_v5  ;;  %v3300_v33 = vld [vmem:[%s13229_s0 + $0x1f4] sm:$0xff] }
 0x4be   :  { %8413 = vmatmul.msk.f32.gmra.mxu3 %vm216_vm1, %v4633_v46 }
 0x4bf   :  { %v4367_v9 = vpop.f32.mrf.mxu2 }
 0x4c0   :  { %v4536_v8 = vadd.f32 %v4367_v9, %v3866_v57  ;;  %v11749_v14 = vpop.f32.mrf.mxu0 }
 0x4c1   :  { %v3709_v42 = vpop.f32.mrf.mxu1  ;;  %v5037_v7 = vpop.f32.mrf.mxu3 }
 0x4c2   :  { %v11757_v45 = vadd.f32 %v5037_v7, %v4536_v8 }
 0x4c3   :  { %8481 = vmatmul.msk.f32.gmra.mxu0 %vm216_vm1, %v5288_v28  ;;  %v13452_v28 = vld [vmem:[#allocation64_spill] sm:$0xff] }
 0x4c4   :  { %8251 = vmatmul.msk.f32.gmra.mxu1 %vm216_vm1, %v3297_v10  ;;  %8331 = vmatmul.msk.f32.gmra.mxu2 %vm216_vm1, %v3296_v15  ;;  %v3200_v7 = vadd.f32 %v10528_v40, %v13452_v28  ;;  %v3301_v40 = vld [vmem:[%s13229_s0 + $0x1fc] sm:$0xff] }
 0x4c6   :  { %8414 = vmatmul.msk.f32.gmra.mxu3 %vm216_vm1, %v4634_v41 }
 0x4c7   :  { %v4370_v29 = vpop.f32.mrf.mxu2 }
 0x4c8   :  { %v4537_v27 = vadd.f32 %v4370_v29, %v3867_v61  ;;  %v11768_v4 = vpop.f32.mrf.mxu0  ;;  %v5292_v61 = vld [vmem:[%s13229_s0 + $0x176] sm:$0xff] }
 0x4c9   :  { %v3712_v31 = vpop.f32.mrf.mxu1  ;;  %v5040_v30 = vpop.f32.mrf.mxu3 }
 0x4ca   :  { %v11776_v60 = vadd.f32 %v5040_v30, %v4537_v27  ;;  %v13453_v30 = vld [vmem:[#allocation65_spill] sm:$0xff] }
 0x4cb   :  { %8482 = vmatmul.msk.f32.gmra.mxu0 %vm216_vm1, %v5289_v52 }
 0x4cc   :  { %8252 = vmatmul.msk.f32.gmra.mxu1 %vm216_vm1, %v3298_v18  ;;  %8332 = vmatmul.msk.f32.gmra.mxu2 %vm216_vm1, %v3297_v10  ;;  %v3870_v10 = vadd.f32 %v3709_v42, %v3200_v7  ;;  %v4638_v42 = vld [vmem:[%s13229_s0 + $0x1f5] sm:$0xff] }
 0x4ce   :  { %8415 = vmatmul.msk.f32.gmra.mxu3 %vm216_vm1, %v4635_v3 }
 0x4cf   :  { %v4373_v24 = vpop.f32.mrf.mxu2 }
 0x4d0   :  { %v4538_v56 = vadd.f32 %v4373_v24, %v3868_v13  ;;  %v5668_v21 = vpop.f32.mrf.mxu0  ;;  %v5293_v24 = vld [vmem:[%s13229_s0 + $0x17e] sm:$0xff] }
 0x4d1   :  { %v3715_v50 = vpop.f32.mrf.mxu1  ;;  %v5043_v20 = vpop.f32.mrf.mxu3  ;;  %v11791_v2 = vadd.f32 %v5668_v21, %v11446_v44  ;;  %v3869_v44 = vadd.f32 %v3706_v25, %v3199_v58  ;;  %v4637_v25 = vld [vmem:[%s13229_s0 + $0x1ed] sm:$0xff] }
 0x4d2   :  { %v11796_v0 = vadd.f32 %v5043_v20, %v4538_v56  ;;  %v13454_v20 = vld [vmem:[#allocation66_spill] sm:$0xff] }
 0x4d3   :  { %8483 = vmatmul.msk.f32.gmra.mxu0 %vm216_vm1, %v5290_v48 }
 0x4d4   :  { %8253 = vmatmul.msk.f32.gmra.mxu1 %vm216_vm1, %v3299_v26  ;;  %8333 = vmatmul.msk.f32.gmra.mxu2 %vm216_vm1, %v3298_v18  ;;  %v3201_v18 = vadd.f32 %v10546_v47, %v13453_v30  ;;  %v3302_v47 = vld [vmem:[%s13229_s0 + $0x204] sm:$0xff] }
 0x4d6   :  { %8416 = vmatmul.msk.f32.gmra.mxu3 %vm216_vm1, %v4636_v6  ;;  %v3871_v3 = vadd.f32 %v3712_v31, %v3201_v18  ;;  %v4639_v31 = vld [vmem:[%s13229_s0 + $0x1fd] sm:$0xff]  ;;  %v13457_v18 = vld [vmem:[#allocation68_spill] sm:$0xff] }
 0x4d7   :  { %v4376_v15 = vpop.f32.mrf.mxu2 }
 0x4d8   :  { %v4539_v46 = vadd.f32 %v4376_v15, %v3869_v44  ;;  %v11807_v17 = vpop.f32.mrf.mxu0  ;;  %v5294_v15 = vld [vmem:[%s13229_s0 + $0x186] sm:$0xff] }
 0x4d9   :  { %v3718_v57 = vpop.f32.mrf.mxu1  ;;  %v5046_v9 = vpop.f32.mrf.mxu3 }
 0x4da   :  { %v11815_v8 = vadd.f32 %v5046_v9, %v4539_v46 }
 0x4db   :  { %8484 = vmatmul.msk.f32.gmra.mxu0 %vm216_vm1, %v5291_v43 }
 0x4dc   :  { %8254 = vmatmul.msk.f32.gmra.mxu1 %vm216_vm1, %v3300_v33  ;;  %8334 = vmatmul.msk.f32.gmra.mxu2 %vm216_vm1, %v3299_v26  ;;  %v3202_v26 = vadd.f32 %v10564_v54, %v13454_v20  ;;  %v3303_v54 = vld [vmem:[%s13229_s0 + $0x20c] sm:$0xff] }
 0x4de   :  { %8417 = vmatmul.msk.f32.gmra.mxu3 %vm216_vm1, %v4637_v25  ;;  %v3872_v6 = vadd.f32 %v3715_v50, %v3202_v26  ;;  %v4640_v50 = vld [vmem:[%s13229_s0 + $0x205] sm:$0xff] }
 0x4df   :  { %v4379_v41 = vpop.f32.mrf.mxu2  ;;  %v13456_v25 = vld [vmem:[#allocation83_spill] sm:$0xff] }
 0x4e0   :  { %v4540_v22 = vadd.f32 %v4379_v41, %v3870_v10  ;;  %v11826_v39 = vpop.f32.mrf.mxu0 }
 0x4e1   :  { %v3721_v29 = vpop.f32.mrf.mxu1  ;;  %v5049_v27 = vpop.f32.mrf.mxu3 }
 0x4e2   :  { %v11834_v52 = vadd.f32 %v5049_v27, %v4540_v22 }
 0x4e3   :  { %8485 = vmatmul.msk.f32.gmra.mxu0 %vm216_vm1, %v5292_v61  ;;  %v5295_v61 = vld [vmem:[%s13229_s0 + $0x18e] sm:$0xff] }
 0x4e4   :  { %8255 = vmatmul.msk.f32.gmra.mxu1 %vm216_vm1, %v3301_v40  ;;  %8335 = vmatmul.msk.f32.gmra.mxu2 %vm216_vm1, %v3300_v33  ;;  %v13455_v33 = vld [vmem:[#allocation67_spill] sm:$0xff] }
 0x4e5   :  { %v3203_v28 = vadd.f32 %v13456_v25, %v13455_v33  ;;  %v13461_v33 = vld [vmem:[#allocation70_spill] sm:$0xff]  ;;  %v13462_v25 = vld [vmem:[#allocation87_spill] sm:$0xff] }
 0x4e6   :  { %8418 = vmatmul.msk.f32.gmra.mxu3 %vm216_vm1, %v4638_v42  ;;  %v3304_v42 = vld [vmem:[%s13229_s0 + $0x214] sm:$0xff] }
 0x4e7   :  { %v4382_v35 = vpop.f32.mrf.mxu2  ;;  %v3873_v7 = vadd.f32 %v3718_v57, %v3203_v28  ;;  %v4641_v57 = vld [vmem:[%s13229_s0 + $0x20d] sm:$0xff] }
 0x4e8   :  { %v4541_v32 = vadd.f32 %v4382_v35, %v3871_v3  ;;  %v11845_v13 = vpop.f32.mrf.mxu0  ;;  %v13458_v3 = vld [vmem:[#allocation85_spill] sm:$0xff] }
 0x4e9   :  { %v3724_v56 = vpop.f32.mrf.mxu1  ;;  %v5052_v21 = vpop.f32.mrf.mxu3  ;;  %v3204_v35 = vadd.f32 %v13458_v3, %v13457_v18 }
 0x4ea   :  { %v11853_v48 = vadd.f32 %v5052_v21, %v4541_v32  ;;  %v13460_v21 = vld [vmem:[#allocation69_spill] sm:$0xff] }
 0x4eb   :  { %8486 = vmatmul.msk.f32.gmra.mxu0 %vm216_vm1, %v5293_v24  ;;  %v3874_v32 = vadd.f32 %v3721_v29, %v3204_v35  ;;  %v13459_v24 = vld [vmem:[#allocation54_spill] sm:$0xff] }
 0x4ec   :  { %8256 = vmatmul.msk.f32.gmra.mxu1 %vm216_vm1, %v3302_v47  ;;  %8336 = vmatmul.msk.f32.gmra.mxu2 %vm216_vm1, %v3301_v40  ;;  %v3305_v29 = vld [vmem:[%s13229_s0 + $0x21c] sm:$0xff] }
 0x4ee   :  { %8419 = vmatmul.msk.f32.gmra.mxu3 %vm216_vm1, %v4639_v31 }
 0x4ef   :  { %v4385_v5 = vpop.f32.mrf.mxu2 }
 0x4f0   :  { %v4542_v58 = vadd.f32 %v4385_v5, %v3872_v6  ;;  %v5680_v44 = vpop.f32.mrf.mxu0  ;;  %v5296_v6 = vld [vmem:[%s13229_s0 + $0x196] sm:$0xff] }
 0x4f1   :  { %v11867_v46 = vpop.f32.mrf.mxu1  ;;  %v5055_v43 = vpop.f32.mrf.mxu3 }
 0x4f2   :  { %v11872_v9 = vadd.f32 %v5055_v43, %v4542_v58 }
 0x4f3   :  { %8487 = vmatmul.msk.f32.gmra.mxu0 %vm216_vm1, %v5294_v15 }
 0x4f4   :  { %8257 = vmatmul.msk.f32.gmra.mxu1 %vm216_vm1, %v3303_v54  ;;  %8337 = vmatmul.msk.f32.gmra.mxu2 %vm216_vm1, %v3302_v47  ;;  %v3190_v47 = vadd.f32 %v13460_v21, %v13459_v24 }
 0x4f6   :  { %8420 = vmatmul.msk.f32.gmra.mxu3 %vm216_vm1, %v4640_v50  ;;  %v3860_v5 = vadd.f32 %v11498_v53, %v3190_v47  ;;  %v4642_v50 = vld [vmem:[%s13229_s0 + $0x215] sm:$0xff]  ;;  %v3205_v53 = vadd.f32 %v13462_v25, %v13461_v33  ;;  %v3307_v25 = vld [vmem:[%s13229_s0 + $0x22c] sm:$0xff] }
 0x4f7   :  { %v4388_v10 = vpop.f32.mrf.mxu2 }
 0x4f8   :  { %v4543_v41 = vadd.f32 %v4388_v10, %v3873_v7  ;;  %v5683_v22 = vpop.f32.mrf.mxu0  ;;  %v3875_v28 = vadd.f32 %v3724_v56, %v3205_v53  ;;  %v3306_v56 = vld [vmem:[%s13229_s0 + $0x224] sm:$0xff] }
 0x4f9   :  { %v11886_v27 = vpop.f32.mrf.mxu1  ;;  %v5058_v40 = vpop.f32.mrf.mxu3 }
 0x4fa   :  { %v11891_v30 = vadd.f32 %v5058_v40, %v4543_v41  ;;  %v5297_v40 = vld [vmem:[%s13229_s0 + $0x19e] sm:$0xff] }
 0x4fb   :  { %8488 = vmatmul.msk.f32.gmra.mxu0 %vm216_vm1, %v5295_v61 }
 0x4fc   :  { %8258 = vmatmul.msk.f32.gmra.mxu1 %vm216_vm1, %v3304_v42  ;;  %8338 = vmatmul.msk.f32.gmra.mxu2 %vm216_vm1, %v3303_v54  ;;  %v4530_v54 = vadd.f32 %v11590_v11, %v3860_v5 }
 0x4fe   :  { %8421 = vmatmul.msk.f32.gmra.mxu3 %vm216_vm1, %v4641_v57  ;;  %v5200_v7 = vadd.f32 %v11602_v12, %v4530_v54  ;;  %v5868_v57 = vadd.f32 %v5683_v22, %v11544_v37  ;;  %v4643_v37 = vld [vmem:[%s13229_s0 + $0x21d] sm:$0xff] }
 0x4ff   :  { %v4391_v31 = vpop.f32.mrf.mxu2  ;;  %v13464_v22 = vld [vmem:[#allocation49_spill] sm:$0xff] }
 0x500   :  { %v4544_v20 = vadd.f32 %v4391_v31, %v3874_v32  ;;  %v5686_v26 = vpop.f32.mrf.mxu0  ;;  %v5866_v21 = vadd.f32 %v11845_v13, %v13464_v22  ;;  %v5953_v47 = vadd.f32 %v11564_v36, %v5868_v57  ;;  %v13465_v31 = vld [vmem:[#allocation48_spill] sm:$0xff]  ;;  %v5298_v13 = vld [vmem:[%s13229_s0 + $0x1a6] sm:$0xff] }
 0x501   :  { %v11908_v58 = vpop.f32.mrf.mxu1  ;;  %v5061_v15 = vpop.f32.mrf.mxu3  ;;  %v5869_v11 = vadd.f32 %v5686_v26, %v11572_v51  ;;  %v13463_v51 = vld [vmem:[#allocation50_spill] sm:$0xff] }
 0x502   :  { %v11913_v43 = vadd.f32 %v5061_v15, %v4544_v20  ;;  %v5867_v35 = vadd.f32 %v5680_v44, %v13463_v51  ;;  %v5865_v20 = vadd.f32 %v11826_v39, %v13465_v31  ;;  %v6034_v53 = vmax.f32 %v5953_v47, 0.0  ;;  %v13470_v51 = vld [vmem:[#allocation45_spill] sm:$0xff] }
 0x503   :  { %8489 = vmatmul.msk.f32.gmra.mxu0 %vm216_vm1, %v5296_v6  ;;  %v5954_v32 = vadd.f32 %v11564_v36, %v5869_v11  ;;  %v13467_v11 = vld [vmem:[#allocation72_spill] sm:$0xff] }
 0x504   :  { %8259 = vmatmul.msk.f32.gmra.mxu1 %vm216_vm1, %v3305_v29  ;;  %8339 = vmatmul.msk.f32.gmra.mxu2 %vm216_vm1, %v3304_v42  ;;  %v5952_v26 = vadd.f32 %v11564_v36, %v5867_v35  ;;  %v5861_v35 = vadd.f32 %v11749_v14, %v13470_v51 }
 0x505   :  { %v6035_v5 = vmax.f32 %v5954_v32, 0.0  ;;  %v5948_v32 = vadd.f32 %v11564_v36, %v11791_v2  ;;  %v3308_v2 = vld [vmem:[%s13229_s0 + $0x234] sm:$0xff] }
 0x506   :  { %8422 = vmatmul.msk.f32.gmra.mxu3 %vm216_vm1, %v4642_v50  ;;  %v5951_v50 = vadd.f32 %v11564_v36, %v5866_v21  ;;  %v13471_v21 = vld [vmem:[#allocation44_spill] sm:$0xff] }
 0x507   :  { %v4394_v10 = vpop.f32.mrf.mxu2 }
 0x508   :  { %v4545_v41 = vadd.f32 %v4394_v10, %v3875_v28  ;;  %v5689_v61 = vpop.f32.mrf.mxu0  ;;  %v5950_v28 = vadd.f32 %v11564_v36, %v5865_v20  ;;  %v13468_v10 = vld [vmem:[#allocation21_spill] sm:$0xff] }
 0x509   :  { %v11931_v18 = vpop.f32.mrf.mxu1  ;;  %v5064_v3 = vpop.f32.mrf.mxu3  ;;  %v5870_v42 = vadd.f32 %v5689_v61, %v5200_v7  ;;  %v6033_v7 = vmax.f32 %v5952_v26, 0.0  ;;  %v13469_v61 = vld [vmem:[#allocation46_spill] sm:$0xff]  ;;  %v13473_v26 = vld [vmem:[#allocation43_spill] sm:$0xff] }
 0x50a   :  { %v11936_v12 = vadd.f32 %v5064_v3, %v4545_v41  ;;  %v3207_v41 = vadd.f32 %v13468_v10, %v13467_v11  ;;  %v6032_v3 = vmax.f32 %v5951_v50, 0.0  ;;  %v13475_v50 = vld [vmem:[#allocation5_spill] sm:$0xff] }
 0x50b   :  { %v5955_v24 = vadd.f32 %v11564_v36, %v5870_v42  ;;  %8490 = vmatmul.msk.f32.gmra.mxu0 %vm216_vm1, %v5297_v40  ;;  %v5862_v40 = vadd.f32 %v11768_v4, %v13469_v61  ;;  %v5299_v4 = vld [vmem:[%s13229_s0 + $0x1ae] sm:$0xff]  ;;  %v13477_v10 = vld [vmem:[#allocation41_spill] sm:$0xff] }
 0x50c   :  { %8260 = vmatmul.msk.f32.gmra.mxu1 %vm216_vm1, %v3306_v56  ;;  %8340 = vmatmul.msk.f32.gmra.mxu2 %vm216_vm1, %v3305_v29  ;;  %v13466_v29 = vld [vmem:[#allocation47_spill] sm:$0xff]  ;;  %v3877_v42 = vadd.f32 %v11886_v27, %v3207_v41  ;;  %v5860_v27 = vadd.f32 %v11729_v38, %v13471_v21  ;;  %v5857_v41 = vadd.f32 %v11659_v23, %v13477_v10 }
 0x50d   :  { %v6036_v44 = vmax.f32 %v5955_v24, 0.0  ;;  %v5864_v54 = vadd.f32 %v11807_v17, %v13466_v29  ;;  %v4644_v17 = vld [vmem:[%s13229_s0 + $0x225] sm:$0xff]  ;;  %v5947_v47 = vadd.f32 %v11564_v36, %v5862_v40  ;;  %v4645_v38 = vld [vmem:[%s13229_s0 + $0x22d] sm:$0xff]  ;;  %v6029_v29 = vmax.f32 %v5948_v32, 0.0  ;;  %v3309_v32 = vld [vmem:[%s13229_s0 + $0x23c] sm:$0xff] }
 0x50e   :  { %8423 = vmatmul.msk.f32.gmra.mxu3 %vm216_vm1, %v4643_v37  ;;  %v5942_v21 = vadd.f32 %v11564_v36, %v5857_v41  ;;  %v13485_v10 = vld [vmem:[#allocation7_spill] sm:$0xff] }
 0x50f   :  { %v11954_v6 = vpop.f32.mrf.mxu2  ;;  %6127 = vmatpush.msrb.mxu2 %v6036_v44  ;;  %v5949_v57 = vadd.f32 %v11564_v36, %v5864_v54  ;;  %v13474_v54 = vld [vmem:[#allocation73_spill] sm:$0xff] }
 0x510   :  { %v11956_v15 = vpop.f32.mrf.mxu0 }
 0x511   :  { %v11964_v33 = vpop.f32.mrf.mxu1  ;;  %v11966_v39 = vpop.f32.mrf.mxu3  ;;  %6128 = vmatpush.msrb.mxu2 %v6035_v5  ;;  %v6030_v31 = vmax.f32 %v5949_v57, 0.0  ;;  %v5859_v5 = vadd.f32 %v11709_v49, %v13473_v26 }
 0x513   :  { %8491 = vmatmul.msk.f32.gmra.mxu0 %vm216_vm1, %v5298_v13  ;;  %6129 = vmatpush.msrb.mxu2 %v6034_v53  ;;  %v5946_v13 = vadd.f32 %v11564_v36, %v5861_v35  ;;  %v3208_v53 = vadd.f32 %v13475_v50, %v13474_v54  ;;  %v5944_v61 = vadd.f32 %v11564_v36, %v5859_v5 }
 0x514   :  { %8261 = vmatmul.msk.f32.gmra.mxu1 %vm216_vm1, %v3307_v25  ;;  %8341 = vmatmul.msk.f32.gmra.mxu2 %vm216_vm1, %v3306_v56  ;;  %v6031_v56 = vmax.f32 %v5950_v28, 0.0  ;;  %v13476_v28 = vld [vmem:[#allocation42_spill] sm:$0xff] }
 0x515   :  { %6130 = vmatpush.msrb.mxu2 %v6033_v7  ;;  %v5858_v49 = vadd.f32 %v11689_v55, %v13476_v28  ;;  %v6028_v7 = vmax.f32 %v5947_v47, 0.0  ;;  %v3878_v11 = vadd.f32 %v11908_v58, %v3208_v53  ;;  %v6027_v57 = vmax.f32 %v5946_v13, 0.0  ;;  %v5300_v55 = vld [vmem:[%s13229_s0 + $0x1b6] sm:$0xff]  ;;  %v13481_v47 = vld [vmem:[#allocation74_spill] sm:$0xff] }
 0x516   :  { %8424 = vmatmul.msk.f32.gmra.mxu3 %vm216_vm1, %v4644_v17  ;;  %v5945_v17 = vadd.f32 %v11564_v36, %v5860_v27  ;;  %v6025_v27 = vmax.f32 %v5944_v61, 0.0 }
 0x517   :  { %v4400_v24 = vpop.f32.mrf.mxu2  ;;  %6131 = vmatpush.msrb.mxu2 %v6032_v3  ;;  %v5943_v51 = vadd.f32 %v11564_v36, %v5858_v49 }
 0x518   :  { %v4547_v37 = vadd.f32 %v4400_v24, %v3877_v42  ;;  %v11989_v22 = vpop.f32.mrf.mxu0  ;;  %v13478_v42 = vld [vmem:[#allocation40_spill] sm:$0xff]  ;;  %v6026_v24 = vmax.f32 %v5945_v17, 0.0 }
 0x519   :  { %v11997_v44 = vpop.f32.mrf.mxu1  ;;  %v5070_v14 = vpop.f32.mrf.mxu3  ;;  %6132 = vmatpush.msrb.mxu2 %v6031_v56  ;;  %v5856_v58 = vadd.f32 %v11625_v34, %v13478_v42  ;;  %v4646_v34 = vld [vmem:[%s13229_s0 + $0x235] sm:$0xff] }
 0x51a   :  { %v12002_v20 = vadd.f32 %v5070_v14, %v4547_v37  ;;  %v13480_v37 = vld [vmem:[#allocation39_spill] sm:$0xff]  ;;  %v13482_v14 = vld [vmem:[#allocation6_spill] sm:$0xff] }
 0x51b   :  { %8492 = vmatmul.msk.f32.gmra.mxu0 %vm216_vm1, %v5299_v4  ;;  %6133 = vmatpush.msrb.mxu2 %v6030_v31  ;;  %v5855_v4 = vadd.f32 %v11592_v1, %v13480_v37  ;;  %v3209_v31 = vadd.f32 %v13482_v14, %v13481_v47  ;;  %v5941_v26 = vadd.f32 %v11564_v36, %v5856_v58  ;;  %v6024_v1 = vmax.f32 %v5943_v51, 0.0  ;;  %v3311_v51 = vld [vmem:[%s13229_s0 + $0x24c] sm:$0xff] }
 0x51c   :  { %13472 = vst [vmem:[#allocation51_spill] sm:$0xff] %v12002_v20  ;;  %8262 = vmatmul.msk.f32.gmra.mxu1 %vm216_vm1, %v3308_v2  ;;  %8342 = vmatmul.msk.f32.gmra.mxu2 %vm216_vm1, %v3307_v25  ;;  %v5303_v47 = vld [vmem:[%s13229_s0 + $0x1ce] sm:$0xff] }
 0x51d   :  { %6134 = vmatpush.msrb.mxu2 %v6029_v29  ;;  %v3879_v5 = vadd.f32 %v11931_v18, %v3209_v31  ;;  %v5940_v13 = vadd.f32 %v11564_v36, %v5855_v4  ;;  %v6023_v29 = vmax.f32 %v5942_v21, 0.0  ;;  %v3310_v18 = vld [vmem:[%s13229_s0 + $0x244] sm:$0xff]  ;;  %v6022_v49 = vmax.f32 %v5941_v26, 0.0  ;;  %v3312_v26 = vld [vmem:[%s13229_s0 + $0x254] sm:$0xff] }
 0x51e   :  { %8425 = vmatmul.msk.f32.gmra.mxu3 %vm216_vm1, %v4645_v38  ;;  %v4647_v36 = vld [vmem:[%s13229_s0 + $0x23d] sm:$0xff] }
 0x51f   :  { %v4403_v40 = vpop.f32.mrf.mxu2  ;;  %6135 = vmatpush.msrb.mxu2 %v6028_v7  ;;  %v6021_v7 = vmax.f32 %v5940_v13, 0.0  ;;  %v13491_v13 = vld [vmem:[#allocation9_spill] sm:$0xff] }
 0x520   :  { %v4548_v25 = vadd.f32 %v4403_v40, %v3878_v11  ;;  %v12023_v3 = vpop.f32.mrf.mxu0  ;;  %v13484_v11 = vld [vmem:[#allocation75_spill] sm:$0xff] }
 0x521   :  { %v12031_v35 = vpop.f32.mrf.mxu1  ;;  %v5073_v23 = vpop.f32.mrf.mxu3  ;;  %6136 = vmatpush.msrb.mxu2 %v6027_v57  ;;  %v3210_v41 = vadd.f32 %v13485_v10, %v13484_v11  ;;  %v13492_v10 = vld [vmem:[#allocation78_spill] sm:$0xff] }
 0x522   :  { %v12036_v56 = vadd.f32 %v5073_v23, %v4548_v25 }
 0x523   :  { %8493 = vmatmul.msk.f32.gmra.mxu0 %vm216_vm1, %v5300_v55  ;;  %6137 = vmatpush.msrb.mxu2 %v6026_v24  ;;  %v3880_v61 = vadd.f32 %v11964_v33, %v3210_v41  ;;  %v5302_v55 = vld [vmem:[%s13229_s0 + $0x1c6] sm:$0xff]  ;;  %v13488_v24 = vld [vmem:[#allocation8_spill] sm:$0xff] }
 0x524   :  { %13479 = vst [vmem:[#allocation52_spill] sm:$0xff] %v12036_v56  ;;  %8263 = vmatmul.msk.f32.gmra.mxu1 %vm216_vm1, %v3309_v32  ;;  %8343 = vmatmul.msk.f32.gmra.mxu2 %vm216_vm1, %v3308_v2  ;;  %v5301_v2 = vld [vmem:[%s13229_s0 + $0x1be] sm:$0xff] }
 0x525   :  { %6138 = vmatpush.msrb.mxu2 %v6025_v27  ;;  %v4648_v33 = vld [vmem:[%s13229_s0 + $0x245] sm:$0xff] }
 0x526   :  { %8426 = vmatmul.msk.f32.gmra.mxu3 %vm216_vm1, %v4646_v34  ;;  %v13493_v41 = vld [vmem:[#allocation10_spill] sm:$0xff] }
 0x527   :  { %v4406_v38 = vpop.f32.mrf.mxu2  ;;  %6139 = vmatpush.msrb.mxu2 %v6024_v1 }
 0x528   :  { %v4549_v54 = vadd.f32 %v4406_v38, %v3879_v5  ;;  %v12053_v50 = vpop.f32.mrf.mxu0  ;;  %v13490_v5 = vld [vmem:[#allocation77_spill] sm:$0xff] }
 0x529   :  { %v3748_v53 = vpop.f32.mrf.mxu1  ;;  %v5076_v28 = vpop.f32.mrf.mxu3  ;;  %6140 = vmatpush.msrb.mxu2 %v6023_v29  ;;  %v3212_v38 = vadd.f32 %v13491_v13, %v13490_v5  ;;  %v5306_v5 = vld [vmem:[%s13229_s0 + $0x1e6] sm:$0xff] }
 0x52a   :  { %v12061_v17 = vadd.f32 %v5076_v28, %v4549_v54 }
 0x52b   :  { %8494 = vmatmul.msk.f32.gmra.mxu0 %vm216_vm1, %v5301_v2  ;;  %6141 = vmatpush.msrb.mxu2 %v6022_v49  ;;  %v3882_v29 = vadd.f32 %v12031_v35, %v3212_v38  ;;  %v4650_v35 = vld [vmem:[%s13229_s0 + $0x255] sm:$0xff] }
 0x52c   :  { %13483 = vst [vmem:[#allocation38_spill] sm:$0xff] %v12061_v17  ;;  %8264 = vmatmul.msk.f32.gmra.mxu1 %vm216_vm1, %v3310_v18  ;;  %8344 = vmatmul.msk.f32.gmra.mxu2 %vm216_vm1, %v3309_v32  ;;  %v13487_v32 = vld [vmem:[#allocation76_spill] sm:$0xff] }
 0x52d   :  { %6142 = vmatpush.msrb.mxu2 %v6021_v7  ;;  %v3211_v37 = vadd.f32 %v13488_v24, %v13487_v32  ;;  %v3313_v7 = vld [vmem:[%s13229_s0 + $0x25c] sm:$0xff]  ;;  %v3314_v24 = vld [vmem:[%s13229_s0 + $0x264] sm:$0xff] }
 0x52e   :  { %8427 = vmatmul.msk.f32.gmra.mxu3 %vm216_vm1, %v4647_v36 }
 0x52f   :  { %v4409_v40 = vpop.f32.mrf.mxu2  ;;  %v3881_v4 = vadd.f32 %v11997_v44, %v3211_v37  ;;  %v4649_v44 = vld [vmem:[%s13229_s0 + $0x24d] sm:$0xff] }
 0x530   :  { %v4550_v57 = vadd.f32 %v4409_v40, %v3880_v61  ;;  %v12073_v25 = vpop.f32.mrf.mxu0  ;;  %v3213_v61 = vadd.f32 %v13493_v41, %v13492_v10 }
 0x531   :  { %v3751_v42 = vpop.f32.mrf.mxu1  ;;  %v5079_v58 = vpop.f32.mrf.mxu3 }
 0x532   :  { %v12081_v23 = vadd.f32 %v5079_v58, %v4550_v57  ;;  %v3883_v40 = vadd.f32 %v3748_v53, %v3213_v61  ;;  %v4651_v53 = vld [vmem:[%s13229_s0 + $0x25d] sm:$0xff]  ;;  %v5307_v61 = vld [vmem:[%s13229_s0 + $0x1ee] sm:$0xff] }
 0x533   :  { %8495 = vmatmul.msk.f32.gmra.mxu0 %vm216_vm1, %v5302_v55 }
 0x534   :  { %13486 = vst [vmem:[#allocation53_spill] sm:$0xff] %v12081_v23  ;;  %8265 = vmatmul.msk.f32.gmra.mxu1 %vm216_vm1, %v3311_v51  ;;  %8345 = vmatmul.msk.f32.gmra.mxu2 %vm216_vm1, %v3310_v18  ;;  %v5304_v18 = vld [vmem:[%s13229_s0 + $0x1d6] sm:$0xff] }
 0x536   :  { %8428 = vmatmul.msk.f32.gmra.mxu3 %vm216_vm1, %v4648_v33 }
 0x537   :  { %v4412_v21 = vpop.f32.mrf.mxu2 }
 0x538   :  { %v4551_v34 = vadd.f32 %v4412_v21, %v3881_v4  ;;  %v12093_v27 = vpop.f32.mrf.mxu0  ;;  %v13494_v4 = vld [vmem:[#allocation79_spill] sm:$0xff] }
 0x539   :  { %v3754_v14 = vpop.f32.mrf.mxu1  ;;  %v5082_v31 = vpop.f32.mrf.mxu3  ;;  %v13495_v21 = vld [vmem:[#allocation11_spill] sm:$0xff] }
 0x53a   :  { %v12101_v1 = vadd.f32 %v5082_v31, %v4551_v34  ;;  %v3214_v34 = vadd.f32 %v13495_v21, %v13494_v4 }
 0x53b   :  { %8496 = vmatmul.msk.f32.gmra.mxu0 %vm216_vm1, %v5303_v47 }
 0x53c   :  { %13489 = vst [vmem:[#allocation55_spill] sm:$0xff] %v12101_v1  ;;  %8266 = vmatmul.msk.f32.gmra.mxu1 %vm216_vm1, %v3312_v26  ;;  %8346 = vmatmul.msk.f32.gmra.mxu2 %vm216_vm1, %v3311_v51  ;;  %v5305_v51 = vld [vmem:[%s13229_s0 + $0x1de] sm:$0xff]  ;;  %v3884_v47 = vadd.f32 %v3751_v42, %v3214_v34 }
 0x53d   :  { %v3317_v34 = vld [vmem:[%s13229_s0 + $0x27c] sm:$0xff] }
 0x53e   :  { %8429 = vmatmul.msk.f32.gmra.mxu3 %vm216_vm1, %v4649_v44 }
 0x53f   :  { %v4415_v54 = vpop.f32.mrf.mxu2 }
 0x540   :  { %v4552_v2 = vadd.f32 %v4415_v54, %v3882_v29  ;;  %v12113_v28 = vpop.f32.mrf.mxu0  ;;  %v3315_v54 = vld [vmem:[%s13229_s0 + $0x26c] sm:$0xff] }
 0x541   :  { %v12118_v49 = vpop.f32.mrf.mxu1  ;;  %v5085_v36 = vpop.f32.mrf.mxu3 }
 0x542   :  { %v12123_v11 = vadd.f32 %v5085_v36, %v4552_v2  ;;  %v4652_v2 = vld [vmem:[%s13229_s0 + $0x265] sm:$0xff]  ;;  %v13497_v36 = vld [vmem:[#allocation12_spill] sm:$0xff] }
 0x543   :  { %8497 = vmatmul.msk.f32.gmra.mxu0 %vm216_vm1, %v5304_v18  ;;  %v13496_v18 = vld [vmem:[#allocation80_spill] sm:$0xff] }
 0x544   :  { %8267 = vmatmul.msk.f32.gmra.mxu1 %vm216_vm1, %v3313_v7  ;;  %8347 = vmatmul.msk.f32.gmra.mxu2 %vm216_vm1, %v3312_v26 }
 0x546   :  { %8430 = vmatmul.msk.f32.gmra.mxu3 %vm216_vm1, %v4650_v35 }
 0x547   :  { %v4418_v57 = vpop.f32.mrf.mxu2 }
 0x548   :  { %v4553_v55 = vadd.f32 %v4418_v57, %v3883_v40  ;;  %v12134_v58 = vpop.f32.mrf.mxu0 }
 0x549   :  { %v12139_v33 = vpop.f32.mrf.mxu1  ;;  %v5088_v32 = vpop.f32.mrf.mxu3 }
 0x54a   :  { %v12144_v37 = vadd.f32 %v5088_v32, %v4553_v55  ;;  %v3316_v55 = vld [vmem:[%s13229_s0 + $0x274] sm:$0xff] }
 0x54b   :  { %8498 = vmatmul.msk.f32.gmra.mxu0 %vm216_vm1, %v5305_v51 }
 0x54c   :  { %8268 = vmatmul.msk.f32.gmra.mxu1 %vm216_vm1, %v3314_v24  ;;  %8348 = vmatmul.msk.f32.gmra.mxu2 %vm216_vm1, %v3313_v7  ;;  %v3215_v7 = vadd.f32 %v13497_v36, %v13496_v18 }
 0x54e   :  { %8431 = vmatmul.msk.f32.gmra.mxu3 %vm216_vm1, %v4651_v53  ;;  %v5308_v53 = vld [vmem:[%s13229_s0 + $0x1f6] sm:$0xff] }
 0x54f   :  { %v4421_v31 = vpop.f32.mrf.mxu2 }
 0x550   :  { %v4554_v26 = vadd.f32 %v4421_v31, %v3884_v47  ;;  %v5716_v44 = vpop.f32.mrf.mxu0  ;;  %v4654_v47 = vld [vmem:[%s13229_s0 + $0x275] sm:$0xff] }
 0x551   :  { %v12158_v13 = vpop.f32.mrf.mxu1  ;;  %v5091_v38 = vpop.f32.mrf.mxu3  ;;  %v12161_v29 = vadd.f32 %v5716_v44, %v11815_v8  ;;  %v3885_v8 = vadd.f32 %v3754_v14, %v3215_v7  ;;  %v4653_v14 = vld [vmem:[%s13229_s0 + $0x26d] sm:$0xff]  ;;  %v5309_v44 = vld [vmem:[%s13229_s0 + $0x1fe] sm:$0xff] }
 0x552   :  { %v12166_v42 = vadd.f32 %v5091_v38, %v4554_v26  ;;  %v5310_v7 = vld [vmem:[%s13229_s0 + $0x206] sm:$0xff] }
 0x553   :  { %8499 = vmatmul.msk.f32.gmra.mxu0 %vm216_vm1, %v5306_v5 }
 0x554   :  { %8269 = vmatmul.msk.f32.gmra.mxu1 %vm216_vm1, %v3315_v54  ;;  %8349 = vmatmul.msk.f32.gmra.mxu2 %vm216_vm1, %v3314_v24 }
 0x556   :  { %8432 = vmatmul.msk.f32.gmra.mxu3 %vm216_vm1, %v4652_v2  ;;  %v4655_v2 = vld [vmem:[%s13229_s0 + $0x27d] sm:$0xff] }
 0x557   :  { %v4424_v35 = vpop.f32.mrf.mxu2 }
 0x558   :  { %v4555_v10 = vadd.f32 %v4424_v35, %v3885_v8  ;;  %v12177_v41 = vpop.f32.mrf.mxu0 }
 0x559   :  { %v12182_v40 = vpop.f32.mrf.mxu1  ;;  %v5094_v57 = vpop.f32.mrf.mxu3 }
 0x55a   :  { %v12187_v51 = vadd.f32 %v5094_v57, %v4555_v10  ;;  %v3319_v10 = vld [vmem:[%s13229_s0 + $0x28c] sm:$0xff] }
 0x55b   :  { %8500 = vmatmul.msk.f32.gmra.mxu0 %vm216_vm1, %v5307_v61  ;;  %v4656_v61 = vld [vmem:[%s13229_s0 + $0x285] sm:$0xff] }
 0x55c   :  { %8270 = vmatmul.msk.f32.gmra.mxu1 %vm216_vm1, %v3316_v55  ;;  %8350 = vmatmul.msk.f32.gmra.mxu2 %vm216_vm1, %v3315_v54  ;;  %v3318_v54 = vld [vmem:[%s13229_s0 + $0x284] sm:$0xff] }
 0x55e   :  { %8433 = vmatmul.msk.f32.gmra.mxu3 %vm216_vm1, %v4653_v14  ;;  %v5311_v14 = vld [vmem:[%s13229_s0 + $0x20e] sm:$0xff] }
 0x55f   :  { %v12196_v32 = vpop.f32.mrf.mxu2 }
 0x560   :  { %v12198_v24 = vpop.f32.mrf.mxu0 }
 0x561   :  { %v12203_v4 = vpop.f32.mrf.mxu1  ;;  %v12205_v21 = vpop.f32.mrf.mxu3 }
 0x563   :  { %8501 = vmatmul.msk.f32.gmra.mxu0 %vm216_vm1, %v5308_v53 }
 0x564   :  { %8271 = vmatmul.msk.f32.gmra.mxu1 %vm216_vm1, %v3317_v34  ;;  %8351 = vmatmul.msk.f32.gmra.mxu2 %vm216_vm1, %v3316_v55 }
 0x566   :  { %8434 = vmatmul.msk.f32.gmra.mxu3 %vm216_vm1, %v4654_v47  ;;  %v3320_v47 = vld [vmem:[%s13229_s0 + $0x294] sm:$0xff] }
 0x567   :  { %v12217_v31 = vpop.f32.mrf.mxu2 }
 0x568   :  { %v5725_v26 = vpop.f32.mrf.mxu0 }
 0x569   :  { %v12222_v5 = vpop.f32.mrf.mxu1  ;;  %v12224_v38 = vpop.f32.mrf.mxu3 }
 0x56b   :  { %8502 = vmatmul.msk.f32.gmra.mxu0 %vm216_vm1, %v5309_v44  ;;  %v4657_v44 = vld [vmem:[%s13229_s0 + $0x28d] sm:$0xff] }
 0x56c   :  { %8272 = vmatmul.msk.f32.gmra.mxu1 %vm216_vm1, %v3318_v54  ;;  %8352 = vmatmul.msk.f32.gmra.mxu2 %vm216_vm1, %v3317_v34 }
 0x56e   :  { %8435 = vmatmul.msk.f32.gmra.mxu3 %vm216_vm1, %v4655_v2  ;;  %v13499_v2 = vld [vmem:[#allocation89_spill] sm:$0xff] }
 0x56f   :  { %v12236_v18 = vpop.f32.mrf.mxu2 }
 0x570   :  { %v5728_v36 = vpop.f32.mrf.mxu0 }
 0x571   :  { %v12241_v8 = vpop.f32.mrf.mxu1  ;;  %v12243_v35 = vpop.f32.mrf.mxu3 }
 0x573   :  { %8503 = vmatmul.msk.f32.gmra.mxu0 %vm216_vm1, %v5310_v7 }
 0x574   :  { %8273 = vmatmul.msk.f32.gmra.mxu1 %vm216_vm1, %v3319_v10  ;;  %8353 = vmatmul.msk.f32.gmra.mxu2 %vm216_vm1, %v3318_v54  ;;  %v13498_v54 = vld [vmem:[#allocation71_spill] sm:$0xff] }
 0x575   :  { %v3206_v7 = vadd.f32 %v13499_v2, %v13498_v54 }
 0x576   :  { %8436 = vmatmul.msk.f32.gmra.mxu3 %vm216_vm1, %v4656_v61 }
 0x577   :  { %v12255_v57 = vpop.f32.mrf.mxu2  ;;  %v3876_v56 = vadd.f32 %v11867_v46, %v3206_v7 }
 0x578   :  { %v5731_v55 = vpop.f32.mrf.mxu0 }
 0x579   :  { %v12260_v53 = vpop.f32.mrf.mxu1  ;;  %v12262_v34 = vpop.f32.mrf.mxu3 }
 0x57b   :  { %8504 = vmatmul.msk.f32.gmra.mxu0 %vm216_vm1, %v5311_v14  ;;  %v5312_v14 = vld [vmem:[%s13229_s0 + $0x216] sm:$0xff] }
 0x57c   :  { %8274 = vmatmul.msk.f32.gmra.mxu1 %vm216_vm1, %v3320_v47  ;;  %8354 = vmatmul.msk.f32.gmra.mxu2 %vm216_vm1, %v3319_v10  ;;  %v4546_v10 = vadd.f32 %v11954_v6, %v3876_v56  ;;  %v5313_v6 = vld [vmem:[%s13229_s0 + $0x21e] sm:$0xff]  ;;  %v5884_v56 = vadd.f32 %v5731_v55, %v11913_v43 }
 0x57d   :  { %v4659_v55 = vld [vmem:[%s13229_s0 + $0x29d] sm:$0xff] }
 0x57e   :  { %8437 = vmatmul.msk.f32.gmra.mxu3 %vm216_vm1, %v4657_v44  ;;  %v4658_v44 = vld [vmem:[%s13229_s0 + $0x295] sm:$0xff]  ;;  %v5216_v54 = vadd.f32 %v11966_v39, %v4546_v10 }
 0x57f   :  { %v12276_v61 = vpop.f32.mrf.mxu2  ;;  %v3989_v39 = vld [vmem:[%s13229_s0 + $0x29c] sm:$0xff] }
 0x580   :  { %v5734_v20 = vpop.f32.mrf.mxu0 }
 0x581   :  { %v12282_v17 = vpop.f32.mrf.mxu1  ;;  %v12284_v23 = vpop.f32.mrf.mxu3  ;;  %v5885_v46 = vadd.f32 %v5734_v20, %v11936_v12  ;;  %v5883_v12 = vadd.f32 %v5728_v36, %v11891_v30  ;;  %v12312_v20 = vld [vmem:[%s13232_s3] ss:$0 sm:$0xff] }
 0x582   :  { %v5969_v30 = vadd.f32 %v12312_v20, %v5884_v56 }
 0x583   :  { %8505 = vmatmul.msk.f32.gmra.mxu0 %vm216_vm1, %v5312_v14  ;;  %v5970_v10 = vadd.f32 %v12312_v20, %v5885_v46  ;;  %v5968_v46 = vadd.f32 %v12312_v20, %v5883_v12 }
 0x584   :  { %8355 = vmatmul.msk.f32.gmra.mxu2 %vm216_vm1, %v3320_v47  ;;  %v6050_v12 = vmax.f32 %v5969_v30, 0.0  ;;  %v5877_v30 = vadd.f32 %v12113_v28, %v11776_v60 }
 0x586   :  { %8438 = vmatmul.msk.f32.gmra.mxu3 %vm216_vm1, %v4658_v44  ;;  %v5882_v44 = vadd.f32 %v5725_v26, %v11872_v9  ;;  %v5314_v9 = vld [vmem:[%s13229_s0 + $0x226] sm:$0xff]  ;;  %v5880_v26 = vadd.f32 %v12177_v41, %v11834_v52  ;;  %v6049_v41 = vmax.f32 %v5968_v46, 0.0 }
 0x587   :  { %v12295_v2 = vpop.f32.mrf.mxu2  ;;  %v4660_v52 = vld [vmem:[%s13229_s0 + $0x2a5] sm:$0xff] }
 0x588   :  { %v5737_v7 = vpop.f32.mrf.mxu0  ;;  %v5967_v56 = vadd.f32 %v12312_v20, %v5882_v44 }
 0x589   :  { %v12301_v14 = vpop.f32.mrf.mxu1  ;;  %v12303_v1 = vpop.f32.mrf.mxu3  ;;  %v5886_v47 = vadd.f32 %v5737_v7, %v5216_v54  ;;  %v5881_v54 = vadd.f32 %v12198_v24, %v11853_v48  ;;  %v3990_v24 = vld [vmem:[%s13229_s0 + $0x2a4] sm:$0xff] }
 0x58a   :  { %v6048_v44 = vmax.f32 %v5967_v56, 0.0  ;;  %v5962_v56 = vadd.f32 %v12312_v20, %v5877_v30 }
 0x58b   :  { %v5971_v43 = vadd.f32 %v12312_v20, %v5886_v47  ;;  %8506 = vmatmul.msk.f32.gmra.mxu0 %vm216_vm1, %v5313_v6  ;;  %v6051_v6 = vmax.f32 %v5970_v10, 0.0  ;;  %v5966_v10 = vadd.f32 %v12312_v20, %v5881_v54 }
 0x58c   :  { %8356 = vmatmul.msk.f32.gmra.mxu2 %vm216_vm1, %v3989_v39 }
 0x58d   :  { %v6052_v36 = vmax.f32 %v5971_v43, 0.0  ;;  %v5878_v43 = vadd.f32 %v12134_v58, %v11796_v0  ;;  %v6047_v46 = vmax.f32 %v5966_v10, 0.0  ;;  %v5315_v0 = vld [vmem:[%s13229_s0 + $0x22e] sm:$0xff]  ;;  %v5876_v58 = vadd.f32 %v12093_v27, %v11757_v45 }
 0x58e   :  { %8439 = vmatmul.msk.f32.gmra.mxu3 %vm216_vm1, %v4659_v55  ;;  %v5965_v55 = vadd.f32 %v12312_v20, %v5880_v26  ;;  %v5874_v45 = vadd.f32 %v12053_v50, %v11717_v59  ;;  %v5873_v10 = vadd.f32 %v12023_v3, %v11697_v16  ;;  %v5872_v59 = vadd.f32 %v11989_v22, %v11672_v63 }
 0x58f   :  { %v12327_v7 = vpop.f32.mrf.mxu2  ;;  %6147 = vmatpush.msrb.mxu3 %v6052_v36  ;;  %v5964_v36 = vadd.f32 %v12312_v20, %v12161_v29  ;;  %v5875_v29 = vadd.f32 %v12073_v25, %v11737_v19  ;;  %v5961_v27 = vadd.f32 %v12312_v20, %v5876_v58  ;;  %v6043_v19 = vmax.f32 %v5962_v56, 0.0 }
 0x590   :  { %v12329_v47 = vpop.f32.mrf.mxu0  ;;  %v6046_v28 = vmax.f32 %v5965_v55, 0.0  ;;  %v5959_v50 = vadd.f32 %v12312_v20, %v5874_v45  ;;  %v5958_v30 = vadd.f32 %v12312_v20, %v5873_v10  ;;  %v13506_v45 = vld [vmem:[#allocation99_spill] sm:$0xff] }
 0x591   :  { %13500 = vst [vmem:[#allocation56_spill] sm:$0xff] %v12329_v47  ;;  %v12337_v39 = vpop.f32.mrf.mxu1  ;;  %v12339_v48 = vpop.f32.mrf.mxu3  ;;  %6148 = vmatpush.msrb.mxu3 %v6051_v6  ;;  %v6042_v3 = vmax.f32 %v5961_v27, 0.0  ;;  %v13507_v27 = vld [vmem:[#allocation28_spill] sm:$0xff] }
 0x592   :  { %13501 = vst [vmem:[#allocation57_spill] sm:$0xff] %v12337_v39  ;;  %v6040_v63 = vmax.f32 %v5959_v50, 0.0  ;;  %v6039_v58 = vmax.f32 %v5958_v30, 0.0  ;;  %v13533_v39 = vld [vmem:[#allocation14_spill] sm:$0xff] }
 0x593   :  { %8507 = vmatmul.msk.f32.gmra.mxu0 %vm216_vm1, %v5314_v9  ;;  %6149 = vmatpush.msrb.mxu3 %v6050_v12  ;;  %v5963_v9 = vadd.f32 %v12312_v20, %v5878_v43  ;;  %v5316_v43 = vld [vmem:[%s13229_s0 + $0x236] sm:$0xff] }
 0x594   :  { %8357 = vmatmul.msk.f32.gmra.mxu2 %vm216_vm1, %v3990_v24  ;;  %v6045_v24 = vmax.f32 %v5964_v36, 0.0 }
 0x595   :  { %6150 = vmatpush.msrb.mxu3 %v6049_v41  ;;  %v6044_v12 = vmax.f32 %v5963_v9, 0.0 }
 0x596   :  { %8440 = vmatmul.msk.f32.gmra.mxu3 %vm216_vm1, %v4660_v52  ;;  %v5960_v52 = vadd.f32 %v12312_v20, %v5875_v29 }
 0x597   :  { %v12358_v54 = vpop.f32.mrf.mxu2  ;;  %6151 = vmatpush.msrb.mxu3 %v6048_v44  ;;  %v5871_v44 = vadd.f32 %v11956_v15, %v11638_v62  ;;  %v5317_v62 = vld [vmem:[%s13229_s0 + $0x23e] sm:$0xff] }
 0x598   :  { %v12360_v6 = vpop.f32.mrf.mxu0  ;;  %v6041_v36 = vmax.f32 %v5960_v52, 0.0  ;;  %v5318_v52 = vld [vmem:[%s13229_s0 + $0x246] sm:$0xff] }
 0x599   :  { %13502 = vst [vmem:[#allocation58_spill] sm:$0xff] %v12360_v6  ;;  %v12368_v26 = vpop.f32.mrf.mxu1  ;;  %v12370_v60 = vpop.f32.mrf.mxu3  ;;  %6152 = vmatpush.msrb.mxu3 %v6047_v46  ;;  %v5957_v46 = vadd.f32 %v12312_v20, %v5872_v59  ;;  %v5956_v22 = vadd.f32 %v12312_v20, %v5871_v44  ;;  %v13511_v44 = vld [vmem:[#allocation29_spill] sm:$0xff] }
 0x59a   :  { %13503 = vst [vmem:[#allocation59_spill] sm:$0xff] %v12368_v26 }
 0x59b   :  { %8508 = vmatmul.msk.f32.gmra.mxu0 %vm216_vm1, %v5315_v0  ;;  %6153 = vmatpush.msrb.mxu3 %v6046_v28  ;;  %v6038_v29 = vmax.f32 %v5957_v46, 0.0  ;;  %v6037_v56 = vmax.f32 %v5956_v22, 0.0  ;;  %v5319_v46 = vld [vmem:[%s13229_s0 + $0x24e] sm:$0xff] }
 0x59d   :  { %6154 = vmatpush.msrb.mxu3 %v6045_v24 }
 0x59f   :  { %v12382_v41 = vpop.f32.mrf.mxu2  ;;  %6155 = vmatpush.msrb.mxu3 %v6044_v12  ;;  %v3230_v12 = vadd.f32 %v13507_v27, %v13506_v45  ;;  %v13515_v27 = vld [vmem:[#allocation98_spill] sm:$0xff] }
 0x5a0   :  { %v12384_v25 = vpop.f32.mrf.mxu0 }
 0x5a1   :  { %v12392_v55 = vpop.f32.mrf.mxu1  ;;  %v12394_v16 = vpop.f32.mrf.mxu3  ;;  %6156 = vmatpush.msrb.mxu3 %v6043_v19 }
 0x5a2   :  { %13504 = vst [vmem:[#allocation60_spill] sm:$0xff] %v12392_v55  ;;  %v13527_v55 = vld [vmem:[#allocation19_spill] sm:$0xff] }
 0x5a3   :  { %8509 = vmatmul.msk.f32.gmra.mxu0 %vm216_vm1, %v5316_v43  ;;  %6157 = vmatpush.msrb.mxu3 %v6042_v3  ;;  %v13510_v3 = vld [vmem:[#allocation100_spill] sm:$0xff] }
 0x5a4   :  { %v3231_v30 = vadd.f32 %v13511_v44, %v13510_v3 }
 0x5a5   :  { %6158 = vmatpush.msrb.mxu3 %v6041_v36 }
 0x5a7   :  { %v12402_v0 = vpop.f32.mrf.mxu2  ;;  %6159 = vmatpush.msrb.mxu3 %v6040_v63 }
 0x5a8   :  { %v12404_v9 = vpop.f32.mrf.mxu0 }
 0x5a9   :  { %v3796_v15 = vpop.f32.mrf.mxu1  ;;  %v12409_v28 = vpop.f32.mrf.mxu3  ;;  %6160 = vmatpush.msrb.mxu3 %v6039_v58 }
 0x5ab   :  { %8510 = vmatmul.msk.f32.gmra.mxu0 %vm216_vm1, %v5317_v62  ;;  %6161 = vmatpush.msrb.mxu3 %v6038_v29 }
 0x5ad   :  { %6162 = vmatpush.msrb.mxu3 %v6037_v56  ;;  %v5320_v56 = vld [vmem:[%s13229_s0 + $0x256] sm:$0xff] }
 0x5af   :  { %v12412_v24 = vpop.f32.mrf.mxu2 }
 0x5b0   :  { %13505 = vst [vmem:[#allocation61_spill] sm:$0xff] %v12412_v24  ;;  %v12416_v10 = vpop.f32.mrf.mxu0  ;;  %v13529_v24 = vld [vmem:[#allocation16_spill] sm:$0xff] }
 0x5b1   :  { %v3799_v19 = vpop.f32.mrf.mxu1  ;;  %v12421_v43 = vpop.f32.mrf.mxu3 }
 0x5b2   :  { %13508 = vst [vmem:[#allocation62_spill] sm:$0xff] %v12421_v43  ;;  %v3900_v59 = vadd.f32 %v3799_v19, %v3230_v12  ;;  %v13516_v12 = vld [vmem:[#allocation27_spill] sm:$0xff]  ;;  %v13528_v43 = vld [vmem:[#allocation86_spill] sm:$0xff] }
 0x5b3   :  { %8511 = vmatmul.msk.f32.gmra.mxu0 %vm216_vm1, %v5318_v52  ;;  %v3229_v52 = vadd.f32 %v13516_v12, %v13515_v27  ;;  %v3219_v47 = vadd.f32 %v13529_v24, %v13528_v43  ;;  %v13534_v43 = vld [vmem:[#allocation81_spill] sm:$0xff] }
 0x5b5   :  { %v3899_v19 = vadd.f32 %v3796_v15, %v3229_v52  ;;  %v5322_v15 = vld [vmem:[%s13229_s0 + $0x266] sm:$0xff] }
 0x5b7   :  { %v12424_v50 = vpop.f32.mrf.mxu2 }
 0x5b8   :  { %13509 = vst [vmem:[#allocation63_spill] sm:$0xff] %v12424_v50  ;;  %v12428_v36 = vpop.f32.mrf.mxu0 }
 0x5b9   :  { %v3802_v63 = vpop.f32.mrf.mxu1  ;;  %v12433_v22 = vpop.f32.mrf.mxu3 }
 0x5ba   :  { %13512 = vst [vmem:[#allocation64_spill] sm:$0xff] %v12433_v22  ;;  %v3901_v58 = vadd.f32 %v3802_v63, %v3231_v30 }
 0x5bb   :  { %8512 = vmatmul.msk.f32.gmra.mxu0 %vm216_vm1, %v5319_v46  ;;  %v5321_v46 = vld [vmem:[%s13229_s0 + $0x25e] sm:$0xff] }
 0x5bf   :  { %v12436_v62 = vpop.f32.mrf.mxu2 }
 0x5c0   :  { %13513 = vst [vmem:[#allocation65_spill] sm:$0xff] %v12436_v62  ;;  %v12438_v29 = vpop.f32.mrf.mxu0 }
 0x5c1   :  { %v12443_v45 = vpop.f32.mrf.mxu3 }
 0x5c2   :  { %13514 = vst [vmem:[#allocation66_spill] sm:$0xff] %v12443_v45 }
 0x5c3   :  { %8513 = vmatmul.msk.f32.gmra.mxu0 %vm216_vm1, %v5320_v56 }
 0x5c7   :  { %v4466_v3 = vpop.f32.mrf.mxu2 }
 0x5c8   :  { %v12448_v44 = vadd.f32 %v4466_v3, %v3899_v19  ;;  %v12450_v30 = vpop.f32.mrf.mxu0 }
 0x5c9   :  { %v12455_v63 = vpop.f32.mrf.mxu3 }
 0x5ca   :  { %13517 = vst [vmem:[#allocation67_spill] sm:$0xff] %v12448_v44  ;;  %v13526_v44 = vld [vmem:[#allocation91_spill] sm:$0xff] }
 0x5cb   :  { %13518 = vst [vmem:[#allocation83_spill] sm:$0xff] %v12455_v63  ;;  %8514 = vmatmul.msk.f32.gmra.mxu0 %vm216_vm1, %v5321_v46  ;;  %v13525_v63 = vld [vmem:[#allocation17_spill] sm:$0xff]  ;;  %v3222_v22 = vadd.f32 %v13527_v55, %v13526_v44  ;;  %v3889_v55 = vadd.f32 %v12182_v40, %v3219_v47  ;;  %v13536_v47 = vld [vmem:[#allocation92_spill] sm:$0xff] }
 0x5cf   :  { %v4469_v45 = vpop.f32.mrf.mxu2 }
 0x5d0   :  { %v12458_v62 = vadd.f32 %v4469_v45, %v3900_v59  ;;  %v5764_v56 = vpop.f32.mrf.mxu0  ;;  %v5323_v59 = vld [vmem:[%s13229_s0 + $0x26e] sm:$0xff] }
 0x5d1   :  { %v12463_v27 = vpop.f32.mrf.mxu3  ;;  %v12466_v12 = vadd.f32 %v5764_v56, %v12187_v51  ;;  %v5324_v51 = vld [vmem:[%s13229_s0 + $0x276] sm:$0xff] }
 0x5d2   :  { %13519 = vst [vmem:[#allocation68_spill] sm:$0xff] %v12458_v62 }
 0x5d3   :  { %13520 = vst [vmem:[#allocation85_spill] sm:$0xff] %v12463_v27  ;;  %8515 = vmatmul.msk.f32.gmra.mxu0 %vm216_vm1, %v5322_v15  ;;  %v13524_v27 = vld [vmem:[#allocation88_spill] sm:$0xff] }
 0x5d7   :  { %v4472_v52 = vpop.f32.mrf.mxu2 }
 0x5d8   :  { %v4571_v19 = vadd.f32 %v4472_v52, %v3901_v58  ;;  %v12469_v3 = vpop.f32.mrf.mxu0  ;;  %v5325_v58 = vld [vmem:[%s13229_s0 + $0x27e] sm:$0xff]  ;;  %v5326_v52 = vld [vmem:[%s13229_s0 + $0x286] sm:$0xff] }
 0x5d9   :  { %v5142_v45 = vpop.f32.mrf.mxu3 }
 0x5da   :  { %v12474_v46 = vadd.f32 %v5142_v45, %v4571_v19  ;;  %v13522_v45 = vld [vmem:[#allocation90_spill] sm:$0xff] }
 0x5db   :  { %8516 = vmatmul.msk.f32.gmra.mxu0 %vm216_vm1, %v5323_v59  ;;  %v5327_v59 = vld [vmem:[%s13229_s0 + $0x28e] sm:$0xff] }
 0x5dc   :  { %13521 = vst [vmem:[#allocation54_spill] sm:$0xff] %v12474_v46 }
 0x5e0   :  { %v5770_v62 = vpop.f32.mrf.mxu0 }
 0x5e3   :  { %8517 = vmatmul.msk.f32.gmra.mxu0 %vm216_vm1, %v5324_v51  ;;  %v13523_v51 = vld [vmem:[#allocation18_spill] sm:$0xff] }
 0x5e4   :  { %v3221_v46 = vadd.f32 %v13523_v51, %v13522_v45  ;;  %v3892_v45 = vadd.f32 %v12241_v8, %v3222_v22  ;;  %v4559_v8 = vadd.f32 %v12255_v57, %v3889_v55  ;;  %v13538_v55 = vld [vmem:[#allocation93_spill] sm:$0xff] }
 0x5e6   :  { %v3891_v50 = vadd.f32 %v12222_v5, %v3221_v46  ;;  %v4562_v44 = vadd.f32 %v12327_v7, %v3892_v45  ;;  %v13532_v46 = vld [vmem:[#allocation82_spill] sm:$0xff]  ;;  %v13537_v7 = vld [vmem:[#allocation20_spill] sm:$0xff] }
 0x5e7   :  { %v3217_v24 = vadd.f32 %v13533_v39, %v13532_v46 }
 0x5e8   :  { %v5773_v56 = vpop.f32.mrf.mxu0  ;;  %v4561_v51 = vadd.f32 %v12295_v2, %v3891_v50  ;;  %v13535_v50 = vld [vmem:[#allocation13_spill] sm:$0xff]  ;;  %v5232_v39 = vadd.f32 %v12339_v48, %v4562_v44 }
 0x5e9   :  { %v3216_v22 = vadd.f32 %v13535_v50, %v13534_v43  ;;  %v3887_v40 = vadd.f32 %v12139_v33, %v3217_v24 }
 0x5ea   :  { %v5231_v2 = vadd.f32 %v12303_v1, %v4561_v51 }
 0x5eb   :  { %8518 = vmatmul.msk.f32.gmra.mxu0 %vm216_vm1, %v5325_v58  ;;  %v3220_v58 = vadd.f32 %v13525_v63, %v13524_v27  ;;  %v13530_v63 = vld [vmem:[#allocation84_spill] sm:$0xff]  ;;  %v13531_v27 = vld [vmem:[#allocation15_spill] sm:$0xff]  ;;  %v4557_v57 = vadd.f32 %v12217_v31, %v3887_v40 }
 0x5ec   :  { %v3218_v6 = vadd.f32 %v13531_v27, %v13530_v63  ;;  %v13541_v40 = vld [vmem:[#allocation23_spill] sm:$0xff] }
 0x5ed   :  { %v5227_v27 = vadd.f32 %v12224_v38, %v4557_v57  ;;  %v5330_v38 = vld [vmem:[%s13229_s0 + $0x2a6] sm:$0xff] }
 0x5f0   :  { %v5776_v15 = vpop.f32.mrf.mxu0 }
 0x5f3   :  { %8519 = vmatmul.msk.f32.gmra.mxu0 %vm216_vm1, %v5326_v52  ;;  %v5328_v52 = vld [vmem:[%s13229_s0 + $0x296] sm:$0xff] }
 0x5f8   :  { %v5779_v19 = vpop.f32.mrf.mxu0 }
 0x5fb   :  { %8520 = vmatmul.msk.f32.gmra.mxu0 %vm216_vm1, %v5327_v59  ;;  %v3890_v59 = vadd.f32 %v12203_v4, %v3220_v58  ;;  %v3888_v4 = vadd.f32 %v12158_v13, %v3218_v6  ;;  %v3223_v58 = vadd.f32 %v13537_v7, %v13536_v47  ;;  %v3886_v13 = vadd.f32 %v12118_v49, %v3216_v22  ;;  %v5329_v6 = vld [vmem:[%s13229_s0 + $0x29e] sm:$0xff]  ;;  %s8764_s0 = smov 64  }
 0x5fc   :  { %v13540_v22 = vld [vmem:[#allocation94_spill] sm:$0xff]  ;;  %v5980_v7 = vadd.f32 %v12312_v20, %v12466_v12 }
 0x5fd   :  { %v4560_v5 = vadd.f32 %v12276_v61, %v3890_v59  ;;  %v4558_v61 = vadd.f32 %v12236_v18, %v3888_v4  ;;  %v3893_v33 = vadd.f32 %v12260_v53, %v3223_v58  ;;  %v5229_v18 = vadd.f32 %v12262_v34, %v4559_v8 }
 0x5fe   :  { %v6061_v57 = vmax.f32 %v5980_v7, 0.0 }
 0x5ff   :  { %v5228_v48 = vadd.f32 %v12243_v35, %v4558_v61  ;;  %v5899_v49 = vadd.f32 %v5776_v15, %v5229_v18  ;;  %v5897_v15 = vadd.f32 %v5770_v62, %v5227_v27  ;;  %v3225_v61 = vadd.f32 %v13541_v40, %v13540_v22  ;;  %v13558_v40 = vld [vmem:[#allocation97_spill] sm:$0xff] }
 0x600   :  { %v5782_v26 = vpop.f32.mrf.mxu0 }
 0x601   :  { %v5901_v59 = vadd.f32 %v5782_v26, %v5231_v2  ;;  %v4563_v26 = vadd.f32 %v12358_v54, %v3893_v33  ;;  %v5898_v53 = vadd.f32 %v5773_v56, %v5228_v48  ;;  %v5984_v44 = vadd.f32 %v12312_v20, %v5899_v49  ;;  %v13545_v33 = vld [vmem:[#allocation24_spill] sm:$0xff]  ;;  %v13547_v48 = vld [vmem:[#allocation57_spill] sm:$0xff] }
 0x602   :  { %v5982_v62 = vadd.f32 %v12312_v20, %v5897_v15 }
 0x603   :  { %8521 = vmatmul.msk.f32.gmra.mxu0 %vm216_vm1, %v5328_v52  ;;  %v5230_v52 = vadd.f32 %v12284_v23, %v4560_v5  ;;  %v4556_v23 = vadd.f32 %v12196_v32, %v3886_v13  ;;  %v5986_v31 = vadd.f32 %v12312_v20, %v5901_v59  ;;  %v13539_v5 = vld [vmem:[#allocation22_spill] sm:$0xff]  ;;  %v5233_v54 = vadd.f32 %v12370_v60, %v4563_v26 }
 0x604   :  { %v3224_v32 = vadd.f32 %v13539_v5, %v13538_v55  ;;  %v5983_v8 = vadd.f32 %v12312_v20, %v5898_v53  ;;  %v6065_v43 = vmax.f32 %v5984_v44, 0.0  ;;  %v6063_v58 = vmax.f32 %v5982_v62, 0.0  ;;  %v13552_v5 = vld [vmem:[#allocation61_spill] sm:$0xff]  ;;  %v13553_v44 = vld [vmem:[#allocation96_spill] sm:$0xff] }
 0x605   :  { %v5900_v45 = vadd.f32 %v5779_v19, %v5230_v52  ;;  %v5226_v35 = vadd.f32 %v12205_v21, %v4556_v23  ;;  %v6067_v46 = vmax.f32 %v5986_v31, 0.0  ;;  %v3895_v52 = vadd.f32 %v12301_v14, %v3225_v61  ;;  %v13543_v14 = vld [vmem:[#allocation53_spill] sm:$0xff]  ;;  %v13549_v31 = vld [vmem:[#allocation58_spill] sm:$0xff] }
 0x606   :  { %v3894_v24 = vadd.f32 %v12282_v17, %v3224_v32  ;;  %v5894_v17 = vadd.f32 %v12450_v30, %v12166_v42  ;;  %v5892_v30 = vadd.f32 %v12428_v36, %v12123_v11  ;;  %v13559_v61 = vld [vmem:[#allocation26_spill] sm:$0xff] }
 0x607   :  { %v5985_v34 = vadd.f32 %v12312_v20, %v5900_v45  ;;  %v5896_v56 = vadd.f32 %v12469_v3, %v5226_v35  ;;  %v6064_v3 = vmax.f32 %v5983_v8, 0.0  ;;  %v13546_v45 = vld [vmem:[#allocation38_spill] sm:$0xff] }
 0x608   :  { %v5785_v1 = vpop.f32.mrf.mxu0  ;;  %v4564_v60 = vadd.f32 %v12382_v41, %v3894_v24  ;;  %v5893_v41 = vadd.f32 %v12438_v29, %v12144_v37  ;;  %v13542_v37 = vld [vmem:[#allocation55_spill] sm:$0xff]  ;;  %v5977_v11 = vadd.f32 %v12312_v20, %v5892_v30 }
 0x609   :  { %v5902_v51 = vadd.f32 %v5785_v1, %v5232_v39  ;;  %v6066_v2 = vmax.f32 %v5985_v34, 0.0  ;;  %v5981_v50 = vadd.f32 %v12312_v20, %v5896_v56  ;;  %v5979_v39 = vadd.f32 %v12312_v20, %v5894_v17 }
 0x60a   :  { %v5234_v47 = vadd.f32 %v12394_v16, %v4564_v60  ;;  %v4565_v16 = vadd.f32 %v12402_v0, %v3895_v52  ;;  %v5891_v29 = vadd.f32 %v12416_v10, %v13542_v37  ;;  %v5978_v12 = vadd.f32 %v12312_v20, %v5893_v41  ;;  %v13556_v60 = vld [vmem:[#allocation59_spill] sm:$0xff]  ;;  %v13560_v41 = vld [vmem:[#allocation64_spill] sm:$0xff] }
 0x60b   :  { %v5987_v63 = vadd.f32 %v12312_v20, %v5902_v51  ;;  %8522 = vmatmul.msk.f32.gmra.mxu0 %vm216_vm1, %v5329_v6  ;;  %v6062_v59 = vmax.f32 %v5981_v50, 0.0  ;;  %v5890_v1 = vadd.f32 %v12404_v9, %v13543_v14  ;;  %v6060_v36 = vmax.f32 %v5979_v39, 0.0  ;;  %v13544_v6 = vld [vmem:[#allocation95_spill] sm:$0xff]  ;;  %v13548_v9 = vld [vmem:[#allocation52_spill] sm:$0xff]  ;;  %v13562_v39 = vld [vmem:[#allocation65_spill] sm:$0xff] }
 0x60c   :  { %v3226_v18 = vadd.f32 %v13545_v33, %v13544_v6  ;;  %v5889_v0 = vadd.f32 %v12384_v25, %v13546_v45  ;;  %v5235_v51 = vadd.f32 %v12409_v28, %v4565_v16  ;;  %v5976_v10 = vadd.f32 %v12312_v20, %v5891_v29  ;;  %v13551_v25 = vld [vmem:[#allocation56_spill] sm:$0xff]  ;;  %v13557_v50 = vld [vmem:[#allocation63_spill] sm:$0xff]  ;;  %v13563_v16 = vld [vmem:[#allocation66_spill] sm:$0xff]  ;;  %v12622_v33 = vpop.f32.mrf.mxu2 }
 0x60d   :  { %v6068_v19 = vmax.f32 %v5987_v63, 0.0  ;;  %v6059_v23 = vmax.f32 %v5978_v12, 0.0  ;;  %v5888_v63 = vadd.f32 %v13549_v31, %v13548_v9  ;;  %v5975_v27 = vadd.f32 %v12312_v20, %v5890_v1  ;;  %v13561_v52 = vld [vmem:[#allocation60_spill] sm:$0xff]  ;;  %v13565_v14 = vld [vmem:[#allocation83_spill] sm:$0xff]  ;;  %v13568_v31 = vld [vmem:[#allocation54_spill] sm:$0xff] }
 0x60e   :  { %v3896_v26 = vadd.f32 %v13547_v48, %v3226_v18  ;;  %v6058_v34 = vmax.f32 %v5977_v11, 0.0  ;;  %v5974_v28 = vadd.f32 %v12312_v20, %v5889_v0  ;;  %v6057_v35 = vmax.f32 %v5976_v10, 0.0  ;;  %v12618_v11 = vpop.f32.mrf.mxu1  ;;  %v12624_v18 = vpop.f32.mrf.mxu3  ;;  %v13566_v45 = vld [vmem:[#allocation68_spill] sm:$0xff]  ;;  %v13567_v0 = vld [vmem:[#allocation85_spill] sm:$0xff] }
 0x60f   :  { %6167 = vmatpush.msra.mxu1 %v6068_v19  ;;  %v13550_v19 = vld [vmem:[#allocation51_spill] sm:$0xff]  ;;  %v6056_v15 = vmax.f32 %v5975_v27, 0.0 }
 0x610   :  { %v5788_v4 = vpop.f32.mrf.mxu0  ;;  %v5887_v55 = vadd.f32 %v13551_v25, %v13550_v19  ;;  %v4566_v32 = vadd.f32 %v13552_v5, %v3896_v26  ;;  %v6055_v8 = vmax.f32 %v5974_v28, 0.0 }
 0x611   :  { %v12553_v21 = vadd.f32 %v5788_v4, %v5233_v54  ;;  %6168 = vmatpush.msra.mxu1 %v6067_v46  ;;  %v5973_v54 = vadd.f32 %v12312_v20, %v5888_v63  ;;  %v13554_v46 = vld [vmem:[#allocation25_spill] sm:$0xff] }
 0x612   :  { %v3227_v24 = vadd.f32 %v13554_v46, %v13553_v44  ;;  %v5972_v4 = vadd.f32 %v12312_v20, %v5887_v55 }
 0x613   :  { %8523 = vmatmul.msk.f32.gmra.mxu0 %vm216_vm1, %v5330_v38  ;;  %6169 = vmatpush.msra.mxu1 %v6066_v2  ;;  %v13555_v38 = vld [vmem:[#allocation62_spill] sm:$0xff]  ;;  %v6054_v17 = vmax.f32 %v5973_v54, 0.0  ;;  %vm6522_vm1 = vcmask 516096  }
 0x614   :  { %v5236_v56 = vadd.f32 %v13555_v38, %v4566_v32  ;;  %v3897_v62 = vadd.f32 %v13556_v60, %v3227_v24  ;;  %v6053_v22 = vmax.f32 %v5972_v4, 0.0  ;;  %v4478_v26 = vpop.f32.mrf.mxu2  ;;  %v13569_v60 = vld [vmem:[#allocation106_spill] sm:$0xff] }
 0x615   :  { %6170 = vmatpush.msra.mxu1 %v6065_v43 }
 0x616   :  { %v3808_v48 = vpop.f32.mrf.mxu1 }
 0x617   :  { %6171 = vmatpush.msra.mxu1 %v6064_v3  ;;  %v4567_v3 = vadd.f32 %v13557_v50, %v3897_v62  ;;  %v13570_v62 = vld [vmem:[#allocation35_spill] sm:$0xff] }
 0x618   :  { %v5791_v42 = vpop.f32.mrf.mxu0 }
 0x619   :  { %v12572_v13 = vadd.f32 %v5791_v42, %v5234_v47  ;;  %6172 = vmatpush.msra.mxu1 %v6063_v58  ;;  %v3228_v47 = vadd.f32 %v13559_v61, %v13558_v40  ;;  %v5237_v7 = vadd.f32 %v13560_v41, %v4567_v3  ;;  %v13571_v3 = vld [vmem:[#allocation105_spill] sm:$0xff]  ;;  %v13573_v61 = vld [vmem:[#allocation107_spill] sm:$0xff] }
 0x61b   :  { %6173 = vmatpush.msra.mxu1 %v6062_v59  ;;  %v3898_v42 = vadd.f32 %v13561_v52, %v3228_v47  ;;  %v13574_v47 = vld [vmem:[#allocation36_spill] sm:$0xff] }
 0x61c   :  { %v3238_v41 = vadd.f32 %v13574_v47, %v13573_v61  ;;  %v13575_v52 = vld [vmem:[#allocation104_spill] sm:$0xff] }
 0x61d   :  { %6174 = vmatpush.msra.mxu1 %v6061_v57  ;;  %v4568_v59 = vadd.f32 %v13562_v39, %v3898_v42  ;;  %v13564_v57 = vld [vmem:[#allocation67_spill] sm:$0xff]  ;;  %v13576_v42 = vld [vmem:[#allocation33_spill] sm:$0xff] }
 0x61e   :  { %v5239_v1 = vadd.f32 %v13565_v14, %v13564_v57  ;;  %v3811_v27 = vpop.f32.mrf.mxu1  ;;  %v3235_v39 = vadd.f32 %v13576_v42, %v13575_v52  ;;  %v13578_v57 = vld [vmem:[#allocation32_spill] sm:$0xff] }
 0x61f   :  { %6175 = vmatpush.msra.mxu1 %v6060_v36  ;;  %v5238_v37 = vadd.f32 %v13563_v16, %v4568_v59 }
 0x620   :  { %v5794_v49 = vpop.f32.mrf.mxu0 }
 0x621   :  { %v12591_v53 = vadd.f32 %v5794_v49, %v5235_v51  ;;  %6176 = vmatpush.msra.mxu1 %v6059_v23  ;;  %v5240_v51 = vadd.f32 %v13567_v0, %v13566_v45  ;;  %v12630_v49 = vpop.f32.mrf.mxu3 }
 0x623   :  { %6177 = vmatpush.msra.mxu1 %v6058_v34  ;;  %v4481_v34 = vpop.f32.mrf.mxu2 }
 0x625   :  { %6178 = vmatpush.msra.mxu1 %v6057_v35 }
 0x626   :  { %v3814_v55 = vpop.f32.mrf.mxu1 }
 0x627   :  { %6179 = vmatpush.msra.mxu1 %v6056_v15 }
 0x628   :  { %v5797_v2 = vpop.f32.mrf.mxu0 }
 0x629   :  { %v12603_v43 = vadd.f32 %v5797_v2, %v5236_v56  ;;  %6180 = vmatpush.msra.mxu1 %v6055_v8  ;;  %v5151_v25 = vpop.f32.mrf.mxu3  ;;  %v6086_v2 = vld [vmem:[%s13230_s1] sm:$0xff] }
 0x62a   :  { %6090 = vst [vmem:[#allocation1] ss:$4 sm:$0xff] %v6086_v2 }
 0x62b   :  { %6181 = vmatpush.msra.mxu1 %v6054_v17  ;;  %v4484_v28 = vpop.f32.mrf.mxu2  ;;  %v3237_v17 = vadd.f32 %v13570_v62, %v13569_v60  ;;  %v13581_v62 = vld [vmem:[#allocation101_spill] sm:$0xff] }
 0x62d   :  { %6182 = vmatpush.msra.mxu1 %v6053_v22  ;;  %v13572_v22 = vld [vmem:[#allocation34_spill] sm:$0xff] }
 0x62e   :  { %v3817_v35 = vpop.f32.mrf.mxu1  ;;  %v3236_v40 = vadd.f32 %v13572_v22, %v13571_v3 }
 0x630   :  { %v5800_v58 = vpop.f32.mrf.mxu0  ;;  %v3906_v59 = vadd.f32 %v3817_v35, %v3236_v40 }
 0x631   :  { %v12610_v30 = vadd.f32 %v5800_v58, %v5237_v7  ;;  %v5154_v32 = vpop.f32.mrf.mxu3  ;;  %v6094_v2 = vld.sshfl [vmem:[#allocation1 + $0x8] sm:$0xff pattern:$0x73625140] }
 0x632   :  { %6143 = vmatmul.f32.vlgmr.msrb.gmra.mxu2 %v6094_v2 }
 0x633   :  { %v4487_v15 = vpop.f32.mrf.mxu2 }
 0x634   :  { %v4576_v45 = vadd.f32 %v4487_v15, %v3906_v59  ;;  %v6093_v15 = vld.sshfl [vmem:[#allocation1] sm:$0xff pattern:$0x73625140] }
 0x635   :  { %6123 = vmatmul.f32.vlgmr.msrb.gmra.mxu1 %v6093_v15 }
 0x636   :  { %v3820_v24 = vpop.f32.mrf.mxu1 }
 0x637   :  { %v3907_v7 = vadd.f32 %v3820_v24, %v3237_v17  ;;  %v13582_v17 = vld [vmem:[#allocation30_spill] sm:$0xff] }
 0x638   :  { %v5803_v29 = vpop.f32.mrf.mxu0  ;;  %v3232_v35 = vadd.f32 %v13582_v17, %v13581_v62 }
 0x639   :  { %v12614_v12 = vadd.f32 %v5803_v29, %v5238_v37  ;;  %v5157_v44 = vpop.f32.mrf.mxu3  ;;  %v13577_v29 = vld [vmem:[#allocation103_spill] sm:$0xff] }
 0x63a   :  { %v3234_v14 = vadd.f32 %v13578_v57, %v13577_v29 }
 0x63b   :  { %v4490_v4 = vpop.f32.mrf.mxu2 }
 0x63c   :  { %v4577_v37 = vadd.f32 %v4490_v4, %v3907_v7  ;;  %v13584_v4 = vld [vmem:[#allocation37_spill] sm:$0xff] }
 0x63e   :  { %v3823_v8 = vpop.f32.mrf.mxu1 }
 0x63f   :  { %v3908_v16 = vadd.f32 %v3823_v8, %v3238_v41  ;;  %v13583_v8 = vld [vmem:[#allocation108_spill] sm:$0xff] }
 0x640   :  { %v5806_v36 = vpop.f32.mrf.mxu0  ;;  %v3239_v3 = vadd.f32 %v13584_v4, %v13583_v8  ;;  %v5993_v4 = vadd.f32 %v12312_v20, %v12614_v12  ;;  %v5989_v12 = vadd.f32 %v12312_v20, %v12572_v13  ;;  %v6233_v13 = vld [vmem:[%s13233_s4 + $0x30] sm:$0xff] }
 0x641   :  { %v12620_v6 = vadd.f32 %v5806_v36, %v5239_v1  ;;  %v5160_v38 = vpop.f32.mrf.mxu3  ;;  %v3905_v36 = vadd.f32 %v3814_v55, %v3235_v39  ;;  %v6095_v55 = vld.sshfl [vmem:[#allocation1 + $0x10] sm:$0xff pattern:$0x73625140] }
 0x642   :  { %v5247_v60 = vadd.f32 %v5160_v38, %v4577_v37  ;;  %6163 = vmatmul.f32.vlgmr.msrb.gmra.mxu3 %v6095_v55 }
 0x643   :  { %v4493_v50 = vpop.f32.mrf.mxu2  ;;  %v4575_v24 = vadd.f32 %v4484_v28, %v3905_v36  ;;  %v3902_v28 = vadd.f32 %v12618_v11, %v3232_v35  ;;  %v5994_v35 = vadd.f32 %v12312_v20, %v12620_v6  ;;  %v5990_v6 = vadd.f32 %v12312_v20, %v12591_v53  ;;  %v6234_v53 = vld [vmem:[%s13233_s4 + $0x38] sm:$0xff] }
 0x644   :  { %v4578_v0 = vadd.f32 %v4493_v50, %v3908_v16  ;;  %v5246_v50 = vadd.f32 %v5157_v44, %v4576_v45 }
 0x645   :  { %v4572_v44 = vadd.f32 %v12622_v33, %v3902_v28  ;;  %v6071_v15 = vmax.f32 %v5990_v6, 0.0  ;;  %v6228_v28 = vld [vmem:[%s13233_s4 + $0x8] sm:$0xff] }
 0x646   :  { %v3826_v61 = vpop.f32.mrf.mxu1 }
 0x648   :  { %v5809_v10 = vpop.f32.mrf.mxu0 }
 0x649   :  { %v12628_v23 = vadd.f32 %v5809_v10, %v5240_v51  ;;  %v5163_v1 = vpop.f32.mrf.mxu3  ;;  %v13579_v51 = vld [vmem:[#allocation102_spill] sm:$0xff]  ;;  %v13580_v10 = vld [vmem:[#allocation31_spill] sm:$0xff] }
 0x64a   :  { %v5248_v47 = vadd.f32 %v5163_v1, %v4578_v0 }
 0x64b   :  { %v4496_v7 = vpop.f32.mrf.mxu2  ;;  %v5995_v62 = vadd.f32 %v12312_v20, %v12628_v23  ;;  %v5991_v23 = vadd.f32 %v12312_v20, %v12603_v43 }
 0x64d   :  { %v6072_v55 = vmax.f32 %v5991_v23, 0.0 }
 0x650   :  { %v5812_v9 = vpop.f32.mrf.mxu0 }
 0x651   :  { %v12633_v63 = vadd.f32 %v5812_v9, %v13568_v31  ;;  %v3233_v9 = vadd.f32 %v13580_v10, %v13579_v51  ;;  %v3904_v31 = vadd.f32 %v3811_v27, %v3234_v14  ;;  %v6087_v27 = vld [vmem:[%s13230_s1 + $0x8] sm:$0xf]  ;;  %v5166_v57 = vpop.f32.mrf.mxu3  ;;  %s7766_s1 = sshll.u32 %s13244_s15, 4  ;;  %s7767_s1 = int_to_ptr.hbm [resolvable:$true] %s7766_s1 }
 0x652   :  { %6092 = vst [vmem:[#allocation1 + $0x20] ss:$4 sm:$0xff] %v6087_v27  ;;  %v6229_v27 = vld [vmem:[%s13233_s4 + $0x10] sm:$0xff] }
 0x653   :  { %v3903_v22 = vadd.f32 %v3808_v48, %v3233_v9  ;;  %v4574_v40 = vadd.f32 %v4481_v34, %v3904_v31  ;;  %v3909_v48 = vadd.f32 %v3826_v61, %v3239_v3  ;;  %v5245_v34 = vadd.f32 %v5154_v32, %v4575_v24 }
 0x654   :  { %v5242_v32 = vadd.f32 %v12624_v18, %v4572_v44  ;;  %v6076_v3 = vmax.f32 %v5995_v62, 0.0 }
 0x655   :  { %v4573_v38 = vadd.f32 %v4478_v26, %v3903_v22  ;;  %v5244_v59 = vadd.f32 %v5151_v25, %v4574_v40  ;;  %v6075_v22 = vmax.f32 %v5994_v35, 0.0  ;;  %v6074_v40 = vmax.f32 %v5993_v4, 0.0 }
 0x657   :  { %v5243_v11 = vadd.f32 %v12630_v49, %v4573_v38  ;;  %v6227_v38 = vld [vmem:[%s13233_s4] sm:$0xff] }
 0x658   :  { %v12635_v19 = vpop.f32.mrf.mxu0 }
 0x659   :  { %v5912_v0 = vadd.f32 %v12635_v19, %v5242_v32  ;;  %v6098_v24 = vld.sshfl [vmem:[#allocation1 + $0x28] sm:$0xff pattern:$0x73625140]  ;;  %v5996_v19 = vadd.f32 %v12312_v20, %v12633_v63  ;;  %v5992_v63 = vadd.f32 %v12312_v20, %v12610_v30  ;;  %v5988_v30 = vadd.f32 %v12312_v20, %v12553_v21  ;;  %v6231_v21 = vld [vmem:[%s13233_s4 + $0x20] sm:$0xff] }
 0x65a   :  { %v12744_v32 = vld [vmem:[%s13237_s8 + $0x8] sm:$0xff] }
 0x65b   :  { %v6077_v8 = vmax.f32 %v5996_v19, 0.0  ;;  %v6073_v61 = vmax.f32 %v5992_v63, 0.0  ;;  %v6069_v43 = vmax.f32 %v5988_v30, 0.0  ;;  %v12792_v30 = vld [vmem:[%s13240_s11 + $0x18] sm:$0xff] }
 0x660   :  { %v12637_v5 = vpop.f32.mrf.mxu0 }
 0x661   :  { %v5913_v33 = vadd.f32 %v12637_v5, %v5243_v11  ;;  %v5997_v5 = vadd.f32 %v12312_v20, %v5912_v0 }
 0x663   :  { %v5998_v10 = vadd.f32 %v12312_v20, %v5913_v33  ;;  %v6078_v17 = vmax.f32 %v5997_v5, 0.0  ;;  %v8585_v33 = vld [vmem:[%s13234_s5] ss:$0 sm:$0xff]  ;;  %s8765_s5 = smov 32  }
 0x668   :  { %v5821_v54 = vpop.f32.mrf.mxu0 }
 0x669   :  { %v5914_v26 = vadd.f32 %v5821_v54, %v5244_v59 }
 0x66b   :  { %v5999_v49 = vadd.f32 %v12312_v20, %v5914_v26  ;;  %v6264_v26 = vld [vmem:[%s13236_s7 + $0x8] sm:$0xff] }
 0x66d   :  { %v6080_v31 = vmax.f32 %v5999_v49, 0.0 }
 0x670   :  { %v5824_v46 = vpop.f32.mrf.mxu0 }
 0x671   :  { %v5915_v16 = vadd.f32 %v5824_v46, %v5245_v34 }
 0x673   :  { %v6000_v25 = vadd.f32 %v12312_v20, %v5915_v16 }
 0x675   :  { %v6081_v18 = vmax.f32 %v6000_v25, 0.0 }
 0x678   :  { %v5827_v56 = vpop.f32.mrf.mxu0 }
 0x679   :  { %v5916_v42 = vadd.f32 %v5827_v56, %v5246_v50  ;;  %v6096_v56 = vld.sshfl [vmem:[#allocation1 + $0x18] sm:$0xff pattern:$0x73625140]  ;;  %v6070_v50 = vmax.f32 %v5989_v12, 0.0 }
 0x67a   :  { %6183 = vmatmul.f32.vlgmr.msra.gmra.mxu1 %v6096_v56  ;;  %v12750_v56 = vld [vmem:[%s13237_s8] sm:$0xff]  ;;  %v12780_v12 = vld [vmem:[%s13239_s10 + $0x18] sm:$0xff] }
 0x67b   :  { %v6001_v14 = vadd.f32 %v12312_v20, %v5916_v42 }
 0x67d   :  { %v6082_v54 = vmax.f32 %v6001_v14, 0.0  ;;  %v12735_v14 = vld [vmem:[%s13237_s8 + $0x10] sm:$0xff] }
 0x680   :  { %v5830_v58 = vpop.f32.mrf.mxu0 }
 0x681   :  { %v5917_v41 = vadd.f32 %v5830_v58, %v5247_v60  ;;  %v4579_v58 = vadd.f32 %v4496_v7, %v3909_v48  ;;  %v6079_v60 = vmax.f32 %v5998_v10, 0.0  ;;  %v6266_v7 = vld [vmem:[%s13236_s7 + $0x18] sm:$0xff] }
 0x682   :  { %v12726_v48 = vld [vmem:[%s13237_s8 + $0x18] sm:$0xff]  ;;  %6333 = vmatpush.msrb.mxu1 %v6266_v7 }
 0x683   :  { %v6002_v37 = vadd.f32 %v12312_v20, %v5917_v41  ;;  %v5249_v36 = vadd.f32 %v5166_v57, %v4579_v58  ;;  %v6230_v41 = vld [vmem:[%s13233_s4 + $0x18] sm:$0xff] }
 0x685   :  { %v6083_v46 = vmax.f32 %v6002_v37, 0.0 }
 0x688   :  { %v5833_v52 = vpop.f32.mrf.mxu0 }
 0x689   :  { %v5918_v39 = vadd.f32 %v5833_v52, %v5248_v47  ;;  %v6097_v47 = vld.sshfl [vmem:[#allocation1 + $0x20] sm:$0xff pattern:$0x73625140]  ;;  %v6265_v52 = vld [vmem:[%s13236_s7 + $0x10] sm:$0xff] }
 0x68a   :  { %6334 = vmatpush.msrb.mxu1 %v6265_v52 }
 0x68b   :  { %v6003_v29 = vadd.f32 %v12312_v20, %v5918_v39 }
 0x68c   :  { %6335 = vmatpush.msrb.mxu1 %v6264_v26 }
 0x68d   :  { %v6084_v1 = vmax.f32 %v6003_v29, 0.0 }
 0x68f   :  { %6187 = vmatpush.msra.mxu2 %v6084_v1  ;;  %v6263_v1 = vld [vmem:[%s13236_s7] sm:$0xff] }
 0x690   :  { %v5836_v45 = vpop.f32.mrf.mxu0  ;;  %6336 = vmatpush.msrb.mxu1 %v6263_v1 }
 0x691   :  { %v5919_v51 = vadd.f32 %v5836_v45, %v5249_v36  ;;  %6188 = vmatpush.msra.mxu2 %v6083_v46  ;;  %v8763_v36 = vmov 0.0   ;;  %v12765_v45 = vld [vmem:[%s13238_s9] ss:$0 sm:$0xff] }
 0x692   :  { %6537 = vmatpush.msra.mxu1 %v12726_v48 }
 0x693   :  { %v6004_v9 = vadd.f32 %v12312_v20, %v5919_v51  ;;  %6189 = vmatpush.msra.mxu2 %v6082_v54  ;;  %v6232_v20 = vld [vmem:[%s13233_s4 + $0x28] sm:$0xff] }
 0x694   :  { %6538 = vmatpush.msra.mxu1 %v12735_v14 }
 0x695   :  { %v6085_v2 = vmax.f32 %v6004_v9, 0.0  ;;  %6190 = vmatpush.msra.mxu2 %v6081_v18 }
 0x696   :  { %6539 = vmatpush.msra.mxu1 %v12744_v32 }
 0x697   :  { %6191 = vmatpush.msra.mxu2 %v6080_v31  ;;  %6222 = vmatpush.msra.mxu3 %v6085_v2 }
 0x698   :  { %8524 = vmatmul.msk.f32.vlgmr.msra.gmra.mxu3 %vm6104_vm2, %v6098_v24  ;;  %6540 = vmatpush.msra.mxu1 %v12750_v56 }
 0x699   :  { %6192 = vmatpush.msra.mxu2 %v6079_v60  ;;  %6251 = vmatpush.msrb.mxu3 %v6234_v53  ;;  %v6314_v53 = vld [vmem:[%s13235_s6 + $0x8] sm:$0x3f] }
 0x69b   :  { %6193 = vmatpush.msra.mxu2 %v6078_v17  ;;  %6252 = vmatpush.msrb.mxu3 %v6233_v13 }
 0x69d   :  { %6194 = vmatpush.msra.mxu2 %v6077_v8  ;;  %6253 = vmatpush.msrb.mxu3 %v6232_v20 }
 0x69f   :  { %6195 = vmatpush.msra.mxu2 %v6076_v3  ;;  %6254 = vmatpush.msrb.mxu3 %v6231_v21  ;;  %v12828_v21 = vld [vmem:[%s13240_s11] sm:$0xff] }
 0x6a1   :  { %6196 = vmatpush.msra.mxu2 %v6075_v22  ;;  %6255 = vmatpush.msrb.mxu3 %v6230_v41 }
 0x6a3   :  { %6197 = vmatpush.msra.mxu2 %v6074_v40  ;;  %6256 = vmatpush.msrb.mxu3 %v6229_v27 }
 0x6a5   :  { %6198 = vmatpush.msra.mxu2 %v6073_v61  ;;  %6257 = vmatpush.msrb.mxu3 %v6228_v28  ;;  %v6313_v61 = vld [vmem:[%s13235_s6] sm:$0xff] }
 0x6a6   :  { %8527 = vmatmul.msk.f32.vlgmr.msrb.gmra.mxu1 %vm6289_vm4, %v6313_v61 }
 0x6a7   :  { %6199 = vmatpush.msra.mxu2 %v6072_v55  ;;  %6258 = vmatpush.msrb.mxu3 %v6227_v38  ;;  %v12787_v55 = vld [vmem:[%s13239_s10 + $0x10] sm:$0xff] }
 0x6a9   :  { %6200 = vmatpush.msra.mxu2 %v6071_v15  ;;  %6305 = vmatpush.msra.mxu3 %v6266_v7  ;;  %v12798_v15 = vld [vmem:[%s13239_s10 + $0x8] sm:$0xff] }
 0x6ab   :  { %6201 = vmatpush.msra.mxu2 %v6070_v50  ;;  %6306 = vmatpush.msra.mxu3 %v6265_v52  ;;  %v12803_v50 = vld [vmem:[%s13240_s11 + $0x10] sm:$0xff] }
 0x6ad   :  { %6202 = vmatpush.msra.mxu2 %v6069_v43  ;;  %6307 = vmatpush.msra.mxu3 %v6264_v26  ;;  %v12809_v43 = vld [vmem:[%s13240_s11 + $0x8] sm:$0xff] }
 0x6ae   :  { %6203 = vmatmul.f32.vlgmr.msra.gmra.mxu2 %v6097_v47  ;;  %v12815_v47 = vld [vmem:[%s13239_s10] sm:$0xff]  ;;  %8528 = vmatmul.msk.f32.gmra.mxu1 %vm6289_vm4, %v6314_v53 }
 0x6af   :  { %6359 = vmatpush.msrb.mxu2 %v12726_v48  ;;  %6308 = vmatpush.msra.mxu3 %v6263_v1 }
 0x6b1   :  { %6360 = vmatpush.msrb.mxu2 %v12735_v14 }
 0x6b2   :  { %v6124_v34 = vpop.f32.mrf.mxu1 }
 0x6b3   :  { %6361 = vmatpush.msrb.mxu2 %v12744_v32 }
 0x6b5   :  { %v6144_v42 = vpop.f32.mrf.mxu2  ;;  %6362 = vmatpush.msrb.mxu2 %v12750_v56 }
 0x6b6   :  { %v6145_v39 = vadd.f32 %v6144_v42, %v6124_v34  ;;  %6363 = vmatmul.f32.vlgmr.msrb.gmra.mxu2 %v8763_v36  ;;  %v12851_v34 = vld [vmem:[%s13241_s12] ss:$0 sm:$0xff] }
 0x6b7   :  { %6445 = vmatpush.msra.mxu2 %v12792_v30 }
 0x6b9   :  { %6446 = vmatpush.msra.mxu2 %v12803_v50 }
 0x6bb   :  { %6447 = vmatpush.msra.mxu2 %v12809_v43 }
 0x6bd   :  { %6448 = vmatpush.msra.mxu2 %v12828_v21 }
 0x6be   :  { %6449 = vmatmul.f32.vlgmr.msra.gmra.mxu2 %v8763_v36 }
 0x6bf   :  { %6600 = vmatpush.msrb.mxu2 %v12780_v12 }
 0x6c1   :  { %6601 = vmatpush.msrb.mxu2 %v12787_v55 }
 0x6c3   :  { %6602 = vmatpush.msrb.mxu2 %v12798_v15 }
 0x6c5   :  { %v6164_v44 = vpop.f32.mrf.mxu3  ;;  %6603 = vmatpush.msrb.mxu2 %v12815_v47 }
 0x6c6   :  { %v6165_v59 = vadd.f32 %v6164_v44, %v6145_v39 }
 0x6c7   :  { %6708 = vmatpush.msra.mxu2 %v12726_v48 }
 0x6c9   :  { %6709 = vmatpush.msra.mxu2 %v12735_v14 }
 0x6cb   :  { %6710 = vmatpush.msra.mxu2 %v12744_v32 }
 0x6cd   :  { %6711 = vmatpush.msra.mxu2 %v12750_v56 }
 0x6f7   :  { %v6184_v58 = vpop.f32.mrf.mxu1 }
 0x6f8   :  { %v6185_v16 = vadd.f32 %v6184_v58, %v6165_v59 }
 0x71b   :  { %v6224_v29 = vpop.f32.mrf.mxu3 }
 0x723   :  { %v6338_v27 = vpop.f32.mrf.mxu1 }
 0x724   :  { %v12845_v38 = vadd.f32 %v12765_v45, %v6338_v27 }
 0x72b   :  { %v12842_v28 = vpop.f32.mrf.mxu1 }
 0x731   :  { %v6204_v37 = vpop.f32.mrf.mxu2 }
 0x732   :  { %v6205_v57 = vadd.f32 %v6204_v37, %v6185_v16 }
 0x734   :  { %v6225_v11 = vadd.f32 %v6224_v29, %v6205_v57 }
 0x736   :  { %8525 = vmatmul.msk.f32.vlgmr.msrb.gmra.mxu3 %vm6239_vm3, %v6225_v11 }
 0x737   :  { %6425 = vmatpush.msrb.mxu3 %v12780_v12 }
 0x739   :  { %v6364_v49 = vpop.f32.mrf.mxu2  ;;  %6426 = vmatpush.msrb.mxu3 %v12787_v55 }
 0x73b   :  { %6427 = vmatpush.msrb.mxu3 %v12798_v15 }
 0x73d   :  { %6428 = vmatpush.msrb.mxu3 %v12815_v47 }
 0x741   :  { %v6450_v39 = vpop.f32.mrf.mxu2 }
 0x7b9   :  { %v6260_v25 = vpop.f32.mrf.mxu3 }
 0x7ba   :  { %v6261_v46 = vadd.f32 %v8585_v33, %v6260_v25 }
 0x7bc   :  { %8526 = vmatmul.msk.f32.vlgmr.msra.gmra.mxu3 %vm6289_vm4, %v6261_v46 }
 0x83f   :  { %v6310_v0 = vpop.f32.mrf.mxu3 }
 0x840   :  { %v6311_v54 = vadd.f32 %v12765_v45, %v6310_v0 }
 0x842   :  { %v6367_v51 = vadd.f32 %v6364_v49, %v6311_v54 }
 0x844   :  { %8589 = vtanh.f32 %v6367_v51  ;;  %v8529_v18 = vmul.f32 -1.442695, %v6367_v51 }
 0x846   :  { %8591 = vpow2.f32 %v8529_v18 }
 0x84a   :  { %v8590_v10 = vpop.eup %8589 }
 0x84b   :  { %6390 = vrot.lane.b32.xlu0 %v8590_v10, %s8764_s0 }
 0x84c   :  { %v8592_v9 = vpop.eup %8591 }
 0x84d   :  { %v6371_v5 = vadd.f32 1.0, %v8592_v9 }
 0x84f   :  { %8593 = vrcp.f32 %v6371_v5  ;;  %v6383_v62 = vand.u32 2147483648, %v6371_v5  ;;  %vm6377_vm6 = vweird.f32 %v6371_v5  ;;  %v6381_v17 = vand.u32 2147483647, %v6371_v5 }
 0x851   :  { %v6384_v8 = vor.u32 1.1754944e-38, %v6383_v62  ;;  %vm6382_vm8 = vcmp.eq.f32.partialorder %v6381_v17, 8.507059e+37 }
 0x855   :  { %v8594_v31 = vpop.eup %8593 }
 0x856   :  { %v6373_v2 = vmul.f32 %v8594_v31, %v6371_v5  ;;  %vm6378_vm5 = vweird.f32 %v8594_v31 }
 0x857   :  { %vm6379_vm7 = vmor %vm6377_vm6, %vm6378_vm5 }
 0x858   :  { %v6374_v24 = vsub.f32 1.0, %v6373_v2 }
 0x85a   :  { %v6375_v19 = vmul.f32 %v8594_v31, %v6374_v24 }
 0x85c   :  { %v6376_v60 = vadd.f32 %v8594_v31, %v6375_v19 }
 0x85e   :  { %v6380_v35 = vsel %vm6379_vm7, %v8594_v31, %v6376_v60 }
 0x85f   :  { %v6385_v3 = vsel %vm6382_vm8, %v6384_v8, %v6380_v35 }
 0x860   :  { %v6388_v22 = vmul.f32 0.0, %v6385_v3 }
 0x8bd   :  { %v6391_v4 = vpop.permute.xlu0 %6390 }
 0x8be   :  { %v6393_v63 = vmul.f32 %v6391_v4, %v6385_v3 }
 0x8c0   :  { %6395 = vrot.lane.b32.xlu0 %v6393_v63, %s8765_s5 }
 0x932   :  { %v6396_v23 = vpop.permute.xlu0 %6395 }
 0x933   :  { %v12770_v40 = vadd.f32 %v6396_v23, %v6388_v22 }
 0x935   :  { %8595 = vtanh.f32 %v12770_v40 }
 0x93b   :  { %v8596_v6 = vpop.eup %8595 }
 0x93c   :  { %6401 = vrot.lane.b32.xlu1 %v8596_v6, %s8764_s0 }
 0x9ae   :  { %v6402_v13 = vpop.permute.xlu1 %6401 }
 0x9af   :  { %v6404_v20 = vmul.f32 %v6402_v13, %v6385_v3 }
 0x9b1   :  { %6409 = vrot.lane.b32.xlu1 %v6404_v20, %s8765_s5 }
 0xa23   :  { %v6410_v41 = vpop.permute.xlu1 %6409 }
 0xa24   :  { %8530 = vmatmul.msk.f32.vlgmr.msrb.gmra.mxu3 %vm6289_vm4, %v6410_v41  ;;  %8533 = vmatmul.msk.f32.vlgmr.msra.gmra.mxu1 %vm6289_vm4, %v6410_v41 }
 0xaa1   :  { %v6542_v7 = vpop.f32.mrf.mxu1 }
 0xaa2   :  { %v6545_v52 = vadd.f32 %v6542_v7, %v12845_v38 }
 0xaa4   :  { %8597 = vtanh.f32 %v6545_v52  ;;  %v8534_v37 = vmul.f32 -1.442695, %v6545_v52  ;;  %v12872_v52 = vld [vmem:[%s13242_s13 + $0x18] sm:$0xff] }
 0xaa5   :  { %6511 = vmatpush.msra.mxu3 %v12872_v52  ;;  %6683 = vmatpush.msrb.mxu1 %v12872_v52 }
 0xaa7   :  { %v6430_v42 = vpop.f32.mrf.mxu3 }
 0xaa8   :  { %v6431_v44 = vadd.f32 %v12851_v34, %v6430_v42  ;;  %v12877_v42 = vld [vmem:[%s13242_s13 + $0x10] sm:$0xff] }
 0xaa9   :  { %6512 = vmatpush.msra.mxu3 %v12877_v42  ;;  %6684 = vmatpush.msrb.mxu1 %v12877_v42 }
 0xaaa   :  { %v8598_v59 = vpop.eup %8597  ;;  %v6453_v58 = vadd.f32 %v6450_v39, %v6431_v44  ;;  %v12884_v39 = vld [vmem:[%s13242_s13 + $0x8] sm:$0xff]  ;;  %v12891_v44 = vld [vmem:[%s13242_s13] sm:$0xff] }
 0xaab   :  { %6568 = vrot.lane.b32.xlu2 %v8598_v59, %s8764_s0  ;;  %6513 = vmatpush.msra.mxu3 %v12884_v39 }
 0xaac   :  { %8599 = vtanh.f32 %v6453_v58  ;;  %v8531_v29 = vmul.f32 -1.442695, %v6453_v58  ;;  %6685 = vmatpush.msrb.mxu1 %v12884_v39 }
 0xaad   :  { %8601 = vpow2.f32 %v8534_v37  ;;  %6514 = vmatpush.msra.mxu3 %v12891_v44  ;;  %v12928_v37 = vld [vmem:[%s13243_s14] ss:$0 sm:$0xff] }
 0xaae   :  { %8603 = vpow2.f32 %v8531_v29  ;;  %6686 = vmatpush.msrb.mxu1 %v12891_v44 }
 0xaaf   :  { %6620 = vmatpush.msrb.mxu3 %v12792_v30 }
 0xab0   :  { %6798 = vmatpush.msra.mxu1 %v12792_v30 }
 0xab1   :  { %6621 = vmatpush.msrb.mxu3 %v12803_v50 }
 0xab2   :  { %v8600_v16 = vpop.eup %8599  ;;  %6799 = vmatpush.msra.mxu1 %v12803_v50 }
 0xab3   :  { %6476 = vrot.lane.b32.xlu2 %v8600_v16, %s8764_s0  ;;  %v8602_v57 = vpop.eup %8601  ;;  %6622 = vmatpush.msrb.mxu3 %v12809_v43 }
 0xab4   :  { %v6549_v11 = vadd.f32 1.0, %v8602_v57  ;;  %v8604_v26 = vpop.eup %8603  ;;  %6800 = vmatpush.msra.mxu1 %v12809_v43 }
 0xab5   :  { %v6457_v1 = vadd.f32 1.0, %v8604_v26  ;;  %6623 = vmatpush.msrb.mxu3 %v12828_v21 }
 0xab6   :  { %8605 = vrcp.f32 %v6549_v11  ;;  %v6561_v51 = vand.u32 2147483648, %v6549_v11  ;;  %vm6555_vm10 = vweird.f32 %v6549_v11  ;;  %v6559_v10 = vand.u32 2147483647, %v6549_v11  ;;  %6801 = vmatpush.msra.mxu1 %v12828_v21 }
 0xab7   :  { %8607 = vrcp.f32 %v6457_v1  ;;  %v6469_v60 = vand.u32 2147483648, %v6457_v1  ;;  %vm6463_vm14 = vweird.f32 %v6457_v1  ;;  %v6467_v62 = vand.u32 2147483647, %v6457_v1 }
 0xab8   :  { %v6562_v5 = vor.u32 1.1754944e-38, %v6561_v51  ;;  %vm6560_vm12 = vcmp.eq.f32.partialorder %v6559_v10, 8.507059e+37 }
 0xab9   :  { %v6470_v35 = vor.u32 1.1754944e-38, %v6469_v60  ;;  %vm6468_vm0 = vcmp.eq.f32.partialorder %v6467_v62, 8.507059e+37 }
 0xabc   :  { %v8606_v36 = vpop.eup %8605 }
 0xabd   :  { %v6551_v33 = vmul.f32 %v8606_v36, %v6549_v11  ;;  %v8608_v46 = vpop.eup %8607  ;;  %vm6556_vm9 = vweird.f32 %v8606_v36 }
 0xabe   :  { %v6459_v0 = vmul.f32 %v8608_v46, %v6457_v1  ;;  %vm6557_vm11 = vmor %vm6555_vm10, %vm6556_vm9  ;;  %vm6464_vm13 = vweird.f32 %v8608_v46 }
 0xabf   :  { %v6552_v25 = vsub.f32 1.0, %v6551_v33  ;;  %vm6465_vm15 = vmor %vm6463_vm14, %vm6464_vm13 }
 0xac0   :  { %v6460_v54 = vsub.f32 1.0, %v6459_v0 }
 0xac1   :  { %v6553_v45 = vmul.f32 %v8606_v36, %v6552_v25 }
 0xac2   :  { %v6461_v9 = vmul.f32 %v8608_v46, %v6460_v54 }
 0xac3   :  { %v6554_v49 = vadd.f32 %v8606_v36, %v6553_v45 }
 0xac4   :  { %v6462_v19 = vadd.f32 %v8608_v46, %v6461_v9 }
 0xac5   :  { %v6558_v18 = vsel %vm6557_vm11, %v8606_v36, %v6554_v49 }
 0xac6   :  { %v6563_v2 = vsel %vm6560_vm12, %v6562_v5, %v6558_v18  ;;  %v6466_v17 = vsel %vm6465_vm15, %v8608_v46, %v6462_v19 }
 0xac7   :  { %v6471_v4 = vsel %vm6468_vm0, %v6470_v35, %v6466_v17  ;;  %v6566_v63 = vmul.f32 %v6563_v2, %v12770_v40 }
 0xac8   :  { %v6474_v6 = vmul.f32 0.0, %v6471_v4 }
 0xb05   :  { %v6569_v31 = vpop.permute.xlu2 %6568 }
 0xb06   :  { %v6571_v24 = vmul.f32 %v6569_v31, %v6563_v2 }
 0xb08   :  { %6573 = vrot.lane.b32.xlu0 %v6571_v24, %s8765_s5 }
 0xb0d   :  { %v6477_v8 = vpop.permute.xlu2 %6476 }
 0xb0e   :  { %v6479_v3 = vmul.f32 %v6477_v8, %v6471_v4 }
 0xb10   :  { %6481 = vrot.lane.b32.xlu1 %v6479_v3, %s8765_s5 }
 0xb7a   :  { %v6574_v22 = vpop.permute.xlu0 %6573 }
 0xb7b   :  { %v12859_v23 = vadd.f32 %v6574_v22, %v6566_v63 }
 0xb7d   :  { %8609 = vtanh.f32 %v12859_v23 }
 0xb82   :  { %v6482_v61 = vpop.permute.xlu1 %6481 }
 0xb83   :  { %v8610_v53 = vpop.eup %8609  ;;  %v12862_v13 = vadd.f32 %v6482_v61, %v6474_v6 }
 0xb84   :  { %6579 = vrot.lane.b32.xlu2 %v8610_v53, %s8764_s0 }
 0xb85   :  { %8611 = vtanh.f32 %v12862_v13 }
 0xb8b   :  { %v8612_v20 = vpop.eup %8611 }
 0xb8c   :  { %6487 = vrot.lane.b32.xlu0 %v8612_v20, %s8764_s0 }
 0xbde   :  { %v6580_v41 = vpop.permute.xlu2 %6579 }
 0xbdf   :  { %v6582_v27 = vmul.f32 %v6580_v41, %v6563_v2 }
 0xbe1   :  { %6584 = vrot.lane.b32.xlu1 %v6582_v27, %s8765_s5 }
 0xbfe   :  { %v6488_v40 = vpop.permute.xlu0 %6487 }
 0xbff   :  { %v6490_v7 = vmul.f32 %v6488_v40, %v6471_v4 }
 0xc01   :  { %6495 = vrot.lane.b32.xlu2 %v6490_v7, %s8765_s5 }
 0xc53   :  { %v6585_v59 = vpop.permute.xlu1 %6584 }
 0xc54   :  { %8535 = vmatmul.msk.f32.vlgmr.msrb.gmra.mxu2 %vm6289_vm4, %v6585_v59 }
 0xc55   :  { %6861 = vmatpush.msrb.mxu2 %v12872_v52 }
 0xc57   :  { %6862 = vmatpush.msrb.mxu2 %v12877_v42 }
 0xc59   :  { %6863 = vmatpush.msrb.mxu2 %v12884_v39 }
 0xc5b   :  { %v6496_v58 = vpop.permute.xlu2 %6495  ;;  %6864 = vmatpush.msrb.mxu2 %v12891_v44 }
 0xc5c   :  { %8532 = vmatmul.msk.f32.vlgmr.msra.gmra.mxu3 %vm6289_vm4, %v6496_v58  ;;  %8539 = vmatmul.msk.f32.vlgmr.msra.gmra.mxu2 %vm6289_vm4, %v6585_v59 }
 0xc5d   :  { %6778 = vmatpush.msra.mxu3 %v12780_v12  ;;  %6976 = vmatpush.msra.mxu2 %v12792_v30 }
 0xc5f   :  { %6779 = vmatpush.msra.mxu3 %v12787_v55  ;;  %6977 = vmatpush.msra.mxu2 %v12803_v50 }
 0xc61   :  { %6780 = vmatpush.msra.mxu3 %v12798_v15  ;;  %6978 = vmatpush.msra.mxu2 %v12809_v43 }
 0xc63   :  { %6781 = vmatpush.msra.mxu3 %v12815_v47  ;;  %6979 = vmatpush.msra.mxu2 %v12828_v21 }
 0xc64   :  { %8536 = vmatmul.msk.f32.vlgmr.msrb.gmra.mxu3 %vm6289_vm4, %v6496_v58 }
 0xc65   :  { %6886 = vmatpush.msrb.mxu3 %v12726_v48 }
 0xc67   :  { %6887 = vmatpush.msrb.mxu3 %v12735_v14 }
 0xc69   :  { %6888 = vmatpush.msrb.mxu3 %v12744_v32 }
 0xc6b   :  { %6889 = vmatpush.msrb.mxu3 %v12750_v56 }
 0xcd7   :  { %v6605_v16 = vpop.f32.mrf.mxu2 }
 0xcd8   :  { %v6606_v33 = vadd.f32 %v12851_v34, %v6605_v16  ;;  %v6741_v16 = vrot.slane %v12859_v23, 6 }
 0xcdf   :  { %v6516_v29 = vpop.f32.mrf.mxu3  ;;  %v6713_v57 = vpop.f32.mrf.mxu2 }
 0xce0   :  { %v6517_v11 = vadd.f32 %v12928_v37, %v6516_v29  ;;  %v6717_v26 = vrot.slane %v6713_v57, 6 }
 0xce2   :  { %v6520_v1 = vrot.slane %v6517_v11, 1  ;;  %6523 = vst.msk [vmem:[#allocation2] sm:$0x1] %vm6522_vm1, %v6517_v11  ;;  %v6719_v36 = vadd.f32 %v6717_v26, %v12845_v38 }
 0xce4   :  { %6524 = vst.msk [vmem:[#allocation2 + $0x8] sm:$0x1] %vm6522_vm1, %v6520_v1  ;;  %8613 = vtanh.f32 %v6719_v36  ;;  %v8540_v49 = vmul.f32 -1.442695, %v6719_v36 }
 0xce7   :  { %v6625_v25 = vpop.f32.mrf.mxu3 }
 0xce8   :  { %v6628_v46 = vadd.f32 %v6625_v25, %v6606_v33 }
 0xcea   :  { %v8614_v45 = vpop.eup %8613  ;;  %8615 = vtanh.f32 %v6628_v46  ;;  %v8537_v54 = vmul.f32 -1.442695, %v6628_v46 }
 0xceb   :  { %6745 = vrot.lane.b32.xlu0 %v8614_v45, %s8764_s0  ;;  %8617 = vpow2.f32 %v8540_v49 }
 0xcec   :  { %8619 = vpow2.f32 %v8537_v54 }
 0xcf0   :  { %v8616_v0 = vpop.eup %8615 }
 0xcf1   :  { %6651 = vrot.lane.b32.xlu1 %v8616_v0, %s8764_s0  ;;  %v8618_v51 = vpop.eup %8617 }
 0xcf2   :  { %v6723_v10 = vadd.f32 1.0, %v8618_v51  ;;  %v8620_v18 = vpop.eup %8619 }
 0xcf3   :  { %v6632_v9 = vadd.f32 1.0, %v8620_v18 }
 0xcf4   :  { %8621 = vrcp.f32 %v6723_v10  ;;  %v6735_v35 = vand.u32 2147483648, %v6723_v10  ;;  %vm6729_vm3 = vweird.f32 %v6723_v10  ;;  %v6733_v8 = vand.u32 2147483647, %v6723_v10 }
 0xcf5   :  { %8623 = vrcp.f32 %v6632_v9  ;;  %v6644_v53 = vand.u32 2147483648, %v6632_v9  ;;  %vm6638_vm8 = vweird.f32 %v6632_v9  ;;  %v6642_v41 = vand.u32 2147483647, %v6632_v9 }
 0xcf6   :  { %v6736_v63 = vor.u32 1.1754944e-38, %v6735_v35  ;;  %vm6734_vm6 = vcmp.eq.f32.partialorder %v6733_v8, 8.507059e+37 }
 0xcf7   :  { %v6645_v40 = vor.u32 1.1754944e-38, %v6644_v53  ;;  %vm6643_vm10 = vcmp.eq.f32.partialorder %v6642_v41, 8.507059e+37 }
 0xcfa   :  { %v8622_v5 = vpop.eup %8621 }
 0xcfb   :  { %v6725_v31 = vmul.f32 %v8622_v5, %v6723_v10  ;;  %v8624_v2 = vpop.eup %8623  ;;  %vm6730_vm2 = vweird.f32 %v8622_v5 }
 0xcfc   :  { %v6634_v19 = vmul.f32 %v8624_v2, %v6632_v9  ;;  %vm6731_vm5 = vmor %vm6729_vm3, %vm6730_vm2  ;;  %vm6639_vm7 = vweird.f32 %v8624_v2 }
 0xcfd   :  { %v6726_v24 = vsub.f32 1.0, %v6725_v31  ;;  %vm6640_vm9 = vmor %vm6638_vm8, %vm6639_vm7 }
 0xcfe   :  { %v6635_v62 = vsub.f32 1.0, %v6634_v19 }
 0xcff   :  { %v6727_v60 = vmul.f32 %v8622_v5, %v6726_v24 }
 0xd00   :  { %v6636_v4 = vmul.f32 %v8624_v2, %v6635_v62 }
 0xd01   :  { %v6728_v17 = vadd.f32 %v8622_v5, %v6727_v60 }
 0xd02   :  { %v6637_v22 = vadd.f32 %v8624_v2, %v6636_v4 }
 0xd03   :  { %v6732_v3 = vsel %vm6731_vm5, %v8622_v5, %v6728_v17 }
 0xd04   :  { %v6737_v6 = vsel %vm6734_vm6, %v6736_v63, %v6732_v3  ;;  %v6641_v27 = vsel %vm6640_vm9, %v8624_v2, %v6637_v22 }
 0xd05   :  { %v6646_v59 = vsel %vm6643_vm10, %v6645_v40, %v6641_v27  ;;  %v6743_v29 = vmul.f32 %v6741_v16, %v6737_v6 }
 0xd06   :  { %v6649_v1 = vmul.f32 %v6646_v59, %v12862_v13 }
 0xd5d   :  { %v6746_v61 = vpop.permute.xlu0 %6745 }
 0xd5e   :  { %v6748_v20 = vmul.f32 %v6746_v61, %v6737_v6 }
 0xd60   :  { %6750 = vrot.lane.b32.xlu2 %v6748_v20, %s8765_s5 }
 0xd63   :  { %v6652_v7 = vpop.permute.xlu1 %6651 }
 0xd64   :  { %v6654_v58 = vmul.f32 %v6652_v7, %v6646_v59 }
 0xd66   :  { %6656 = vrot.lane.b32.xlu0 %v6654_v58, %s8765_s5 }
 0xdba   :  { %v6751_v57 = vpop.permute.xlu2 %6750 }
 0xdbb   :  { %v12940_v11 = vadd.f32 %v6751_v57, %v6743_v29 }
 0xdbd   :  { %8625 = vtanh.f32 %v12940_v11 }
 0xdc3   :  { %v8626_v26 = vpop.eup %8625 }
 0xdc4   :  { %6756 = vrot.lane.b32.xlu1 %v8626_v26, %s8764_s0 }
 0xdd8   :  { %v6657_v36 = vpop.permute.xlu0 %6656 }
 0xdd9   :  { %v12945_v33 = vadd.f32 %v6657_v36, %v6649_v1 }
 0xddb   :  { %8627 = vtanh.f32 %v12945_v33 }
 0xde1   :  { %v8628_v25 = vpop.eup %8627 }
 0xde2   :  { %6662 = vrot.lane.b32.xlu2 %v8628_v25, %s8764_s0 }
 0xe36   :  { %v6757_v23 = vpop.permute.xlu1 %6756 }
 0xe37   :  { %v6759_v46 = vmul.f32 %v6757_v23, %v6737_v6 }
 0xe39   :  { %v6761_v45 = vrot.slane %v6759_v46, 2 }
 0xe3b   :  { %6762 = vrot.lane.b32.xlu0 %v6761_v45, %s8765_s5 }
 0xe3c   :  { %v6663_v0 = vpop.permute.xlu2 %6662 }
 0xe3d   :  { %v6665_v49 = vmul.f32 %v6663_v0, %v6646_v59 }
 0xe3f   :  { %6667 = vrot.lane.b32.xlu1 %v6665_v49, %s8765_s5 }
 0xead   :  { %v6763_v54 = vpop.permute.xlu0 %6762 }
 0xeae   :  { %8541 = vmatmul.msk.f32.vlgmr.msra.gmra.mxu3 %vm6289_vm4, %v6763_v54 }
 0xeaf   :  { %7039 = vmatpush.msra.mxu3 %v12872_v52 }
 0xeb1   :  { %v6668_v13 = vpop.permute.xlu1 %6667  ;;  %7040 = vmatpush.msra.mxu3 %v12877_v42 }
 0xeb2   :  { %8538 = vmatmul.msk.f32.vlgmr.msrb.gmra.mxu1 %vm6289_vm4, %v6668_v13 }
 0xeb3   :  { %6956 = vmatpush.msrb.mxu1 %v12780_v12  ;;  %7041 = vmatpush.msra.mxu3 %v12884_v39 }
 0xeb5   :  { %6957 = vmatpush.msrb.mxu1 %v12787_v55  ;;  %7042 = vmatpush.msra.mxu3 %v12891_v44 }
 0xeb6   :  { %8545 = vmatmul.msk.f32.vlgmr.msrb.gmra.mxu3 %vm6289_vm4, %v6763_v54 }
 0xeb7   :  { %6958 = vmatpush.msrb.mxu1 %v12798_v15  ;;  %7154 = vmatpush.msrb.mxu3 %v12792_v30 }
 0xeb9   :  { %6959 = vmatpush.msrb.mxu1 %v12815_v47  ;;  %7155 = vmatpush.msrb.mxu3 %v12803_v50 }
 0xeba   :  { %8542 = vmatmul.msk.f32.vlgmr.msra.gmra.mxu1 %vm6289_vm4, %v6668_v13 }
 0xebb   :  { %7064 = vmatpush.msra.mxu1 %v12726_v48  ;;  %7156 = vmatpush.msrb.mxu3 %v12809_v43 }
 0xebd   :  { %7065 = vmatpush.msra.mxu1 %v12735_v14  ;;  %7157 = vmatpush.msrb.mxu3 %v12828_v21 }
 0xebf   :  { %7066 = vmatpush.msra.mxu1 %v12744_v32 }
 0xec1   :  { %7067 = vmatpush.msra.mxu1 %v12750_v56 }
 0xf2f   :  { %v6688_v51 = vpop.f32.mrf.mxu1 }
 0xf30   :  { %v6689_v10 = vadd.f32 %v12928_v37, %v6688_v51 }
 0xf31   :  { %v6783_v18 = vpop.f32.mrf.mxu3 }
 0xf32   :  { %v6692_v9 = vrot.slane %v6689_v10, 1  ;;  %6694 = vst.msk [vmem:[#allocation2 + $0x1] sm:$0x1] %vm6522_vm1, %v6689_v10  ;;  %v6784_v5 = vadd.f32 %v12851_v34, %v6783_v18  ;;  %v6919_v18 = vrot.slane %v12940_v11, 6 }
 0xf34   :  { %6695 = vst.msk [vmem:[#allocation2 + $0x9] sm:$0x1] %vm6522_vm1, %v6692_v9 }
 0xf37   :  { %v6803_v31 = vpop.f32.mrf.mxu1 }
 0xf38   :  { %v6806_v2 = vadd.f32 %v6803_v31, %v6784_v5 }
 0xf39   :  { %v6891_v24 = vpop.f32.mrf.mxu3 }
 0xf3a   :  { %8629 = vtanh.f32 %v6806_v2  ;;  %v6895_v19 = vrot.slane %v6891_v24, 4  ;;  %v8543_v3 = vmul.f32 -1.442695, %v6806_v2 }
 0xf3c   :  { %v6897_v60 = vadd.f32 %v6895_v19, %v12845_v38 }
 0xf3e   :  { %8631 = vtanh.f32 %v6897_v60  ;;  %v8546_v35 = vmul.f32 -1.442695, %v6897_v60 }
 0xf40   :  { %v8630_v62 = vpop.eup %8629  ;;  %8633 = vpow2.f32 %v8546_v35 }
 0xf41   :  { %6829 = vrot.lane.b32.xlu0 %v8630_v62, %s8764_s0 }
 0xf44   :  { %v8632_v17 = vpop.eup %8631 }
 0xf45   :  { %6923 = vrot.lane.b32.xlu2 %v8632_v17, %s8764_s0 }
 0xf46   :  { %v8634_v8 = vpop.eup %8633 }
 0xf47   :  { %v6901_v4 = vadd.f32 1.0, %v8634_v8 }
 0xf49   :  { %8635 = vrcp.f32 %v6901_v4  ;;  %v6913_v27 = vand.u32 2147483648, %v6901_v4  ;;  %vm6907_vm12 = vweird.f32 %v6901_v4  ;;  %v6911_v40 = vand.u32 2147483647, %v6901_v4 }
 0xf4a   :  { %8637 = vpow2.f32 %v8543_v3 }
 0xf4b   :  { %v6914_v58 = vor.u32 1.1754944e-38, %v6913_v27  ;;  %vm6912_vm14 = vcmp.eq.f32.partialorder %v6911_v40, 8.507059e+37 }
 0xf4f   :  { %v8636_v63 = vpop.eup %8635 }
 0xf50   :  { %v6903_v22 = vmul.f32 %v8636_v63, %v6901_v4  ;;  %v8638_v6 = vpop.eup %8637  ;;  %vm6908_vm11 = vweird.f32 %v8636_v63 }
 0xf51   :  { %v6810_v53 = vadd.f32 1.0, %v8638_v6  ;;  %vm6909_vm13 = vmor %vm6907_vm12, %vm6908_vm11 }
 0xf52   :  { %v6904_v61 = vsub.f32 1.0, %v6903_v22 }
 0xf53   :  { %8639 = vrcp.f32 %v6810_v53  ;;  %v6822_v23 = vand.u32 2147483648, %v6810_v53  ;;  %vm6816_vm0 = vweird.f32 %v6810_v53  ;;  %v6820_v46 = vand.u32 2147483647, %v6810_v53 }
 0xf54   :  { %v6905_v20 = vmul.f32 %v8636_v63, %v6904_v61 }
 0xf55   :  { %v6823_v0 = vor.u32 1.1754944e-38, %v6822_v23  ;;  %vm6821_vm3 = vcmp.eq.f32.partialorder %v6820_v46, 8.507059e+37 }
 0xf56   :  { %v6906_v41 = vadd.f32 %v8636_v63, %v6905_v20 }
 0xf58   :  { %v6910_v7 = vsel %vm6909_vm13, %v8636_v63, %v6906_v41 }
 0xf59   :  { %v8640_v59 = vpop.eup %8639  ;;  %v6915_v29 = vsel %vm6912_vm14, %v6914_v58, %v6910_v7 }
 0xf5a   :  { %v6812_v26 = vmul.f32 %v8640_v59, %v6810_v53  ;;  %vm6817_vm15 = vweird.f32 %v8640_v59  ;;  %v6921_v5 = vmul.f32 %v6919_v18, %v6915_v29 }
 0xf5b   :  { %vm6818_vm2 = vmor %vm6816_vm0, %vm6817_vm15 }
 0xf5c   :  { %v6813_v1 = vsub.f32 1.0, %v6812_v26 }
 0xf5e   :  { %v6814_v36 = vmul.f32 %v8640_v59, %v6813_v1 }
 0xf60   :  { %v6815_v25 = vadd.f32 %v8640_v59, %v6814_v36 }
 0xf62   :  { %v6819_v45 = vsel %vm6818_vm2, %v8640_v59, %v6815_v25 }
 0xf63   :  { %v6824_v54 = vsel %vm6821_vm3, %v6823_v0, %v6819_v45 }
 0xf64   :  { %v6827_v51 = vmul.f32 %v6824_v54, %v12945_v33 }
 0xf9f   :  { %v6924_v16 = vpop.permute.xlu2 %6923 }
 0xfa0   :  { %v6926_v57 = vmul.f32 %v6924_v16, %v6915_v29 }
 0xfa2   :  { %6928 = vrot.lane.b32.xlu1 %v6926_v57, %s8765_s5 }
 0xfb3   :  { %v6830_v49 = vpop.permute.xlu0 %6829 }
 0xfb4   :  { %v6832_v13 = vmul.f32 %v6830_v49, %v6824_v54 }
 0xfb6   :  { %6834 = vrot.lane.b32.xlu2 %v6832_v13, %s8765_s5 }
0x1010   :  { %v6835_v10 = vpop.permute.xlu2 %6834 }
0x1011   :  { %v12982_v9 = vadd.f32 %v6835_v10, %v6827_v51 }
0x1013   :  { %8641 = vtanh.f32 %v12982_v9 }
0x1014   :  { %v6929_v31 = vpop.permute.xlu1 %6928 }
0x1015   :  { %v12985_v2 = vadd.f32 %v6929_v31, %v6921_v5 }
0x1017   :  { %8643 = vtanh.f32 %v12985_v2 }
0x1019   :  { %v8642_v24 = vpop.eup %8641 }
0x101a   :  { %6840 = vrot.lane.b32.xlu1 %v8642_v24, %s8764_s0 }
0x101d   :  { %v8644_v19 = vpop.eup %8643 }
0x101e   :  { %6934 = vrot.lane.b32.xlu0 %v8644_v19, %s8764_s0 }
0x108c   :  { %v6841_v33 = vpop.permute.xlu1 %6840 }
0x108d   :  { %v6843_v60 = vmul.f32 %v6841_v33, %v6824_v54 }
0x108f   :  { %6845 = vrot.lane.b32.xlu2 %v6843_v60, %s8765_s5 }
0x1090   :  { %v6935_v11 = vpop.permute.xlu0 %6934 }
0x1091   :  { %v6937_v62 = vmul.f32 %v6935_v11, %v6915_v29 }
0x1093   :  { %v6939_v17 = vrot.slane %v6937_v62, 4 }
0x1095   :  { %6940 = vrot.lane.b32.xlu0 %v6939_v17, %s8765_s5 }
0x10e9   :  { %v6846_v35 = vpop.permute.xlu2 %6845 }
0x10ea   :  { %8544 = vmatmul.msk.f32.vlgmr.msrb.gmra.mxu2 %vm6289_vm4, %v6846_v35 }
0x10eb   :  { %7134 = vmatpush.msrb.mxu2 %v12780_v12 }
0x10ed   :  { %7135 = vmatpush.msrb.mxu2 %v12787_v55 }
0x10ef   :  { %7136 = vmatpush.msrb.mxu2 %v12798_v15 }
0x10f1   :  { %7137 = vmatpush.msrb.mxu2 %v12815_v47 }
0x10f2   :  { %8548 = vmatmul.msk.f32.vlgmr.msra.gmra.mxu2 %vm6289_vm4, %v6846_v35 }
0x10f3   :  { %7242 = vmatpush.msra.mxu2 %v12726_v48 }
0x10f5   :  { %7243 = vmatpush.msra.mxu2 %v12735_v14 }
0x10f7   :  { %7244 = vmatpush.msra.mxu2 %v12744_v32 }
0x10f9   :  { %7245 = vmatpush.msra.mxu2 %v12750_v56 }
0x1107   :  { %v6941_v8 = vpop.permute.xlu0 %6940 }
0x1108   :  { %8547 = vmatmul.msk.f32.vlgmr.msrb.gmra.mxu1 %vm6289_vm4, %v6941_v8 }
0x1109   :  { %7217 = vmatpush.msrb.mxu1 %v12872_v52 }
0x110b   :  { %7218 = vmatpush.msrb.mxu1 %v12877_v42 }
0x110d   :  { %7219 = vmatpush.msrb.mxu1 %v12884_v39 }
0x110f   :  { %7220 = vmatpush.msrb.mxu1 %v12891_v44 }
0x1110   :  { %8551 = vmatmul.msk.f32.vlgmr.msra.gmra.mxu1 %vm6289_vm4, %v6941_v8 }
0x1111   :  { %7328 = vmatpush.msra.mxu1 %v12792_v30 }
0x1113   :  { %7329 = vmatpush.msra.mxu1 %v12803_v50 }
0x1115   :  { %7330 = vmatpush.msra.mxu1 %v12809_v43 }
0x1117   :  { %7331 = vmatpush.msra.mxu1 %v12828_v21 }
0x116d   :  { %v6866_v48 = vpop.f32.mrf.mxu2 }
0x116e   :  { %v6867_v14 = vadd.f32 %v12928_v37, %v6866_v48  ;;  %v7097_v48 = vrot.slane %v12985_v2, 6  ;;  %v13042_v2 = vld [vmem:[%s13237_s8 + $0x18] sm:$0xff] }
0x1170   :  { %v6870_v32 = vrot.slane %v6867_v14, 1  ;;  %6872 = vst.msk [vmem:[#allocation2 + $0x2] sm:$0x1] %vm6522_vm1, %v6867_v14 }
0x1172   :  { %6873 = vst.msk [vmem:[#allocation2 + $0xa] sm:$0x1] %vm6522_vm1, %v6870_v32 }
0x1175   :  { %v6981_v63 = vpop.f32.mrf.mxu2 }
0x1185   :  { %v6961_v4 = vpop.f32.mrf.mxu1 }
0x1186   :  { %v6962_v3 = vadd.f32 %v12851_v34, %v6961_v4 }
0x1188   :  { %v6984_v22 = vadd.f32 %v6981_v63, %v6962_v3 }
0x118a   :  { %8645 = vtanh.f32 %v6984_v22  ;;  %v8549_v27 = vmul.f32 -1.442695, %v6984_v22 }
0x118d   :  { %v7069_v6 = vpop.f32.mrf.mxu1 }
0x118e   :  { %v7073_v61 = vrot.slane %v7069_v6, 2 }
0x1190   :  { %v8646_v53 = vpop.eup %8645  ;;  %v7075_v20 = vadd.f32 %v7073_v61, %v12845_v38 }
0x1191   :  { %7007 = vrot.lane.b32.xlu2 %v8646_v53, %s8764_s0 }
0x1192   :  { %8647 = vtanh.f32 %v7075_v20  ;;  %v8552_v29 = vmul.f32 -1.442695, %v7075_v20  ;;  %v13048_v20 = vld [vmem:[%s13237_s8 + $0x10] sm:$0xff] }
0x1193   :  { %8649 = vpow2.f32 %v8549_v27 }
0x1198   :  { %v8648_v41 = vpop.eup %8647 }
0x1199   :  { %7101 = vrot.lane.b32.xlu1 %v8648_v41, %s8764_s0  ;;  %v8650_v40 = vpop.eup %8649 }
0x119a   :  { %v6988_v7 = vadd.f32 1.0, %v8650_v40 }
0x119c   :  { %8651 = vrcp.f32 %v6988_v7  ;;  %v7000_v38 = vand.u32 2147483648, %v6988_v7  ;;  %vm6994_vm6 = vweird.f32 %v6988_v7  ;;  %v6998_v1 = vand.u32 2147483647, %v6988_v7 }
0x119d   :  { %8653 = vpow2.f32 %v8552_v29 }
0x119e   :  { %v7001_v23 = vor.u32 1.1754944e-38, %v7000_v38  ;;  %vm6999_vm8 = vcmp.eq.f32.partialorder %v6998_v1, 8.507059e+37 }
0x11a2   :  { %v8652_v59 = vpop.eup %8651 }
0x11a3   :  { %v6990_v58 = vmul.f32 %v8652_v59, %v6988_v7  ;;  %vm6995_vm5 = vweird.f32 %v8652_v59  ;;  %v8654_v36 = vpop.eup %8653 }
0x11a4   :  { %vm6996_vm7 = vmor %vm6994_vm6, %vm6995_vm5  ;;  %v7079_v46 = vadd.f32 1.0, %v8654_v36 }
0x11a5   :  { %v6991_v16 = vsub.f32 1.0, %v6990_v58 }
0x11a6   :  { %8655 = vrcp.f32 %v7079_v46  ;;  %v7091_v5 = vand.u32 2147483648, %v7079_v46  ;;  %vm7085_vm10 = vweird.f32 %v7079_v46  ;;  %v7089_v31 = vand.u32 2147483647, %v7079_v46 }
0x11a7   :  { %v6992_v57 = vmul.f32 %v8652_v59, %v6991_v16 }
0x11a8   :  { %v7092_v19 = vor.u32 1.1754944e-38, %v7091_v5  ;;  %vm7090_vm12 = vcmp.eq.f32.partialorder %v7089_v31, 8.507059e+37 }
0x11a9   :  { %v6993_v26 = vadd.f32 %v8652_v59, %v6992_v57 }
0x11ab   :  { %v6997_v25 = vsel %vm6996_vm7, %v8652_v59, %v6993_v26 }
0x11ac   :  { %v7002_v0 = vsel %vm6999_vm8, %v7001_v23, %v6997_v25  ;;  %v8656_v54 = vpop.eup %8655 }
0x11ad   :  { %v7081_v13 = vmul.f32 %v8656_v54, %v7079_v46  ;;  %vm7086_vm9 = vweird.f32 %v8656_v54  ;;  %v7005_v62 = vmul.f32 %v7002_v0, %v12982_v9 }
0x11ae   :  { %vm7087_vm11 = vmor %vm7085_vm10, %vm7086_vm9 }
0x11af   :  { %v7082_v51 = vsub.f32 1.0, %v7081_v13 }
0x11b1   :  { %v7083_v10 = vmul.f32 %v8656_v54, %v7082_v51 }
0x11b3   :  { %v7084_v18 = vadd.f32 %v8656_v54, %v7083_v10 }
0x11b5   :  { %v7088_v24 = vsel %vm7087_vm11, %v8656_v54, %v7084_v18 }
0x11b6   :  { %v7093_v33 = vsel %vm7090_vm12, %v7092_v19, %v7088_v24 }
0x11b7   :  { %v7099_v14 = vmul.f32 %v7097_v48, %v7093_v33 }
0x11eb   :  { %v7008_v45 = vpop.permute.xlu2 %7007 }
0x11ec   :  { %v7010_v49 = vmul.f32 %v7008_v45, %v7002_v0 }
0x11ee   :  { %7012 = vrot.lane.b32.xlu1 %v7010_v49, %s8765_s5 }
0x120b   :  { %v7102_v60 = vpop.permute.xlu1 %7101 }
0x120c   :  { %v7104_v11 = vmul.f32 %v7102_v60, %v7093_v33 }
0x120e   :  { %7106 = vrot.lane.b32.xlu0 %v7104_v11, %s8765_s5 }
0x1260   :  { %v7013_v17 = vpop.permute.xlu1 %7012 }
0x1261   :  { %v13022_v35 = vadd.f32 %v7013_v17, %v7005_v62 }
0x1263   :  { %8657 = vtanh.f32 %v13022_v35 }
0x1269   :  { %v8658_v8 = vpop.eup %8657 }
0x126a   :  { %7018 = vrot.lane.b32.xlu0 %v8658_v8, %s8764_s0 }
0x1280   :  { %v7107_v32 = vpop.permute.xlu0 %7106 }
0x1281   :  { %v13027_v4 = vadd.f32 %v7107_v32, %v7099_v14 }
0x1283   :  { %8659 = vtanh.f32 %v13027_v4  ;;  %v7272_v48 = vrot.slane %v13027_v4, 6 }
0x1289   :  { %v8660_v3 = vpop.eup %8659 }
0x128a   :  { %7112 = vrot.lane.b32.xlu2 %v8660_v3, %s8764_s0 }
0x12dc   :  { %v7019_v9 = vpop.permute.xlu0 %7018 }
0x12dd   :  { %v7021_v63 = vmul.f32 %v7019_v9, %v7002_v0 }
0x12df   :  { %7023 = vrot.lane.b32.xlu2 %v7021_v63, %s8765_s5 }
0x12e4   :  { %v7113_v22 = vpop.permute.xlu2 %7112 }
0x12e5   :  { %v7115_v6 = vmul.f32 %v7113_v22, %v7093_v33 }
0x12e7   :  { %v7117_v61 = vrot.slane %v7115_v6, 6 }
0x12e9   :  { %7118 = vrot.lane.b32.xlu1 %v7117_v61, %s8765_s5 }
0x1339   :  { %v7024_v53 = vpop.permute.xlu2 %7023 }
0x133a   :  { %8550 = vmatmul.msk.f32.vlgmr.msra.gmra.mxu3 %vm6289_vm4, %v7024_v53 }
0x133b   :  { %7308 = vmatpush.msra.mxu3 %v12780_v12  ;;  %v13054_v12 = vld [vmem:[%s13237_s8 + $0x8] sm:$0xff] }
0x133d   :  { %7309 = vmatpush.msra.mxu3 %v12787_v55 }
0x133f   :  { %7310 = vmatpush.msra.mxu3 %v12798_v15 }
0x1341   :  { %7311 = vmatpush.msra.mxu3 %v12815_v47 }
0x1342   :  { %8554 = vmatmul.msk.f32.vlgmr.msrb.gmra.mxu3 %vm6289_vm4, %v7024_v53 }
0x1343   :  { %7416 = vmatpush.msrb.mxu3 %v13042_v2 }
0x1345   :  { %7417 = vmatpush.msrb.mxu3 %v13048_v20 }
0x1347   :  { %7418 = vmatpush.msrb.mxu3 %v13054_v12 }
0x1349   :  { %7419 = vmatpush.msrb.mxu3 %v12750_v56 }
0x135b   :  { %v7119_v55 = vpop.permute.xlu1 %7118 }
0x135c   :  { %8553 = vmatmul.msk.f32.vlgmr.msrb.gmra.mxu2 %vm6289_vm4, %v7119_v55 }
0x135d   :  { %7391 = vmatpush.msrb.mxu2 %v12872_v52 }
0x135f   :  { %7392 = vmatpush.msrb.mxu2 %v12877_v42 }
0x1361   :  { %7393 = vmatpush.msrb.mxu2 %v12884_v39 }
0x1363   :  { %7394 = vmatpush.msrb.mxu2 %v12891_v44 }
0x1364   :  { %8557 = vmatmul.msk.f32.vlgmr.msra.gmra.mxu2 %vm6289_vm4, %v7119_v55 }
0x1365   :  { %7506 = vmatpush.msra.mxu2 %v12792_v30  ;;  %v8721_v30 = vld [vmem:[%s13238_s9] ss:$0 sm:$0xff] }
0x1367   :  { %7507 = vmatpush.msra.mxu2 %v12803_v50  ;;  %v13076_v50 = vadd.f32 %v8721_v30, %v12842_v28 }
0x1369   :  { %7508 = vmatpush.msra.mxu2 %v12809_v43 }
0x136b   :  { %7509 = vmatpush.msra.mxu2 %v12828_v21 }
0x13bd   :  { %v7044_v56 = vpop.f32.mrf.mxu3 }
0x13be   :  { %v7045_v15 = vadd.f32 %v12928_v37, %v7044_v56 }
0x13c0   :  { %v7048_v47 = vrot.slane %v7045_v15, 1  ;;  %7050 = vst.msk [vmem:[#allocation2 + $0x3] sm:$0x1] %vm6522_vm1, %v7045_v15 }
0x13c2   :  { %7051 = vst.msk [vmem:[#allocation2 + $0xb] sm:$0x1] %vm6522_vm1, %v7048_v47  ;;  %v13105_v47 = vld [vmem:[%s13239_s10 + $0x10] sm:$0xff] }
0x13c5   :  { %v7159_v40 = vpop.f32.mrf.mxu3 }
0x13df   :  { %v7139_v41 = vpop.f32.mrf.mxu2 }
0x13e0   :  { %v7140_v27 = vadd.f32 %v12851_v34, %v7139_v41 }
0x13e2   :  { %v7162_v7 = vadd.f32 %v7159_v40, %v7140_v27  ;;  %v13111_v27 = vld [vmem:[%s13239_s10 + $0x8] sm:$0xff]  ;;  %v13118_v40 = vld [vmem:[%s13239_s10] sm:$0xff] }
0x13e4   :  { %8661 = vtanh.f32 %v7162_v7  ;;  %v8555_v34 = vmul.f32 -1.442695, %v7162_v7 }
0x13e7   :  { %v7247_v43 = vpop.f32.mrf.mxu2 }
0x13e8   :  { %v7250_v21 = vadd.f32 %v7247_v43, %v13076_v50  ;;  %v13151_v43 = vld [vmem:[%s13241_s12] ss:$0 sm:$0xff] }
0x13ea   :  { %v8662_v59 = vpop.eup %8661  ;;  %8663 = vtanh.f32 %v7250_v21  ;;  %v8558_v16 = vmul.f32 -1.442695, %v7250_v21 }
0x13eb   :  { %7185 = vrot.lane.b32.xlu1 %v8662_v59, %s8764_s0  ;;  %8665 = vpow2.f32 %v8555_v34 }
0x13ec   :  { %8667 = vpow2.f32 %v8558_v16 }
0x13f0   :  { %v8664_v58 = vpop.eup %8663 }
0x13f1   :  { %7276 = vrot.lane.b32.xlu0 %v8664_v58, %s8764_s0  ;;  %v8666_v29 = vpop.eup %8665 }
0x13f2   :  { %v7166_v57 = vadd.f32 1.0, %v8666_v29  ;;  %v8668_v26 = vpop.eup %8667 }
0x13f3   :  { %v7254_v28 = vadd.f32 1.0, %v8668_v26 }
0x13f4   :  { %8669 = vrcp.f32 %v7166_v57  ;;  %v7178_v49 = vand.u32 2147483648, %v7166_v57  ;;  %vm7172_vm14 = vweird.f32 %v7166_v57  ;;  %v7176_v54 = vand.u32 2147483647, %v7166_v57 }
0x13f5   :  { %8671 = vrcp.f32 %v7254_v28  ;;  %v7266_v24 = vand.u32 2147483648, %v7254_v28  ;;  %vm7260_vm3 = vweird.f32 %v7254_v28  ;;  %v7264_v33 = vand.u32 2147483647, %v7254_v28 }
0x13f6   :  { %v7179_v10 = vor.u32 1.1754944e-38, %v7178_v49  ;;  %vm7177_vm0 = vcmp.eq.f32.partialorder %v7176_v54, 8.507059e+37 }
0x13f7   :  { %v7267_v11 = vor.u32 1.1754944e-38, %v7266_v24  ;;  %vm7265_vm6 = vcmp.eq.f32.partialorder %v7264_v33, 8.507059e+37 }
0x13fa   :  { %v8670_v38 = vpop.eup %8669 }
0x13fb   :  { %v7168_v1 = vmul.f32 %v8670_v38, %v7166_v57  ;;  %v8672_v36 = vpop.eup %8671  ;;  %vm7173_vm13 = vweird.f32 %v8670_v38 }
0x13fc   :  { %v7256_v23 = vmul.f32 %v8672_v36, %v7254_v28  ;;  %vm7174_vm15 = vmor %vm7172_vm14, %vm7173_vm13  ;;  %vm7261_vm2 = vweird.f32 %v8672_v36 }
0x13fd   :  { %v7169_v25 = vsub.f32 1.0, %v7168_v1  ;;  %vm7262_vm5 = vmor %vm7260_vm3, %vm7261_vm2 }
0x13fe   :  { %v7257_v45 = vsub.f32 1.0, %v7256_v23 }
0x13ff   :  { %v7170_v46 = vmul.f32 %v8670_v38, %v7169_v25 }
0x1400   :  { %v7258_v13 = vmul.f32 %v8672_v36, %v7257_v45 }
0x1401   :  { %v7171_v0 = vadd.f32 %v8670_v38, %v7170_v46 }
0x1402   :  { %v7259_v18 = vadd.f32 %v8672_v36, %v7258_v13 }
0x1403   :  { %v7175_v51 = vsel %vm7174_vm15, %v8670_v38, %v7171_v0 }
0x1404   :  { %v7180_v31 = vsel %vm7177_vm0, %v7179_v10, %v7175_v51  ;;  %v7263_v60 = vsel %vm7262_vm5, %v8672_v36, %v7259_v18 }
0x1405   :  { %v7268_v17 = vsel %vm7265_vm6, %v7267_v11, %v7263_v60  ;;  %v7183_v63 = vmul.f32 %v7180_v31, %v13022_v35  ;;  %v13099_v35 = vld [vmem:[%s13239_s10 + $0x18] sm:$0xff] }
0x1406   :  { %v7274_v14 = vmul.f32 %v7272_v48, %v7268_v17 }
0x145d   :  { %v7186_v5 = vpop.permute.xlu1 %7185 }
0x145e   :  { %v7188_v19 = vmul.f32 %v7186_v5, %v7180_v31 }
0x1460   :  { %7190 = vrot.lane.b32.xlu0 %v7188_v19, %s8765_s5 }
0x1463   :  { %v7277_v62 = vpop.permute.xlu0 %7276 }
0x1464   :  { %v7279_v8 = vmul.f32 %v7277_v62, %v7268_v17 }
0x1466   :  { %7281 = vrot.lane.b32.xlu2 %v7279_v8, %s8765_s5 }
0x14c0   :  { %v7282_v32 = vpop.permute.xlu2 %7281 }
0x14c1   :  { %v13084_v3 = vadd.f32 %v7282_v32, %v7274_v14 }
0x14c3   :  { %8673 = vtanh.f32 %v13084_v3 }
0x14c9   :  { %v8674_v9 = vpop.eup %8673 }
0x14ca   :  { %7287 = vrot.lane.b32.xlu1 %v8674_v9, %s8764_s0 }
0x14d2   :  { %v7191_v22 = vpop.permute.xlu0 %7190 }
0x14d3   :  { %v13089_v6 = vadd.f32 %v7191_v22, %v7183_v63 }
0x14d5   :  { %8675 = vtanh.f32 %v13089_v6 }
0x14db   :  { %v8676_v61 = vpop.eup %8675 }
0x14dc   :  { %7196 = vrot.lane.b32.xlu2 %v8676_v61, %s8764_s0 }
0x1536   :  { %v7197_v4 = vpop.permute.xlu2 %7196 }
0x1537   :  { %v7199_v53 = vmul.f32 %v7197_v4, %v7180_v31  ;;  %v7449_v4 = vrot.slane %v13084_v3, 6 }
0x1539   :  { %7201 = vrot.lane.b32.xlu1 %v7199_v53, %s8765_s5 }
0x153c   :  { %v7288_v55 = vpop.permute.xlu1 %7287 }
0x153d   :  { %v7290_v56 = vmul.f32 %v7288_v55, %v7268_v17 }
0x153f   :  { %7292 = vrot.lane.b32.xlu0 %v7290_v56, %s8765_s5 }
0x15ab   :  { %v7202_v15 = vpop.permute.xlu1 %7201 }
0x15ac   :  { %8556 = vmatmul.msk.f32.vlgmr.msrb.gmra.mxu1 %vm6289_vm4, %v7202_v15 }
0x15ad   :  { %7486 = vmatpush.msrb.mxu1 %v13099_v35 }
0x15af   :  { %7487 = vmatpush.msrb.mxu1 %v13105_v47 }
0x15b1   :  { %v7293_v41 = vpop.permute.xlu0 %7292  ;;  %7488 = vmatpush.msrb.mxu1 %v13111_v27 }
0x15b2   :  { %8559 = vmatmul.msk.f32.vlgmr.msra.gmra.mxu3 %vm6289_vm4, %v7293_v41 }
0x15b3   :  { %7489 = vmatpush.msrb.mxu1 %v13118_v40  ;;  %7569 = vmatpush.msra.mxu3 %v12872_v52  ;;  %v8726_v52 = vld [vmem:[%s13237_s8] sm:$0xff] }
0x15b4   :  { %8560 = vmatmul.msk.f32.vlgmr.msra.gmra.mxu1 %vm6289_vm4, %v7202_v15 }
0x15b5   :  { %7594 = vmatpush.msra.mxu1 %v13042_v2  ;;  %7570 = vmatpush.msra.mxu3 %v12877_v42  ;;  %v8727_v2 = vld [vmem:[%s13240_s11 + $0x18] sm:$0xff]  ;;  %v8728_v42 = vld [vmem:[%s13240_s11 + $0x10] sm:$0xff] }
0x15b7   :  { %7595 = vmatpush.msra.mxu1 %v13048_v20  ;;  %7571 = vmatpush.msra.mxu3 %v12884_v39  ;;  %v8729_v39 = vld [vmem:[%s13240_s11 + $0x8] sm:$0xff] }
0x15b9   :  { %7596 = vmatpush.msra.mxu1 %v13054_v12  ;;  %7572 = vmatpush.msra.mxu3 %v12891_v44  ;;  %v8730_v44 = vld [vmem:[%s13240_s11] sm:$0xff] }
0x15ba   :  { %8563 = vmatmul.msk.f32.vlgmr.msrb.gmra.mxu3 %vm6289_vm4, %v7293_v41 }
0x15bb   :  { %7597 = vmatpush.msra.mxu1 %v8726_v52  ;;  %7684 = vmatpush.msrb.mxu3 %v8727_v2 }
0x15bd   :  { %7685 = vmatpush.msrb.mxu3 %v8728_v42 }
0x15bf   :  { %7686 = vmatpush.msrb.mxu3 %v8729_v39 }
0x15c1   :  { %7687 = vmatpush.msrb.mxu3 %v8730_v44 }
0x1629   :  { %v7222_v20 = vpop.f32.mrf.mxu1 }
0x162a   :  { %v7223_v12 = vadd.f32 %v12928_v37, %v7222_v20  ;;  %v8732_v20 = vld [vmem:[%s13242_s13 + $0x18] sm:$0xff] }
0x162c   :  { %v7226_v7 = vrot.slane %v7223_v12, 1  ;;  %7228 = vst.msk [vmem:[#allocation2 + $0x4] sm:$0x1] %vm6522_vm1, %v7223_v12  ;;  %v13194_v12 = vld [vmem:[%s13243_s14] ss:$0 sm:$0xff] }
0x162e   :  { %7229 = vst.msk [vmem:[#allocation2 + $0xc] sm:$0x1] %vm6522_vm1, %v7226_v7 }
0x1631   :  { %v7333_v59 = vpop.f32.mrf.mxu1 }
0x1635   :  { %v7313_v30 = vpop.f32.mrf.mxu3 }
0x1636   :  { %v7314_v21 = vadd.f32 %v13151_v43, %v7313_v30 }
0x1638   :  { %v7336_v58 = vadd.f32 %v7333_v59, %v7314_v21 }
0x163a   :  { %8677 = vtanh.f32 %v7336_v58  ;;  %v8561_v26 = vmul.f32 -1.442695, %v7336_v58 }
0x163d   :  { %v7421_v34 = vpop.f32.mrf.mxu3 }
0x163e   :  { %v7425_v16 = vrot.slane %v7421_v34, 6 }
0x1640   :  { %v8678_v29 = vpop.eup %8677  ;;  %v7427_v37 = vadd.f32 %v7425_v16, %v13076_v50 }
0x1641   :  { %7359 = vrot.lane.b32.xlu2 %v8678_v29, %s8764_s0 }
0x1642   :  { %8679 = vtanh.f32 %v7427_v37  ;;  %v8564_v23 = vmul.f32 -1.442695, %v7427_v37 }
0x1643   :  { %8681 = vpow2.f32 %v8561_v26 }
0x1648   :  { %v8680_v57 = vpop.eup %8679 }
0x1649   :  { %7453 = vrot.lane.b32.xlu0 %v8680_v57, %s8764_s0  ;;  %v8682_v28 = vpop.eup %8681 }
0x164a   :  { %v7340_v38 = vadd.f32 1.0, %v8682_v28 }
0x164c   :  { %8683 = vrcp.f32 %v7340_v38  ;;  %v7352_v0 = vand.u32 2147483648, %v7340_v38  ;;  %vm7346_vm8 = vweird.f32 %v7340_v38  ;;  %v7350_v49 = vand.u32 2147483647, %v7340_v38 }
0x164d   :  { %8685 = vpow2.f32 %v8564_v23 }
0x164e   :  { %v7353_v51 = vor.u32 1.1754944e-38, %v7352_v0  ;;  %vm7351_vm10 = vcmp.eq.f32.partialorder %v7350_v49, 8.507059e+37 }
0x1652   :  { %v8684_v1 = vpop.eup %8683 }
0x1653   :  { %v7342_v36 = vmul.f32 %v8684_v1, %v7340_v38  ;;  %vm7347_vm7 = vweird.f32 %v8684_v1  ;;  %v8686_v54 = vpop.eup %8685 }
0x1654   :  { %vm7348_vm9 = vmor %vm7346_vm8, %vm7347_vm7  ;;  %v7431_v10 = vadd.f32 1.0, %v8686_v54 }
0x1655   :  { %v7343_v25 = vsub.f32 1.0, %v7342_v36 }
0x1656   :  { %8687 = vrcp.f32 %v7431_v10  ;;  %v7443_v62 = vand.u32 2147483648, %v7431_v10  ;;  %vm7437_vm12 = vweird.f32 %v7431_v10  ;;  %v7441_v17 = vand.u32 2147483647, %v7431_v10 }
0x1657   :  { %v7344_v46 = vmul.f32 %v8684_v1, %v7343_v25 }
0x1658   :  { %v7444_v48 = vor.u32 1.1754944e-38, %v7443_v62  ;;  %vm7442_vm14 = vcmp.eq.f32.partialorder %v7441_v17, 8.507059e+37 }
0x1659   :  { %v7345_v45 = vadd.f32 %v8684_v1, %v7344_v46 }
0x165b   :  { %v7349_v13 = vsel %vm7348_vm9, %v8684_v1, %v7345_v45 }
0x165c   :  { %v7354_v5 = vsel %vm7351_vm10, %v7353_v51, %v7349_v13  ;;  %v8688_v24 = vpop.eup %8687 }
0x165d   :  { %v7433_v19 = vmul.f32 %v8688_v24, %v7431_v10  ;;  %vm7438_vm11 = vweird.f32 %v8688_v24  ;;  %v7357_v63 = vmul.f32 %v7354_v5, %v13089_v6 }
0x165e   :  { %vm7439_vm13 = vmor %vm7437_vm12, %vm7438_vm11 }
0x165f   :  { %v7434_v33 = vsub.f32 1.0, %v7433_v19 }
0x1661   :  { %v7435_v60 = vmul.f32 %v8688_v24, %v7434_v33 }
0x1663   :  { %v7436_v11 = vadd.f32 %v8688_v24, %v7435_v60 }
0x1665   :  { %v7440_v8 = vsel %vm7439_vm13, %v8688_v24, %v7436_v11 }
0x1666   :  { %v7445_v32 = vsel %vm7442_vm14, %v7444_v48, %v7440_v8 }
0x1667   :  { %v7451_v53 = vmul.f32 %v7449_v4, %v7445_v32 }
0x169b   :  { %v7360_v18 = vpop.permute.xlu2 %7359 }
0x169c   :  { %v7362_v31 = vmul.f32 %v7360_v18, %v7354_v5 }
0x169e   :  { %7364 = vrot.lane.b32.xlu1 %v7362_v31, %s8765_s5 }
0x16bb   :  { %v7454_v14 = vpop.permute.xlu0 %7453 }
0x16bc   :  { %v7456_v9 = vmul.f32 %v7454_v14, %v7445_v32 }
0x16be   :  { %7458 = vrot.lane.b32.xlu2 %v7456_v9, %s8765_s5 }
0x1710   :  { %v7365_v22 = vpop.permute.xlu1 %7364 }
0x1711   :  { %v13160_v61 = vadd.f32 %v7365_v22, %v7357_v63 }
0x1713   :  { %8689 = vtanh.f32 %v13160_v61 }
0x1718   :  { %v7459_v55 = vpop.permute.xlu2 %7458 }
0x1719   :  { %v8690_v56 = vpop.eup %8689  ;;  %v13164_v15 = vadd.f32 %v7459_v55, %v7451_v53 }
0x171a   :  { %7370 = vrot.lane.b32.xlu0 %v8690_v56, %s8764_s0 }
0x171b   :  { %8691 = vtanh.f32 %v13164_v15  ;;  %v7627_v63 = vrot.slane %v13164_v15, 6 }
0x1721   :  { %v8692_v41 = vpop.eup %8691 }
0x1722   :  { %7464 = vrot.lane.b32.xlu1 %v8692_v41, %s8764_s0 }
0x178c   :  { %v7371_v6 = vpop.permute.xlu0 %7370 }
0x178d   :  { %v7373_v52 = vmul.f32 %v7371_v6, %v7354_v5 }
0x178f   :  { %7375 = vrot.lane.b32.xlu2 %v7373_v52, %s8765_s5 }
0x1794   :  { %v7465_v2 = vpop.permute.xlu1 %7464 }
0x1795   :  { %v7467_v42 = vmul.f32 %v7465_v2, %v7445_v32 }
0x1797   :  { %v7469_v39 = vrot.slane %v7467_v42, 2 }
0x1799   :  { %7470 = vrot.lane.b32.xlu0 %v7469_v39, %s8765_s5 }
0x17e9   :  { %v7376_v3 = vpop.permute.xlu2 %7375 }
0x17ea   :  { %8562 = vmatmul.msk.f32.vlgmr.msrb.gmra.mxu2 %vm6289_vm4, %v7376_v3 }
0x17eb   :  { %7664 = vmatpush.msrb.mxu2 %v13099_v35  ;;  %v8733_v35 = vld [vmem:[%s13242_s13 + $0x10] sm:$0xff] }
0x17ed   :  { %7665 = vmatpush.msrb.mxu2 %v13105_v47  ;;  %v8734_v47 = vld [vmem:[%s13242_s13 + $0x8] sm:$0xff] }
0x17ef   :  { %7666 = vmatpush.msrb.mxu2 %v13111_v27  ;;  %v8735_v27 = vld [vmem:[%s13242_s13] sm:$0xff]  ;;  %s8766_s13 = smov [#allocation2]  }
0x17f0   :  { %s7764_s14 = sshll.u32 %s8766_s13, 4  ;;  %s7765_s14 = int_to_ptr.vmem [resolvable:$true] %s7764_s14 }
0x17f1   :  { %7667 = vmatpush.msrb.mxu2 %v13118_v40 }
0x17f2   :  { %8566 = vmatmul.msk.f32.vlgmr.msra.gmra.mxu2 %vm6289_vm4, %v7376_v3 }
0x180b   :  { %v7471_v44 = vpop.permute.xlu0 %7470 }
0x180c   :  { %8565 = vmatmul.msk.f32.vlgmr.msrb.gmra.mxu1 %vm6289_vm4, %v7471_v44 }
0x180d   :  { %7747 = vmatpush.msrb.mxu1 %v8732_v20 }
0x180f   :  { %7748 = vmatpush.msrb.mxu1 %v8733_v35 }
0x1811   :  { %7749 = vmatpush.msrb.mxu1 %v8734_v47 }
0x1813   :  { %7750 = vmatpush.msrb.mxu1 %v8735_v27 }
0x1814   :  { %8569 = vmatmul.msk.f32.vlgmr.msra.gmra.mxu1 %vm6289_vm4, %v7471_v44 }
0x186d   :  { %v7396_v40 = vpop.f32.mrf.mxu2 }
0x186e   :  { %v7397_v7 = vadd.f32 %v13194_v12, %v7396_v40 }
0x1870   :  { %v7400_v30 = vrot.slane %v7397_v7, 1  ;;  %7402 = vst.msk [vmem:[#allocation2 + $0x5] sm:$0x1] %vm6522_vm1, %v7397_v7 }
0x1872   :  { %7403 = vst.msk [vmem:[#allocation2 + $0xd] sm:$0x1] %vm6522_vm1, %v7400_v30 }
0x1875   :  { %v7511_v58 = vpop.f32.mrf.mxu2 }
0x1889   :  { %v7491_v21 = vpop.f32.mrf.mxu1 }
0x188a   :  { %v7492_v59 = vadd.f32 %v13151_v43, %v7491_v21 }
0x188c   :  { %v7514_v34 = vadd.f32 %v7511_v58, %v7492_v59 }
0x188e   :  { %8693 = vtanh.f32 %v7514_v34  ;;  %v8567_v36 = vmul.f32 -1.442695, %v7514_v34 }
0x1891   :  { %v7599_v16 = vpop.f32.mrf.mxu1 }
0x1892   :  { %v7603_v29 = vrot.slane %v7599_v16, 4 }
0x1894   :  { %v8694_v37 = vpop.eup %8693  ;;  %v7605_v57 = vadd.f32 %v7603_v29, %v13076_v50 }
0x1895   :  { %7537 = vrot.lane.b32.xlu1 %v8694_v37, %s8764_s0 }
0x1896   :  { %8695 = vtanh.f32 %v7605_v57  ;;  %v8570_v28 = vmul.f32 -1.442695, %v7605_v57 }
0x1898   :  { %8697 = vpow2.f32 %v8570_v28 }
0x189c   :  { %v8696_v26 = vpop.eup %8695 }
0x189d   :  { %7631 = vrot.lane.b32.xlu2 %v8696_v26, %s8764_s0 }
0x189e   :  { %v8698_v38 = vpop.eup %8697 }
0x189f   :  { %v7609_v1 = vadd.f32 1.0, %v8698_v38 }
0x18a1   :  { %8699 = vrcp.f32 %v7609_v1  ;;  %v7621_v13 = vand.u32 2147483648, %v7609_v1  ;;  %vm7615_vm0 = vweird.f32 %v7609_v1  ;;  %v7619_v51 = vand.u32 2147483647, %v7609_v1 }
0x18a2   :  { %8701 = vpow2.f32 %v8567_v36 }
0x18a3   :  { %v7622_v5 = vor.u32 1.1754944e-38, %v7621_v13  ;;  %vm7620_vm3 = vcmp.eq.f32.partialorder %v7619_v51, 8.507059e+37 }
0x18a7   :  { %v8700_v25 = vpop.eup %8699 }
0x18a8   :  { %v8702_v23 = vpop.eup %8701  ;;  %v7611_v46 = vmul.f32 %v8700_v25, %v7609_v1  ;;  %vm7616_vm15 = vweird.f32 %v8700_v25 }
0x18a9   :  { %v7518_v45 = vadd.f32 1.0, %v8702_v23  ;;  %vm7617_vm2 = vmor %vm7615_vm0, %vm7616_vm15 }
0x18aa   :  { %v7612_v0 = vsub.f32 1.0, %v7611_v46 }
0x18ab   :  { %8703 = vrcp.f32 %v7518_v45  ;;  %v7530_v62 = vand.u32 2147483648, %v7518_v45  ;;  %vm7524_vm6 = vweird.f32 %v7518_v45  ;;  %v7528_v17 = vand.u32 2147483647, %v7518_v45 }
0x18ac   :  { %v7613_v50 = vmul.f32 %v8700_v25, %v7612_v0 }
0x18ad   :  { %v7531_v48 = vor.u32 1.1754944e-38, %v7530_v62  ;;  %vm7529_vm8 = vcmp.eq.f32.partialorder %v7528_v17, 8.507059e+37 }
0x18ae   :  { %v7614_v49 = vadd.f32 %v8700_v25, %v7613_v50 }
0x18b0   :  { %v7618_v10 = vsel %vm7617_vm2, %v8700_v25, %v7614_v49 }
0x18b1   :  { %v8704_v54 = vpop.eup %8703  ;;  %v7623_v24 = vsel %vm7620_vm3, %v7622_v5, %v7618_v10 }
0x18b2   :  { %v7520_v18 = vmul.f32 %v8704_v54, %v7518_v45  ;;  %vm7525_vm5 = vweird.f32 %v8704_v54  ;;  %v7629_v22 = vmul.f32 %v7627_v63, %v7623_v24 }
0x18b3   :  { %vm7526_vm7 = vmor %vm7524_vm6, %vm7525_vm5 }
0x18b4   :  { %v7521_v33 = vsub.f32 1.0, %v7520_v18 }
0x18b6   :  { %v7522_v60 = vmul.f32 %v8704_v54, %v7521_v33 }
0x18b8   :  { %v7523_v11 = vadd.f32 %v8704_v54, %v7522_v60 }
0x18ba   :  { %v7527_v8 = vsel %vm7526_vm7, %v8704_v54, %v7523_v11 }
0x18bb   :  { %v7532_v32 = vsel %vm7529_vm8, %v7531_v48, %v7527_v8 }
0x18bc   :  { %v7535_v56 = vmul.f32 %v7532_v32, %v13160_v61 }
0x18f7   :  { %v7632_v31 = vpop.permute.xlu2 %7631 }
0x18f8   :  { %v7634_v19 = vmul.f32 %v7632_v31, %v7623_v24 }
0x18fa   :  { %7636 = vrot.lane.b32.xlu1 %v7634_v19, %s8765_s5 }
0x1907   :  { %v7538_v14 = vpop.permute.xlu1 %7537 }
0x1908   :  { %v7540_v9 = vmul.f32 %v7538_v14, %v7532_v32 }
0x190a   :  { %7542 = vrot.lane.b32.xlu0 %v7540_v9, %s8765_s5 }
0x196c   :  { %v7637_v4 = vpop.permute.xlu1 %7636 }
0x196d   :  { %v7639_v53 = vadd.f32 %v7637_v4, %v7629_v22 }
0x196f   :  { %8705 = vtanh.f32 %v7639_v53 }
0x1975   :  { %v8706_v55 = vpop.eup %8705 }
0x1976   :  { %7642 = vrot.lane.b32.xlu0 %v8706_v55, %s8764_s0 }
0x197c   :  { %v7543_v41 = vpop.permute.xlu0 %7542 }
0x197d   :  { %v7545_v6 = vadd.f32 %v7543_v41, %v7535_v56 }
0x197f   :  { %8707 = vtanh.f32 %v7545_v6 }
0x1985   :  { %v8708_v52 = vpop.eup %8707 }
0x1986   :  { %7548 = vrot.lane.b32.xlu2 %v8708_v52, %s8764_s0 }
0x19e0   :  { %v7549_v2 = vpop.permute.xlu2 %7548 }
0x19e1   :  { %v7551_v42 = vmul.f32 %v7549_v2, %v7532_v32 }
0x19e3   :  { %7553 = vrot.lane.b32.xlu1 %v7551_v42, %s8765_s5 }
0x19e8   :  { %v7643_v15 = vpop.permute.xlu0 %7642 }
0x19e9   :  { %v7645_v39 = vmul.f32 %v7643_v15, %v7623_v24 }
0x19eb   :  { %v7647_v3 = vrot.slane %v7645_v39, 4 }
0x19ed   :  { %7648 = vrot.lane.b32.xlu2 %v7647_v3, %s8765_s5 }
0x1a47   :  { %v7649_v44 = vpop.permute.xlu2 %7648 }
0x1a48   :  { %8571 = vmatmul.msk.f32.vlgmr.msrb.gmra.mxu2 %vm6289_vm4, %v7649_v44 }
0x1a55   :  { %v7554_v20 = vpop.permute.xlu1 %7553 }
0x1a56   :  { %8568 = vmatmul.msk.f32.vlgmr.msra.gmra.mxu3 %vm6289_vm4, %v7554_v20 }
0x1a5e   :  { %8572 = vmatmul.msk.f32.vlgmr.msrb.gmra.mxu3 %vm6289_vm4, %v7554_v20 }
0x1acb   :  { %v7669_v27 = vpop.f32.mrf.mxu2 }
0x1acc   :  { %v7670_v40 = vadd.f32 %v13151_v43, %v7669_v27 }
0x1ad9   :  { %v7574_v61 = vpop.f32.mrf.mxu3 }
0x1ada   :  { %v7575_v35 = vadd.f32 %v13194_v12, %v7574_v61 }
0x1adc   :  { %v7578_v47 = vrot.slane %v7575_v35, 1  ;;  %7580 = vst.msk [vmem:[#allocation2 + $0x6] sm:$0x1] %vm6522_vm1, %v7575_v35 }
0x1ade   :  { %7581 = vst.msk [vmem:[#allocation2 + $0xe] sm:$0x1] %vm6522_vm1, %v7578_v47 }
0x1ae1   :  { %v7689_v7 = vpop.f32.mrf.mxu3 }
0x1ae2   :  { %v7692_v30 = vadd.f32 %v7689_v7, %v7670_v40 }
0x1ae4   :  { %8709 = vtanh.f32 %v7692_v30  ;;  %v8573_v59 = vmul.f32 -1.442695, %v7692_v30 }
0x1ae6   :  { %8711 = vpow2.f32 %v8573_v59 }
0x1aea   :  { %v8710_v21 = vpop.eup %8709 }
0x1aeb   :  { %7715 = vrot.lane.b32.xlu0 %v8710_v21, %s8764_s0 }
0x1aec   :  { %v8712_v58 = vpop.eup %8711 }
0x1aed   :  { %v7696_v34 = vadd.f32 1.0, %v8712_v58 }
0x1aef   :  { %8713 = vrcp.f32 %v7696_v34  ;;  %v7708_v28 = vand.u32 2147483648, %v7696_v34  ;;  %vm7702_vm10 = vweird.f32 %v7696_v34  ;;  %v7706_v43 = vand.u32 2147483647, %v7696_v34 }
0x1af1   :  { %v7709_v1 = vor.u32 1.1754944e-38, %v7708_v28  ;;  %vm7707_vm12 = vcmp.eq.f32.partialorder %v7706_v43, 8.507059e+37 }
0x1af5   :  { %v8714_v16 = vpop.eup %8713 }
0x1af6   :  { %v7698_v29 = vmul.f32 %v8714_v16, %v7696_v34  ;;  %vm7703_vm9 = vweird.f32 %v8714_v16 }
0x1af7   :  { %vm7704_vm11 = vmor %vm7702_vm10, %vm7703_vm9 }
0x1af8   :  { %v7699_v37 = vsub.f32 1.0, %v7698_v29 }
0x1afa   :  { %v7700_v57 = vmul.f32 %v8714_v16, %v7699_v37 }
0x1afc   :  { %v7701_v26 = vadd.f32 %v8714_v16, %v7700_v57 }
0x1afe   :  { %v7705_v38 = vsel %vm7704_vm11, %v8714_v16, %v7701_v26 }
0x1aff   :  { %v7710_v25 = vsel %vm7707_vm12, %v7709_v1, %v7705_v38 }
0x1b00   :  { %v7713_v46 = vmul.f32 %v7710_v25, %v7545_v6 }
0x1b5d   :  { %v7716_v36 = vpop.permute.xlu0 %7715 }
0x1b5e   :  { %v7718_v23 = vmul.f32 %v7716_v36, %v7710_v25 }
0x1b60   :  { %7720 = vrot.lane.b32.xlu1 %v7718_v23, %s8765_s5 }
0x1bd2   :  { %v7721_v45 = vpop.permute.xlu1 %7720 }
0x1bd3   :  { %v7723_v0 = vadd.f32 %v7721_v45, %v7713_v46 }
0x1bd5   :  { %8715 = vtanh.f32 %v7723_v0 }
0x1bdb   :  { %v8716_v50 = vpop.eup %8715 }
0x1bdc   :  { %7726 = vrot.lane.b32.xlu2 %v8716_v50, %s8764_s0  ;;  %s8767_s0 = smov 128  }
0x1c36   :  { %v7727_v49 = vpop.permute.xlu2 %7726 }
0x1c37   :  { %v7729_v54 = vmul.f32 %v7727_v49, %v7710_v25 }
0x1c39   :  { %7731 = vrot.lane.b32.xlu0 %v7729_v54, %s8765_s5  ;;  %s8768_s5 = smov 8  }
0x1cab   :  { %v7732_v13 = vpop.permute.xlu0 %7731 }
0x1cac   :  { %8574 = vmatmul.msk.f32.vlgmr.msrb.gmra.mxu1 %vm6289_vm4, %v7732_v13 }
0x1d29   :  { %v7752_v51 = vpop.f32.mrf.mxu1 }
0x1d2a   :  { %v7753_v10 = vadd.f32 %v13194_v12, %v7752_v51 }
0x1d2c   :  { %v7756_v18 = vrot.slane %v7753_v10, 1  ;;  %7758 = vst.msk [vmem:[#allocation2 + $0x7] sm:$0x1] %vm6522_vm1, %v7753_v10 }
0x1d2e   :  { %7759 = vst.msk [vmem:[#allocation2 + $0xf] sm:$0x1] %vm6522_vm1, %v7756_v18 }
0x1d2f   :  { %7772 = dma.vmem_to_hbm [thread:$0]  %s7765_s14, 256, %s7767_s1, [#allocation3], %s8767_s0, %s8767_s0, %s8768_s5  }
0x1d30   :  { %8761 = dma.done.wait [#allocation3], 256  }
0x1d31   :  { %8762 = vsyncadd [#allocation3], 4294967040 }
0x1d32   :  { %7777 = vsyncpa [#allocation3], 1 }

</bundles_post_ra>
